<compile_context>
chip_gen: v7x
topology: tpu7x:2x2x1
jax: 0.10.0
libtpu: 0.0.40
codegen_flags: <defaults>
</compile_context>

<pallas_src>
import functools

import jax
import jax.numpy as jnp
from jax.experimental import pallas as pl
from jax.experimental.pallas import tpu as pltpu

EPS = 1e-5


def _round_up(x, m):
    return (x + m - 1) // m * m


def _make_fused_kernel(H, W, C, k, p, Wp_pad):
    """Fused (reflect-pad -> conv -> IN [-> relu]) x2 + residual for one NHWC image."""
    Hp, Wp = H + 2 * p, W + 2 * p
    inv_n = 1.0 / float(H * W)

    def kernel(x_ref, w1_ref, w2_ref, o_ref, xpad_ref):
        # xpad_ref: bf16 VMEM scratch (Hp, Wp_pad, C), reused by both conv stages.

        def reflect_pad(src_hwc_f32):
            """Write a reflect-padded bf16 copy of `src` (H, W, C) into xpad_ref."""
            src = src_hwc_f32.astype(jnp.bfloat16)
            xpad_ref[p:p + H, p:p + W, :] = src
            # Reflected rows (interior columns only; corners come from the column pass).
            top = src[1:p + 1]            # -> rows src[p], ..., src[1] after flip
            bot = src[H - 1 - p:H - 1]    # -> rows src[H-2], ..., src[H-1-p] after flip
            if p > 1:
                top = jnp.flip(top, axis=0)
                bot = jnp.flip(bot, axis=0)
            xpad_ref[0:p, p:p + W, :] = top
            xpad_ref[p + H:Hp, p:p + W, :] = bot
            # Reflected column slabs, copied from already-written padded columns
            # (this fills the corners with the correct reflect-of-reflect values).
            left = xpad_ref[:, p + 1:2 * p + 1, :]
            right = xpad_ref[:, W - 1:W - 1 + p, :]
            if p > 1:
                left = jnp.flip(left, axis=1)
                right = jnp.flip(right, axis=1)
            xpad_ref[:, 0:p, :] = left
            xpad_ref[:, p + W:Wp, :] = right

        def conv_stage(src_hwc_f32, w_ref):
            """reflect-pad + VALID k x k conv as k*k per-tap bf16 MXU matmuls.

            Returns the pre-InstanceNorm conv output, (H*W, C) f32.  Conv bias is omitted:
            InstanceNorm (no affine) cancels it exactly.
            """
            reflect_pad(src_hwc_f32)
            acc = None
            for dy in range(k):
                for dx in range(k):
                    win = xpad_ref[dy:dy + H, dx:dx + W, :].reshape(H * W, C)   # bf16
                    contrib = jnp.dot(win, w_ref[dy * k + dx],
                                      preferred_element_type=jnp.float32)       # (H*W, C) f32
                    acc = contrib if acc is None else acc + contrib
            return acc

        x = x_ref[0]                                                   # (H, W, C) f32

        # Stage 1: relu(IN(conv1(pad(x))))
        acc1 = conv_stage(x, w1_ref)
        m1 = jnp.sum(acc1, axis=0, keepdims=True) * inv_n
        c1 = acc1 - m1
        v1 = jnp.sum(c1 * c1, axis=0, keepdims=True) * inv_n
        h = jnp.maximum(c1 * jax.lax.rsqrt(v1 + EPS), 0.0)             # (H*W, C) f32

        # Stage 2: IN(conv2(pad(h))) + residual, fused epilogue straight into o_ref.
        acc2 = conv_stage(h.reshape(H, W, C), w2_ref)
        m2 = jnp.sum(acc2, axis=0, keepdims=True) * inv_n
        c2 = acc2 - m2
        v2 = jnp.sum(c2 * c2, axis=0, keepdims=True) * inv_n
        y = c2 * jax.lax.rsqrt(v2 + EPS) + x.reshape(H * W, C)
        o_ref[0] = y.reshape(H, W, C).astype(o_ref.dtype)

    return kernel


def _pick_vmem_limit_bytes(per_step_bytes):
    """Scoped-VMEM limit from the per-step footprint, capped below physical VMEM."""
    cap = 56 * 1024 * 1024                       # conservative fallback: fits v7x's 64 MiB
    try:
        phys = getattr(pltpu.get_tpu_info(), "vmem_capacity_bytes", None)
        if phys:
            # ~100 MiB on v5e/v6e (128 MiB physical), ~56 MiB on v7x (64 MiB physical).
            cap = min(int(phys) - 8 * 1024 * 1024, 100 * 1024 * 1024)
    except Exception:
        pass
    want = 2 * int(per_step_bytes) + 4 * 1024 * 1024   # 2x margin + compiler scratch slack
    return max(16 * 1024 * 1024, min(want, cap))


def _prep_weight(w_oihw, k, C):
    """PyTorch OIHW -> per-tap stack (k*k, C_in, C_out), bf16 for the MXU."""
    return jnp.transpose(w_oihw, (2, 3, 1, 0)).reshape(k * k, C, C).astype(jnp.bfloat16)


def resnet_block_forward_nhwc(x_nhwc, w1_taps, w2_taps, *, kernel=3, padding=1):
    """NHWC entry point (use this when stacking blocks to avoid layout round trips).

    x_nhwc: (B, H, W, C) f32; w*_taps: (k*k, C_in, C_out) bf16 (see _prep_weight).
    """
    B, H, W, C = x_nhwc.shape
    k, p = kernel, padding
    Hp, Wp = H + 2 * p, W + 2 * p
    Wp_pad = _round_up(Wp, 8)

    # Per-grid-step VMEM footprint estimate: double-buffered in/out blocks, bf16 padded
    # scratch, both weight tap stacks, plus live f32 intermediates (acc / h / residual).
    img_f32 = H * W * C * 4
    per_step = (2 * 2 * img_f32                   # input + output blocks, double-buffered
                + Hp * Wp_pad * C * 2             # padded bf16 scratch
                + 2 * k * k * C * C * 2           # w1 + w2 (bf16)
                + 3 * img_f32)                    # live f32 temps

    fused = _make_fused_kernel(H, W, C, k, p, Wp_pad)

    return pl.pallas_call(
        fused,
        out_shape=jax.ShapeDtypeStruct((B, H, W, C), jnp.float32),
        grid=(B,),
        in_specs=[
            pl.BlockSpec((1, H, W, C), lambda b: (b, 0, 0, 0)),      # x
            pl.BlockSpec((k * k, C, C), lambda b: (0, 0, 0)),        # w1 taps (bf16)
            pl.BlockSpec((k * k, C, C), lambda b: (0, 0, 0)),        # w2 taps (bf16)
        ],
        out_specs=pl.BlockSpec((1, H, W, C), lambda b: (b, 0, 0, 0)),
        scratch_shapes=[pltpu.VMEM((Hp, Wp_pad, C), jnp.bfloat16)],  # padded-image scratch
        compiler_params=pltpu.CompilerParams(
            dimension_semantics=("parallel",),
            vmem_limit_bytes=_pick_vmem_limit_bytes(per_step),
        ),
    )(x_nhwc, w1_taps, w2_taps)


@functools.partial(jax.jit, static_argnames=("kernel", "stride", "padding"))
def resnet_block_forward(x_nchw, w1, b1, w2, b2, *, kernel=3, stride=1, padding=1):
    """PyTorch-facing wrapper. x_nchw: (B, C, H, W) f32; weights OIHW; biases (C,).

    b1/b2 are accepted for API parity but are NOT used: InstanceNorm2d without affine
    exactly cancels a per-channel constant bias (mean absorbs it, variance unchanged).
    """
    del b1, b2
    assert stride == 1, "residual add requires stride == 1"
    k, p = kernel, padding
    B, C, H, W = x_nchw.shape
    assert 2 * p == k - 1, "spatial size must be preserved for the residual add"

    # TODO(synk): when blocks are stacked, stay NHWC end-to-end (call
    #             resnet_block_forward_nhwc directly) -- each transpose here is a full
    #             extra HBM read+write pass and exists only to match the NCHW API.
    x = jnp.transpose(x_nchw, (0, 2, 3, 1))
    out = resnet_block_forward_nhwc(
        x, _prep_weight(w1, k, C), _prep_weight(w2, k, C), kernel=k, padding=p)
    return jnp.transpose(out, (0, 3, 1, 2))


def _reference_forward(x_nchw, w1, b1, w2, b2, k, p, matmul_dtype=None):
    """Pure-JAX reference mirroring the PyTorch module.

    If matmul_dtype is set, conv operands are cast to it (f32 accumulation), matching the
    kernel's bf16-operand MXU numerics.
    """
    def conv(x, w, b):
        if matmul_dtype is not None:
            x = x.astype(matmul_dtype)
            w = w.astype(matmul_dtype)
        y = jax.lax.conv_general_dilated(
            x, w, window_strides=(1, 1), padding="VALID",
            dimension_numbers=("NCHW", "OIHW", "NCHW"),
            preferred_element_type=jnp.float32)
        return y + b[None, :, None, None]

    def inorm(x):
        mean = jnp.mean(x, axis=(2, 3), keepdims=True)
        var = jnp.mean((x - mean) ** 2, axis=(2, 3), keepdims=True)
        return (x - mean) * jax.lax.rsqrt(var + EPS)

    xp = jnp.pad(x_nchw, ((0, 0), (0, 0), (p, p), (p, p)), mode="reflect")
    h = jax.nn.relu(inorm(conv(xp, w1, b1)))
    hp = jnp.pad(h, ((0, 0), (0, 0), (p, p), (p, p)), mode="reflect")
    return x_nchw + inorm(conv(hp, w2, b2))


if __name__ == "__main__":
    B, C, H, W = 2, 4, 16, 16
    k, stride, pad = 3, 1, 1

    key = jax.random.PRNGKey(0)
    kx, kw1, kw2 = jax.random.split(key, 3)

    x = jax.random.normal(kx, (B, C, H, W), jnp.float32)
    # weight_init(mean=0.0, std=0.02): normal weights, zero biases.
    w1 = 0.02 * jax.random.normal(kw1, (C, C, k, k), jnp.float32)
    b1 = jnp.zeros((C,), jnp.float32)
    w2 = 0.02 * jax.random.normal(kw2, (C, C, k, k), jnp.float32)
    b2 = jnp.zeros((C,), jnp.float32)

    out = resnet_block_forward(x, w1, b1, w2, b2,
                               kernel=k, stride=stride, padding=pad)
    out = jax.block_until_ready(out)
    assert out.shape == (B, C, H, W)

    # Tight check against a reference matching the kernel's numerics (bf16 conv operands,
    # f32 accumulation).
    ref_bf16 = _reference_forward(x, w1, b1, w2, b2, k, pad, matmul_dtype=jnp.bfloat16)
    assert jnp.allclose(out, ref_bf16, atol=2e-3, rtol=2e-3), "mismatch vs bf16-operand reference"

    # Loose sanity check against exact f32 PyTorch semantics (bf16 operand rounding only).
    ref_f32 = _reference_forward(x, w1, b1, w2, b2, k, pad)
    assert jnp.allclose(out, ref_f32, atol=1e-1, rtol=1e-1), "mismatch vs f32 reference"

    print("KERNEL_OK")
</pallas_src>

<mosaic_0001>
module attributes {stable_mosaic.version = 11 : i64} {
  func.func @kernel(%arg0: i32, %arg1: memref<1x16x16x4xf32, #tpu.memory_space<vmem>>, %arg2: memref<9x4x4xbf16, #tpu.memory_space<vmem>>, %arg3: memref<9x4x4xbf16, #tpu.memory_space<vmem>>, %arg4: memref<1x16x16x4xf32, #tpu.memory_space<vmem>>, %arg5: memref<18x24x4xbf16, #tpu.memory_space<vmem>>) attributes {dimension_semantics = [#tpu.dimension_semantics<parallel>], iteration_bounds = array<i64: 2>, scalar_prefetch = 0 : i64, scratch_operands = 1 : i64, tpu.core_type = #tpu.core_type<tc>, window_params = [{transform_indices = @transform_0, window_bounds = array<i64: 1, 16, 16, 4>}, {pipeline_mode = #tpu.pipeline_mode<synchronous>, transform_indices = @transform_1, window_bounds = array<i64: 9, 4, 4>}, {pipeline_mode = #tpu.pipeline_mode<synchronous>, transform_indices = @transform_2, window_bounds = array<i64: 9, 4, 4>}, {transform_indices = @transform_3, window_bounds = array<i64: 1, 16, 16, 4>}]} {
    %c0 = arith.constant 0 : index
    %c0_0 = arith.constant 0 : index
    %c0_1 = arith.constant 0 : index
    %c0_2 = arith.constant 0 : index
    %0 = vector.load %arg1[%c0, %c0_0, %c0_1, %c0_2] : memref<1x16x16x4xf32, #tpu.memory_space<vmem>>, vector<1x16x16x4xf32>
    %1 = vector.shape_cast %0 : vector<1x16x16x4xf32> to vector<16x16x4xf32>
    %2 = arith.truncf %1 : vector<16x16x4xf32> to vector<16x16x4xbf16>
    %c1 = arith.constant 1 : index
    %c1_3 = arith.constant 1 : index
    %c0_4 = arith.constant 0 : index
    %3 = vector.load %arg5[%c1, %c1_3, %c0_4] : memref<18x24x4xbf16, #tpu.memory_space<vmem>>, vector<16x16x4xbf16>
    tpu.vector_store %arg5[%c1, %c1_3, %c0_4], %2 {strides = array<i32>} : memref<18x24x4xbf16, #tpu.memory_space<vmem>>, vector<16x16x4xbf16>,
    %4 = vector.extract_strided_slice %2 {offsets = [1, 0, 0], sizes = [1, 16, 4], strides = [1, 1, 1]} : vector<16x16x4xbf16> to vector<1x16x4xbf16>
    %5 = vector.extract_strided_slice %2 {offsets = [14, 0, 0], sizes = [1, 16, 4], strides = [1, 1, 1]} : vector<16x16x4xbf16> to vector<1x16x4xbf16>
    %c0_5 = arith.constant 0 : index
    %c1_6 = arith.constant 1 : index
    %c0_7 = arith.constant 0 : index
    %6 = vector.load %arg5[%c0_5, %c1_6, %c0_7] : memref<18x24x4xbf16, #tpu.memory_space<vmem>>, vector<1x16x4xbf16>
    tpu.vector_store %arg5[%c0_5, %c1_6, %c0_7], %4 {strides = array<i32>} : memref<18x24x4xbf16, #tpu.memory_space<vmem>>, vector<1x16x4xbf16>,
    %c17 = arith.constant 17 : index
    %c1_8 = arith.constant 1 : index
    %c0_9 = arith.constant 0 : index
    %7 = vector.load %arg5[%c17, %c1_8, %c0_9] : memref<18x24x4xbf16, #tpu.memory_space<vmem>>, vector<1x16x4xbf16>
    tpu.vector_store %arg5[%c17, %c1_8, %c0_9], %5 {strides = array<i32>} : memref<18x24x4xbf16, #tpu.memory_space<vmem>>, vector<1x16x4xbf16>,
    %c0_10 = arith.constant 0 : index
    %c2 = arith.constant 2 : index
    %c0_11 = arith.constant 0 : index
    %8 = vector.load %arg5[%c0_10, %c2, %c0_11] : memref<18x24x4xbf16, #tpu.memory_space<vmem>>, vector<18x1x4xbf16>
    %c0_12 = arith.constant 0 : index
    %c15 = arith.constant 15 : index
    %c0_13 = arith.constant 0 : index
    %9 = vector.load %arg5[%c0_12, %c15, %c0_13] : memref<18x24x4xbf16, #tpu.memory_space<vmem>>, vector<18x1x4xbf16>
    %c0_14 = arith.constant 0 : index
    %c0_15 = arith.constant 0 : index
    %c0_16 = arith.constant 0 : index
    %10 = vector.load %arg5[%c0_14, %c0_15, %c0_16] : memref<18x24x4xbf16, #tpu.memory_space<vmem>>, vector<18x1x4xbf16>
    tpu.vector_store %arg5[%c0_14, %c0_15, %c0_16], %8 {strides = array<i32>} : memref<18x24x4xbf16, #tpu.memory_space<vmem>>, vector<18x1x4xbf16>,
    %c0_17 = arith.constant 0 : index
    %c17_18 = arith.constant 17 : index
    %c0_19 = arith.constant 0 : index
    %11 = vector.load %arg5[%c0_17, %c17_18, %c0_19] : memref<18x24x4xbf16, #tpu.memory_space<vmem>>, vector<18x1x4xbf16>
    tpu.vector_store %arg5[%c0_17, %c17_18, %c0_19], %9 {strides = array<i32>} : memref<18x24x4xbf16, #tpu.memory_space<vmem>>, vector<18x1x4xbf16>,
    %c0_20 = arith.constant 0 : index
    %c0_21 = arith.constant 0 : index
    %c0_22 = arith.constant 0 : index
    %12 = vector.load %arg5[%c0_20, %c0_21, %c0_22] : memref<18x24x4xbf16, #tpu.memory_space<vmem>>, vector<16x16x4xbf16>
    %13 = vector.shape_cast %12 : vector<16x16x4xbf16> to vector<256x4xbf16>
    %c0_23 = arith.constant 0 : index
    %c0_24 = arith.constant 0 : index
    %c0_25 = arith.constant 0 : index
    %14 = vector.load %arg2[%c0_23, %c0_24, %c0_25] : memref<9x4x4xbf16, #tpu.memory_space<vmem>>, vector<1x4x4xbf16>
    %15 = vector.shape_cast %14 : vector<1x4x4xbf16> to vector<4x4xbf16>
    %cst = arith.constant dense<0.000000e+00> : vector<256x4xf32>
    %16 = tpu.matmul %13, %15, %cst {dimension_numbers = #tpu.dot_dimension_numbers<[1], [0], [0], [1], [0, 0, 1, 1], [], []>} : vector<256x4xbf16>, vector<4x4xbf16>, vector<256x4xf32> -> vector<256x4xf32>
    %c0_26 = arith.constant 0 : index
    %c1_27 = arith.constant 1 : index
    %c0_28 = arith.constant 0 : index
    %17 = vector.load %arg5[%c0_26, %c1_27, %c0_28] : memref<18x24x4xbf16, #tpu.memory_space<vmem>>, vector<16x16x4xbf16>
    %18 = vector.shape_cast %17 : vector<16x16x4xbf16> to vector<256x4xbf16>
    %c1_29 = arith.constant 1 : index
    %c0_30 = arith.constant 0 : index
    %c0_31 = arith.constant 0 : index
    %19 = vector.load %arg2[%c1_29, %c0_30, %c0_31] : memref<9x4x4xbf16, #tpu.memory_space<vmem>>, vector<1x4x4xbf16>
    %20 = vector.shape_cast %19 : vector<1x4x4xbf16> to vector<4x4xbf16>
    %cst_32 = arith.constant dense<0.000000e+00> : vector<256x4xf32>
    %21 = tpu.matmul %18, %20, %cst_32 {dimension_numbers = #tpu.dot_dimension_numbers<[1], [0], [0], [1], [0, 0, 1, 1], [], []>} : vector<256x4xbf16>, vector<4x4xbf16>, vector<256x4xf32> -> vector<256x4xf32>
    %22 = arith.addf %16, %21 : vector<256x4xf32>
    %c0_33 = arith.constant 0 : index
    %c2_34 = arith.constant 2 : index
    %c0_35 = arith.constant 0 : index
    %23 = vector.load %arg5[%c0_33, %c2_34, %c0_35] : memref<18x24x4xbf16, #tpu.memory_space<vmem>>, vector<16x16x4xbf16>
    %24 = vector.shape_cast %23 : vector<16x16x4xbf16> to vector<256x4xbf16>
    %c2_36 = arith.constant 2 : index
    %c0_37 = arith.constant 0 : index
    %c0_38 = arith.constant 0 : index
    %25 = vector.load %arg2[%c2_36, %c0_37, %c0_38] : memref<9x4x4xbf16, #tpu.memory_space<vmem>>, vector<1x4x4xbf16>
    %26 = vector.shape_cast %25 : vector<1x4x4xbf16> to vector<4x4xbf16>
    %cst_39 = arith.constant dense<0.000000e+00> : vector<256x4xf32>
    %27 = tpu.matmul %24, %26, %cst_39 {dimension_numbers = #tpu.dot_dimension_numbers<[1], [0], [0], [1], [0, 0, 1, 1], [], []>} : vector<256x4xbf16>, vector<4x4xbf16>, vector<256x4xf32> -> vector<256x4xf32>
    %28 = arith.addf %22, %27 : vector<256x4xf32>
    %c1_40 = arith.constant 1 : index
    %c0_41 = arith.constant 0 : index
    %c0_42 = arith.constant 0 : index
    %29 = vector.load %arg5[%c1_40, %c0_41, %c0_42] : memref<18x24x4xbf16, #tpu.memory_space<vmem>>, vector<16x16x4xbf16>
    %30 = vector.shape_cast %29 : vector<16x16x4xbf16> to vector<256x4xbf16>
    %c3 = arith.constant 3 : index
    %c0_43 = arith.constant 0 : index
    %c0_44 = arith.constant 0 : index
    %31 = vector.load %arg2[%c3, %c0_43, %c0_44] : memref<9x4x4xbf16, #tpu.memory_space<vmem>>, vector<1x4x4xbf16>
    %32 = vector.shape_cast %31 : vector<1x4x4xbf16> to vector<4x4xbf16>
    %cst_45 = arith.constant dense<0.000000e+00> : vector<256x4xf32>
    %33 = tpu.matmul %30, %32, %cst_45 {dimension_numbers = #tpu.dot_dimension_numbers<[1], [0], [0], [1], [0, 0, 1, 1], [], []>} : vector<256x4xbf16>, vector<4x4xbf16>, vector<256x4xf32> -> vector<256x4xf32>
    %34 = arith.addf %28, %33 : vector<256x4xf32>
    %c1_46 = arith.constant 1 : index
    %c1_47 = arith.constant 1 : index
    %c0_48 = arith.constant 0 : index
    %35 = vector.load %arg5[%c1_46, %c1_47, %c0_48] : memref<18x24x4xbf16, #tpu.memory_space<vmem>>, vector<16x16x4xbf16>
    %36 = vector.shape_cast %35 : vector<16x16x4xbf16> to vector<256x4xbf16>
    %c4 = arith.constant 4 : index
    %c0_49 = arith.constant 0 : index
    %c0_50 = arith.constant 0 : index
    %37 = vector.load %arg2[%c4, %c0_49, %c0_50] : memref<9x4x4xbf16, #tpu.memory_space<vmem>>, vector<1x4x4xbf16>
    %38 = vector.shape_cast %37 : vector<1x4x4xbf16> to vector<4x4xbf16>
    %cst_51 = arith.constant dense<0.000000e+00> : vector<256x4xf32>
    %39 = tpu.matmul %36, %38, %cst_51 {dimension_numbers = #tpu.dot_dimension_numbers<[1], [0], [0], [1], [0, 0, 1, 1], [], []>} : vector<256x4xbf16>, vector<4x4xbf16>, vector<256x4xf32> -> vector<256x4xf32>
    %40 = arith.addf %34, %39 : vector<256x4xf32>
    %c1_52 = arith.constant 1 : index
    %c2_53 = arith.constant 2 : index
    %c0_54 = arith.constant 0 : index
    %41 = vector.load %arg5[%c1_52, %c2_53, %c0_54] : memref<18x24x4xbf16, #tpu.memory_space<vmem>>, vector<16x16x4xbf16>
    %42 = vector.shape_cast %41 : vector<16x16x4xbf16> to vector<256x4xbf16>
    %c5 = arith.constant 5 : index
    %c0_55 = arith.constant 0 : index
    %c0_56 = arith.constant 0 : index
    %43 = vector.load %arg2[%c5, %c0_55, %c0_56] : memref<9x4x4xbf16, #tpu.memory_space<vmem>>, vector<1x4x4xbf16>
    %44 = vector.shape_cast %43 : vector<1x4x4xbf16> to vector<4x4xbf16>
    %cst_57 = arith.constant dense<0.000000e+00> : vector<256x4xf32>
    %45 = tpu.matmul %42, %44, %cst_57 {dimension_numbers = #tpu.dot_dimension_numbers<[1], [0], [0], [1], [0, 0, 1, 1], [], []>} : vector<256x4xbf16>, vector<4x4xbf16>, vector<256x4xf32> -> vector<256x4xf32>
    %46 = arith.addf %40, %45 : vector<256x4xf32>
    %c2_58 = arith.constant 2 : index
    %c0_59 = arith.constant 0 : index
    %c0_60 = arith.constant 0 : index
    %47 = vector.load %arg5[%c2_58, %c0_59, %c0_60] : memref<18x24x4xbf16, #tpu.memory_space<vmem>>, vector<16x16x4xbf16>
    %48 = vector.shape_cast %47 : vector<16x16x4xbf16> to vector<256x4xbf16>
    %c6 = arith.constant 6 : index
    %c0_61 = arith.constant 0 : index
    %c0_62 = arith.constant 0 : index
    %49 = vector.load %arg2[%c6, %c0_61, %c0_62] : memref<9x4x4xbf16, #tpu.memory_space<vmem>>, vector<1x4x4xbf16>
    %50 = vector.shape_cast %49 : vector<1x4x4xbf16> to vector<4x4xbf16>
    %cst_63 = arith.constant dense<0.000000e+00> : vector<256x4xf32>
    %51 = tpu.matmul %48, %50, %cst_63 {dimension_numbers = #tpu.dot_dimension_numbers<[1], [0], [0], [1], [0, 0, 1, 1], [], []>} : vector<256x4xbf16>, vector<4x4xbf16>, vector<256x4xf32> -> vector<256x4xf32>
    %52 = arith.addf %46, %51 : vector<256x4xf32>
    %c2_64 = arith.constant 2 : index
    %c1_65 = arith.constant 1 : index
    %c0_66 = arith.constant 0 : index
    %53 = vector.load %arg5[%c2_64, %c1_65, %c0_66] : memref<18x24x4xbf16, #tpu.memory_space<vmem>>, vector<16x16x4xbf16>
    %54 = vector.shape_cast %53 : vector<16x16x4xbf16> to vector<256x4xbf16>
    %c7 = arith.constant 7 : index
    %c0_67 = arith.constant 0 : index
    %c0_68 = arith.constant 0 : index
    %55 = vector.load %arg2[%c7, %c0_67, %c0_68] : memref<9x4x4xbf16, #tpu.memory_space<vmem>>, vector<1x4x4xbf16>
    %56 = vector.shape_cast %55 : vector<1x4x4xbf16> to vector<4x4xbf16>
    %cst_69 = arith.constant dense<0.000000e+00> : vector<256x4xf32>
    %57 = tpu.matmul %54, %56, %cst_69 {dimension_numbers = #tpu.dot_dimension_numbers<[1], [0], [0], [1], [0, 0, 1, 1], [], []>} : vector<256x4xbf16>, vector<4x4xbf16>, vector<256x4xf32> -> vector<256x4xf32>
    %58 = arith.addf %52, %57 : vector<256x4xf32>
    %c2_70 = arith.constant 2 : index
    %c2_71 = arith.constant 2 : index
    %c0_72 = arith.constant 0 : index
    %59 = vector.load %arg5[%c2_70, %c2_71, %c0_72] : memref<18x24x4xbf16, #tpu.memory_space<vmem>>, vector<16x16x4xbf16>
    %60 = vector.shape_cast %59 : vector<16x16x4xbf16> to vector<256x4xbf16>
    %c8 = arith.constant 8 : index
    %c0_73 = arith.constant 0 : index
    %c0_74 = arith.constant 0 : index
    %61 = vector.load %arg2[%c8, %c0_73, %c0_74] : memref<9x4x4xbf16, #tpu.memory_space<vmem>>, vector<1x4x4xbf16>
    %62 = vector.shape_cast %61 : vector<1x4x4xbf16> to vector<4x4xbf16>
    %cst_75 = arith.constant dense<0.000000e+00> : vector<256x4xf32>
    %63 = tpu.matmul %60, %62, %cst_75 {dimension_numbers = #tpu.dot_dimension_numbers<[1], [0], [0], [1], [0, 0, 1, 1], [], []>} : vector<256x4xbf16>, vector<4x4xbf16>, vector<256x4xf32> -> vector<256x4xf32>
    %64 = arith.addf %58, %63 : vector<256x4xf32>
    %cst_76 = arith.constant dense<0.000000e+00> : vector<4xf32>
    %65 = vector.multi_reduction <add>, %64, %cst_76 [0] : vector<256x4xf32> to vector<4xf32>
    %66 = vector.shape_cast %65 : vector<4xf32> to vector<1x4xf32>
    %cst_77 = arith.constant 3.906250e-03 : f32
    %67 = vector.broadcast %cst_77 : f32 to vector<1x4xf32>
    %68 = arith.mulf %66, %67 : vector<1x4xf32>
    %69 = vector.broadcast %68 : vector<1x4xf32> to vector<256x4xf32>
    %70 = arith.subf %64, %69 : vector<256x4xf32>
    %71 = arith.mulf %70, %70 : vector<256x4xf32>
    %cst_78 = arith.constant dense<0.000000e+00> : vector<4xf32>
    %72 = vector.multi_reduction <add>, %71, %cst_78 [0] : vector<256x4xf32> to vector<4xf32>
    %73 = vector.shape_cast %72 : vector<4xf32> to vector<1x4xf32>
    %cst_79 = arith.constant 3.906250e-03 : f32
    %74 = vector.broadcast %cst_79 : f32 to vector<1x4xf32>
    %75 = arith.mulf %73, %74 : vector<1x4xf32>
    %cst_80 = arith.constant 9.99999974E-6 : f32
    %76 = vector.broadcast %cst_80 : f32 to vector<1x4xf32>
    %77 = arith.addf %75, %76 : vector<1x4xf32>
    %78 = math.rsqrt %77 : vector<1x4xf32>
    %79 = vector.broadcast %78 : vector<1x4xf32> to vector<256x4xf32>
    %80 = arith.mulf %70, %79 : vector<256x4xf32>
    %cst_81 = arith.constant 0.000000e+00 : f32
    %81 = vector.broadcast %cst_81 : f32 to vector<256x4xf32>
    %82 = arith.maximumf %80, %81 : vector<256x4xf32>
    %83 = vector.shape_cast %82 : vector<256x4xf32> to vector<16x16x4xf32>
    %84 = arith.truncf %83 : vector<16x16x4xf32> to vector<16x16x4xbf16>
    %c1_82 = arith.constant 1 : index
    %c1_83 = arith.constant 1 : index
    %c0_84 = arith.constant 0 : index
    %85 = vector.load %arg5[%c1_82, %c1_83, %c0_84] : memref<18x24x4xbf16, #tpu.memory_space<vmem>>, vector<16x16x4xbf16>
    tpu.vector_store %arg5[%c1_82, %c1_83, %c0_84], %84 {strides = array<i32>} : memref<18x24x4xbf16, #tpu.memory_space<vmem>>, vector<16x16x4xbf16>,
    %86 = vector.extract_strided_slice %84 {offsets = [1, 0, 0], sizes = [1, 16, 4], strides = [1, 1, 1]} : vector<16x16x4xbf16> to vector<1x16x4xbf16>
    %87 = vector.extract_strided_slice %84 {offsets = [14, 0, 0], sizes = [1, 16, 4], strides = [1, 1, 1]} : vector<16x16x4xbf16> to vector<1x16x4xbf16>
    %c0_85 = arith.constant 0 : index
    %c1_86 = arith.constant 1 : index
    %c0_87 = arith.constant 0 : index
    %88 = vector.load %arg5[%c0_85, %c1_86, %c0_87] : memref<18x24x4xbf16, #tpu.memory_space<vmem>>, vector<1x16x4xbf16>
    tpu.vector_store %arg5[%c0_85, %c1_86, %c0_87], %86 {strides = array<i32>} : memref<18x24x4xbf16, #tpu.memory_space<vmem>>, vector<1x16x4xbf16>,
    %c17_88 = arith.constant 17 : index
    %c1_89 = arith.constant 1 : index
    %c0_90 = arith.constant 0 : index
    %89 = vector.load %arg5[%c17_88, %c1_89, %c0_90] : memref<18x24x4xbf16, #tpu.memory_space<vmem>>, vector<1x16x4xbf16>
    tpu.vector_store %arg5[%c17_88, %c1_89, %c0_90], %87 {strides = array<i32>} : memref<18x24x4xbf16, #tpu.memory_space<vmem>>, vector<1x16x4xbf16>,
    %c0_91 = arith.constant 0 : index
    %c2_92 = arith.constant 2 : index
    %c0_93 = arith.constant 0 : index
    %90 = vector.load %arg5[%c0_91, %c2_92, %c0_93] : memref<18x24x4xbf16, #tpu.memory_space<vmem>>, vector<18x1x4xbf16>
    %c0_94 = arith.constant 0 : index
    %c15_95 = arith.constant 15 : index
    %c0_96 = arith.constant 0 : index
    %91 = vector.load %arg5[%c0_94, %c15_95, %c0_96] : memref<18x24x4xbf16, #tpu.memory_space<vmem>>, vector<18x1x4xbf16>
    %c0_97 = arith.constant 0 : index
    %c0_98 = arith.constant 0 : index
    %c0_99 = arith.constant 0 : index
    %92 = vector.load %arg5[%c0_97, %c0_98, %c0_99] : memref<18x24x4xbf16, #tpu.memory_space<vmem>>, vector<18x1x4xbf16>
    tpu.vector_store %arg5[%c0_97, %c0_98, %c0_99], %90 {strides = array<i32>} : memref<18x24x4xbf16, #tpu.memory_space<vmem>>, vector<18x1x4xbf16>,
    %c0_100 = arith.constant 0 : index
    %c17_101 = arith.constant 17 : index
    %c0_102 = arith.constant 0 : index
    %93 = vector.load %arg5[%c0_100, %c17_101, %c0_102] : memref<18x24x4xbf16, #tpu.memory_space<vmem>>, vector<18x1x4xbf16>
    tpu.vector_store %arg5[%c0_100, %c17_101, %c0_102], %91 {strides = array<i32>} : memref<18x24x4xbf16, #tpu.memory_space<vmem>>, vector<18x1x4xbf16>,
    %c0_103 = arith.constant 0 : index
    %c0_104 = arith.constant 0 : index
    %c0_105 = arith.constant 0 : index
    %94 = vector.load %arg5[%c0_103, %c0_104, %c0_105] : memref<18x24x4xbf16, #tpu.memory_space<vmem>>, vector<16x16x4xbf16>
    %95 = vector.shape_cast %94 : vector<16x16x4xbf16> to vector<256x4xbf16>
    %c0_106 = arith.constant 0 : index
    %c0_107 = arith.constant 0 : index
    %c0_108 = arith.constant 0 : index
    %96 = vector.load %arg3[%c0_106, %c0_107, %c0_108] : memref<9x4x4xbf16, #tpu.memory_space<vmem>>, vector<1x4x4xbf16>
    %97 = vector.shape_cast %96 : vector<1x4x4xbf16> to vector<4x4xbf16>
    %cst_109 = arith.constant dense<0.000000e+00> : vector<256x4xf32>
    %98 = tpu.matmul %95, %97, %cst_109 {dimension_numbers = #tpu.dot_dimension_numbers<[1], [0], [0], [1], [0, 0, 1, 1], [], []>} : vector<256x4xbf16>, vector<4x4xbf16>, vector<256x4xf32> -> vector<256x4xf32>
    %c0_110 = arith.constant 0 : index
    %c1_111 = arith.constant 1 : index
    %c0_112 = arith.constant 0 : index
    %99 = vector.load %arg5[%c0_110, %c1_111, %c0_112] : memref<18x24x4xbf16, #tpu.memory_space<vmem>>, vector<16x16x4xbf16>
    %100 = vector.shape_cast %99 : vector<16x16x4xbf16> to vector<256x4xbf16>
    %c1_113 = arith.constant 1 : index
    %c0_114 = arith.constant 0 : index
    %c0_115 = arith.constant 0 : index
    %101 = vector.load %arg3[%c1_113, %c0_114, %c0_115] : memref<9x4x4xbf16, #tpu.memory_space<vmem>>, vector<1x4x4xbf16>
    %102 = vector.shape_cast %101 : vector<1x4x4xbf16> to vector<4x4xbf16>
    %cst_116 = arith.constant dense<0.000000e+00> : vector<256x4xf32>
    %103 = tpu.matmul %100, %102, %cst_116 {dimension_numbers = #tpu.dot_dimension_numbers<[1], [0], [0], [1], [0, 0, 1, 1], [], []>} : vector<256x4xbf16>, vector<4x4xbf16>, vector<256x4xf32> -> vector<256x4xf32>
    %104 = arith.addf %98, %103 : vector<256x4xf32>
    %c0_117 = arith.constant 0 : index
    %c2_118 = arith.constant 2 : index
    %c0_119 = arith.constant 0 : index
    %105 = vector.load %arg5[%c0_117, %c2_118, %c0_119] : memref<18x24x4xbf16, #tpu.memory_space<vmem>>, vector<16x16x4xbf16>
    %106 = vector.shape_cast %105 : vector<16x16x4xbf16> to vector<256x4xbf16>
    %c2_120 = arith.constant 2 : index
    %c0_121 = arith.constant 0 : index
    %c0_122 = arith.constant 0 : index
    %107 = vector.load %arg3[%c2_120, %c0_121, %c0_122] : memref<9x4x4xbf16, #tpu.memory_space<vmem>>, vector<1x4x4xbf16>
    %108 = vector.shape_cast %107 : vector<1x4x4xbf16> to vector<4x4xbf16>
    %cst_123 = arith.constant dense<0.000000e+00> : vector<256x4xf32>
    %109 = tpu.matmul %106, %108, %cst_123 {dimension_numbers = #tpu.dot_dimension_numbers<[1], [0], [0], [1], [0, 0, 1, 1], [], []>} : vector<256x4xbf16>, vector<4x4xbf16>, vector<256x4xf32> -> vector<256x4xf32>
    %110 = arith.addf %104, %109 : vector<256x4xf32>
    %c1_124 = arith.constant 1 : index
    %c0_125 = arith.constant 0 : index
    %c0_126 = arith.constant 0 : index
    %111 = vector.load %arg5[%c1_124, %c0_125, %c0_126] : memref<18x24x4xbf16, #tpu.memory_space<vmem>>, vector<16x16x4xbf16>
    %112 = vector.shape_cast %111 : vector<16x16x4xbf16> to vector<256x4xbf16>
    %c3_127 = arith.constant 3 : index
    %c0_128 = arith.constant 0 : index
    %c0_129 = arith.constant 0 : index
    %113 = vector.load %arg3[%c3_127, %c0_128, %c0_129] : memref<9x4x4xbf16, #tpu.memory_space<vmem>>, vector<1x4x4xbf16>
    %114 = vector.shape_cast %113 : vector<1x4x4xbf16> to vector<4x4xbf16>
    %cst_130 = arith.constant dense<0.000000e+00> : vector<256x4xf32>
    %115 = tpu.matmul %112, %114, %cst_130 {dimension_numbers = #tpu.dot_dimension_numbers<[1], [0], [0], [1], [0, 0, 1, 1], [], []>} : vector<256x4xbf16>, vector<4x4xbf16>, vector<256x4xf32> -> vector<256x4xf32>
    %116 = arith.addf %110, %115 : vector<256x4xf32>
    %c1_131 = arith.constant 1 : index
    %c1_132 = arith.constant 1 : index
    %c0_133 = arith.constant 0 : index
    %117 = vector.load %arg5[%c1_131, %c1_132, %c0_133] : memref<18x24x4xbf16, #tpu.memory_space<vmem>>, vector<16x16x4xbf16>
    %118 = vector.shape_cast %117 : vector<16x16x4xbf16> to vector<256x4xbf16>
    %c4_134 = arith.constant 4 : index
    %c0_135 = arith.constant 0 : index
    %c0_136 = arith.constant 0 : index
    %119 = vector.load %arg3[%c4_134, %c0_135, %c0_136] : memref<9x4x4xbf16, #tpu.memory_space<vmem>>, vector<1x4x4xbf16>
    %120 = vector.shape_cast %119 : vector<1x4x4xbf16> to vector<4x4xbf16>
    %cst_137 = arith.constant dense<0.000000e+00> : vector<256x4xf32>
    %121 = tpu.matmul %118, %120, %cst_137 {dimension_numbers = #tpu.dot_dimension_numbers<[1], [0], [0], [1], [0, 0, 1, 1], [], []>} : vector<256x4xbf16>, vector<4x4xbf16>, vector<256x4xf32> -> vector<256x4xf32>
    %122 = arith.addf %116, %121 : vector<256x4xf32>
    %c1_138 = arith.constant 1 : index
    %c2_139 = arith.constant 2 : index
    %c0_140 = arith.constant 0 : index
    %123 = vector.load %arg5[%c1_138, %c2_139, %c0_140] : memref<18x24x4xbf16, #tpu.memory_space<vmem>>, vector<16x16x4xbf16>
    %124 = vector.shape_cast %123 : vector<16x16x4xbf16> to vector<256x4xbf16>
    %c5_141 = arith.constant 5 : index
    %c0_142 = arith.constant 0 : index
    %c0_143 = arith.constant 0 : index
    %125 = vector.load %arg3[%c5_141, %c0_142, %c0_143] : memref<9x4x4xbf16, #tpu.memory_space<vmem>>, vector<1x4x4xbf16>
    %126 = vector.shape_cast %125 : vector<1x4x4xbf16> to vector<4x4xbf16>
    %cst_144 = arith.constant dense<0.000000e+00> : vector<256x4xf32>
    %127 = tpu.matmul %124, %126, %cst_144 {dimension_numbers = #tpu.dot_dimension_numbers<[1], [0], [0], [1], [0, 0, 1, 1], [], []>} : vector<256x4xbf16>, vector<4x4xbf16>, vector<256x4xf32> -> vector<256x4xf32>
    %128 = arith.addf %122, %127 : vector<256x4xf32>
    %c2_145 = arith.constant 2 : index
    %c0_146 = arith.constant 0 : index
    %c0_147 = arith.constant 0 : index
    %129 = vector.load %arg5[%c2_145, %c0_146, %c0_147] : memref<18x24x4xbf16, #tpu.memory_space<vmem>>, vector<16x16x4xbf16>
    %130 = vector.shape_cast %129 : vector<16x16x4xbf16> to vector<256x4xbf16>
    %c6_148 = arith.constant 6 : index
    %c0_149 = arith.constant 0 : index
    %c0_150 = arith.constant 0 : index
    %131 = vector.load %arg3[%c6_148, %c0_149, %c0_150] : memref<9x4x4xbf16, #tpu.memory_space<vmem>>, vector<1x4x4xbf16>
    %132 = vector.shape_cast %131 : vector<1x4x4xbf16> to vector<4x4xbf16>
    %cst_151 = arith.constant dense<0.000000e+00> : vector<256x4xf32>
    %133 = tpu.matmul %130, %132, %cst_151 {dimension_numbers = #tpu.dot_dimension_numbers<[1], [0], [0], [1], [0, 0, 1, 1], [], []>} : vector<256x4xbf16>, vector<4x4xbf16>, vector<256x4xf32> -> vector<256x4xf32>
    %134 = arith.addf %128, %133 : vector<256x4xf32>
    %c2_152 = arith.constant 2 : index
    %c1_153 = arith.constant 1 : index
    %c0_154 = arith.constant 0 : index
    %135 = vector.load %arg5[%c2_152, %c1_153, %c0_154] : memref<18x24x4xbf16, #tpu.memory_space<vmem>>, vector<16x16x4xbf16>
    %136 = vector.shape_cast %135 : vector<16x16x4xbf16> to vector<256x4xbf16>
    %c7_155 = arith.constant 7 : index
    %c0_156 = arith.constant 0 : index
    %c0_157 = arith.constant 0 : index
    %137 = vector.load %arg3[%c7_155, %c0_156, %c0_157] : memref<9x4x4xbf16, #tpu.memory_space<vmem>>, vector<1x4x4xbf16>
    %138 = vector.shape_cast %137 : vector<1x4x4xbf16> to vector<4x4xbf16>
    %cst_158 = arith.constant dense<0.000000e+00> : vector<256x4xf32>
    %139 = tpu.matmul %136, %138, %cst_158 {dimension_numbers = #tpu.dot_dimension_numbers<[1], [0], [0], [1], [0, 0, 1, 1], [], []>} : vector<256x4xbf16>, vector<4x4xbf16>, vector<256x4xf32> -> vector<256x4xf32>
    %140 = arith.addf %134, %139 : vector<256x4xf32>
    %c2_159 = arith.constant 2 : index
    %c2_160 = arith.constant 2 : index
    %c0_161 = arith.constant 0 : index
    %141 = vector.load %arg5[%c2_159, %c2_160, %c0_161] : memref<18x24x4xbf16, #tpu.memory_space<vmem>>, vector<16x16x4xbf16>
    %142 = vector.shape_cast %141 : vector<16x16x4xbf16> to vector<256x4xbf16>
    %c8_162 = arith.constant 8 : index
    %c0_163 = arith.constant 0 : index
    %c0_164 = arith.constant 0 : index
    %143 = vector.load %arg3[%c8_162, %c0_163, %c0_164] : memref<9x4x4xbf16, #tpu.memory_space<vmem>>, vector<1x4x4xbf16>
    %144 = vector.shape_cast %143 : vector<1x4x4xbf16> to vector<4x4xbf16>
    %cst_165 = arith.constant dense<0.000000e+00> : vector<256x4xf32>
    %145 = tpu.matmul %142, %144, %cst_165 {dimension_numbers = #tpu.dot_dimension_numbers<[1], [0], [0], [1], [0, 0, 1, 1], [], []>} : vector<256x4xbf16>, vector<4x4xbf16>, vector<256x4xf32> -> vector<256x4xf32>
    %146 = arith.addf %140, %145 : vector<256x4xf32>
    %cst_166 = arith.constant dense<0.000000e+00> : vector<4xf32>
    %147 = vector.multi_reduction <add>, %146, %cst_166 [0] : vector<256x4xf32> to vector<4xf32>
    %148 = vector.shape_cast %147 : vector<4xf32> to vector<1x4xf32>
    %cst_167 = arith.constant 3.906250e-03 : f32
    %149 = vector.broadcast %cst_167 : f32 to vector<1x4xf32>
    %150 = arith.mulf %148, %149 : vector<1x4xf32>
    %151 = vector.broadcast %150 : vector<1x4xf32> to vector<256x4xf32>
    %152 = arith.subf %146, %151 : vector<256x4xf32>
    %153 = arith.mulf %152, %152 : vector<256x4xf32>
    %cst_168 = arith.constant dense<0.000000e+00> : vector<4xf32>
    %154 = vector.multi_reduction <add>, %153, %cst_168 [0] : vector<256x4xf32> to vector<4xf32>
    %155 = vector.shape_cast %154 : vector<4xf32> to vector<1x4xf32>
    %cst_169 = arith.constant 3.906250e-03 : f32
    %156 = vector.broadcast %cst_169 : f32 to vector<1x4xf32>
    %157 = arith.mulf %155, %156 : vector<1x4xf32>
    %cst_170 = arith.constant 9.99999974E-6 : f32
    %158 = vector.broadcast %cst_170 : f32 to vector<1x4xf32>
    %159 = arith.addf %157, %158 : vector<1x4xf32>
    %160 = math.rsqrt %159 : vector<1x4xf32>
    %161 = vector.broadcast %160 : vector<1x4xf32> to vector<256x4xf32>
    %162 = arith.mulf %152, %161 : vector<256x4xf32>
    %163 = vector.shape_cast %1 : vector<16x16x4xf32> to vector<256x4xf32>
    %164 = arith.addf %162, %163 : vector<256x4xf32>
    %165 = vector.shape_cast %164 : vector<256x4xf32> to vector<16x16x4xf32>
    %c0_171 = arith.constant 0 : index
    %c0_172 = arith.constant 0 : index
    %c0_173 = arith.constant 0 : index
    %c0_174 = arith.constant 0 : index
    %166 = vector.load %arg4[%c0_171, %c0_172, %c0_173, %c0_174] : memref<1x16x16x4xf32, #tpu.memory_space<vmem>>, vector<1x16x16x4xf32>
    %167 = vector.shape_cast %166 : vector<1x16x16x4xf32> to vector<16x16x4xf32>
    %168 = vector.shape_cast %165 : vector<16x16x4xf32> to vector<1x16x16x4xf32>
    tpu.vector_store %arg4[%c0_171, %c0_172, %c0_173, %c0_174], %168 {strides = array<i32>} : memref<1x16x16x4xf32, #tpu.memory_space<vmem>>, vector<1x16x16x4xf32>,
    return
  }
  func.func @transform_0(%arg0: i32) -> (i32, i32, i32, i32) {
    %c0_i32 = arith.constant 0 : i32
    %c0_i32_0 = arith.constant 0 : i32
    %c0_i32_1 = arith.constant 0 : i32
    %c0_i32_2 = arith.constant 0 : i32
    return %arg0, %c0_i32, %c0_i32_0, %c0_i32_1 : i32, i32, i32, i32
  }
  func.func @transform_1(%arg0: i32) -> (i32, i32, i32) {
    %c0_i32 = arith.constant 0 : i32
    %c0_i32_0 = arith.constant 0 : i32
    %c0_i32_1 = arith.constant 0 : i32
    %c0_i32_2 = arith.constant 0 : i32
    return %c0_i32, %c0_i32_0, %c0_i32_1 : i32, i32, i32
  }
  func.func @transform_2(%arg0: i32) -> (i32, i32, i32) {
    %c0_i32 = arith.constant 0 : i32
    %c0_i32_0 = arith.constant 0 : i32
    %c0_i32_1 = arith.constant 0 : i32
    %c0_i32_2 = arith.constant 0 : i32
    return %c0_i32, %c0_i32_0, %c0_i32_1 : i32, i32, i32
  }
  func.func @transform_3(%arg0: i32) -> (i32, i32, i32, i32) {
    %c0_i32 = arith.constant 0 : i32
    %c0_i32_0 = arith.constant 0 : i32
    %c0_i32_1 = arith.constant 0 : i32
    %c0_i32_2 = arith.constant 0 : i32
    return %arg0, %c0_i32, %c0_i32_0, %c0_i32_1 : i32, i32, i32, i32
  }
}

</mosaic_0001>

<bundles_post_ra>
// kernel: resnet_block_forward.1
= control target key start
LH: loop header
LB: loop body
LE: loop exit
PB: predicated region body
PF: predicated region fallthrough
CT: control target
= control target key end

     0   :  { %s14141_s12 = smov 0   ;;  %s18801_s0 = inlined_call_operand.vmem [shape: f32[2,16,16,4], index: 0, kind: input, shape index: {}]   ;;  %s18802_s1 = inlined_call_operand.vmem [shape: bf16[9,4,4], index: 1, kind: input, shape index: {}]   ;;  %s18803_s2 = inlined_call_operand.vmem [shape: bf16[9,4,4], index: 2, kind: input, shape index: {}]   ;;  %s18804_s3 = inlined_call_operand.vmem [shape: f32[2,16,16,4], index: 3, kind: output, shape index: {}]  }
   0x1 LB: > { %s11609_s13 = sadd.s32 4294967295, %s14119_s12   ;;  %p11613_p0 = scmp.ge.s32.totalorder %s14119_s12, 1  ;;  %s14119_s12 = sphi %s14141_s12, %s13_s12  }
   0x2   : > { %p137_p1 = scmp.lt.s32.totalorder %s14119_s12, 3 }
   0x4   : > { %p138_p2 = pnand %p11613_p0, %p137_p1 }
   0x6   : > { %141 = sbr.rel (%p138_p2) target bundleno = 2119 (0x847), region = 32 }
   0xd   : > { %v11686_v0 = vld [vmem:[%s18802_s1 + $0x2] sm:$0x3]  ;;  %vm1581_vm0 = vcmask 1041408   ;;  %p161_p3 = scmp.lt.s32.totalorder %s11609_s13, 1  ;;  %v14160_v2 = vld [vmem:[%s18802_s1] sm:$0x3] }
   0xe   : > { %13940 = vmatprep.subr.msk.bf16.mxu0 %vm1581_vm0, %v11686_v0  ;;  %v1583_v1 = vsel %vm1581_vm0, %v11686_v0, 0  ;;  %vm300_vm1 = vsmask.f32 256  ;;  %vm301_vm2 = vsmask.f32 4368  ;;  %vm624_vm3 = vcmask 27648  }
   0xf   : > { %12817 = vmatpush3.bf16.msra.mxu0 %v1583_v1  ;;  %s19186_s13 = smov (!%p161_p3, %s11609_s13), 1  ;;  %vm625_vm4 = vsmask.f32 7938  ;;  %vm632_vm5 = vcmask 24576   ;;  %vm14178_vm6 = vmor %vm300_vm1, %vm301_vm2  ;;  %v18914_v17 = vmov 0  ;;  %v18917_v26 = vmov 0 }
  0x10   : > { %s12444_s16 = sshll.u32 %s19186_s13, 8  ;;  %13941 = vmatprep.subr.msk.bf16.mxu0 %vm1581_vm0, %v14160_v2  ;;  %v18915_v17 = vsel %vm14178_vm6, 4294967295, %v18914_v17  ;;  %vm14186_vm7 = vmand %vm624_vm3, %vm625_vm4  ;;  %v742_v27 = vld [vmem:[#allocation2] sm:$0xf]  ;;  %v746_v28 = vld [vmem:[#allocation2 + $0x8] sm:$0x1] }
  0x11   : > { %s14167_s21 = scalar_lea.vmem %s18801_s0, %s12444_s16  ;;  %18916 = vst [vmem:[#allocation3_spill] sm:$0xff] %v18915_v17  ;;  %v18918_v26 = vsel %vm14186_vm7, 4294967295, %v18917_v26  ;;  %vm14192_vm8 = vmand %vm632_vm5, %vm300_vm1  ;;  %v18920_v31 = vmov 0  ;;  %v627_v34 = vld [vmem:[#allocation2 + $0xc] sm:$0xf]  ;;  %v14217_v0 = vsel %vm1581_vm0, %v14160_v2, 0  ;;  %s18676_s10 = scalar_lea.vmem %s18804_s3, %s12444_s16 }
  0x12   : > { %v174_v3 = vld [vmem:[%s14167_s21 + $0x10] sm:$0xff]  ;;  %v175_v4 = vld [vmem:[%s14167_s21 + $0x18] sm:$0xff]  ;;  %v172_v7 = vld [vmem:[%s14167_s21] sm:$0xff]  ;;  %18919 = vst [vmem:[#allocation4_spill] sm:$0xff] %v18918_v26  ;;  %v18921_v31 = vsel %vm14192_vm8, 4294967295, %v18920_v31  ;;  %vm1532_vm12 = vcmask 31744  }
  0x13   : > { %v12448_v5 = vpack.c.bf16 %v174_v3, %v174_v3  ;;  %v12449_v6 = vpack.c.bf16 %v175_v4, %v175_v4  ;;  %v173_v8 = vld [vmem:[%s14167_s21 + $0x8] sm:$0xff]  ;;  %v12446_v9 = vpack.c.bf16 %v172_v7, %v172_v7  ;;  %v176_v11 = vld [vmem:[%s14167_s21 + $0x20] sm:$0xff]  ;;  %v178_v22 = vld [vmem:[%s14167_s21 + $0x30] sm:$0xff]  ;;  %18922 = vst [vmem:[#allocation5_spill] sm:$0xff] %v18921_v31  ;;  %vm1095_vm10 = vsmask.f32 3328 }
  0x14   : > { %v12447_v10 = vpack.c.bf16 %v173_v8, %v173_v8  ;;  %v177_v12 = vld [vmem:[%s14167_s21 + $0x28] sm:$0xff]  ;;  %v179_v23 = vld [vmem:[%s14167_s21 + $0x38] sm:$0xff]  ;;  %v12450_v29 = vpack.c.bf16 %v176_v11, %v176_v11  ;;  %v12452_v36 = vpack.c.bf16 %v178_v22, %v178_v22  ;;  %v634_v42 = vld [vmem:[#allocation2 + $0x14] sm:$0x1]  ;;  %v18923_v8 = vmov 0 }
  0x15   : > { %v321_v13 = vshrl.u32 %v12448_v5, 16  ;;  %v324_v14 = vshll.u32 %v12448_v5, 16  ;;  %v329_v15 = vshrl.u32 %v12449_v6, 16  ;;  %v332_v16 = vshll.u32 %v12449_v6, 16  ;;  %v637_v35 = vld [vmem:[#allocation2 + $0x18] sm:$0xf]  ;;  %vm14221_vm9 = vmand %vm632_vm5, %vm625_vm4 }
  0x16   : > { %v304_v18 = vshrl.u32 %v12446_v9, 16  ;;  %v307_v19 = vshll.u32 %v12446_v9, 16  ;;  %v312_v20 = vshrl.u32 %v12447_v10, 16  ;;  %v315_v21 = vshll.u32 %v12447_v10, 16  ;;  %v641_v43 = vld [vmem:[#allocation2 + $0x20] sm:$0x1] }
  0x17   : > { %v323_v24 = vrot.slane %v321_v13, 7  ;;  %v331_v25 = vrot.slane %v329_v15, 7  ;;  %v12451_v30 = vpack.c.bf16 %v177_v12, %v177_v12  ;;  %v12453_v37 = vpack.c.bf16 %v179_v23, %v179_v23  ;;  %v644_v4 = vld [vmem:[#allocation2 + $0x24] sm:$0xf]  ;;  %v648_v5 = vld [vmem:[#allocation2 + $0x2c] sm:$0x1] }
  0x18   : > { %v306_v32 = vrot.slane %v304_v18, 7  ;;  %v314_v33 = vrot.slane %v312_v20, 7  ;;  %v338_v56 = vshrl.u32 %v12450_v29, 16  ;;  %v341_v57 = vshll.u32 %v12450_v29, 16  ;;  %v651_v12 = vld [vmem:[#allocation2 + $0x30] sm:$0xf] }
  0x19   : > { %v326_v38 = vor.u32 %v324_v14, %v323_v24  ;;  %v327_v39 = vrot.slane %v323_v24, 4  ;;  %v334_v40 = vor.u32 %v332_v16, %v331_v25  ;;  %v336_v41 = vrot.slane %v331_v25, 4  ;;  %v655_v13 = vld [vmem:[#allocation2 + $0x38] sm:$0x1]  ;;  %v181_v20 = vld [vmem:[%s14167_s21 + $0x48] sm:$0xff] }
  0x1a   : > { %v309_v44 = vor.u32 %v307_v19, %v306_v32  ;;  %v310_v45 = vrot.slane %v306_v32, 4  ;;  %v317_v46 = vor.u32 %v315_v21, %v314_v33  ;;  %v319_v47 = vrot.slane %v314_v33, 4  ;;  %v180_v19 = vld [vmem:[%s14167_s21 + $0x40] sm:$0xff]  ;;  %v182_v21 = vld [vmem:[%s14167_s21 + $0x50] sm:$0xff] }
  0x1b   : > { %v335_v48 = vsel %vm14178_vm6, %v327_v39, %v334_v40  ;;  %v743_v49 = vsel %vm14186_vm7, %v326_v38, %v742_v27  ;;  %v747_v50 = vsel %vm14192_vm8, %v336_v41, %v746_v28  ;;  %v638_v51 = vsel %vm14186_vm7, %v326_v38, %v637_v35 }
  0x1c   : > { %640 = vst.msk [vmem:[#allocation2 + $0x1c] sm:$0xf] %vm624_vm3, %v335_v48  ;;  %744 = vst [vmem:[#allocation2] sm:$0xf] %v743_v49  ;;  %v318_v52 = vsel %vm14178_vm6, %v310_v45, %v317_v46  ;;  %v628_v53 = vsel %vm14186_vm7, %v309_v44, %v627_v34  ;;  %v635_v54 = vsel %vm14192_vm8, %v319_v47, %v634_v42  ;;  %v346_v58 = vshrl.u32 %v12451_v30, 16  ;;  %v184_v49 = vld [vmem:[%s14167_s21 + $0x60] sm:$0xff] }
  0x1d   : > { %745 = vst.msk [vmem:[#allocation2 + $0x4] sm:$0xf] %vm624_vm3, %v335_v48  ;;  %748 = vst [vmem:[#allocation2 + $0x8] sm:$0x1] %v747_v50  ;;  %v642_v55 = vsel %vm14192_vm8, %v336_v41, %v641_v43  ;;  %v349_v59 = vshll.u32 %v12451_v30, 16  ;;  %v355_v60 = vshrl.u32 %v12452_v36, 16  ;;  %v14243_v42 = vpack.c.bf16 %v180_v19, %v180_v19 }
  0x1e   : > { %639 = vst [vmem:[#allocation2 + $0x18] sm:$0xf] %v638_v51  ;;  %629 = vst [vmem:[#allocation2 + $0xc] sm:$0xf] %v628_v53  ;;  %v358_v61 = vshll.u32 %v12452_v36, 16  ;;  %v363_v62 = vshrl.u32 %v12453_v37, 16 }
  0x1f   : > { %631 = vst.msk [vmem:[#allocation2 + $0x10] sm:$0xf] %vm624_vm3, %v318_v52  ;;  %636 = vst [vmem:[#allocation2 + $0x14] sm:$0x1] %v635_v54  ;;  %v366_v63 = vshll.u32 %v12453_v37, 16  ;;  %v340_v1 = vrot.slane %v338_v56, 7  ;;  %v14252_v54 = vpack.c.bf16 %v181_v20, %v181_v20 }
  0x20   : > { %643 = vst [vmem:[#allocation2 + $0x20] sm:$0x1] %v642_v55  ;;  %v348_v3 = vrot.slane %v346_v58, 7  ;;  %v357_v6 = vrot.slane %v355_v60, 7  ;;  %v365_v7 = vrot.slane %v363_v62, 7  ;;  %v18924_v8 = vsel %vm14221_vm9, 4294967295, %v18923_v8 }
  0x21   : > { %18925 = vst [vmem:[#allocation6_spill] sm:$0xff] %v18924_v8  ;;  %v343_v9 = vor.u32 %v341_v57, %v340_v1  ;;  %v344_v10 = vrot.slane %v340_v1, 4  ;;  %v183_v36 = vld [vmem:[%s14167_s21 + $0x58] sm:$0xff]  ;;  %vm1096_vm11 = vsmask.f32 7440  ;;  %v14254_v55 = vpack.c.bf16 %v182_v21, %v182_v21 }
  0x22   : > { %v351_v11 = vor.u32 %v349_v59, %v348_v3  ;;  %v353_v2 = vrot.slane %v348_v3, 4  ;;  %v360_v14 = vor.u32 %v358_v61, %v357_v6  ;;  %v361_v15 = vrot.slane %v357_v6, 4  ;;  %v187_v19 = vld [vmem:[%s14167_s21 + $0x78] sm:$0xff]  ;;  %vm14294_vm13 = vmor %vm1095_vm10, %vm1096_vm11 }
  0x23   : > { %v368_v16 = vor.u32 %v366_v63, %v365_v7  ;;  %v370_v18 = vrot.slane %v365_v7, 4  ;;  %v757_v22 = vld [vmem:[#allocation2] sm:$0x2]  ;;  %v865_v24 = vld [vmem:[#allocation2] sm:$0x1]  ;;  %v645_v27 = vsel %vm14186_vm7, %v343_v9, %v644_v4  ;;  %vm2086_vm14 = vcmask 1042432  }
  0x24   : > { %v775_v23 = vld [vmem:[#allocation2 + $0x4] sm:$0x8]  ;;  %v352_v25 = vsel %vm14178_vm6, %v344_v10, %v351_v11  ;;  %v649_v28 = vsel %vm14192_vm8, %v353_v2, %v648_v5  ;;  %v11650_v29 = vrot.slane %v757_v22, 9  ;;  %v992_v32 = vld [vmem:[#allocation2 + $0x8] sm:$0x1]  ;;  %v652_v35 = vsel %vm14186_vm7, %v360_v14, %v651_v12  ;;  %v186_v2 = vld [vmem:[%s14167_s21 + $0x70] sm:$0xff] }
  0x25   : > { %v11668_v30 = vrot.slane %v775_v23, 11  ;;  %v1047_v33 = vld [vmem:[#allocation2 + $0x4] sm:$0xf]  ;;  %646 = vst [vmem:[#allocation2 + $0x24] sm:$0xf] %v645_v27  ;;  %v369_v34 = vsel %vm14178_vm6, %v361_v15, %v368_v16  ;;  %v656_v41 = vsel %vm14192_vm8, %v370_v18, %v655_v13  ;;  %v14261_v5 = vpack.c.bf16 %v183_v36, %v183_v36  ;;  %v185_v11 = vld [vmem:[%s14167_s21 + $0x68] sm:$0xff] }
  0x26   : > { %647 = vst.msk [vmem:[#allocation2 + $0x28] sm:$0xf] %vm624_vm3, %v352_v25  ;;  %650 = vst [vmem:[#allocation2 + $0x2c] sm:$0x1] %v649_v28  ;;  %v1108_v37 = vshll.u32 %v1047_v33, 16  ;;  %v1112_v38 = vshrl.u32 %v1047_v33, 16  ;;  %v866_v43 = vsel %vm14192_vm8, %v11650_v29, %v865_v24  ;;  %v14272_v18 = vpack.c.bf16 %v184_v49, %v184_v49 }
  0x27   : > { %v758_v39 = vld [vmem:[#allocation2 + $0xc] sm:$0x2]  ;;  %v776_v40 = vld [vmem:[#allocation2 + $0x10] sm:$0x8]  ;;  %653 = vst [vmem:[#allocation2 + $0x30] sm:$0xf] %v652_v35  ;;  %v993_v44 = vsel %vm14221_vm9, %v11668_v30, %v992_v32  ;;  %v14281_v32 = vpack.c.bf16 %v185_v11, %v185_v11  ;;  %v14283_v33 = vpack.c.bf16 %v186_v2, %v186_v2 }
  0x28   : > { %654 = vst.msk [vmem:[#allocation2 + $0x34] sm:$0xf] %vm624_vm3, %v369_v34  ;;  %v11651_v45 = vrot.slane %v758_v39, 9  ;;  %v868_v46 = vld [vmem:[#allocation2 + $0xc] sm:$0x1]  ;;  %v11669_v47 = vrot.slane %v776_v40, 11 }
  0x29   : > { %v995_v48 = vld [vmem:[#allocation2 + $0x14] sm:$0x1]  ;;  %657 = vst [vmem:[#allocation2 + $0x38] sm:$0x1] %v656_v41  ;;  %867 = vst [vmem:[#allocation2] sm:$0x1] %v866_v43 }
  0x2a   : > { %994 = vst [vmem:[#allocation2 + $0x8] sm:$0x1] %v993_v44  ;;  %v14250_v50 = vrot.slane %v1108_v37, 5  ;;  %v1114_v51 = vrot.slane %v1112_v38, 4  ;;  %v1049_v52 = vld [vmem:[#allocation2 + $0x10] sm:$0xf]  ;;  %v869_v56 = vsel %vm14192_vm8, %v11651_v45, %v868_v46  ;;  %v996_v57 = vsel %vm14221_vm9, %v11669_v47, %v995_v48 }
  0x2b   : > { %v759_v53 = vld [vmem:[#allocation2 + $0x18] sm:$0x2]  ;;  %v1132_v58 = vshll.u32 %v1049_v52, 16  ;;  %v1136_v59 = vshrl.u32 %v1049_v52, 16  ;;  %v777_v60 = vld [vmem:[#allocation2 + $0x1c] sm:$0x8]  ;;  %v14300_v52 = vpack.c.bf16 %v187_v19, %v187_v19 }
  0x2c   : > { %v871_v61 = vld [vmem:[#allocation2 + $0x18] sm:$0x1]  ;;  %v1115_v62 = vor.u32 %v1114_v51, %v14250_v50  ;;  %870 = vst [vmem:[#allocation2 + $0xc] sm:$0x1] %v869_v56  ;;  %997 = vst [vmem:[#allocation2 + $0x14] sm:$0x1] %v996_v57 }
  0x2d   : > { %v11652_v63 = vrot.slane %v759_v53, 9  ;;  %v11670_v1 = vrot.slane %v777_v60, 11  ;;  %v998_v3 = vld [vmem:[#allocation2 + $0x20] sm:$0x1]  ;;  %v1051_v4 = vld [vmem:[#allocation2 + $0x1c] sm:$0xf] }
  0x2e   : > { %v14263_v6 = vrot.slane %v1132_v58, 5  ;;  %v1138_v7 = vrot.slane %v1136_v59, 4  ;;  %v1156_v9 = vshll.u32 %v1051_v4, 16  ;;  %v1160_v10 = vshrl.u32 %v1051_v4, 16  ;;  %v760_v14 = vld [vmem:[#allocation2 + $0x24] sm:$0x2] }
  0x2f   : > { %v872_v12 = vsel %vm14192_vm8, %v11652_v63, %v871_v61  ;;  %v999_v13 = vsel %vm14221_vm9, %v11670_v1, %v998_v3  ;;  %v778_v15 = vld [vmem:[#allocation2 + $0x28] sm:$0x8]  ;;  %v372_v16 = vshrl.u32 %v14243_v42, 16  ;;  %v11653_v23 = vrot.slane %v760_v14, 9  ;;  %v874_v24 = vld [vmem:[#allocation2 + $0x24] sm:$0x1] }
  0x30   : > { %v1139_v20 = vor.u32 %v1138_v7, %v14263_v6  ;;  %873 = vst [vmem:[#allocation2 + $0x18] sm:$0x1] %v872_v12  ;;  %1000 = vst [vmem:[#allocation2 + $0x20] sm:$0x1] %v999_v13  ;;  %v14276_v21 = vrot.slane %v1156_v9, 5  ;;  %v1162_v22 = vrot.slane %v1160_v10, 4 }
  0x31   : > { %v188_v25 = vld [vmem:[%s14167_s21 + $0x80] sm:$0xff]  ;;  %v14279_v27 = vrot.slane %v1115_v62, 4  ;;  %v11671_v28 = vrot.slane %v778_v15, 11  ;;  %v1001_v29 = vld [vmem:[#allocation2 + $0x2c] sm:$0x1]  ;;  %v875_v37 = vsel %vm14192_vm8, %v11653_v23, %v874_v24  ;;  %v14288_v39 = vrot.slane %v372_v16, 7 }
  0x32   : > { %v1053_v30 = vld [vmem:[#allocation2 + $0x28] sm:$0xf]  ;;  %v1046_v34 = vld [vmem:[#allocation2] sm:$0xf]  ;;  %v1163_v36 = vor.u32 %v1162_v22, %v14276_v21  ;;  %876 = vst [vmem:[#allocation2 + $0x24] sm:$0x1] %v875_v37  ;;  %v14302_v53 = vpack.c.bf16 %v188_v25, %v188_v25 }
  0x33   : > { %v1079_v35 = vld [vmem:[#allocation2 + $0x8] sm:$0x1]  ;;  %v1180_v38 = vshll.u32 %v1053_v30, 16  ;;  %v1099_v40 = vshrl.u32 %v1046_v34, 16  ;;  %v1102_v41 = vshll.u32 %v1046_v34, 16  ;;  %v1002_v44 = vsel %vm14221_vm9, %v11671_v28, %v1001_v29 }
  0x34   : > { %v1118_v43 = vshll.u32 %v1079_v35, 16  ;;  %v761_v45 = vld [vmem:[#allocation2 + $0x30] sm:$0x2]  ;;  %v18926_v46 = vmov 0  ;;  %v1048_v47 = vld [vmem:[#allocation2 + $0xc] sm:$0xf] }
  0x35   : > { %v18927_v46 = vsel %vm14294_vm13, 4294967295, %v18926_v46  ;;  %v1080_v48 = vld [vmem:[#allocation2 + $0x14] sm:$0x1]  ;;  %v1140_v49 = vrot.slane %v1139_v20, 4  ;;  %v14298_v51 = vrot.slane %v1163_v36, 4  ;;  %v1101_v56 = vrot.slane %v1099_v40, 4 }
  0x36   : > { %18928 = vst [vmem:[#allocation7_spill] sm:$0xff] %v18927_v46  ;;  %1003 = vst [vmem:[#allocation2 + $0x2c] sm:$0x1] %v1002_v44  ;;  %v1104_v57 = vrot.slane %v1102_v41, 5  ;;  %v1120_v58 = vrot.slane %v1118_v43, 5  ;;  %v1123_v59 = vshrl.u32 %v1048_v47, 16 }
  0x37   : > { %v1126_v60 = vshll.u32 %v1048_v47, 16  ;;  %v1142_v61 = vshll.u32 %v1080_v48, 16  ;;  %v14304_v62 = vrot.slane %v1180_v38, 5  ;;  %v1184_v63 = vshrl.u32 %v1053_v30, 16  ;;  %v877_v1 = vld [vmem:[#allocation2 + $0x30] sm:$0x1] }
  0x38   : > { %v1105_v3 = vor.u32 %v1104_v57, %v1101_v56  ;;  %v1121_v4 = vsel %vm14294_vm13, %v14279_v27, %v1120_v58  ;;  %v1125_v7 = vrot.slane %v1123_v59, 4  ;;  %v1050_v9 = vld [vmem:[#allocation2 + $0x18] sm:$0xf]  ;;  %v1081_v10 = vld [vmem:[#allocation2 + $0x20] sm:$0x1]  ;;  %v11654_v11 = vrot.slane %v761_v45, 9 }
  0x39   : > { %v1128_v2 = vrot.slane %v1126_v60, 5  ;;  %v1144_v12 = vrot.slane %v1142_v61, 5  ;;  %v1147_v13 = vshrl.u32 %v1050_v9, 16  ;;  %v1150_v14 = vshll.u32 %v1050_v9, 16  ;;  %v1052_v27 = vld [vmem:[#allocation2 + $0x24] sm:$0xf] }
  0x3a   : > { %v1106_v15 = vrot.slane %v1105_v3, 4  ;;  %v1166_v16 = vshll.u32 %v1081_v10, 16  ;;  %v1186_v19 = vrot.slane %v1184_v63, 4  ;;  %v878_v20 = vsel %vm14192_vm8, %v11654_v11, %v877_v1  ;;  %v779_v28 = vld [vmem:[#allocation2 + $0x34] sm:$0x8] }
  0x3b   : > { %v1129_v22 = vor.u32 %v1128_v2, %v1125_v7  ;;  %v1145_v23 = vsel %vm14294_vm13, %v1140_v49, %v1144_v12  ;;  %v1149_v24 = vrot.slane %v1147_v13, 4  ;;  %v1152_v25 = vrot.slane %v1150_v14, 5  ;;  %879 = vst [vmem:[#allocation2 + $0x30] sm:$0x1] %v878_v20  ;;  %v1055_v43 = vld [vmem:[#allocation2 + $0x34] sm:$0xf] }
  0x3c   : > { %v1111_v29 = vsel %vm14294_vm13, %v1106_v15, %v14250_v50  ;;  %v1168_v30 = vrot.slane %v1166_v16, 5  ;;  %v1171_v35 = vshrl.u32 %v1052_v27, 16  ;;  %v1174_v36 = vshll.u32 %v1052_v27, 16  ;;  %v1004_v49 = vld [vmem:[#allocation2 + $0x38] sm:$0x1] }
  0x3d   : > { %v1082_v34 = vld [vmem:[#allocation2 + $0x2c] sm:$0x1]  ;;  %v11687_v37 = vcombine.low %v1111_v29, %v1121_v4  ;;  %v1130_v38 = vrot.slane %v1129_v22, 4  ;;  %v1153_v40 = vor.u32 %v1152_v25, %v1149_v24  ;;  %v1187_v41 = vor.u32 %v1186_v19, %v14304_v62  ;;  %v658_v7 = vld [vmem:[#allocation2 + $0x3c] sm:$0xf] }
  0x3e   : > { %v1169_v44 = vsel %vm14294_vm13, %v14298_v51, %v1168_v30  ;;  %v1173_v45 = vrot.slane %v1171_v35, 4  ;;  %v1176_v47 = vrot.slane %v1174_v36, 5  ;;  %v1190_v48 = vshll.u32 %v1082_v34, 16  ;;  %v662_v25 = vld [vmem:[#allocation2 + $0x44] sm:$0x1] }
  0x3f   : > { %12818 = vmatprep.mubr.msk.bf16.mxu0 %vm1532_vm12, %v11687_v37  ;;  %v1135_v50 = vsel %vm14294_vm13, %v1130_v38, %v14263_v6  ;;  %v1154_v56 = vrot.slane %v1153_v40, 4  ;;  %v1188_v57 = vrot.slane %v1187_v41, 4  ;;  %v11672_v58 = vrot.slane %v779_v28, 11  ;;  %v665_v35 = vld [vmem:[#allocation2 + $0x48] sm:$0xf] }
  0x40   : > { %v11688_v59 = vcombine.low %v1135_v50, %v1145_v23  ;;  %v1177_v60 = vor.u32 %v1176_v47, %v1173_v45  ;;  %v1192_v61 = vrot.slane %v1190_v48, 5  ;;  %v1204_v63 = vshll.u32 %v1055_v43, 16  ;;  %v669_v40 = vld [vmem:[#allocation2 + $0x50] sm:$0x1] }
  0x41   : > { %v1159_v51 = vsel %vm14294_vm13, %v1154_v56, %v14276_v21  ;;  %v1005_v1 = vsel %vm14221_vm9, %v11672_v58, %v1004_v49  ;;  %v1208_v3 = vshrl.u32 %v1055_v43, 16  ;;  %v375_v4 = vshll.u32 %v14243_v42, 16  ;;  %v11767_v21 = vld [vmem:[%s18802_s1 + $0x4] sm:$0x3] }
  0x42   : > { %12819 = vmatmul.mubr.msk.bf16.vlgmr.msra.gmra.mrb[0].mxu0 %vm1532_vm12, %v11688_v59  ;;  %v11689_v6 = vcombine.low %v1159_v51, %v1169_v44  ;;  %v1178_v9 = vrot.slane %v1177_v60, 4  ;;  %v1193_v10 = vsel %vm14294_vm13, %v1188_v57, %v1192_v61  ;;  %1006 = vst [vmem:[#allocation2 + $0x38] sm:$0x1] %v1005_v1  ;;  %v1054_v11 = vld [vmem:[#allocation2 + $0x30] sm:$0xf]  ;;  %v14333_v2 = vrot.slane %v1204_v63, 5 }
  0x43   : > { %12851 = vmatpush3.bf16.msra.mxu0 %v14217_v0  ;;  %v1195_v12 = vshrl.u32 %v1054_v11, 16  ;;  %v1198_v42 = vshll.u32 %v1054_v11, 16  ;;  %v1210_v13 = vrot.slane %v1208_v3, 4  ;;  %v377_v14 = vor.u32 %v375_v4, %v14288_v39  ;;  %v672_v59 = vld [vmem:[#allocation2 + $0x54] sm:$0xf] }
  0x44   : > { %12822 = vmatprep.mubr.msk.bf16.mxu0 %vm1532_vm12, %v11689_v6  ;;  %v1183_v15 = vsel %vm14294_vm13, %v1178_v9, %v14304_v62  ;;  %v378_v16 = vrot.slane %v14288_v39, 4  ;;  %v380_v19 = vshrl.u32 %v14252_v54, 16  ;;  %v383_v20 = vshll.u32 %v14252_v54, 16  ;;  %13942 = vmatprep.subr.msk.bf16.mxu0 %vm1581_vm0, %v11767_v21  ;;  %v676_v60 = vld [vmem:[#allocation2 + $0x5c] sm:$0x1] }
  0x45   : > { %v11690_v0 = vcombine.low %v1183_v15, %v1193_v10  ;;  %v1197_v22 = vrot.slane %v1195_v12, 4  ;;  %v1200_v23 = vrot.slane %v1198_v42, 5  ;;  %v1211_v24 = vor.u32 %v1210_v13, %v14333_v2 }
  0x46   : > { %v382_v27 = vrot.slane %v380_v19, 7  ;;  %v659_v28 = vsel %vm14186_vm7, %v377_v14, %v658_v7  ;;  %v389_v62 = vshrl.u32 %v14254_v55, 16  ;;  %v392_v39 = vshll.u32 %v14254_v55, 16  ;;  %v191_v19 = vld [vmem:[%s14167_s21 + $0x98] sm:$0xff] }
  0x47   : > { %v1201_v29 = vor.u32 %v1200_v23, %v1197_v22  ;;  %v1212_v30 = vrot.slane %v1211_v24, 4  ;;  %660 = vst [vmem:[#allocation2 + $0x3c] sm:$0xf] %v659_v28  ;;  %v397_v54 = vshrl.u32 %v14261_v5, 16  ;;  %v400_v34 = vshll.u32 %v14261_v5, 16 }
  0x48   : > { %v385_v36 = vor.u32 %v383_v20, %v382_v27  ;;  %v387_v37 = vrot.slane %v382_v27, 4  ;;  %v391_v38 = vrot.slane %v389_v62, 7  ;;  %v406_v41 = vshrl.u32 %v14272_v18, 16  ;;  %v679_v62 = vld [vmem:[#allocation2 + $0x60] sm:$0xf] }
  0x49   : > { %v1083_v43 = vld [vmem:[#allocation2 + $0x38] sm:$0x1]  ;;  %v1202_v44 = vrot.slane %v1201_v29, 4  ;;  %v399_v45 = vrot.slane %v397_v54, 7  ;;  %v409_v47 = vshll.u32 %v14272_v18, 16  ;;  %v414_v55 = vshrl.u32 %v14281_v32, 16 }
  0x4a   : > { %12823 = vmatmul.mubr.msk.bf16.gmra.mrb[4].mxu0 %vm1532_vm12, %v11690_v0  ;;  %v1214_v48 = vshll.u32 %v1083_v43, 16  ;;  %v386_v5 = vsel %vm14178_vm6, %v378_v16, %v385_v36  ;;  %v663_v49 = vsel %vm14192_vm8, %v387_v37, %v662_v25  ;;  %v394_v50 = vor.u32 %v392_v39, %v391_v38  ;;  %v190_v16 = vld [vmem:[%s14167_s21 + $0x90] sm:$0xff]  ;;  %v192_v39 = vld [vmem:[%s14167_s21 + $0xa0] sm:$0xff]  ;;  %v683_v43 = vld [vmem:[#allocation2 + $0x68] sm:$0x1] }
  0x4b   : > { %v1207_v56 = vsel %vm14294_vm13, %v1202_v44, %v14333_v2  ;;  %661 = vst.msk [vmem:[#allocation2 + $0x40] sm:$0xf] %vm624_vm3, %v386_v5  ;;  %664 = vst [vmem:[#allocation2 + $0x44] sm:$0x1] %v663_v49  ;;  %v395_v18 = vrot.slane %v391_v38, 4  ;;  %v402_v57 = vor.u32 %v400_v34, %v399_v45  ;;  %v404_v58 = vrot.slane %v399_v45, 4 }
  0x4c   : > { %v1216_v61 = vrot.slane %v1214_v48, 5  ;;  %v666_v63 = vsel %vm14186_vm7, %v394_v50, %v665_v35  ;;  %v408_v51 = vrot.slane %v406_v41, 7  ;;  %v416_v1 = vrot.slane %v414_v55, 7  ;;  %v194_v44 = vld [vmem:[%s14167_s21 + $0xb0] sm:$0xff] }
  0x4d   : > { %v403_v3 = vsel %vm14178_vm6, %v395_v18, %v402_v57  ;;  %667 = vst [vmem:[#allocation2 + $0x48] sm:$0xf] %v666_v63  ;;  %v670_v4 = vsel %vm14192_vm8, %v404_v58, %v669_v40  ;;  %v417_v7 = vshll.u32 %v14281_v32, 16  ;;  %v423_v6 = vshrl.u32 %v14283_v33, 16  ;;  %v189_v32 = vld [vmem:[%s14167_s21 + $0x88] sm:$0xff] }
  0x4e   : > { %v1217_v9 = vsel %vm14294_vm13, %v1212_v30, %v1216_v61  ;;  %v762_v10 = vld [vmem:[#allocation2 + $0x3c] sm:$0x2]  ;;  %v880_v11 = vld [vmem:[#allocation2 + $0x3c] sm:$0x1]  ;;  %668 = vst.msk [vmem:[#allocation2 + $0x4c] sm:$0xf] %vm624_vm3, %v403_v3  ;;  %v411_v2 = vor.u32 %v409_v47, %v408_v51  ;;  %v14400_v35 = vpack.c.bf16 %v189_v32, %v189_v32  ;;  %v14402_v36 = vpack.c.bf16 %v190_v16, %v190_v16 }
  0x4f   : > { %671 = vst [vmem:[#allocation2 + $0x50] sm:$0x1] %v670_v4  ;;  %v412_v21 = vrot.slane %v408_v51, 4  ;;  %v421_v12 = vrot.slane %v416_v1, 4  ;;  %v11691_v42 = vcombine.low %v1207_v56, %v1217_v9  ;;  %v11655_v13 = vrot.slane %v762_v10, 9 }
  0x50   : > { %v419_v14 = vor.u32 %v417_v7, %v416_v1  ;;  %v14378_v15 = vrot.slane %v423_v6, 7  ;;  %v673_v20 = vsel %vm14186_vm7, %v411_v2, %v672_v59  ;;  %v426_v22 = vshll.u32 %v14283_v33, 16  ;;  %v193_v33 = vld [vmem:[%s14167_s21 + $0xa8] sm:$0xff]  ;;  %v195_v59 = vld [vmem:[%s14167_s21 + $0xb8] sm:$0xff] }
  0x51   : > { %v677_v0 = vsel %vm14192_vm8, %v421_v12, %v676_v60  ;;  %v431_v23 = vshrl.u32 %v14300_v52, 16  ;;  %12826 = vmatprep.mubr.msk.bf16.mxu0 %vm1532_vm12, %v11691_v42  ;;  %v881_v24 = vsel %vm14192_vm8, %v11655_v13, %v880_v11  ;;  %674 = vst [vmem:[#allocation2 + $0x54] sm:$0xf] %v673_v20  ;;  %v434_v28 = vshll.u32 %v14300_v52, 16  ;;  %v196_v60 = vld [vmem:[%s14167_s21 + $0xc0] sm:$0xff] }
  0x52   : > { %v420_v25 = vsel %vm14178_vm6, %v412_v21, %v419_v14  ;;  %678 = vst [vmem:[#allocation2 + $0x5c] sm:$0x1] %v677_v0  ;;  %v429_v27 = vrot.slane %v14378_v15, 4  ;;  %v780_v29 = vld [vmem:[#allocation2 + $0x40] sm:$0x8]  ;;  %v428_v34 = vor.u32 %v426_v22, %v14378_v15  ;;  %v14404_v37 = vpack.c.bf16 %v191_v19, %v191_v19 }
  0x53   : > { %882 = vst [vmem:[#allocation2 + $0x3c] sm:$0x1] %v881_v24  ;;  %v1007_v30 = vld [vmem:[#allocation2 + $0x44] sm:$0x1]  ;;  %v1057_v54 = vld [vmem:[#allocation2 + $0x40] sm:$0xf]  ;;  %v14411_v49 = vpack.c.bf16 %v192_v39, %v192_v39  ;;  %v14419_v4 = vpack.c.bf16 %v193_v33, %v193_v33  ;;  %v14430_v14 = vpack.c.bf16 %v194_v44, %v194_v44 }
  0x54   : > { %675 = vst.msk [vmem:[#allocation2 + $0x58] sm:$0xf] %vm624_vm3, %v420_v25  ;;  %v11673_v38 = vrot.slane %v780_v29, 11  ;;  %v1228_v52 = vshll.u32 %v1057_v54, 16  ;;  %v1232_v40 = vshrl.u32 %v1057_v54, 16  ;;  %v433_v41 = vrot.slane %v431_v23, 7 }
  0x55   : > { %v763_v45 = vld [vmem:[#allocation2 + $0x48] sm:$0x2]  ;;  %v883_v47 = vld [vmem:[#allocation2 + $0x48] sm:$0x1]  ;;  %v680_v55 = vsel %vm14186_vm7, %v428_v34, %v679_v62  ;;  %v440_v48 = vshrl.u32 %v14302_v53, 16  ;;  %v443_v5 = vshll.u32 %v14302_v53, 16  ;;  %v14441_v25 = vpack.c.bf16 %v195_v59, %v195_v59 }
  0x56   : > { %v1008_v50 = vsel %vm14221_vm9, %v11673_v38, %v1007_v30  ;;  %v14415_v56 = vrot.slane %v1228_v52, 5  ;;  %v1234_v18 = vrot.slane %v1232_v40, 4  ;;  %v781_v57 = vld [vmem:[#allocation2 + $0x4c] sm:$0x8]  ;;  %v11656_v58 = vrot.slane %v763_v45, 9 }
  0x57   : > { %681 = vst [vmem:[#allocation2 + $0x60] sm:$0xf] %v680_v55  ;;  %1009 = vst [vmem:[#allocation2 + $0x44] sm:$0x1] %v1008_v50  ;;  %v11674_v61 = vrot.slane %v781_v57, 11  ;;  %v436_v1 = vor.u32 %v434_v28, %v433_v41  ;;  %v438_v3 = vrot.slane %v433_v41, 4 }
  0x58   : > { %v1010_v63 = vld [vmem:[#allocation2 + $0x50] sm:$0x1]  ;;  %v1059_v51 = vld [vmem:[#allocation2 + $0x4c] sm:$0xf]  ;;  %v1235_v7 = vor.u32 %v1234_v18, %v14415_v56  ;;  %v884_v6 = vsel %vm14192_vm8, %v11656_v58, %v883_v47  ;;  %v764_v2 = vld [vmem:[#allocation2 + $0x54] sm:$0x2] }
  0x59   : > { %v1252_v9 = vshll.u32 %v1059_v51, 16  ;;  %v1256_v10 = vshrl.u32 %v1059_v51, 16  ;;  %885 = vst [vmem:[#allocation2 + $0x48] sm:$0x1] %v884_v6  ;;  %v1011_v11 = vsel %vm14221_vm9, %v11674_v61, %v1010_v63  ;;  %v886_v21 = vld [vmem:[#allocation2 + $0x54] sm:$0x1]  ;;  %v437_v42 = vsel %vm14178_vm6, %v429_v27, %v436_v1 }
  0x5a   : > { %v1013_v12 = vld [vmem:[#allocation2 + $0x5c] sm:$0x1]  ;;  %v684_v13 = vsel %vm14192_vm8, %v438_v3, %v683_v43  ;;  %v1236_v32 = vrot.slane %v1235_v7, 4  ;;  %1012 = vst [vmem:[#allocation2 + $0x50] sm:$0x1] %v1011_v11  ;;  %v11657_v20 = vrot.slane %v764_v2, 9  ;;  %v14443_v27 = vpack.c.bf16 %v196_v60, %v196_v60 }
  0x5b   : > { %v14432_v15 = vld [vmem:[#allocation2 + $0x3c] sm:$0xf]  ;;  %v14434_v16 = vrot.slane %v1252_v9, 5  ;;  %v1258_v19 = vrot.slane %v1256_v10, 4  ;;  %682 = vst.msk [vmem:[#allocation2 + $0x64] sm:$0xf] %vm624_vm3, %v437_v42 }
  0x5c   : > { %685 = vst [vmem:[#allocation2 + $0x68] sm:$0x1] %v684_v13  ;;  %v1219_v0 = vshrl.u32 %v14432_v15, 16  ;;  %v1222_v22 = vshll.u32 %v14432_v15, 16  ;;  %v782_v23 = vld [vmem:[#allocation2 + $0x58] sm:$0x8]  ;;  %v887_v62 = vsel %vm14192_vm8, %v11657_v20, %v886_v21 }
  0x5d   : > { %v14439_v24 = vld [vmem:[#allocation2 + $0x58] sm:$0xf]  ;;  %v1259_v28 = vor.u32 %v1258_v19, %v14434_v16  ;;  %v11675_v39 = vrot.slane %v782_v23, 11  ;;  %888 = vst [vmem:[#allocation2 + $0x54] sm:$0x1] %v887_v62  ;;  %v442_v38 = vrot.slane %v440_v48, 7 }
  0x5e   : > { %v1276_v33 = vshll.u32 %v14439_v24, 16  ;;  %v1221_v29 = vrot.slane %v1219_v0, 4  ;;  %v1224_v30 = vrot.slane %v1222_v22, 5  ;;  %v1280_v54 = vshrl.u32 %v14439_v24, 16  ;;  %v765_v34 = vld [vmem:[#allocation2 + $0x60] sm:$0x2] }
  0x5f   : > { %v686_v52 = vld [vmem:[#allocation2 + $0x6c] sm:$0xf]  ;;  %v1084_v40 = vld [vmem:[#allocation2 + $0x44] sm:$0x1]  ;;  %v14450_v41 = vrot.slane %v1259_v28, 4  ;;  %v1014_v43 = vsel %vm14221_vm9, %v11675_v39, %v1013_v12  ;;  %v11658_v45 = vrot.slane %v765_v34, 9  ;;  %v445_v57 = vor.u32 %v443_v5, %v442_v38 }
  0x60   : > { %v14454_v44 = vrot.slane %v1276_v33, 5  ;;  %v1225_v47 = vor.u32 %v1224_v30, %v1221_v29  ;;  %v1238_v55 = vshll.u32 %v1084_v40, 16  ;;  %1015 = vst [vmem:[#allocation2 + $0x5c] sm:$0x1] %v1014_v43  ;;  %v1282_v50 = vrot.slane %v1280_v54, 4 }
  0x61   : > { %v889_v18 = vld [vmem:[#allocation2 + $0x60] sm:$0x1]  ;;  %v14458_v58 = vld [vmem:[#allocation2 + $0x48] sm:$0xf]  ;;  %v446_v59 = vrot.slane %v442_v38, 4  ;;  %v448_v60 = vshrl.u32 %v14400_v35, 16  ;;  %v687_v11 = vsel %vm14186_vm7, %v445_v57, %v686_v52 }
  0x62   : > { %v890_v48 = vsel %vm14192_vm8, %v11658_v45, %v889_v18  ;;  %v451_v61 = vshll.u32 %v14400_v35, 16  ;;  %v1226_v63 = vrot.slane %v1225_v47, 4  ;;  %v1240_v51 = vrot.slane %v1238_v55, 5  ;;  %v1085_v1 = vld [vmem:[#allocation2 + $0x50] sm:$0x1] }
  0x63   : > { %v1243_v3 = vshrl.u32 %v14458_v58, 16  ;;  %v1246_v7 = vshll.u32 %v14458_v58, 16  ;;  %891 = vst [vmem:[#allocation2 + $0x60] sm:$0x1] %v890_v48  ;;  %v1262_v53 = vshll.u32 %v1085_v1, 16  ;;  %v1283_v5 = vor.u32 %v1282_v50, %v14454_v44 }
  0x64   : > { %v783_v6 = vld [vmem:[#allocation2 + $0x64] sm:$0x8]  ;;  %v1016_v9 = vld [vmem:[#allocation2 + $0x68] sm:$0x1]  ;;  %v450_v10 = vrot.slane %v448_v60, 7  ;;  %v1231_v35 = vsel %vm14294_vm13, %v1226_v63, %v14415_v56  ;;  %v1241_v2 = vsel %vm14294_vm13, %v1236_v32, %v1240_v51  ;;  %vm2087_vm15 = vcmask 1046532  }
  0x65   : > { %v1245_v21 = vrot.slane %v1243_v3, 4  ;;  %v1248_v12 = vrot.slane %v1246_v7, 5  ;;  %v14474_v42 = vld [vmem:[#allocation2 + $0x64] sm:$0xf]  ;;  %688 = vst [vmem:[#allocation2 + $0x6c] sm:$0xf] %v687_v11  ;;  %v11692_v13 = vcombine.low %v1231_v35, %v1241_v2  ;;  %vm14852_vm1 = vmor %vm2086_vm14, %vm2087_vm15 }
  0x66   : > { %v1264_v19 = vrot.slane %v1262_v53, 5  ;;  %v14476_v20 = vld [vmem:[#allocation2 + $0x54] sm:$0xf]  ;;  %v1284_v0 = vrot.slane %v1283_v5, 4  ;;  %v11676_v22 = vrot.slane %v783_v6, 11  ;;  %v1300_v56 = vshll.u32 %v14474_v42, 16 }
  0x67   : > { %v1249_v23 = vor.u32 %v1248_v12, %v1245_v21  ;;  %v1267_v28 = vshrl.u32 %v14476_v20, 16  ;;  %v1270_v62 = vshll.u32 %v14476_v20, 16  ;;  %v690_v39 = vld [vmem:[#allocation2 + $0x74] sm:$0x1]  ;;  %12827 = vmatmul.mubr.msk.bf16.gmra.mrb[8].mxu0 %vm1532_vm12, %v11692_v13  ;;  %v1086_v33 = vld [vmem:[#allocation2 + $0x5c] sm:$0x1]  ;;  %v453_v54 = vor.u32 %v451_v61, %v450_v10 }
  0x68   : > { %v1265_v32 = vsel %vm14294_vm13, %v14450_v41, %v1264_v19  ;;  %v1017_v29 = vsel %vm14221_vm9, %v11676_v22, %v1016_v9  ;;  %v1304_v30 = vshrl.u32 %v14474_v42, 16  ;;  %v1286_v40 = vshll.u32 %v1086_v33, 16  ;;  %v197_v5 = vld [vmem:[%s14167_s21 + $0xc8] sm:$0xff] }
  0x69   : > { %v1250_v34 = vrot.slane %v1249_v23, 4  ;;  %v1269_v38 = vrot.slane %v1267_v28, 4  ;;  %v1272_v52 = vrot.slane %v1270_v62, 5  ;;  %1018 = vst [vmem:[#allocation2 + $0x68] sm:$0x1] %v1017_v29  ;;  %v14490_v45 = vrot.slane %v1300_v56, 5 }
  0x6a   : > { %v14488_v43 = vld [vmem:[#allocation2 + $0x60] sm:$0xf]  ;;  %v1306_v47 = vrot.slane %v1304_v30, 4  ;;  %v454_v41 = vsel %vm14178_vm6, %v446_v59, %v453_v54  ;;  %v455_v55 = vrot.slane %v450_v10, 4  ;;  %v1288_v57 = vrot.slane %v1286_v40, 5 }
  0x6b   : > { %v1255_v50 = vsel %vm14294_vm13, %v1250_v34, %v14434_v16  ;;  %v1273_v18 = vor.u32 %v1272_v52, %v1269_v38  ;;  %v1291_v48 = vshrl.u32 %v14488_v43, 16  ;;  %689 = vst.msk [vmem:[#allocation2 + $0x70] sm:$0xf] %vm624_vm3, %v454_v41  ;;  %v1294_v61 = vshll.u32 %v14488_v43, 16  ;;  %v693_v23 = vld [vmem:[#allocation2 + $0x78] sm:$0xf] }
  0x6c   : > { %v11693_v60 = vcombine.low %v1255_v50, %v1265_v32  ;;  %v1307_v63 = vor.u32 %v1306_v47, %v14490_v45  ;;  %v691_v59 = vsel %vm14192_vm8, %v455_v55, %v690_v39  ;;  %v766_v51 = vld [vmem:[#allocation2 + $0x6c] sm:$0x2]  ;;  %v892_v1 = vld [vmem:[#allocation2 + $0x6c] sm:$0x1]  ;;  %v1289_v16 = vsel %vm14294_vm13, %v1284_v0, %v1288_v57 }
  0x6d   : > { %v1274_v3 = vrot.slane %v1273_v18, 4  ;;  %v1293_v7 = vrot.slane %v1291_v48, 4  ;;  %692 = vst [vmem:[#allocation2 + $0x74] sm:$0x1] %v691_v59  ;;  %v11659_v53 = vrot.slane %v766_v51, 9  ;;  %v1296_v6 = vrot.slane %v1294_v61, 5 }
  0x6e   : > { %12830 = vmatprep.mubr.msk.bf16.mxu0 %vm1532_vm12, %v11693_v60  ;;  %v1308_v9 = vrot.slane %v1307_v63, 4  ;;  %v457_v10 = vshrl.u32 %v14402_v36, 16  ;;  %v460_v11 = vshll.u32 %v14402_v36, 16  ;;  %v465_v21 = vshrl.u32 %v14404_v37, 16  ;;  %v700_v51 = vld [vmem:[#allocation2 + $0x84] sm:$0xf] }
  0x6f   : > { %v1279_v35 = vsel %vm14294_vm13, %v1274_v3, %v14454_v44  ;;  %v893_v2 = vsel %vm14192_vm8, %v11659_v53, %v892_v1  ;;  %v468_v12 = vshll.u32 %v14404_v37, 16  ;;  %v1297_v0 = vor.u32 %v1296_v6, %v1293_v7  ;;  %v697_v44 = vld [vmem:[#allocation2 + $0x80] sm:$0x1]  ;;  %v704_v1 = vld [vmem:[#allocation2 + $0x8c] sm:$0x1] }
  0x70   : > { %v11694_v13 = vcombine.low %v1279_v35, %v1289_v16  ;;  %v14516_v19 = vld [vmem:[#allocation2 + $0x68] sm:$0x1]  ;;  %894 = vst [vmem:[#allocation2 + $0x6c] sm:$0x1] %v893_v2  ;;  %v459_v22 = vrot.slane %v457_v10, 7  ;;  %v474_v36 = vshrl.u32 %v14411_v49, 16  ;;  %v14525_v54 = vpack.c.bf16 %v197_v5, %v197_v5 }
  0x71   : > { %v1310_v28 = vshll.u32 %v14516_v19, 16  ;;  %v467_v62 = vrot.slane %v465_v21, 7  ;;  %v477_v56 = vshll.u32 %v14411_v49, 16  ;;  %v482_v39 = vshrl.u32 %v14419_v4, 16 }
  0x72   : > { %12831 = vmatmul.mubr.msk.bf16.gmra.mrb[12].mxu0 %vm1532_vm12, %v11694_v13  ;;  %v1298_v37 = vrot.slane %v1297_v0, 4  ;;  %v784_v32 = vld [vmem:[#allocation2 + $0x70] sm:$0x8]  ;;  %v462_v29 = vor.u32 %v460_v11, %v459_v22  ;;  %v463_v30 = vrot.slane %v459_v22, 4  ;;  %v476_v59 = vrot.slane %v474_v36, 7 }
  0x73   : > { %v14523_v33 = vld [vmem:[#allocation2 + $0x70] sm:$0xf]  ;;  %v1312_v34 = vrot.slane %v1310_v28, 5  ;;  %v11677_v38 = vrot.slane %v784_v32, 11  ;;  %v470_v41 = vor.u32 %v468_v12, %v467_v62  ;;  %v472_v55 = vrot.slane %v467_v62, 4 }
  0x74   : > { %v1324_v52 = vshll.u32 %v14523_v33, 16  ;;  %v1328_v40 = vshrl.u32 %v14523_v33, 16  ;;  %v1303_v49 = vsel %vm14294_vm13, %v1298_v37, %v14490_v45  ;;  %v1019_v47 = vld [vmem:[#allocation2 + $0x74] sm:$0x1]  ;;  %v694_v50 = vsel %vm14186_vm7, %v462_v29, %v693_v23  ;;  %v711_v29 = vld [vmem:[#allocation2 + $0x98] sm:$0x1] }
  0x75   : > { %v1313_v18 = vsel %vm14294_vm13, %v1308_v9, %v1312_v34  ;;  %v1020_v57 = vsel %vm14221_vm9, %v11677_v38, %v1019_v47  ;;  %695 = vst [vmem:[#allocation2 + $0x78] sm:$0xf] %v694_v50  ;;  %v471_v45 = vsel %vm14178_vm6, %v463_v30, %v470_v41  ;;  %v698_v63 = vsel %vm14192_vm8, %v472_v55, %v697_v44  ;;  %v707_v44 = vld [vmem:[#allocation2 + $0x90] sm:$0xf] }
  0x76   : > { %v14538_v48 = vrot.slane %v1324_v52, 5  ;;  %v1330_v60 = vrot.slane %v1328_v40, 4  ;;  %v11695_v61 = vcombine.low %v1303_v49, %v1313_v18  ;;  %1021 = vst [vmem:[#allocation2 + $0x74] sm:$0x1] %v1020_v57  ;;  %696 = vst.msk [vmem:[#allocation2 + $0x7c] sm:$0xf] %vm624_vm3, %v471_v45  ;;  %v479_v10 = vor.u32 %v477_v56, %v476_v59 }
  0x77   : > { %v14544_v3 = vld [vmem:[#allocation2 + $0x6c] sm:$0xf]  ;;  %699 = vst [vmem:[#allocation2 + $0x80] sm:$0x1] %v698_v63  ;;  %v484_v7 = vrot.slane %v482_v39, 7  ;;  %v485_v53 = vshll.u32 %v14419_v4, 16 }
  0x78   : > { %v1331_v16 = vor.u32 %v1330_v60, %v14538_v48  ;;  %v491_v5 = vshrl.u32 %v14430_v14, 16  ;;  %12834 = vmatprep.mubr.msk.bf16.mxu0 %vm1532_vm12, %v11695_v61  ;;  %v1315_v6 = vshrl.u32 %v14544_v3, 16  ;;  %v1318_v9 = vshll.u32 %v14544_v3, 16 }
  0x79   : > { %v480_v11 = vrot.slane %v476_v59, 4  ;;  %v487_v2 = vor.u32 %v485_v53, %v484_v7  ;;  %v489_v21 = vrot.slane %v484_v7, 4  ;;  %v701_v22 = vsel %vm14186_vm7, %v479_v10, %v700_v51 }
  0x7a   : > { %v1332_v35 = vrot.slane %v1331_v16, 4  ;;  %v493_v12 = vrot.slane %v491_v5, 7  ;;  %v1317_v13 = vrot.slane %v1315_v6, 4  ;;  %v1320_v0 = vrot.slane %v1318_v9, 5  ;;  %702 = vst [vmem:[#allocation2 + $0x84] sm:$0xf] %v701_v22 }
  0x7b   : > { %v494_v4 = vshll.u32 %v14430_v14, 16  ;;  %v488_v23 = vsel %vm14178_vm6, %v480_v11, %v487_v2  ;;  %v705_v36 = vsel %vm14192_vm8, %v489_v21, %v704_v1  ;;  %v499_v62 = vshrl.u32 %v14441_v25, 16  ;;  %v714_v6 = vld [vmem:[#allocation2 + $0x9c] sm:$0xf] }
  0x7c   : > { %v497_v28 = vrot.slane %v493_v12, 4  ;;  %v1321_v56 = vor.u32 %v1320_v0, %v1317_v13  ;;  %v767_v39 = vld [vmem:[#allocation2 + $0x78] sm:$0x2]  ;;  %v895_v37 = vld [vmem:[#allocation2 + $0x78] sm:$0x1]  ;;  %v502_v14 = vshll.u32 %v14441_v25, 16 }
  0x7d   : > { %703 = vst.msk [vmem:[#allocation2 + $0x88] sm:$0xf] %vm624_vm3, %v488_v23  ;;  %706 = vst [vmem:[#allocation2 + $0x8c] sm:$0x1] %v705_v36  ;;  %v496_v32 = vor.u32 %v494_v4, %v493_v12  ;;  %v508_v30 = vshrl.u32 %v14443_v27, 16  ;;  %v11660_v38 = vrot.slane %v767_v39, 9 }
  0x7e   : > { %v14564_v34 = vld [vmem:[#allocation2 + $0x74] sm:$0x1]  ;;  %v501_v52 = vrot.slane %v499_v62, 7  ;;  %v511_v40 = vshll.u32 %v14443_v27, 16  ;;  %v516_v49 = vshrl.u32 %v14525_v54, 16  ;;  %v1322_v47 = vrot.slane %v1321_v56, 4 }
  0x7f   : > { %v1334_v41 = vshll.u32 %v14564_v34, 16  ;;  %v785_v55 = vld [vmem:[#allocation2 + $0x7c] sm:$0x8]  ;;  %v1022_v50 = vld [vmem:[#allocation2 + $0x80] sm:$0x1]  ;;  %v708_v25 = vsel %vm14186_vm7, %v496_v32, %v707_v44  ;;  %v896_v18 = vsel %vm14192_vm8, %v11660_v38, %v895_v37  ;;  %v198_v27 = vld [vmem:[%s14167_s21 + $0xd0] sm:$0xff] }
  0x80   : > { %v11678_v57 = vrot.slane %v785_v55, 11  ;;  %v14573_v60 = vld [vmem:[#allocation2 + $0x7c] sm:$0xf]  ;;  %v504_v61 = vor.u32 %v502_v14, %v501_v52  ;;  %v506_v45 = vrot.slane %v501_v52, 4  ;;  %709 = vst [vmem:[#allocation2 + $0x90] sm:$0xf] %v708_v25  ;;  %v1327_v63 = vsel %vm14294_vm13, %v1322_v47, %v14538_v48 }
  0x81   : > { %v1336_v59 = vrot.slane %v1334_v41, 5  ;;  %897 = vst [vmem:[#allocation2 + $0x78] sm:$0x1] %v896_v18  ;;  %v1348_v51 = vshll.u32 %v14573_v60, 16  ;;  %v1352_v1 = vshrl.u32 %v14573_v60, 16  ;;  %v510_v5 = vrot.slane %v508_v30, 7 }
  0x82   : > { %v1023_v16 = vsel %vm14221_vm9, %v11678_v57, %v1022_v50  ;;  %v505_v7 = vsel %vm14178_vm6, %v497_v28, %v504_v61  ;;  %v712_v53 = vsel %vm14192_vm8, %v506_v45, %v711_v29  ;;  %v768_v11 = vld [vmem:[#allocation2 + $0x84] sm:$0x2]  ;;  %v898_v2 = vld [vmem:[#allocation2 + $0x84] sm:$0x1]  ;;  %v14592_v21 = vpack.c.bf16 %v198_v27, %v198_v27  ;;  %v199_v39 = vld [vmem:[%s14167_s21 + $0xd8] sm:$0xff] }
  0x83   : > { %v1337_v48 = vsel %vm14294_vm13, %v1332_v35, %v1336_v59  ;;  %1024 = vst [vmem:[#allocation2 + $0x80] sm:$0x1] %v1023_v16  ;;  %v14589_v9 = vrot.slane %v1348_v51, 5  ;;  %v1354_v10 = vrot.slane %v1352_v1, 4  ;;  %710 = vst.msk [vmem:[#allocation2 + $0x94] sm:$0xf] %vm624_vm3, %v505_v7  ;;  %v513_v4 = vor.u32 %v511_v40, %v510_v5 }
  0x84   : > { %713 = vst [vmem:[#allocation2 + $0x98] sm:$0x1] %v712_v53  ;;  %v11696_v12 = vcombine.low %v1327_v63, %v1337_v48  ;;  %v786_v13 = vld [vmem:[#allocation2 + $0x88] sm:$0x8]  ;;  %v11661_v0 = vrot.slane %v768_v11, 9  ;;  %v514_v23 = vrot.slane %v510_v5, 4  ;;  %v14628_v7 = vpack.c.bf16 %v199_v39, %v199_v39 }
  0x85   : > { %v1025_v22 = vld [vmem:[#allocation2 + $0x8c] sm:$0x1]  ;;  %v718_v36 = vld [vmem:[#allocation2 + $0xa4] sm:$0x1]  ;;  %v1355_v35 = vor.u32 %v1354_v10, %v14589_v9  ;;  %v11679_v28 = vrot.slane %v786_v13, 11  ;;  %v518_v44 = vrot.slane %v516_v49, 7  ;;  %v715_v29 = vsel %vm14186_vm7, %v513_v4, %v714_v6 }
  0x86   : > { %v14595_v62 = vld [vmem:[#allocation2 + $0x88] sm:$0xf]  ;;  %v519_v56 = vshll.u32 %v14525_v54, 16  ;;  %12835 = vmatmul.mubr.msk.bf16.gmra.mrb[16].mxu0 %vm1532_vm12, %v11696_v12  ;;  %v899_v37 = vsel %vm14192_vm8, %v11661_v0, %v898_v2  ;;  %716 = vst [vmem:[#allocation2 + $0x9c] sm:$0xf] %v715_v29  ;;  %v525_v25 = vshrl.u32 %v14592_v21, 16 }
  0x87   : > { %v1372_v32 = vshll.u32 %v14595_v62, 16  ;;  %v1376_v14 = vshrl.u32 %v14595_v62, 16  ;;  %v14606_v30 = vrot.slane %v1355_v35, 4  ;;  %900 = vst [vmem:[#allocation2 + $0x84] sm:$0x1] %v899_v37  ;;  %v1026_v38 = vsel %vm14221_vm9, %v11679_v28, %v1025_v22  ;;  %v200_v27 = vld [vmem:[%s14167_s21 + $0xe0] sm:$0xff] }
  0x88   : > { %v769_v54 = vld [vmem:[#allocation2 + $0x90] sm:$0x2]  ;;  %v901_v52 = vld [vmem:[#allocation2 + $0x90] sm:$0x1]  ;;  %v521_v40 = vor.u32 %v519_v56, %v518_v44  ;;  %v523_v49 = vrot.slane %v518_v44, 4  ;;  %v201_v63 = vld [vmem:[%s14167_s21 + $0xe8] sm:$0xff]  ;;  %v14645_v56 = vpack.c.bf16 %v200_v27, %v200_v27 }
  0x89   : > { %v14610_v47 = vld [vmem:[#allocation2 + $0x78] sm:$0xf]  ;;  %1027 = vst [vmem:[#allocation2 + $0x8c] sm:$0x1] %v1026_v38  ;;  %v14612_v41 = vrot.slane %v1372_v32, 5  ;;  %v1378_v55 = vrot.slane %v1376_v14, 4  ;;  %v14647_v39 = vpack.c.bf16 %v201_v63, %v201_v63 }
  0x8a   : > { %v11662_v50 = vrot.slane %v769_v54, 9  ;;  %v1339_v18 = vshrl.u32 %v14610_v47, 16  ;;  %v1342_v57 = vshll.u32 %v14610_v47, 16  ;;  %v522_v61 = vsel %vm14178_vm6, %v514_v23, %v521_v40  ;;  %v14623_v59 = vld [vmem:[#allocation2 + $0x80] sm:$0x1] }
  0x8b   : > { %v719_v45 = vsel %vm14192_vm8, %v523_v49, %v718_v36  ;;  %v787_v51 = vld [vmem:[#allocation2 + $0x94] sm:$0x8]  ;;  %v1028_v16 = vld [vmem:[#allocation2 + $0x98] sm:$0x1]  ;;  %717 = vst.msk [vmem:[#allocation2 + $0xa0] sm:$0xf] %vm624_vm3, %v522_v61  ;;  %v1379_v11 = vor.u32 %v1378_v55, %v14612_v41 }
  0x8c   : > { %v902_v1 = vsel %vm14192_vm8, %v11662_v50, %v901_v52  ;;  %720 = vst [vmem:[#allocation2 + $0xa4] sm:$0x1] %v719_v45  ;;  %v1341_v53 = vrot.slane %v1339_v18, 4  ;;  %v1344_v5 = vrot.slane %v1342_v57, 5  ;;  %v1358_v6 = vshll.u32 %v14623_v59, 16 }
  0x8d   : > { %903 = vst [vmem:[#allocation2 + $0x90] sm:$0x1] %v902_v1  ;;  %v11680_v48 = vrot.slane %v787_v51, 11  ;;  %v14631_v10 = vld [vmem:[#allocation2 + $0x94] sm:$0xf]  ;;  %v14636_v13 = vrot.slane %v525_v25, 7 }
  0x8e   : > { %v1396_v2 = vshll.u32 %v14631_v10, 16  ;;  %v1400_v12 = vshrl.u32 %v14631_v10, 16  ;;  %v1345_v0 = vor.u32 %v1344_v5, %v1341_v53  ;;  %v1360_v22 = vrot.slane %v1358_v6, 5  ;;  %v14641_v36 = vld [vmem:[#allocation2 + $0x84] sm:$0xf] }
  0x8f   : > { %v1029_v4 = vsel %vm14221_vm9, %v11680_v48, %v1028_v16  ;;  %v528_v23 = vshll.u32 %v14592_v21, 16  ;;  %v770_v44 = vld [vmem:[#allocation2 + $0x9c] sm:$0x2]  ;;  %v1363_v21 = vshrl.u32 %v14641_v36, 16  ;;  %v1366_v29 = vshll.u32 %v14641_v36, 16 }
  0x90   : > { %1030 = vst [vmem:[#allocation2 + $0x98] sm:$0x1] %v1029_v4  ;;  %v14643_v35 = vrot.slane %v1396_v2, 5  ;;  %v1402_v28 = vrot.slane %v1400_v12, 4  ;;  %v1346_v37 = vrot.slane %v1345_v0, 4  ;;  %v1361_v32 = vsel %vm14294_vm13, %v14606_v30, %v1360_v22 }
  0x91   : > { %v14652_v14 = vld [vmem:[#allocation2 + $0x8c] sm:$0x1]  ;;  %v1380_v38 = vrot.slane %v1379_v11, 4  ;;  %v11663_v40 = vrot.slane %v770_v44, 9  ;;  %v904_v49 = vld [vmem:[#allocation2 + $0x9c] sm:$0x1]  ;;  %v530_v57 = vor.u32 %v528_v23, %v14636_v13 }
  0x92   : > { %v1382_v54 = vshll.u32 %v14652_v14, 16  ;;  %v1403_v52 = vor.u32 %v1402_v28, %v14643_v35  ;;  %v1351_v55 = vsel %vm14294_vm13, %v1346_v37, %v14589_v9  ;;  %v1365_v50 = vrot.slane %v1363_v21, 4  ;;  %v788_v30 = vld [vmem:[#allocation2 + $0xa0] sm:$0x8]  ;;  %v721_v6 = vld [vmem:[#allocation2 + $0xa8] sm:$0xf] }
  0x93   : > { %v1368_v25 = vrot.slane %v1366_v29, 5  ;;  %v1031_v18 = vld [vmem:[#allocation2 + $0xa4] sm:$0x1]  ;;  %v11697_v61 = vcombine.low %v1351_v55, %v1361_v32  ;;  %v905_v51 = vsel %vm14192_vm8, %v11663_v40, %v904_v49  ;;  %v14666_v1 = vld [vmem:[#allocation2 + $0xa0] sm:$0xf]  ;;  %v11681_v5 = vrot.slane %v788_v30, 11 }
  0x94   : > { %v1384_v45 = vrot.slane %v1382_v54, 5  ;;  %v14662_v27 = vld [vmem:[#allocation2 + $0x90] sm:$0xf]  ;;  %v1404_v63 = vrot.slane %v1403_v52, 4  ;;  %906 = vst [vmem:[#allocation2 + $0x9c] sm:$0x1] %v905_v51  ;;  %v722_v54 = vsel %vm14186_vm7, %v530_v57, %v721_v6 }
  0x95   : > { %v1369_v16 = vor.u32 %v1368_v25, %v1365_v50  ;;  %v1387_v53 = vshrl.u32 %v14662_v27, 16  ;;  %v1390_v9 = vshll.u32 %v14662_v27, 16  ;;  %12838 = vmatprep.mubr.msk.bf16.mxu0 %vm1532_vm12, %v11697_v61  ;;  %v1420_v11 = vshll.u32 %v14666_v1, 16  ;;  %v725_v52 = vld [vmem:[#allocation2 + $0xb0] sm:$0x1] }
  0x96   : > { %v1385_v48 = vsel %vm14294_vm13, %v1380_v38, %v1384_v45  ;;  %v1424_v2 = vshrl.u32 %v14666_v1, 16  ;;  %v531_v12 = vrot.slane %v14636_v13, 4  ;;  %v1032_v28 = vsel %vm14221_vm9, %v11681_v5, %v1031_v18  ;;  %723 = vst [vmem:[#allocation2 + $0xa8] sm:$0xf] %v722_v54  ;;  %v728_v51 = vld [vmem:[#allocation2 + $0xb4] sm:$0xf] }
  0x97   : > { %v1370_v0 = vrot.slane %v1369_v16, 4  ;;  %v14676_v22 = vld [vmem:[#allocation2 + $0x98] sm:$0x1]  ;;  %v1389_v4 = vrot.slane %v1387_v53, 4  ;;  %v1392_v23 = vrot.slane %v1390_v9, 5  ;;  %v14681_v37 = vrot.slane %v1420_v11, 5 }
  0x98   : > { %v1406_v44 = vshll.u32 %v14676_v22, 16  ;;  %1033 = vst [vmem:[#allocation2 + $0xa4] sm:$0x1] %v1032_v28  ;;  %v1426_v32 = vrot.slane %v1424_v2, 4  ;;  %v533_v21 = vshrl.u32 %v14628_v7, 16  ;;  %v536_v38 = vshll.u32 %v14628_v7, 16 }
  0x99   : > { %v1375_v13 = vsel %vm14294_vm13, %v1370_v0, %v14612_v41  ;;  %v1393_v29 = vor.u32 %v1392_v23, %v1389_v4  ;;  %v542_v30 = vshrl.u32 %v14645_v56, 16  ;;  %v545_v18 = vshll.u32 %v14645_v56, 16  ;;  %v732_v5 = vld [vmem:[#allocation2 + $0xbc] sm:$0x1] }
  0x9a   : > { %v11698_v40 = vcombine.low %v1375_v13, %v1385_v48  ;;  %v1408_v49 = vrot.slane %v1406_v44, 5  ;;  %v1427_v55 = vor.u32 %v1426_v32, %v14681_v37  ;;  %v535_v50 = vrot.slane %v533_v21, 7 }
  0x9b   : > { %v1394_v25 = vrot.slane %v1393_v29, 4  ;;  %v550_v41 = vshrl.u32 %v14647_v39, 16  ;;  %v14697_v57 = vld [vmem:[#allocation2 + $0x9c] sm:$0xf]  ;;  %v544_v9 = vrot.slane %v542_v30, 7  ;;  %v553_v44 = vshll.u32 %v14647_v39, 16 }
  0x9c   : > { %12839 = vmatmul.mubr.msk.bf16.gmra.mrb[20].mxu0 %vm1532_vm12, %v11698_v40  ;;  %v1409_v7 = vsel %vm14294_vm13, %v1404_v63, %v1408_v49  ;;  %v538_v61 = vor.u32 %v536_v38, %v535_v50  ;;  %v540_v45 = vrot.slane %v535_v50, 4  ;;  %v1411_v53 = vshrl.u32 %v14697_v57, 16 }
  0x9d   : > { %v1399_v16 = vsel %vm14294_vm13, %v1394_v25, %v14643_v35  ;;  %v1414_v56 = vshll.u32 %v14697_v57, 16  ;;  %v14708_v11 = vrot.slane %v550_v41, 7  ;;  %v1428_v35 = vrot.slane %v1427_v55, 4  ;;  %v771_v13 = vld [vmem:[#allocation2 + $0xa8] sm:$0x2] }
  0x9e   : > { %v11699_v6 = vcombine.low %v1399_v16, %v1409_v7  ;;  %v539_v48 = vsel %vm14178_vm6, %v531_v12, %v538_v61  ;;  %v726_v63 = vsel %vm14192_vm8, %v540_v45, %v725_v52  ;;  %v1413_v0 = vrot.slane %v1411_v53, 4  ;;  %v907_v29 = vld [vmem:[#allocation2 + $0xa8] sm:$0x1] }
  0x9f   : > { %18929 = vst [vmem:[#allocation8_spill] sm:$0xff] %v14708_v11  ;;  %v14710_v2 = vld [vmem:[#allocation2 + $0xa4] sm:$0x1]  ;;  %v1416_v4 = vrot.slane %v1414_v56, 5  ;;  %724 = vst.msk [vmem:[#allocation2 + $0xac] sm:$0xf] %vm624_vm3, %v539_v48  ;;  %v14713_v23 = vor.u32 %v545_v18, %v544_v9  ;;  %v555_v40 = vor.u32 %v553_v44, %v14708_v11 }
  0xa0   : > { %727 = vst [vmem:[#allocation2 + $0xb0] sm:$0x1] %v726_v63  ;;  %12842 = vmatprep.mubr.msk.bf16.mxu0 %vm1532_vm12, %v11699_v6  ;;  %v1430_v28 = vshll.u32 %v14710_v2, 16  ;;  %v548_v12 = vrot.slane %v544_v9, 4  ;;  %v18805_v32 = vrot.slane %v14708_v11, 4  ;;  %v11664_v52 = vrot.slane %v771_v13, 9 }
  0xa1   : > { %v1417_v21 = vor.u32 %v1416_v4, %v1413_v0  ;;  %v729_v38 = vsel %vm14186_vm7, %v14713_v23, %v728_v51  ;;  %v15199_v8 = vld [vmem:[#allocation2 + $0xa4] sm:$0x1] }
  0xa2   : > { %v1432_v54 = vrot.slane %v1430_v28, 5  ;;  %730 = vst [vmem:[#allocation2 + $0xb4] sm:$0xf] %v729_v38  ;;  %v733_v49 = vsel %vm14192_vm8, %v18805_v32, %v732_v5  ;;  %v908_v50 = vsel %vm14192_vm8, %v11664_v52, %v907_v29  ;;  %v556_v25 = vsel %vm14178_vm6, %v548_v12, %v555_v40  ;;  %v15169_v32 = vld [vmem:[#allocation2 + $0x94] sm:$0xf]  ;;  %18936 = vst [vmem:[#allocation13_spill] sm:$0xff] %v15199_v8 }
  0xa3   : > { %v1418_v39 = vrot.slane %v1417_v21, 4  ;;  %734 = vst [vmem:[#allocation2 + $0xbc] sm:$0x1] %v733_v49  ;;  %909 = vst [vmem:[#allocation2 + $0xa8] sm:$0x1] %v908_v50 }
  0xa4   : > { %v1433_v55 = vsel %vm14294_vm13, %v1428_v35, %v1432_v54  ;;  %731 = vst.msk [vmem:[#allocation2 + $0xb8] sm:$0xf] %vm624_vm3, %v556_v25  ;;  %753 = vst.msk [vmem:[#allocation2 + $0xd0] sm:$0xf] %vm624_vm3, %v556_v25 }
  0xa5   : > { %v1423_v30 = vsel %vm14294_vm13, %v1418_v39, %v14681_v37  ;;  %18933 = vst [vmem:[#allocation10_spill] sm:$0xff] %v15169_v32 }
  0xa6   : > { %v11700_v18 = vcombine.low %v1423_v30, %v1433_v55  ;;  %v789_v41 = vld [vmem:[#allocation2 + $0xac] sm:$0x8] }
  0xa7   : > { %v1034_v7 = vld [vmem:[#allocation2 + $0xb0] sm:$0x1]  ;;  %v14738_v61 = vld [vmem:[#allocation2 + $0xac] sm:$0xf]  ;;  %v11682_v45 = vrot.slane %v789_v41, 11 }
  0xa8   : > { %v1444_v51 = vshll.u32 %v14738_v61, 16  ;;  %v1448_v16 = vshrl.u32 %v14738_v61, 16  ;;  %12843 = vmatmul.mubr.msk.bf16.gmra.mrb[24].mxu0 %vm1532_vm12, %v11700_v18 }
  0xa9   : > { %v1035_v37 = vsel %vm14221_vm9, %v11682_v45, %v1034_v7  ;;  %v772_v53 = vld [vmem:[#allocation2 + $0xb4] sm:$0x2]  ;;  %v910_v56 = vld [vmem:[#allocation2 + $0xb4] sm:$0x1] }
  0xaa   : > { %1036 = vst [vmem:[#allocation2 + $0xb0] sm:$0x1] %v1035_v37  ;;  %v1446_v9 = vrot.slane %v1444_v51, 5  ;;  %v1450_v5 = vrot.slane %v1448_v16, 4  ;;  %v11665_v6 = vrot.slane %v772_v53, 9 }
  0xab   : > { %v1037_v48 = vld [vmem:[#allocation2 + $0xbc] sm:$0x1]  ;;  %v14745_v63 = vld [vmem:[#allocation2 + $0xa8] sm:$0xf]  ;;  %v790_v0 = vld [vmem:[#allocation2 + $0xb8] sm:$0x8] }
  0xac   : > { %v911_v4 = vsel %vm14192_vm8, %v11665_v6, %v910_v56  ;;  %v14749_v35 = vld [vmem:[#allocation2 + $0xb8] sm:$0xf]  ;;  %v1435_v28 = vshrl.u32 %v14745_v63, 16  ;;  %v1438_v12 = vshll.u32 %v14745_v63, 16  ;;  %v11683_v44 = vrot.slane %v790_v0, 11 }
  0xad   : > { %912 = vst [vmem:[#allocation2 + $0xb4] sm:$0x1] %v911_v4  ;;  %v1451_v21 = vor.u32 %v1450_v5, %v1446_v9  ;;  %v1468_v13 = vshll.u32 %v14749_v35, 16  ;;  %v1472_v29 = vshrl.u32 %v14749_v35, 16  ;;  %v2892_v11 = vld [vmem:[#allocation2 + $0xa8] sm:$0xf] }
  0xae   : > { %v1437_v38 = vrot.slane %v1435_v28, 4  ;;  %v1440_v54 = vrot.slane %v1438_v12, 5  ;;  %v1038_v52 = vsel %vm14221_vm9, %v11683_v44, %v1037_v48 }
  0xaf   : > { %1039 = vst [vmem:[#allocation2 + $0xbc] sm:$0x1] %v1038_v52  ;;  %v1470_v40 = vrot.slane %v1468_v13, 5  ;;  %v1474_v49 = vrot.slane %v1472_v29, 4  ;;  %v1452_v50 = vrot.slane %v1451_v21, 4 }
  0xb0   : > { %v1441_v55 = vor.u32 %v1440_v54, %v1437_v38  ;;  %v14776_v21 = vld [vmem:[#allocation2 + $0x4] sm:$0xf]  ;;  %v14051_v13 = vld [vmem:[#allocation2] sm:$0xf]  ;;  %v14781_v54 = vld [vmem:[#allocation2 + $0x10] sm:$0xf] }
  0xb1   : > { %v14757_v39 = vld [vmem:[#allocation2 + $0xb0] sm:$0x1]  ;;  %v1475_v7 = vor.u32 %v1474_v49, %v1470_v40  ;;  %v11719_v29 = vcombine.low %v14051_v13, %v14776_v21  ;;  %v14053_v52 = vld [vmem:[#allocation2 + $0xc] sm:$0xf] }
  0xb2   : > { %v1454_v25 = vshll.u32 %v14757_v39, 16  ;;  %v1442_v30 = vrot.slane %v1441_v55, 4  ;;  %v11720_v49 = vcombine.low %v14053_v52, %v14781_v54  ;;  %v14784_v55 = vld [vmem:[#allocation2 + $0x1c] sm:$0xf] }
  0xb3   : > { %v1476_v48 = vrot.slane %v1475_v7, 4  ;;  %v14800_v7 = vld [vmem:[#allocation2 + $0x28] sm:$0xf] }
  0xb4   : > { %v1456_v18 = vrot.slane %v1454_v25, 5  ;;  %v14760_v41 = vld [vmem:[#allocation2 + $0xb4] sm:$0xf]  ;;  %v1447_v45 = vsel %vm14294_vm13, %v1442_v30, %v1446_v9  ;;  %v14056_v25 = vld [vmem:[%s18802_s1 + $0x4] sm:$0x3] }
  0xb5   : > { %v1459_v51 = vshrl.u32 %v14760_v41, 16  ;;  %v1462_v16 = vshll.u32 %v14760_v41, 16  ;;  %v2300_v30 = vsel %vm1581_vm0, %v14056_v25, 0 }
  0xb6   : > { %v1457_v37 = vsel %vm14294_vm13, %v1452_v50, %v1456_v18  ;;  %v14768_v56 = vld [vmem:[#allocation2 + $0xbc] sm:$0x1]  ;;  %v14055_v50 = vld [vmem:[#allocation2 + $0x18] sm:$0xf]  ;;  %v14794_v18 = vld [vmem:[%s18802_s1 + $0x6] sm:$0x3] }
  0xb7   : > { %v11701_v53 = vcombine.low %v1447_v45, %v1457_v37  ;;  %v1461_v5 = vrot.slane %v1459_v51, 4  ;;  %v1464_v6 = vrot.slane %v1462_v16, 5  ;;  %v1478_v0 = vshll.u32 %v14768_v56, 16  ;;  %v14058_v45 = vld [vmem:[#allocation2 + $0x24] sm:$0xf] }
  0xb8   : > { %v11722_v51 = vcombine.low %v14058_v45, %v14800_v7  ;;  %v14803_v16 = vld [vmem:[#allocation2 + $0x34] sm:$0xf]  ;;  %v14060_v37 = vld [vmem:[#allocation2 + $0x30] sm:$0xf] }
  0xb9   : > { %12846 = vmatprep.mubr.msk.bf16.mxu0 %vm1532_vm12, %v11701_v53  ;;  %v1465_v4 = vor.u32 %v1464_v6, %v1461_v5  ;;  %v1480_v28 = vrot.slane %v1478_v0, 5  ;;  %v11723_v53 = vcombine.low %v14060_v37, %v14803_v16  ;;  %v14808_v5 = vld [vmem:[#allocation2 + $0x40] sm:$0xf]  ;;  %v11733_v37 = vcombine.low %v14745_v63, %v14738_v61 }
  0xba   : > { %v11724_v6 = vcombine.low %v14432_v15, %v14808_v5  ;;  %v202_v15 = vld [vmem:[%s14167_s21 + $0xf0] sm:$0xff]  ;;  %v2098_v63 = vrot.slane %v14781_v54, 5 }
  0xbb   : > { %v1466_v9 = vrot.slane %v1465_v4, 4  ;;  %v1481_v12 = vsel %vm14294_vm13, %v1476_v48, %v1480_v28  ;;  %v14812_v48 = vld [vmem:[#allocation2 + $0x4c] sm:$0xf]  ;;  %v11726_v4 = vcombine.low %v14476_v20, %v14439_v24  ;;  %v11727_v28 = vcombine.low %v14488_v43, %v14474_v42  ;;  %v735_v42 = vld [vmem:[#allocation2 + $0xc0] sm:$0xf] }
  0xbc   : > { %v11725_v0 = vcombine.low %v14458_v58, %v14812_v48  ;;  %v11728_v58 = vcombine.low %v14544_v3, %v14523_v33  ;;  %v11730_v43 = vcombine.low %v14641_v36, %v14595_v62  ;;  %v11731_v3 = vcombine.low %v14662_v27, %v14631_v10 }
  0xbd   : > { %v1471_v44 = vsel %vm14294_vm13, %v1466_v9, %v1470_v40  ;;  %v11721_v40 = vcombine.low %v14055_v50, %v14784_v55  ;;  %v12476_v9 = vpack.c.bf16 %v202_v15, %v202_v15  ;;  %v2091_v50 = vrot.slane %v14776_v21, 5  ;;  %v14063_v21 = vld [vmem:[#allocation2 + $0x8] sm:$0x1] }
  0xbe   : > { %v11702_v38 = vcombine.low %v1471_v44, %v1481_v12  ;;  %v11729_v12 = vcombine.low %v14610_v47, %v14573_v60  ;;  %v203_v47 = vld [vmem:[%s14167_s21 + $0xf8] sm:$0xff]  ;;  %v11732_v36 = vcombine.low %v14697_v57, %v14666_v1  ;;  %v18930_v15 = vmov 0 }
  0xbf   : > { %v559_v44 = vshrl.u32 %v12476_v9, 16  ;;  %v18931_v15 = vsel %vm14852_vm1, 4294967295, %v18930_v15 }
  0xc0   : > { %12847 = vmatmul.mubr.msk.bf16.gmra.mrb[28].mxu0 %vm1532_vm12, %v11702_v38  ;;  %v12477_v38 = vpack.c.bf16 %v203_v47, %v203_v47  ;;  %18932 = vst [vmem:[#allocation9_spill] sm:$0xff] %v18931_v15 }
  0xc1   : > { %12852 = vmatprep.mubr.msk.bf16.mxu0 %vm1532_vm12, %v11719_v29  ;;  %v561_v13 = vrot.slane %v559_v44, 7  ;;  %v562_v29 = vshll.u32 %v12476_v9, 16  ;;  %v2040_v44 = vld [vmem:[#allocation2 + $0x18] sm:$0xe] }
  0xc2   : > { %v567_v52 = vshrl.u32 %v12477_v38, 16  ;;  %v570_v25 = vshll.u32 %v12477_v38, 16  ;;  %v11753_v47 = vrot.slane %v2040_v44, 9  ;;  %v14065_v38 = vld [vmem:[#allocation2 + $0x20] sm:$0x1] }
  0xc3   : > { %v564_v24 = vor.u32 %v562_v29, %v561_v13  ;;  %v565_v27 = vrot.slane %v561_v13, 4  ;;  %v2105_v13 = vrot.slane %v14784_v55, 5  ;;  %v14064_v29 = vld [vmem:[#allocation2 + $0x14] sm:$0x1]  ;;  %v2043_v44 = vld [vmem:[#allocation2 + $0x3c] sm:$0xe] }
  0xc5   : > { %v736_v20 = vsel %vm14186_vm7, %v564_v24, %v735_v42  ;;  %v2101_v24 = vrot.slane %v14064_v29, 5  ;;  %v11734_v42 = vcombine.low %v14760_v41, %v14749_v35  ;;  %v2107_v54 = vrot.slane %v2105_v13, 4  ;;  %v2044_v29 = vld [vmem:[#allocation2 + $0x48] sm:$0xe] }
  0xc6   : > { %737 = vst [vmem:[#allocation2 + $0xc0] sm:$0xf] %v736_v20  ;;  %v2106_v41 = vsel %vm14852_vm1, %v11753_v47, %v2105_v13  ;;  %v2133_v13 = vrot.slane %v14812_v48, 5 }
  0xc8   : > { %12853 = vmatmul.mubr.msk.bf16.vlgmr.msra.gmra.mrb[0].mxu0 %vm1532_vm12, %v11720_v49  ;;  %v2038_v49 = vld [vmem:[#allocation2] sm:$0xe] }
  0xc9   : > { %12885 = vmatpush3.bf16.msra.mxu0 %v2300_v30  ;;  %12856 = vmatprep.mubr.msk.bf16.mxu0 %vm1532_vm12, %v11721_v40  ;;  %v14841_v40 = vrot.slane %v567_v52, 7  ;;  %v2108_v52 = vrot.slane %v14065_v38, 5  ;;  %v14069_v38 = vld [vmem:[#allocation2 + $0x50] sm:$0x1] }
  0xca   : > { %13943 = vmatprep.subr.msk.bf16.mxu0 %vm1581_vm0, %v14794_v18 }
  0xcb   : > { %v572_v45 = vor.u32 %v570_v25, %v14841_v40  ;;  %v2109_v25 = vsel %vm14852_vm1, %v2107_v54, %v2108_v52  ;;  %v2135_v54 = vrot.slane %v2133_v13, 4  ;;  %v2136_v52 = vrot.slane %v14069_v38, 5  ;;  %v2049_v38 = vld [vmem:[#allocation2 + $0x84] sm:$0xe] }
  0xcd   : > { %v773_v30 = vld [vmem:[#allocation2 + $0xc0] sm:$0x2] }
  0xd0   : > { %12857 = vmatmul.mubr.msk.bf16.gmra.mrb[4].mxu0 %vm1532_vm12, %v11722_v51  ;;  %v11666_v51 = vrot.slane %v773_v30, 9  ;;  %v2119_v30 = vrot.slane %v14803_v16, 5 }
  0xd1   : > { %12860 = vmatprep.mubr.msk.bf16.mxu0 %vm1532_vm12, %v11723_v53  ;;  %v11751_v53 = vrot.slane %v2038_v49, 9 }
  0xd3   : > { %v2092_v9 = vsel %vm14852_vm1, %v11751_v53, %v2091_v50 }
  0xd8   : > { %12861 = vmatmul.mubr.msk.bf16.gmra.mrb[8].mxu0 %vm1532_vm12, %v11724_v6  ;;  %v913_v6 = vld [vmem:[#allocation2 + $0xc0] sm:$0x1] }
  0xd9   : > { %12864 = vmatprep.mubr.msk.bf16.mxu0 %vm1532_vm12, %v11725_v0  ;;  %v2093_v0 = vrot.slane %v2091_v50, 4  ;;  %v914_v57 = vsel %vm14192_vm8, %v11666_v51, %v913_v6  ;;  %v2112_v50 = vrot.slane %v14800_v7, 5  ;;  %v11770_v51 = vcombine.low %v2106_v41, %v2109_v25  ;;  %v14066_v6 = vld [vmem:[#allocation2 + $0x2c] sm:$0x1] }
  0xda   : > { %915 = vst [vmem:[#allocation2 + $0xc0] sm:$0x1] %v914_v57  ;;  %v2137_v25 = vsel %vm14852_vm1, %v2135_v54, %v2136_v52  ;;  %v2050_v52 = vld [vmem:[#allocation2 + $0x90] sm:$0xe] }
  0xdb   : > { %v2114_v53 = vrot.slane %v2112_v50, 4 }
  0xe0   : > { %12865 = vmatmul.mubr.msk.bf16.gmra.mrb[12].mxu0 %vm1532_vm12, %v11726_v4  ;;  %v2094_v4 = vrot.slane %v14063_v21, 5  ;;  %v2658_v21 = vsel %vm1581_vm0, %v14794_v18, 0 }
  0xe1   : > { %12868 = vmatprep.mubr.msk.bf16.mxu0 %vm1532_vm12, %v11727_v28  ;;  %v573_v28 = vsel %vm14178_vm6, %v565_v27, %v572_v45  ;;  %v2042_v27 = vld [vmem:[#allocation2 + $0x30] sm:$0xe] }
  0xe2   : > { %738 = vst.msk [vmem:[#allocation2 + $0xc4] sm:$0xf] %vm624_vm3, %v573_v28  ;;  %v11755_v7 = vrot.slane %v2042_v27, 9  ;;  %v14067_v28 = vld [vmem:[#allocation2 + $0x38] sm:$0x1] }
  0xe3   : > { %v2122_v57 = vrot.slane %v14067_v28, 5  ;;  %v2150_v28 = vrot.slane %v14516_v19, 5  ;;  %v2161_v19 = vrot.slane %v14573_v60, 5 }
  0xe8   : > { %12869 = vmatmul.mubr.msk.bf16.gmra.mrb[16].mxu0 %vm1532_vm12, %v11728_v58  ;;  %v2095_v58 = vsel %vm14852_vm1, %v2093_v0, %v2094_v4  ;;  %v2115_v0 = vrot.slane %v14066_v6, 5  ;;  %v2121_v4 = vrot.slane %v2119_v30, 4 }
  0xe9   : > { %12872 = vmatprep.mubr.msk.bf16.mxu0 %vm1532_vm12, %v11729_v12  ;;  %v2039_v12 = vld [vmem:[#allocation2 + $0xc] sm:$0xe]  ;;  %v11768_v20 = vcombine.low %v2092_v9, %v2095_v58  ;;  %v2126_v9 = vrot.slane %v14808_v5, 5  ;;  %v2120_v58 = vsel %vm14852_vm1, %v11755_v7, %v2119_v30  ;;  %v11757_v5 = vrot.slane %v2044_v29, 9  ;;  %v14071_v30 = vld [vmem:[#allocation2 + $0x64] sm:$0xf] }
  0xea   : > { %v2116_v18 = vsel %vm14852_vm1, %v2114_v53, %v2115_v0  ;;  %v2147_v27 = vrot.slane %v14071_v30, 5  ;;  %v14072_v0 = vld [vmem:[#allocation2 + $0x5c] sm:$0x1] }
  0xeb   : > { %v2134_v41 = vsel %vm14852_vm1, %v11757_v5, %v2133_v13  ;;  %v2168_v5 = vrot.slane %v14595_v62, 5  ;;  %v2178_v62 = vrot.slane %v14676_v22, 5  ;;  %v2189_v22 = vrot.slane %v14738_v61, 5 }
  0xf0   : > { %12873 = vmatmul.mubr.msk.bf16.gmra.mrb[20].mxu0 %vm1532_vm12, %v11730_v43  ;;  %v11752_v43 = vrot.slane %v2039_v12, 9  ;;  %v2123_v12 = vsel %vm14852_vm1, %v2121_v4, %v2122_v57  ;;  %v2149_v4 = vrot.slane %v2147_v27, 4 }
  0xf1   : > { %12876 = vmatprep.mubr.msk.bf16.mxu0 %vm1532_vm12, %v11731_v3  ;;  %v2100_v3 = vrot.slane %v2098_v63, 4 }
  0xf2   : > { %v2099_v49 = vsel %vm14852_vm1, %v11752_v43, %v2098_v63  ;;  %v14884_v63 = vld [vmem:[%s18802_s1 + $0x8] sm:$0x3]  ;;  %v2128_v43 = vrot.slane %v2126_v9, 4 }
  0xf3   : > { %v2102_v55 = vsel %vm14852_vm1, %v2100_v3, %v2101_v24  ;;  %v14068_v3 = vld [vmem:[#allocation2 + $0x44] sm:$0x1] }
  0xf4   : > { %v11769_v45 = vcombine.low %v2099_v49, %v2102_v55  ;;  %v2129_v47 = vrot.slane %v14068_v3, 5  ;;  %v14070_v55 = vld [vmem:[#allocation2 + $0x58] sm:$0xf]  ;;  %v2163_v3 = vrot.slane %v2161_v19, 4 }
  0xf6   : > { %v2130_v49 = vsel %vm14852_vm1, %v2128_v43, %v2129_v47 }
  0xf8   : > { %12877 = vmatmul.mubr.msk.bf16.gmra.mrb[24].mxu0 %vm1532_vm12, %v11732_v36  ;;  %v2041_v36 = vld [vmem:[#allocation2 + $0x24] sm:$0xe] }
  0xf9   : > { %12880 = vmatprep.mubr.msk.bf16.mxu0 %vm1532_vm12, %v11733_v37  ;;  %v11754_v37 = vrot.slane %v2041_v36, 9  ;;  %v2045_v36 = vld [vmem:[#allocation2 + $0x54] sm:$0xe] }
  0xfa   : > { %v11758_v53 = vrot.slane %v2045_v36, 9 }
  0xfb   : > { %v2113_v16 = vsel %vm14852_vm1, %v11754_v37, %v2112_v50  ;;  %v2140_v50 = vrot.slane %v14070_v55, 5  ;;  %v11774_v37 = vcombine.low %v2134_v41, %v2137_v25  ;;  %v11762_v55 = vrot.slane %v2049_v38, 9  ;;  %v13970_v38 = vld [vmem:[#allocation2 + $0x3c] sm:$0xff]  }
  0xfc   : > { %v11771_v24 = vcombine.low %v2113_v16, %v2116_v18  ;;  %v2154_v18 = vrot.slane %v14523_v33, 5  ;;  %v2164_v33 = vrot.slane %v14623_v59, 5  ;;  %v2175_v59 = vrot.slane %v14631_v10, 5 }
  0xfd   : > { %v2142_v6 = vrot.slane %v2140_v50, 4  ;;  %v2141_v57 = vsel %vm14852_vm1, %v11758_v53, %v2140_v50  ;;  %v2170_v50 = vrot.slane %v2168_v5, 4  ;;  %v2171_v41 = vrot.slane %v14652_v14, 5 }
  0xfe   : > { %v11763_v25 = vrot.slane %v2050_v52, 9  ;;  %v2177_v36 = vrot.slane %v2175_v59, 4  ;;  %v2169_v30 = vsel %vm14852_vm1, %v11762_v55, %v2168_v5  ;;  %v3384_v5 = vsel %vm1581_vm0, %v14884_v63, 0  ;;  %v13973_v52 = vld [vmem:[#allocation2 + $0x60] sm:$0xff]   ;;  %v14995_v55 = vld [vmem:[#allocation2 + $0x10] sm:$0xf] }
  0xff   : > { %v2172_v10 = vsel %vm14852_vm1, %v2170_v50, %v2171_v41  ;;  %v13975_v50 = vld [vmem:[#allocation2 + $0x78] sm:$0xff]  }
 0x100   : > { %12881 = vmatmul.mubr.msk.bf16.gmra.mrb[28].mxu0 %vm1532_vm12, %v11734_v42  ;;  %v11772_v42 = vcombine.low %v2120_v58, %v2123_v12  ;;  %v2151_v58 = vsel %vm14852_vm1, %v2149_v4, %v2150_v28  ;;  %v2047_v12 = vld [vmem:[#allocation2 + $0x6c] sm:$0xe]  ;;  %v2179_v14 = vsel %vm14852_vm1, %v2177_v36, %v2178_v62  ;;  %v11779_v53 = vcombine.low %v2169_v30, %v2172_v10  ;;  %v13976_v36 = vld [vmem:[#allocation2 + $0x84] sm:$0xff]   ;;  %v2856_v10 = vld [vmem:[#allocation2 + $0x18] sm:$0xf] }
 0x101   : > { %12886 = vmatprep.mubr.msk.bf16.mxu0 %vm1532_vm12, %v11768_v20  ;;  %v11756_v20 = vrot.slane %v2043_v44, 9  ;;  %v2048_v44 = vld [vmem:[#allocation2 + $0x78] sm:$0xe]  ;;  %v2191_v28 = vrot.slane %v2189_v22, 4  ;;  %v2911_v62 = vshll.u32 %v14995_v55, 16  ;;  %v2915_v30 = vshrl.u32 %v14995_v55, 16 }
 0x102   : > { %v11761_v43 = vrot.slane %v2048_v44, 9  ;;  %v2199_v44 = vrot.slane %v14768_v56, 5  ;;  %v791_v56 = vld [vmem:[#allocation2 + $0xc4] sm:$0x8] }
 0x103   : > { %v2127_v48 = vsel %vm14852_vm1, %v11756_v20, %v2126_v9  ;;  %v2157_v20 = vrot.slane %v14564_v34, 5  ;;  %v2165_v34 = vsel %vm14852_vm1, %v2163_v3, %v2164_v33  ;;  %v13967_v33 = vld [vmem:[#allocation2 + $0x18] sm:$0xff]  }
 0x104   : > { %v2162_v54 = vsel %vm14852_vm1, %v11761_v43, %v2161_v19  ;;  %v13966_v43 = vld [vmem:[#allocation2 + $0xc] sm:$0xff]  }
 0x108   : > { %12887 = vmatmul.mubr.msk.bf16.vlgmr.msra.gmra.mrb[0].mxu0 %vm1532_vm12, %v11769_v45  ;;  %v2046_v45 = vld [vmem:[#allocation2 + $0x60] sm:$0xe] }
 0x109   : > { %12919 = vmatpush3.bf16.msra.mxu0 %v2658_v21  ;;  %12890 = vmatprep.mubr.msk.bf16.mxu0 %vm1532_vm12, %v11770_v51  ;;  %v11773_v51 = vcombine.low %v2127_v48, %v2130_v49  ;;  %v2143_v21 = vrot.slane %v14072_v0, 5  ;;  %v11759_v7 = vrot.slane %v2046_v45, 9  ;;  %v11778_v49 = vcombine.low %v2162_v54, %v2165_v34  ;;  %v14983_v54 = vld [vmem:[%s18802_s1 + $0xa] sm:$0x3]  ;;  %v13969_v34 = vld [vmem:[#allocation2 + $0x30] sm:$0xff]  }
 0x10a   : > { %13944 = vmatprep.subr.msk.bf16.mxu0 %vm1581_vm0, %v14884_v63  ;;  %v2176_v45 = vsel %vm14852_vm1, %v11763_v25, %v2175_v59  ;;  %v13971_v63 = vld [vmem:[#allocation2 + $0x48] sm:$0xff]   ;;  %v13972_v59 = vld [vmem:[#allocation2 + $0x54] sm:$0xff]  }
 0x10b   : > { %v2144_v16 = vsel %vm14852_vm1, %v2142_v6, %v2143_v21  ;;  %v2148_v9 = vsel %vm14852_vm1, %v11759_v7, %v2147_v27  ;;  %v2182_v27 = vrot.slane %v14666_v1, 5  ;;  %v11780_v6 = vcombine.low %v2176_v45, %v2179_v14 }
 0x10c   : > { %v11775_v13 = vcombine.low %v2141_v57, %v2144_v16  ;;  %v11776_v29 = vcombine.low %v2148_v9, %v2151_v58  ;;  %v2185_v7 = vrot.slane %v14710_v2, 5  ;;  %v2192_v1 = vrot.slane %v14757_v39, 5  ;;  %v2053_v9 = vld [vmem:[#allocation2 + $0xb4] sm:$0xe] }
 0x10d   : > { %v2184_v21 = vrot.slane %v2182_v27, 4  ;;  %v2196_v16 = vrot.slane %v14749_v35, 5 }
 0x10e   : > { %v2193_v2 = vsel %vm14852_vm1, %v2191_v28, %v2192_v1  ;;  %v13977_v28 = vld [vmem:[#allocation2 + $0x90] sm:$0xff]  }
 0x10f   : > { %v2186_v61 = vsel %vm14852_vm1, %v2184_v21, %v2185_v7  ;;  %v2198_v19 = vrot.slane %v2196_v16, 4  ;;  %v2859_v7 = vld [vmem:[#allocation2 + $0x24] sm:$0xf] }
 0x110   : > { %12891 = vmatmul.mubr.msk.bf16.gmra.mrb[4].mxu0 %vm1532_vm12, %v11771_v24  ;;  %v11760_v24 = vrot.slane %v2047_v12, 9  ;;  %v11766_v12 = vrot.slane %v2053_v9, 9  ;;  %v15013_v9 = vld [vmem:[#allocation2 + $0x20] sm:$0x1] }
 0x111   : > { %12894 = vmatprep.mubr.msk.bf16.mxu0 %vm1532_vm12, %v11772_v42  ;;  %v2156_v42 = vrot.slane %v2154_v18, 4 }
 0x112   : > { %v2155_v47 = vsel %vm14852_vm1, %v11760_v24, %v2154_v18  ;;  %v2197_v35 = vsel %vm14852_vm1, %v11766_v12, %v2196_v16  ;;  %v2200_v24 = vsel %vm14852_vm1, %v2198_v19, %v2199_v44  ;;  %v13978_v16 = vld [vmem:[#allocation2 + $0x9c] sm:$0xff]   ;;  %v2950_v12 = vshrl.u32 %v2859_v7, 16 }
 0x113   : > { %v2158_v60 = vsel %vm14852_vm1, %v2156_v42, %v2157_v20  ;;  %v11783_v20 = vcombine.low %v2197_v35, %v2200_v24  ;;  %v2953_v19 = vshll.u32 %v2859_v7, 16  ;;  %v2945_v35 = vshll.u32 %v15013_v9, 16  ;;  %v2862_v24 = vld [vmem:[#allocation2 + $0x30] sm:$0xf] }
 0x114   : > { %v11777_v48 = vcombine.low %v2155_v47, %v2158_v60  ;;  %v13968_v60 = vld [vmem:[#allocation2 + $0x24] sm:$0xff]  }
 0x118   : > { %12895 = vmatmul.mubr.msk.bf16.gmra.mrb[8].mxu0 %vm1532_vm12, %v11773_v51  ;;  %v2051_v51 = vld [vmem:[#allocation2 + $0x9c] sm:$0xe] }
 0x119   : > { %12898 = vmatprep.mubr.msk.bf16.mxu0 %vm1532_vm12, %v11774_v37  ;;  %v2052_v37 = vld [vmem:[#allocation2 + $0xa8] sm:$0xe]  ;;  %v11764_v0 = vrot.slane %v2051_v51, 9  ;;  %v2926_v51 = vshrl.u32 %v2856_v10, 16 }
 0x11a   : > { %v11765_v4 = vrot.slane %v2052_v37, 9  ;;  %v15003_v37 = vld [vmem:[#allocation2 + $0x14] sm:$0x1] }
 0x11b   : > { %v2183_v57 = vsel %vm14852_vm1, %v11764_v0, %v2182_v27  ;;  %v14999_v27 = vld [vmem:[#allocation2 + $0x1c] sm:$0xf]  ;;  %v2921_v1 = vshll.u32 %v15003_v37, 16 }
 0x11c   : > { %v2190_v18 = vsel %vm14852_vm1, %v11765_v4, %v2189_v22  ;;  %v11781_v39 = vcombine.low %v2183_v57, %v2186_v61  ;;  %v2929_v22 = vshll.u32 %v2856_v10, 16  ;;  %v2935_v0 = vshll.u32 %v14999_v27, 16  ;;  %v15009_v4 = vld [vmem:[#allocation2 + $0x28] sm:$0xf] }
 0x11d   : > { %v11782_v58 = vcombine.low %v2190_v18, %v2193_v2  ;;  %v2939_v21 = vshrl.u32 %v14999_v27, 16  ;;  %v2928_v57 = vrot.slane %v2926_v51, 4  ;;  %v2959_v44 = vshll.u32 %v15009_v4, 16  ;;  %v2868_v51 = vld [vmem:[#allocation2 + $0x48] sm:$0xf] }
 0x11e   : > { %v2931_v61 = vrot.slane %v2929_v22, 5 }
 0x120   : > { %12899 = vmatmul.mubr.msk.bf16.gmra.mrb[12].mxu0 %vm1532_vm12, %v11775_v13  ;;  %v574_v13 = vrot.slane %v14841_v40, 4  ;;  %v11684_v40 = vrot.slane %v791_v56, 11  ;;  %v2923_v56 = vrot.slane %v2921_v1, 5 }
 0x121   : > { %12902 = vmatprep.mubr.msk.bf16.mxu0 %vm1532_vm12, %v11776_v29  ;;  %v739_v29 = vld [vmem:[#allocation2 + $0xc8] sm:$0x1] }
 0x122   : > { %v740_v42 = vsel %vm14192_vm8, %v574_v13, %v739_v29  ;;  %v2963_v13 = vshrl.u32 %v15009_v4, 16  ;;  %v2932_v29 = vor.u32 %v2931_v61, %v2928_v57 }
 0x123   : > { %741 = vst [vmem:[#allocation2 + $0xc8] sm:$0x1] %v740_v42  ;;  %v15021_v42 = vld [vmem:[#allocation2 + $0x34] sm:$0xf] }
 0x128   : > { %12903 = vmatmul.mubr.msk.bf16.gmra.mrb[16].mxu0 %vm1532_vm12, %v11777_v48  ;;  %v13974_v48 = vld [vmem:[#allocation2 + $0x6c] sm:$0xff]  }
 0x129   : > { %12906 = vmatprep.mubr.msk.bf16.mxu0 %vm1532_vm12, %v11778_v49  ;;  %v2853_v49 = vld [vmem:[#allocation2 + $0xc] sm:$0xf] }
 0x12a   : > { %v1040_v3 = vld [vmem:[#allocation2 + $0xc8] sm:$0x1]  ;;  %v2902_v41 = vshrl.u32 %v2853_v49, 16  ;;  %v2905_v25 = vshll.u32 %v2853_v49, 16 }
 0x12b   : > { %v1041_v47 = vsel %vm14221_vm9, %v11684_v40, %v1040_v3  ;;  %v2865_v3 = vld [vmem:[#allocation2 + $0x3c] sm:$0xf]  ;;  %v13979_v49 = vld [vmem:[#allocation2 + $0xa8] sm:$0xff]  }
 0x12c   : > { %1042 = vst [vmem:[#allocation2 + $0xc8] sm:$0x1] %v1041_v47  ;;  %v2904_v45 = vrot.slane %v2902_v41, 4  ;;  %v2907_v14 = vrot.slane %v2905_v25, 5  ;;  %v2955_v47 = vrot.slane %v2953_v19, 5  ;;  %v2947_v41 = vrot.slane %v2945_v35, 5 }
 0x12d   : > { %v2998_v25 = vshrl.u32 %v2865_v3, 16  ;;  %v15051_v19 = vld [vmem:[#allocation2 + $0x44] sm:$0x1] }
 0x12e   : > { %v2908_v18 = vor.u32 %v2907_v14, %v2904_v45 }
 0x12f   : > { %v3000_v61 = vrot.slane %v2998_v25, 4 }
 0x130   : > { %12907 = vmatmul.mubr.msk.bf16.gmra.mrb[20].mxu0 %vm1532_vm12, %v11779_v53  ;;  %v15005_v53 = vrot.slane %v2911_v62, 5  ;;  %v13980_v62 = vld [vmem:[#allocation2 + $0xb4] sm:$0xff]  }
 0x131   : > { %12910 = vmatprep.mubr.msk.bf16.mxu0 %vm1532_vm12, %v11780_v6  ;;  %v2917_v6 = vrot.slane %v2915_v30, 4 }
 0x133   : > { %v2918_v2 = vor.u32 %v2917_v6, %v15005_v53 }
 0x138   : > { %12911 = vmatmul.mubr.msk.bf16.gmra.mrb[24].mxu0 %vm1532_vm12, %v11781_v39  ;;  %v15015_v39 = vrot.slane %v2935_v0, 5 }
 0x139   : > { %12914 = vmatprep.mubr.msk.bf16.mxu0 %vm1532_vm12, %v11782_v58  ;;  %v2941_v58 = vrot.slane %v2939_v21, 4 }
 0x13b   : > { %v2942_v40 = vor.u32 %v2941_v58, %v15015_v39 }
 0x13d   : > { %v2943_v22 = vrot.slane %v2942_v40, 4 }
 0x140   : > { %12915 = vmatmul.mubr.msk.bf16.gmra.mrb[28].mxu0 %vm1532_vm12, %v11783_v20  ;;  %v2909_v20 = vrot.slane %v2908_v18, 4  ;;  %v3022_v18 = vshrl.u32 %v2868_v51, 16 }
 0x141   : > { %12920 = vmatprep.mubr.msk.bf16.mxu0 %vm1532_vm12, %v13966_v43  ;;  %v2919_v43 = vrot.slane %v2918_v2, 4  ;;  %v3025_v2 = vshll.u32 %v2868_v51, 16 }
 0x142   : > { %v2914_v30 = vsel %vm14294_vm13, %v2909_v20, %v15005_v53  ;;  %v15045_v53 = vld [vmem:[#allocation2 + $0x38] sm:$0x1] }
 0x143   : > { %v2924_v10 = vsel %vm14294_vm13, %v2919_v43, %v2923_v56  ;;  %v15057_v43 = vld [vmem:[#allocation2 + $0x4c] sm:$0xf]  ;;  %v15061_v56 = vsel %vm1581_vm0, %v14983_v54, 0 }
 0x144   : > { %v11834_v58 = vcombine.low %v2914_v30, %v2924_v10 }
 0x148   : > { %12921 = vmatmul.mubr.msk.bf16.vlgmr.msra.gmra.mrb[0].mxu0 %vm1532_vm12, %v13967_v33  ;;  %v2952_v33 = vrot.slane %v2950_v12, 4 }
 0x149   : > { %12953 = vmatpush3.bf16.msra.mxu0 %v3384_v5  ;;  %12924 = vmatprep.mubr.msk.bf16.mxu0 %vm1532_vm12, %v13968_v60  ;;  %v15025_v60 = vrot.slane %v2959_v44, 5  ;;  %v2965_v5 = vrot.slane %v2963_v13, 4 }
 0x14a   : > { %13945 = vmatprep.subr.msk.bf16.mxu0 %vm1581_vm0, %v14983_v54  ;;  %v2956_v6 = vor.u32 %v2955_v47, %v2952_v33  ;;  %v2871_v33 = vld [vmem:[#allocation2 + $0x54] sm:$0xf]  ;;  %v13981_v47 = vld [vmem:[#allocation2 + $0xc0] sm:$0xff]   ;;  %v3031_v54 = vshll.u32 %v15057_v43, 16 }
 0x14b   : > { %v2966_v0 = vor.u32 %v2965_v5, %v15025_v60  ;;  %v3046_v30 = vshrl.u32 %v2871_v33, 16  ;;  %v3049_v10 = vshll.u32 %v2871_v33, 16 }
 0x14c   : > { %v2957_v35 = vrot.slane %v2956_v6, 4  ;;  %v2874_v6 = vld [vmem:[#allocation2 + $0x60] sm:$0xf] }
 0x14e   : > { %v2962_v25 = vsel %vm14294_vm13, %v2957_v35, %v15025_v60  ;;  %v15087_v35 = vld [vmem:[#allocation2 + $0x5c] sm:$0x1] }
 0x150   : > { %12925 = vmatmul.mubr.msk.bf16.gmra.mrb[4].mxu0 %vm1532_vm12, %v13969_v34  ;;  %v15027_v34 = vld [vmem:[#allocation2 + $0x40] sm:$0xf] }
 0x151   : > { %12928 = vmatprep.mubr.msk.bf16.mxu0 %vm1532_vm12, %v13970_v38  ;;  %v15029_v38 = vld [vmem:[#allocation2 + $0x2c] sm:$0x1]  ;;  %v3007_v45 = vshll.u32 %v15027_v34, 16  ;;  %v3011_v14 = vshrl.u32 %v15027_v34, 16 }
 0x152   : > { %v2969_v21 = vshll.u32 %v15029_v38, 16 }
 0x153   : > { %v15053_v44 = vrot.slane %v3007_v45, 5  ;;  %v3013_v13 = vrot.slane %v3011_v14, 4 }
 0x154   : > { %v2971_v20 = vrot.slane %v2969_v21, 5 }
 0x158   : > { %12929 = vmatmul.mubr.msk.bf16.gmra.mrb[8].mxu0 %vm1532_vm12, %v13971_v63  ;;  %v2974_v63 = vshrl.u32 %v2862_v24, 16 }
 0x159   : > { %12932 = vmatprep.mubr.msk.bf16.mxu0 %vm1532_vm12, %v13972_v59  ;;  %v2977_v59 = vshll.u32 %v2862_v24, 16  ;;  %v2967_v24 = vrot.slane %v2966_v0, 4 }
 0x15a   : > { %v2976_v7 = vrot.slane %v2974_v63, 4  ;;  %v3017_v63 = vshll.u32 %v15051_v19, 16 }
 0x160   : > { %12933 = vmatmul.mubr.msk.bf16.gmra.mrb[12].mxu0 %vm1532_vm12, %v13973_v52  ;;  %v2983_v52 = vshll.u32 %v15021_v42, 16 }
 0x161   : > { %12936 = vmatprep.mubr.msk.bf16.mxu0 %vm1532_vm12, %v13974_v48  ;;  %v2987_v48 = vshrl.u32 %v15021_v42, 16 }
 0x162   : > { %v15042_v1 = vrot.slane %v2983_v52, 5  ;;  %v3027_v52 = vrot.slane %v3025_v2, 5  ;;  %v3048_v2 = vrot.slane %v3046_v30, 4  ;;  %v2880_v30 = vld [vmem:[#allocation2 + $0x78] sm:$0xf] }
 0x163   : > { %v2989_v57 = vrot.slane %v2987_v48, 4  ;;  %v15066_v48 = vld [vmem:[#allocation2 + $0x58] sm:$0xf] }
 0x164   : > { %v3055_v51 = vshll.u32 %v15066_v48, 16 }
 0x168   : > { %12937 = vmatmul.mubr.msk.bf16.gmra.mrb[16].mxu0 %vm1532_vm12, %v13975_v50  ;;  %v2933_v50 = vrot.slane %v2932_v29, 4  ;;  %v2948_v29 = vsel %vm14294_vm13, %v2943_v22, %v2947_v41  ;;  %v3035_v41 = vshrl.u32 %v15057_v43, 16  ;;  %v3059_v22 = vshrl.u32 %v15066_v48, 16 }
 0x169   : > { %12940 = vmatprep.mubr.msk.bf16.mxu0 %vm1532_vm12, %v13976_v36  ;;  %v3001_v36 = vshll.u32 %v2865_v3, 16  ;;  %v2993_v3 = vshll.u32 %v15045_v53, 16 }
 0x16a   : > { %v2938_v12 = vsel %vm14294_vm13, %v2933_v50, %v15015_v39  ;;  %v2990_v39 = vor.u32 %v2989_v57, %v15042_v1  ;;  %v3014_v50 = vor.u32 %v3013_v13, %v15053_v44  ;;  %v3070_v13 = vshrl.u32 %v2874_v6, 16 }
 0x16b   : > { %v2995_v14 = vrot.slane %v2993_v3, 5 }
 0x16c   : > { %v2991_v0 = vrot.slane %v2990_v39, 4  ;;  %v3015_v57 = vrot.slane %v3014_v50, 4  ;;  %v2877_v50 = vld [vmem:[#allocation2 + $0x6c] sm:$0xf] }
 0x16e   : > { %v2996_v33 = vsel %vm14294_vm13, %v2991_v0, %v2995_v14  ;;  %v3094_v0 = vshrl.u32 %v2877_v50, 16 }
 0x170   : > { %12941 = vmatmul.mubr.msk.bf16.gmra.mrb[20].mxu0 %vm1532_vm12, %v13977_v28  ;;  %v2979_v28 = vrot.slane %v2977_v59, 5  ;;  %v3024_v59 = vrot.slane %v3022_v18, 4 }
 0x171   : > { %12944 = vmatprep.mubr.msk.bf16.mxu0 %vm1532_vm12, %v13978_v16  ;;  %v3003_v16 = vrot.slane %v3001_v36, 5  ;;  %v2972_v36 = vsel %vm14294_vm13, %v2967_v24, %v2971_v20  ;;  %v15089_v24 = vrot.slane %v3055_v51, 5  ;;  %v3061_v20 = vrot.slane %v3059_v22, 4  ;;  %v15114_v51 = vld [vmem:[#allocation2 + $0x7c] sm:$0xf] }
 0x172   : > { %v2980_v40 = vor.u32 %v2979_v28, %v2976_v7  ;;  %v3019_v7 = vrot.slane %v3017_v63, 5  ;;  %v3028_v60 = vor.u32 %v3027_v52, %v3024_v59  ;;  %v15081_v28 = vld [vmem:[#allocation2 + $0x64] sm:$0xf]  ;;  %v15119_v22 = vld [vmem:[%s18802_s1 + $0xc] sm:$0x3] }
 0x173   : > { %v3004_v5 = vor.u32 %v3003_v16, %v3000_v61  ;;  %v15084_v61 = vrot.slane %v3031_v54, 5  ;;  %v3037_v16 = vrot.slane %v3035_v41, 4  ;;  %v3083_v39 = vshrl.u32 %v15081_v28, 16  ;;  %v15108_v54 = vld [vmem:[#allocation2 + $0x70] sm:$0xf] }
 0x174   : > { %v2981_v45 = vrot.slane %v2980_v40, 4  ;;  %v3079_v40 = vshll.u32 %v15081_v28, 16  ;;  %v15103_v63 = vrot.slane %v3028_v60, 4  ;;  %v3065_v41 = vshll.u32 %v15087_v35, 16 }
 0x175   : > { %v3005_v21 = vrot.slane %v3004_v5, 4  ;;  %v3020_v5 = vsel %vm14294_vm13, %v3015_v57, %v3019_v7  ;;  %v3038_v59 = vor.u32 %v3037_v16, %v15084_v61  ;;  %v3085_v14 = vrot.slane %v3083_v39, 4 }
 0x176   : > { %v2986_v3 = vsel %vm14294_vm13, %v2981_v45, %v15042_v1  ;;  %v15112_v45 = vrot.slane %v3079_v40, 5  ;;  %v3103_v7 = vshll.u32 %v15108_v54, 16  ;;  %v3107_v60 = vshrl.u32 %v15108_v54, 16 }
 0x177   : > { %v3039_v16 = vrot.slane %v3038_v59, 4 }
 0x178   : > { %12945 = vmatmul.mubr.msk.bf16.gmra.mrb[24].mxu0 %vm1532_vm12, %v13979_v49  ;;  %v11835_v49 = vcombine.low %v2938_v12, %v2948_v29  ;;  %v3051_v12 = vrot.slane %v3049_v10, 5  ;;  %v3073_v29 = vshll.u32 %v2874_v6, 16  ;;  %v11837_v10 = vcombine.low %v2986_v3, %v2996_v33  ;;  %v15122_v6 = vld [vmem:[#allocation2 + $0x68] sm:$0x1]  ;;  %v15134_v3 = vld [vmem:[#allocation2 + $0x74] sm:$0x1] }
 0x179   : > { %12948 = vmatprep.mubr.msk.bf16.mxu0 %vm1532_vm12, %v13980_v62  ;;  %v15076_v62 = vld [vmem:[#allocation2 + $0x50] sm:$0x1]  ;;  %v3086_v39 = vor.u32 %v3085_v14, %v15112_v45  ;;  %v3096_v33 = vrot.slane %v3094_v0, 4  ;;  %v3109_v59 = vrot.slane %v3107_v60, 4  ;;  %v15149_v14 = vld [vmem:[#allocation2 + $0x88] sm:$0xf] }
 0x17a   : > { %v3041_v18 = vshll.u32 %v15076_v62, 16  ;;  %v3052_v1 = vor.u32 %v3051_v12, %v3048_v2  ;;  %v3121_v2 = vshll.u32 %v2880_v30, 16 }
 0x17c   : > { %v15106_v52 = vrot.slane %v3041_v18, 5  ;;  %v3118_v18 = vshrl.u32 %v2880_v30, 16  ;;  %v3053_v12 = vrot.slane %v3052_v1, 4 }
 0x17e   : > { %v3044_v1 = vsel %vm14294_vm13, %v3039_v16, %v15106_v52  ;;  %v3113_v52 = vshll.u32 %v15134_v3, 16  ;;  %v3087_v16 = vrot.slane %v3086_v39, 4 }
 0x180   : > { %12949 = vmatmul.mubr.msk.bf16.gmra.mrb[28].mxu0 %vm1532_vm12, %v13981_v47  ;;  %v3010_v47 = vsel %vm14294_vm13, %v3005_v21, %v15053_v44  ;;  %v3062_v44 = vor.u32 %v3061_v20, %v15089_v24  ;;  %v3097_v21 = vshll.u32 %v2877_v50, 16  ;;  %v3034_v50 = vsel %vm14294_vm13, %v15103_v63, %v15084_v61 }
 0x181   : > { %12954 = vmatprep.mubr.msk.bf16.mxu0 %vm1532_vm12, %v11834_v58  ;;  %v11836_v58 = vcombine.low %v2962_v25, %v2972_v36  ;;  %v3072_v25 = vrot.slane %v3070_v13, 4  ;;  %v3075_v36 = vrot.slane %v3073_v29, 5  ;;  %v11838_v57 = vcombine.low %v3010_v47, %v3020_v5 }
 0x182   : > { %v3067_v13 = vrot.slane %v3065_v41, 5  ;;  %v3131_v29 = vshrl.u32 %v15114_v51, 16  ;;  %v3063_v20 = vrot.slane %v3062_v44, 4  ;;  %v3099_v47 = vrot.slane %v3097_v21, 5  ;;  %v15145_v41 = vld [vmem:[#allocation2 + $0x80] sm:$0x1] }
 0x183   : > { %v3076_v40 = vor.u32 %v3075_v36, %v3072_v25  ;;  %v15136_v5 = vrot.slane %v3103_v7, 5  ;;  %v3120_v25 = vrot.slane %v3118_v18, 4  ;;  %v3123_v36 = vrot.slane %v3121_v2, 5 }
 0x184   : > { %v3133_v44 = vrot.slane %v3131_v29, 4  ;;  %v3058_v7 = vsel %vm14294_vm13, %v3053_v12, %v15089_v24  ;;  %v3068_v61 = vsel %vm14294_vm13, %v3063_v20, %v3067_v13  ;;  %v3100_v18 = vor.u32 %v3099_v47, %v3096_v33 }
 0x185   : > { %v3077_v60 = vrot.slane %v3076_v40, 4  ;;  %v3110_v2 = vor.u32 %v3109_v59, %v15136_v5  ;;  %v3151_v29 = vshll.u32 %v15149_v14, 16  ;;  %v3155_v24 = vshrl.u32 %v15149_v14, 16 }
 0x186   : > { %v3124_v12 = vor.u32 %v3123_v36, %v3120_v25  ;;  %v11840_v40 = vcombine.low %v3058_v7, %v3068_v61  ;;  %v3115_v39 = vrot.slane %v3113_v52, 5  ;;  %v3101_v47 = vrot.slane %v3100_v18, 4  ;;  %v2889_v25 = vld [vmem:[#allocation2 + $0x9c] sm:$0xf]  ;;  %v15175_v52 = vld [vmem:[#allocation2 + $0x8c] sm:$0x1] }
 0x187   : > { %v3082_v33 = vsel %vm14294_vm13, %v3077_v60, %v15112_v45  ;;  %v3111_v59 = vrot.slane %v3110_v2, 4  ;;  %v15171_v36 = vrot.slane %v3151_v29, 5  ;;  %v3179_v60 = vshrl.u32 %v15169_v32, 16 }
 0x188   : > { %12955 = vmatmul.mubr.msk.bf16.vlgmr.msra.gmra.mrb[0].mxu0 %vm1532_vm12, %v11835_v49  ;;  %v3127_v49 = vshll.u32 %v15114_v51, 16  ;;  %v3193_v18 = vshll.u32 %v2889_v25, 16  ;;  %v3106_v2 = vsel %vm14294_vm13, %v3101_v47, %v15136_v5 }
 0x189   : > { %12987 = vmatpush3.bf16.msra.mxu0 %v15061_v56  ;;  %12958 = vmatprep.mubr.msk.bf16.mxu0 %vm1532_vm12, %v11836_v58  ;;  %v3089_v56 = vshll.u32 %v15122_v6, 16  ;;  %v2883_v58 = vld [vmem:[#allocation2 + $0x84] sm:$0xf]  ;;  %v3116_v29 = vsel %vm14294_vm13, %v3111_v59, %v3115_v39  ;;  %v15195_v39 = vld [vmem:[#allocation2 + $0x98] sm:$0x1]  ;;  %v3181_v59 = vrot.slane %v3179_v60, 4 }
 0x18a   : > { %13946 = vmatprep.subr.msk.bf16.mxu0 %vm1581_vm0, %v15119_v22  ;;  %v15147_v30 = vrot.slane %v3127_v49, 5  ;;  %v3142_v0 = vshrl.u32 %v2883_v58, 16  ;;  %v3145_v21 = vshll.u32 %v2883_v58, 16  ;;  %v3137_v49 = vshll.u32 %v15145_v41, 16  ;;  %v2886_v58 = vld [vmem:[#allocation2 + $0x90] sm:$0xf] }
 0x18b   : > { %v3091_v63 = vrot.slane %v3089_v56, 5  ;;  %18935 = vst [vmem:[#allocation12_spill] sm:$0xff] %v15195_v39  ;;  %v11842_v17 = vcombine.low %v3106_v2, %v3116_v29  ;;  %v3217_v29 = vshll.u32 %v2892_v11, 16 }
 0x18c   : > { %v3134_v13 = vor.u32 %v3133_v44, %v15147_v30  ;;  %v3144_v20 = vrot.slane %v3142_v0, 4  ;;  %v3147_v56 = vrot.slane %v3145_v21, 5  ;;  %v3157_v44 = vrot.slane %v3155_v24, 4 }
 0x18d   : > { %v3166_v0 = vshrl.u32 %v2886_v58, 16  ;;  %v3169_v21 = vshll.u32 %v2886_v58, 16  ;;  %v3139_v61 = vrot.slane %v3137_v49, 5 }
 0x18e   : > { %v3135_v7 = vrot.slane %v3134_v13, 4  ;;  %v3148_v45 = vor.u32 %v3147_v56, %v3144_v20  ;;  %v3161_v13 = vshll.u32 %v15175_v52, 16 }
 0x18f   : > { %v3168_v20 = vrot.slane %v3166_v0, 4  ;;  %v3171_v56 = vrot.slane %v3169_v21, 5 }
 0x190   : > { %12959 = vmatmul.mubr.msk.bf16.gmra.mrb[4].mxu0 %vm1532_vm12, %v11837_v10  ;;  %v11839_v10 = vcombine.low %v3034_v50, %v3044_v1  ;;  %v15173_v50 = vld [vmem:[#allocation2 + $0xa0] sm:$0xf]  ;;  %v3125_v1 = vrot.slane %v3124_v12, 4  ;;  %v3158_v12 = vor.u32 %v3157_v44, %v15171_v36  ;;  %v3140_v5 = vsel %vm14294_vm13, %v3135_v7, %v3139_v61  ;;  %v15204_v61 = vld [vmem:[#allocation2 + $0xac] sm:$0xf] }
 0x191   : > { %12962 = vmatprep.mubr.msk.bf16.mxu0 %vm1532_vm12, %v11838_v57  ;;  %v3092_v57 = vsel %vm14294_vm13, %v3087_v16, %v3091_v63  ;;  %18934 = vst [vmem:[#allocation11_spill] sm:$0xff] %v15173_v50  ;;  %v3175_v63 = vshll.u32 %v15169_v32, 16  ;;  %v3190_v16 = vshrl.u32 %v2889_v25, 16  ;;  %v3199_v49 = vshll.u32 %v15173_v50, 16  ;;  %18937 = vst [vmem:[#allocation14_spill] sm:$0xff] %v15204_v61 }
 0x192   : > { %v3203_v24 = vshrl.u32 %v15173_v50, 16  ;;  %v3130_v58 = vsel %vm14294_vm13, %v3125_v1, %v15147_v30  ;;  %v3195_v25 = vrot.slane %v3193_v18, 5  ;;  %v11841_v44 = vcombine.low %v3082_v33, %v3092_v57  ;;  %v15208_v18 = vld [vmem:[#allocation2 + $0xb8] sm:$0xf]  ;;  %v15224_v32 = vld [vmem:[#allocation2 + $0xc4] sm:$0xf] }
 0x193   : > { %v15197_v47 = vrot.slane %v3175_v63, 5  ;;  %v15201_v0 = vrot.slane %v3199_v49, 5  ;;  %v3159_v30 = vrot.slane %v3158_v12, 4  ;;  %v3163_v1 = vrot.slane %v3161_v13, 5 }
 0x194   : > { %v3205_v21 = vrot.slane %v3203_v24, 4  ;;  %v3172_v50 = vor.u32 %v3171_v56, %v3168_v20  ;;  %v3185_v7 = vshll.u32 %v15195_v39, 16  ;;  %v3209_v33 = vshll.u32 %v15199_v8, 16 }
 0x195   : > { %v3182_v63 = vor.u32 %v3181_v59, %v15197_v47  ;;  %v3214_v57 = vshrl.u32 %v2892_v11, 16  ;;  %v3223_v49 = vshll.u32 %v15204_v61, 16  ;;  %v3227_v24 = vshrl.u32 %v15204_v61, 16  ;;  %v15222_v61 = vld [vmem:[#allocation2 + $0xb0] sm:$0x1] }
 0x196   : > { %v3206_v2 = vor.u32 %v3205_v21, %v15201_v0  ;;  %v3164_v13 = vsel %vm14294_vm13, %v3159_v30, %v3163_v1  ;;  %v3173_v20 = vrot.slane %v3172_v50, 4  ;;  %v3187_v56 = vrot.slane %v3185_v7, 5  ;;  %v2898_v30 = vld [vmem:[#allocation2 + $0xc0] sm:$0xf] }
 0x197   : > { %v3247_v59 = vshll.u32 %v15208_v18, 16  ;;  %v3251_v11 = vshrl.u32 %v15208_v18, 16  ;;  %v3216_v21 = vrot.slane %v3214_v57, 4  ;;  %v3219_v8 = vrot.slane %v3217_v29, 5  ;;  %v15232_v57 = vld [vmem:[#allocation2 + $0xbc] sm:$0x1] }
 0x198   : > { %12963 = vmatmul.mubr.msk.bf16.gmra.mrb[8].mxu0 %vm1532_vm12, %v11839_v10  ;;  %v3149_v10 = vrot.slane %v3148_v45, 4  ;;  %v11843_v45 = vcombine.low %v3130_v58, %v3140_v5 }
 0x199   : > { %12966 = vmatprep.mubr.msk.bf16.mxu0 %vm1532_vm12, %v11840_v40  ;;  %v3192_v40 = vrot.slane %v3190_v16, 4  ;;  %v2895_v16 = vld [vmem:[#allocation2 + $0xb4] sm:$0xf]  ;;  %v3249_v7 = vrot.slane %v3247_v59, 5 }
 0x19a   : > { %v3154_v12 = vsel %vm14294_vm13, %v3149_v10, %v15171_v36  ;;  %v3238_v58 = vshrl.u32 %v2895_v16, 16  ;;  %v3241_v5 = vshll.u32 %v2895_v16, 16  ;;  %v3225_v36 = vrot.slane %v3223_v49, 5 }
 0x19b   : > { %v3196_v60 = vor.u32 %v3195_v25, %v3192_v40  ;;  %v3183_v40 = vrot.slane %v3182_v63, 4  ;;  %v3229_v10 = vrot.slane %v3227_v24, 4  ;;  %v11844_v39 = vcombine.low %v3154_v12, %v3164_v13 }
 0x19c   : > { %v3240_v50 = vrot.slane %v3238_v58, 4  ;;  %v3243_v1 = vrot.slane %v3241_v5, 5  ;;  %v3253_v16 = vrot.slane %v3251_v11, 4  ;;  %v3178_v63 = vsel %vm14294_vm13, %v3173_v20, %v15197_v47  ;;  %v750_v5 = vld [vmem:[#allocation2 + $0xcc] sm:$0xf] }
 0x19d   : > { %v3197_v25 = vrot.slane %v3196_v60, 4  ;;  %v3188_v60 = vsel %vm14294_vm13, %v3183_v40, %v3187_v56  ;;  %v3220_v49 = vor.u32 %v3219_v8, %v3216_v21  ;;  %v3230_v24 = vor.u32 %v3229_v10, %v3225_v36 }
 0x19e   : > { %v3262_v47 = vshrl.u32 %v2898_v30, 16  ;;  %v3265_v12 = vshll.u32 %v2898_v30, 16  ;;  %v3271_v13 = vshll.u32 %v15224_v32, 16  ;;  %v3275_v20 = vshrl.u32 %v15224_v32, 16 }
 0x19f   : > { %v3244_v56 = vor.u32 %v3243_v1, %v3240_v50  ;;  %v3254_v58 = vor.u32 %v3253_v16, %v3249_v7  ;;  %v11845_v59 = vcombine.low %v3178_v63, %v3188_v60  ;;  %v3221_v11 = vrot.slane %v3220_v49, 4  ;;  %v15247_v1 = vld [vmem:[#allocation2 + $0xc8] sm:$0x1] }
 0x1a0   : > { %12967 = vmatmul.mubr.msk.bf16.gmra.mrb[12].mxu0 %vm1532_vm12, %v11841_v44  ;;  %v3211_v44 = vrot.slane %v3209_v33, 5  ;;  %v3233_v33 = vshll.u32 %v15222_v61, 16  ;;  %v3231_v40 = vrot.slane %v3230_v24, 4  ;;  %v3273_v21 = vrot.slane %v3271_v13, 5  ;;  %v3579_v24 = vld [vmem:[#allocation2 + $0xc] sm:$0xe] }
 0x1a1   : > { %12970 = vmatprep.mubr.msk.bf16.mxu0 %vm1532_vm12, %v11842_v17  ;;  %v3207_v17 = vrot.slane %v3206_v2, 4  ;;  %v3202_v2 = vsel %vm14294_vm13, %v3197_v25, %v15201_v0  ;;  %v751_v0 = vsel %vm14186_vm7, %v14713_v23, %v750_v5  ;;  %v3264_v25 = vrot.slane %v3262_v47, 4 }
 0x1a2   : > { %752 = vst [vmem:[#allocation2 + $0xcc] sm:$0xf] %v751_v0  ;;  %v3245_v10 = vrot.slane %v3244_v56, 4  ;;  %v3255_v30 = vrot.slane %v3254_v58, 4  ;;  %v3226_v16 = vsel %vm14294_vm13, %v3221_v11, %v3225_v36  ;;  %v3645_v49 = vrot.slane %v14995_v55, 5 }
 0x1a3   : > { %v3212_v29 = vsel %vm14294_vm13, %v3207_v17, %v3211_v44  ;;  %v3267_v44 = vrot.slane %v3265_v12, 5  ;;  %v3277_v17 = vrot.slane %v3275_v20, 4  ;;  %v11866_v5 = vrot.slane %v3579_v24, 9 }
 0x1a4   : > { %v11846_v8 = vcombine.low %v3202_v2, %v3212_v29  ;;  %v3250_v2 = vsel %vm14294_vm13, %v3245_v10, %v3249_v7  ;;  %v3648_v0 = vrot.slane %v15003_v37, 5  ;;  %v3652_v11 = vrot.slane %v14999_v27, 5 }
 0x1a5   : > { %v3268_v63 = vor.u32 %v3267_v44, %v3264_v25  ;;  %v3278_v60 = vor.u32 %v3277_v17, %v3273_v21  ;;  %v3659_v25 = vrot.slane %v15009_v4, 5  ;;  %v3581_v44 = vld [vmem:[#allocation2 + $0x24] sm:$0xe]  ;;  %v3662_v27 = vrot.slane %v15029_v38, 5 }
 0x1a6   : > { %v3673_v38 = vrot.slane %v15027_v34, 5 }
 0x1a7   : > { %v3269_v20 = vrot.slane %v3268_v63, 4  ;;  %v3279_v56 = vrot.slane %v3278_v60, 4  ;;  %v3666_v60 = vrot.slane %v15021_v42, 5 }
 0x1a8   : > { %12971 = vmatmul.mubr.msk.bf16.gmra.mrb[16].mxu0 %vm1532_vm12, %v11843_v45  ;;  %v3257_v45 = vshll.u32 %v15232_v57, 16 }
 0x1a9   : > { %12974 = vmatprep.mubr.msk.bf16.mxu0 %vm1532_vm12, %v11844_v39  ;;  %v3235_v39 = vrot.slane %v3233_v33, 5  ;;  %v3281_v33 = vshll.u32 %v15247_v1, 16  ;;  %v774_v47 = vld [vmem:[#allocation2 + $0xcc] sm:$0x2]  ;;  %v3274_v55 = vsel %vm14294_vm13, %v3269_v20, %v3273_v21  ;;  %v3655_v21 = vrot.slane %v15013_v9, 5 }
 0x1aa   : > { %v3259_v50 = vrot.slane %v3257_v45, 5  ;;  %v11667_v12 = vrot.slane %v774_v47, 9  ;;  %v916_v45 = vld [vmem:[#allocation2 + $0xcc] sm:$0x1]  ;;  %v3675_v20 = vrot.slane %v3673_v38, 4 }
 0x1ab   : > { %v3236_v23 = vsel %vm14294_vm13, %v3231_v40, %v3235_v39  ;;  %v3283_v58 = vrot.slane %v3281_v33, 5  ;;  %v3646_v40 = vsel %vm14852_vm1, %v11866_v5, %v3645_v49  ;;  %v3580_v39 = vld [vmem:[#allocation2 + $0x18] sm:$0xe]  ;;  %v3584_v5 = vld [vmem:[#allocation2 + $0x48] sm:$0xe] }
 0x1ac   : > { %v3260_v29 = vsel %vm14294_vm13, %v3255_v30, %v3259_v50  ;;  %v11847_v36 = vcombine.low %v3226_v16, %v3236_v23  ;;  %v917_v7 = vsel %vm14192_vm8, %v11667_v12, %v916_v45  ;;  %v11867_v30 = vrot.slane %v3580_v39, 9 }
 0x1ad   : > { %v11848_v13 = vcombine.low %v3250_v2, %v3260_v29  ;;  %918 = vst [vmem:[#allocation2 + $0xcc] sm:$0x1] %v917_v7  ;;  %v3654_v50 = vrot.slane %v3652_v11, 4  ;;  %v11868_v16 = vrot.slane %v3581_v44, 9  ;;  %v3661_v23 = vrot.slane %v3659_v25, 4 }
 0x1ae   : > { %v3653_v63 = vsel %vm14852_vm1, %v11867_v30, %v3652_v11  ;;  %v3582_v2 = vld [vmem:[#allocation2 + $0x30] sm:$0xe]  ;;  %v3583_v29 = vld [vmem:[#allocation2 + $0x3c] sm:$0xe]  ;;  %v3669_v12 = vrot.slane %v15045_v53, 5  ;;  %v3690_v39 = vrot.slane %v15087_v35, 5 }
 0x1af   : > { %v3656_v4 = vsel %vm14852_vm1, %v3654_v50, %v3655_v21  ;;  %v3660_v33 = vsel %vm14852_vm1, %v11868_v16, %v3659_v25  ;;  %v3663_v9 = vsel %vm14852_vm1, %v3661_v23, %v3662_v27  ;;  %v11869_v47 = vrot.slane %v3582_v2, 9  ;;  %v3587_v30 = vld [vmem:[#allocation2 + $0x6c] sm:$0xe]  ;;  %v3588_v2 = vld [vmem:[#allocation2 + $0x78] sm:$0xe] }
 0x1b0   : > { %12975 = vmatmul.mubr.msk.bf16.gmra.mrb[20].mxu0 %vm1532_vm12, %v11845_v59  ;;  %v3647_v59 = vrot.slane %v3645_v49, 4  ;;  %v11884_v49 = vcombine.low %v3653_v63, %v3656_v4  ;;  %v11885_v24 = vcombine.low %v3660_v33, %v3663_v9  ;;  %v11870_v42 = vrot.slane %v3583_v29, 9 }
 0x1b1   : > { %12978 = vmatprep.mubr.msk.bf16.mxu0 %vm1532_vm12, %v11846_v8  ;;  %v3284_v8 = vsel %vm14294_vm13, %v3279_v56, %v3283_v58  ;;  %v3676_v56 = vrot.slane %v15051_v19, 5  ;;  %v15297_v58 = vld [vmem:[%s18802_s1 + $0xe] sm:$0x3]  ;;  %v3667_v34 = vsel %vm14852_vm1, %v11869_v47, %v3666_v60  ;;  %v3694_v44 = vrot.slane %v15081_v28, 5 }
 0x1b2   : > { %v3649_v37 = vsel %vm14852_vm1, %v3647_v59, %v3648_v0  ;;  %v11849_v17 = vcombine.low %v3274_v55, %v3284_v8  ;;  %v3674_v19 = vsel %vm14852_vm1, %v11870_v42, %v3673_v38  ;;  %v3687_v59 = vrot.slane %v15066_v48, 5  ;;  %v3585_v0 = vld [vmem:[#allocation2 + $0x54] sm:$0xe]  ;;  %v3589_v38 = vld [vmem:[#allocation2 + $0x84] sm:$0xe] }
 0x1b3   : > { %v11883_v10 = vcombine.low %v3646_v40, %v3649_v37  ;;  %v3677_v45 = vsel %vm14852_vm1, %v3675_v20, %v3676_v56  ;;  %v11871_v8 = vrot.slane %v3584_v5, 9  ;;  %v3683_v40 = vrot.slane %v15076_v62, 5  ;;  %v18938_v20 = vld [vmem:[#allocation10_spill] sm:$0xff] }
 0x1b4   : > { %v11887_v55 = vcombine.low %v3674_v19, %v3677_v45  ;;  %v3689_v37 = vrot.slane %v3687_v59, 4  ;;  %v3701_v35 = vrot.slane %v15108_v54, 5  ;;  %v3696_v23 = vrot.slane %v3694_v44, 4  ;;  %v3591_v19 = vld [vmem:[#allocation2 + $0x9c] sm:$0xe] }
 0x1b5   : > { %v3697_v27 = vrot.slane %v15122_v6, 5  ;;  %v11874_v63 = vrot.slane %v3587_v30, 9  ;;  %v3704_v28 = vrot.slane %v15134_v3, 5  ;;  %v3708_v33 = vrot.slane %v15114_v51, 5 }
 0x1b6   : > { %v3691_v62 = vsel %vm14852_vm1, %v3689_v37, %v3690_v39  ;;  %v3703_v4 = vrot.slane %v3701_v35, 4  ;;  %v3715_v3 = vrot.slane %v15149_v14, 5  ;;  %v3718_v51 = vrot.slane %v15175_v52, 5  ;;  %v18939_v52 = vld [vmem:[#allocation11_spill] sm:$0xff] }
 0x1b7   : > { %v3698_v54 = vsel %vm14852_vm1, %v3696_v23, %v3697_v27  ;;  %v3702_v9 = vsel %vm14852_vm1, %v11874_v63, %v3701_v35  ;;  %v3710_v47 = vrot.slane %v3708_v33, 4  ;;  %v3722_v56 = vrot.slane %v18938_v20, 5  ;;  %v3593_v35 = vld [vmem:[#allocation2 + $0xb4] sm:$0xe] }
 0x1b8   : > { %12979 = vmatmul.mubr.msk.bf16.gmra.mrb[24].mxu0 %vm1532_vm12, %v11847_v36  ;;  %v3668_v36 = vrot.slane %v3666_v60, 4  ;;  %v3705_v6 = vsel %vm14852_vm1, %v3703_v4, %v3704_v28  ;;  %v3739_v23 = vrot.slane %v15222_v61, 5  ;;  %v11880_v27 = vrot.slane %v3593_v35, 9 }
 0x1b9   : > { %12982 = vmatprep.mubr.msk.bf16.mxu0 %vm1532_vm12, %v11848_v13  ;;  %v4213_v13 = vsel %vm1581_vm0, %v15119_v22, 0  ;;  %v3680_v22 = vrot.slane %v15057_v43, 5  ;;  %v11872_v43 = vrot.slane %v3585_v0, 9  ;;  %v3724_v0 = vrot.slane %v3722_v56, 4 }
 0x1ba   : > { %v3670_v53 = vsel %vm14852_vm1, %v3668_v36, %v3669_v12  ;;  %v3711_v36 = vrot.slane %v15145_v41, 5  ;;  %v11876_v12 = vrot.slane %v3589_v38, 9  ;;  %v3746_v4 = vrot.slane %v15232_v57, 5  ;;  %v754_v38 = vld [vmem:[#allocation2 + $0xd4] sm:$0x1] }
 0x1bb   : > { %v11886_v7 = vcombine.low %v3667_v34, %v3670_v53  ;;  %v3682_v11 = vrot.slane %v3680_v22, 4  ;;  %v3681_v48 = vsel %vm14852_vm1, %v11871_v8, %v3680_v22  ;;  %v3590_v53 = vld [vmem:[#allocation2 + $0x90] sm:$0xe]  ;;  %v3729_v22 = vrot.slane %v18939_v52, 5  ;;  %v13986_v52 = vld [vmem:[#allocation2 + $0x48] sm:$0xff]  }
 0x1bc   : > { %v3712_v14 = vsel %vm14852_vm1, %v3710_v47, %v3711_v36  ;;  %v3716_v34 = vsel %vm14852_vm1, %v11876_v12, %v3715_v3  ;;  %v11878_v8 = vrot.slane %v3591_v19, 9  ;;  %v13982_v12 = vld [vmem:[#allocation2 + $0x18] sm:$0xff]   ;;  %v13989_v19 = vld [vmem:[#allocation2 + $0x6c] sm:$0xff]  }
 0x1bd   : > { %v3684_v25 = vsel %vm14852_vm1, %v3682_v11, %v3683_v40  ;;  %v3731_v11 = vrot.slane %v3729_v22, 4  ;;  %v18941_v40 = vld [vmem:[#allocation13_spill] sm:$0xff] }
 0x1be   : > { %v11888_v50 = vcombine.low %v3681_v48, %v3684_v25  ;;  %v18942_v48 = vld [vmem:[#allocation14_spill] sm:$0xff] }
 0x1bf   : > { %v3736_v25 = vrot.slane %v18942_v48, 5 }
 0x1c0   : > { %12983 = vmatmul.mubr.msk.bf16.gmra.mrb[28].mxu0 %vm1532_vm12, %v11849_v17  ;;  %v3688_v17 = vsel %vm14852_vm1, %v11872_v43, %v3687_v59  ;;  %v11877_v59 = vrot.slane %v3590_v53, 9  ;;  %v3732_v43 = vrot.slane %v18941_v40, 5  ;;  %v13985_v53 = vld [vmem:[#allocation2 + $0x3c] sm:$0xff]  }
 0x1c1   : > { %12988 = vmatprep.mubr.msk.bf16.mxu0 %vm1532_vm12, %v11883_v10  ;;  %v3586_v10 = vld [vmem:[#allocation2 + $0x60] sm:$0xe]  ;;  %v11889_v21 = vcombine.low %v3688_v17, %v3691_v62  ;;  %v3592_v62 = vld [vmem:[#allocation2 + $0xa8] sm:$0xe] }
 0x1c2   : > { %v11873_v16 = vrot.slane %v3586_v10, 9  ;;  %v3723_v37 = vsel %vm14852_vm1, %v11877_v59, %v3722_v56  ;;  %v3733_v17 = vsel %vm14852_vm1, %v3731_v11, %v3732_v43  ;;  %v3743_v10 = vrot.slane %v15208_v18, 5  ;;  %v13984_v56 = vld [vmem:[#allocation2 + $0x30] sm:$0xff]   ;;  %v15414_v59 = vld [vmem:[#allocation2 + $0x1c] sm:$0xf] }
 0x1c3   : > { %v4466_v11 = vshll.u32 %v15414_v59, 16  ;;  %v4470_v40 = vshrl.u32 %v15414_v59, 16  ;;  %v4411_v43 = vld [vmem:[#allocation2 + $0x24] sm:$0xf] }
 0x1c4   : > { %v3695_v60 = vsel %vm14852_vm1, %v11873_v16, %v3694_v44  ;;  %v3730_v44 = vsel %vm14852_vm1, %v11878_v8, %v3729_v22  ;;  %v3738_v16 = vrot.slane %v3736_v25, 4  ;;  %v3745_v63 = vrot.slane %v3743_v10, 4  ;;  %v13988_v22 = vld [vmem:[#allocation2 + $0x60] sm:$0xff]  }
 0x1c5   : > { %v11890_v29 = vcombine.low %v3695_v60, %v3698_v54  ;;  %v3750_v60 = vrot.slane %v15224_v32, 5  ;;  %v3744_v54 = vsel %vm14852_vm1, %v11880_v27, %v3743_v10  ;;  %v4481_v48 = vshrl.u32 %v4411_v43, 16  ;;  %v13993_v27 = vld [vmem:[#allocation2 + $0x9c] sm:$0xff]  }
 0x1c6   : > { %v3740_v18 = vsel %vm14852_vm1, %v3738_v16, %v3739_v23  ;;  %v3747_v61 = vsel %vm14852_vm1, %v3745_v63, %v3746_v4  ;;  %v15424_v10 = vrot.slane %v4466_v11, 5  ;;  %v4472_v35 = vrot.slane %v4470_v40, 4 }
 0x1c8   : > { %12989 = vmatmul.mubr.msk.bf16.vlgmr.msra.gmra.mrb[0].mxu0 %vm1532_vm12, %v11884_v49  ;;  %v11891_v49 = vcombine.low %v3702_v9, %v3705_v6  ;;  %v11897_v9 = vcombine.low %v3744_v54, %v3747_v61  ;;  %v4473_v61 = vor.u32 %v4472_v35, %v15424_v10 }
 0x1c9   : > { %13021 = vmatpush3.bf16.msra.mxu0 %v4213_v13  ;;  %12992 = vmatprep.mubr.msk.bf16.mxu0 %vm1532_vm12, %v11885_v24  ;;  %v11875_v24 = vrot.slane %v3588_v2, 9  ;;  %v3717_v13 = vrot.slane %v3715_v3, 4  ;;  %v3752_v2 = vrot.slane %v3750_v60, 4  ;;  %v3753_v3 = vrot.slane %v15247_v1, 5  ;;  %v792_v1 = vld [vmem:[#allocation2 + $0xd0] sm:$0x8] }
 0x1ca   : > { %13947 = vmatprep.subr.msk.bf16.mxu0 %vm1581_vm0, %v15297_v58 }
 0x1cb   : > { %v3709_v42 = vsel %vm14852_vm1, %v11875_v24, %v3708_v33  ;;  %v3719_v41 = vsel %vm14852_vm1, %v3717_v13, %v3718_v51  ;;  %v3594_v33 = vld [vmem:[#allocation2 + $0xc0] sm:$0xe]  ;;  %v11685_v13 = vrot.slane %v792_v1, 11 }
 0x1cc   : > { %v11892_v45 = vcombine.low %v3709_v42, %v3712_v14  ;;  %v11893_v5 = vcombine.low %v3716_v34, %v3719_v41  ;;  %v11881_v6 = vrot.slane %v3594_v33, 9  ;;  %v13983_v42 = vld [vmem:[#allocation2 + $0x24] sm:$0xff]   ;;  %v4939_v34 = vsel %vm1581_vm0, %v15297_v58, 0  ;;  %v15402_v41 = vld [vmem:[%s18802_s1 + $0x10] sm:$0x3]  ;;  %v13987_v58 = vld [vmem:[#allocation2 + $0x54] sm:$0xff]  }
 0x1ce   : > { %v3751_v32 = vsel %vm14852_vm1, %v11881_v6, %v3750_v60  ;;  %v4417_v60 = vld [vmem:[#allocation2 + $0x3c] sm:$0xf]  ;;  %v15436_v6 = vld [vmem:[#allocation2 + $0x2c] sm:$0x1] }
 0x1d0   : > { %12993 = vmatmul.mubr.msk.bf16.gmra.mrb[4].mxu0 %vm1532_vm12, %v11886_v7  ;;  %v18940_v7 = vld [vmem:[#allocation12_spill] sm:$0xff] }
 0x1d1   : > { %12996 = vmatprep.mubr.msk.bf16.mxu0 %vm1532_vm12, %v11887_v55  ;;  %v3725_v55 = vrot.slane %v18940_v7, 5  ;;  %v13992_v7 = vld [vmem:[#allocation2 + $0x90] sm:$0xff]  }
 0x1d3   : > { %v3726_v39 = vsel %vm14852_vm1, %v3724_v0, %v3725_v55  ;;  %v13991_v0 = vld [vmem:[#allocation2 + $0x84] sm:$0xff]  }
 0x1d4   : > { %v11894_v30 = vcombine.low %v3723_v37, %v3726_v39  ;;  %v15419_v37 = vld [vmem:[#allocation2 + $0x28] sm:$0xf]  ;;  %v4414_v39 = vld [vmem:[#allocation2 + $0x30] sm:$0xf] }
 0x1d5   : > { %v4505_v16 = vshrl.u32 %v4414_v39, 16  ;;  %v4508_v23 = vshll.u32 %v4414_v39, 16  ;;  %v15456_v39 = vld [vmem:[#allocation2 + $0x44] sm:$0x1] }
 0x1d8   : > { %12997 = vmatmul.mubr.msk.bf16.gmra.mrb[8].mxu0 %vm1532_vm12, %v11888_v50  ;;  %v11895_v50 = vcombine.low %v3730_v44, %v3733_v17  ;;  %v15422_v44 = vld [vmem:[#allocation2 + $0x34] sm:$0xf] }
 0x1d9   : > { %13000 = vmatprep.mubr.msk.bf16.mxu0 %vm1532_vm12, %v11889_v21  ;;  %v11879_v21 = vrot.slane %v3592_v62, 9  ;;  %v4514_v63 = vshll.u32 %v15422_v44, 16  ;;  %v4518_v4 = vshrl.u32 %v15422_v44, 16 }
 0x1db   : > { %v3737_v28 = vsel %vm14852_vm1, %v11879_v21, %v3736_v25  ;;  %v4484_v25 = vshll.u32 %v4411_v43, 16  ;;  %v4494_v21 = vshrl.u32 %v15419_v37, 16 }
 0x1dc   : > { %v11896_v57 = vcombine.low %v3737_v28, %v3740_v18  ;;  %v13994_v28 = vld [vmem:[#allocation2 + $0xa8] sm:$0xff]   ;;  %v4483_v18 = vrot.slane %v4481_v48, 4 }
 0x1e0   : > { %13001 = vmatmul.mubr.msk.bf16.gmra.mrb[12].mxu0 %vm1532_vm12, %v11890_v29  ;;  %v3754_v29 = vsel %vm14852_vm1, %v3752_v2, %v3753_v3  ;;  %v4496_v3 = vrot.slane %v4494_v21, 4  ;;  %v4423_v21 = vld [vmem:[#allocation2 + $0x54] sm:$0xf] }
 0x1e1   : > { %13004 = vmatprep.mubr.msk.bf16.mxu0 %vm1532_vm12, %v11891_v49  ;;  %v18943_v49 = vld [vmem:[#allocation8_spill] sm:$0xff]  ;;  %v11898_v36 = vcombine.low %v3751_v32, %v3754_v29  ;;  %v4510_v32 = vrot.slane %v4508_v23, 5  ;;  %v15441_v29 = vrot.slane %v4514_v63, 5 }
 0x1e2   : > { %v18944_v24 = vrot.slane %v18943_v49, 4  ;;  %v4520_v49 = vrot.slane %v4518_v4, 4 }
 0x1e4   : > { %v755_v47 = vsel %vm14192_vm8, %v18944_v24, %v754_v38  ;;  %v4507_v38 = vrot.slane %v4505_v16, 4  ;;  %v4529_v24 = vshrl.u32 %v4417_v60, 16 }
 0x1e5   : > { %756 = vst [vmem:[#allocation2 + $0xd4] sm:$0x1] %v755_v47  ;;  %v4532_v47 = vshll.u32 %v4417_v60, 16  ;;  %v15469_v60 = vld [vmem:[#allocation2 + $0x58] sm:$0xf] }
 0x1e8   : > { %13005 = vmatmul.mubr.msk.bf16.gmra.mrb[16].mxu0 %vm1532_vm12, %v11892_v45  ;;  %v13990_v45 = vld [vmem:[#allocation2 + $0x78] sm:$0xff]  }
 0x1e9   : > { %13008 = vmatprep.mubr.msk.bf16.mxu0 %vm1532_vm12, %v11893_v5  ;;  %v4408_v5 = vld [vmem:[#allocation2 + $0x18] sm:$0xf] }
 0x1ea   : > { %v4457_v55 = vshrl.u32 %v4408_v5, 16  ;;  %v4460_v8 = vshll.u32 %v4408_v5, 16  ;;  %v4531_v5 = vrot.slane %v4529_v24, 4 }
 0x1ec   : > { %v1043_v51 = vld [vmem:[#allocation2 + $0xd4] sm:$0x1]  ;;  %v4459_v17 = vrot.slane %v4457_v55, 4  ;;  %v4462_v62 = vrot.slane %v4460_v8, 5 }
 0x1ed   : > { %v1044_v20 = vsel %vm14221_vm9, %v11685_v13, %v1043_v51 }
 0x1ee   : > { %1045 = vst [vmem:[#allocation2 + $0xd4] sm:$0x1] %v1044_v20  ;;  %v4463_v54 = vor.u32 %v4462_v62, %v4459_v17  ;;  %v4420_v20 = vld [vmem:[#allocation2 + $0x48] sm:$0xf] }
 0x1ef   : > { %v4553_v11 = vshrl.u32 %v4420_v20, 16  ;;  %v4556_v40 = vshll.u32 %v4420_v20, 16 }
 0x1f0   : > { %13009 = vmatmul.mubr.msk.bf16.gmra.mrb[20].mxu0 %vm1532_vm12, %v11894_v30  ;;  %v15426_v30 = vld [vmem:[#allocation2 + $0x20] sm:$0x1]  ;;  %v4464_v13 = vrot.slane %v4463_v54, 4  ;;  %v15471_v54 = vld [vmem:[#allocation2 + $0x50] sm:$0x1] }
 0x1f1   : > { %13012 = vmatprep.mubr.msk.bf16.mxu0 %vm1532_vm12, %v11895_v50  ;;  %v4490_v50 = vshll.u32 %v15419_v37, 16  ;;  %v4476_v33 = vshll.u32 %v15426_v30, 16 }
 0x1f2   : > { %v4469_v17 = vsel %vm14294_vm13, %v4464_v13, %v15424_v10  ;;  %v4558_v10 = vrot.slane %v4556_v40, 5  ;;  %v4590_v13 = vshrl.u32 %v15469_v60, 16 }
 0x1f3   : > { %v15438_v2 = vrot.slane %v4490_v50, 5 }
 0x1f8   : > { %13013 = vmatmul.mubr.msk.bf16.gmra.mrb[24].mxu0 %vm1532_vm12, %v11896_v57  ;;  %v4486_v57 = vrot.slane %v4484_v25, 5 }
 0x1f9   : > { %13016 = vmatprep.mubr.msk.bf16.mxu0 %vm1532_vm12, %v11897_v9  ;;  %v15434_v9 = vld [vmem:[#allocation2 + $0x40] sm:$0xf] }
 0x1fa   : > { %v4542_v1 = vshrl.u32 %v15434_v9, 16  ;;  %v4487_v51 = vor.u32 %v4486_v57, %v4483_v18  ;;  %v4555_v18 = vrot.slane %v4553_v11, 4  ;;  %v4577_v57 = vshrl.u32 %v4423_v21, 16 }
 0x1fb   : > { %v5409_v11 = vsel %vm1581_vm0, %v15402_v41, 0 }
 0x1fc   : > { %v4544_v8 = vrot.slane %v4542_v1, 4  ;;  %v4488_v43 = vrot.slane %v4487_v51, 4  ;;  %v4586_v1 = vshll.u32 %v15469_v60, 16  ;;  %v4426_v51 = vld [vmem:[#allocation2 + $0x60] sm:$0xf] }
 0x1fe   : > { %v15504_v40 = vrot.slane %v4586_v1, 5 }
 0x200   : > { %13017 = vmatmul.mubr.msk.bf16.gmra.mrb[28].mxu0 %vm1532_vm12, %v11898_v36  ;;  %v15444_v36 = vld [vmem:[#allocation2 + $0x38] sm:$0x1] }
 0x201   : > { %13022 = vmatprep.mubr.msk.bf16.mxu0 %vm1532_vm12, %v13982_v12  ;;  %v4538_v12 = vshll.u32 %v15434_v9, 16 }
 0x203   : > { %v15454_v55 = vrot.slane %v4538_v12, 5 }
 0x205   : > { %v4545_v4 = vor.u32 %v4544_v8, %v15454_v55 }
 0x208   : > { %13023 = vmatmul.mubr.msk.bf16.vlgmr.msra.gmra.mrb[0].mxu0 %vm1532_vm12, %v13983_v42  ;;  %v4500_v42 = vshll.u32 %v15436_v6, 16 }
 0x209   : > { %13055 = vmatpush3.bf16.msra.mxu0 %v4939_v34  ;;  %13026 = vmatprep.mubr.msk.bf16.mxu0 %vm1532_vm12, %v13984_v56  ;;  %v4474_v56 = vrot.slane %v4473_v61, 4  ;;  %v4478_v34 = vrot.slane %v4476_v33, 5 }
 0x20a   : > { %13948 = vmatprep.subr.msk.bf16.mxu0 %vm1581_vm0, %v15402_v41  ;;  %v4502_v50 = vrot.slane %v4500_v42, 5  ;;  %v15487_v42 = vld [vmem:[#allocation2 + $0x64] sm:$0xf] }
 0x20b   : > { %v4479_v62 = vsel %vm14294_vm13, %v4474_v56, %v4478_v34  ;;  %v4559_v56 = vor.u32 %v4558_v10, %v4555_v18  ;;  %v4572_v34 = vshll.u32 %v15471_v54, 16  ;;  %v15522_v10 = vld [vmem:[#allocation2 + $0x7c] sm:$0xf] }
 0x210   : > { %13027 = vmatmul.mubr.msk.bf16.gmra.mrb[4].mxu0 %vm1532_vm12, %v13985_v53  ;;  %v4497_v53 = vor.u32 %v4496_v3, %v15438_v2  ;;  %v4580_v3 = vshll.u32 %v4423_v21, 16 }
 0x211   : > { %13030 = vmatprep.mubr.msk.bf16.mxu0 %vm1532_vm12, %v13986_v52  ;;  %v4511_v52 = vor.u32 %v4510_v32, %v4507_v38  ;;  %v13997_v38 = vld [vmem:[#allocation2 + $0xcc] sm:$0xff]   ;;  %v11949_v32 = vcombine.low %v4469_v17, %v4479_v62  ;;  %v4560_v17 = vrot.slane %v4559_v56, 4  ;;  %v4574_v62 = vrot.slane %v4572_v34, 5 }
 0x212   : > { %v4498_v35 = vrot.slane %v4497_v53, 4  ;;  %v15494_v53 = vrot.slane %v4545_v4, 4 }
 0x213   : > { %v4512_v16 = vrot.slane %v4511_v52, 4  ;;  %v4579_v52 = vrot.slane %v4577_v57, 4 }
 0x214   : > { %v4503_v24 = vsel %vm14294_vm13, %v4498_v35, %v4502_v50  ;;  %v15511_v35 = vld [vmem:[#allocation2 + $0x68] sm:$0x1]  ;;  %v4429_v50 = vld [vmem:[#allocation2 + $0x6c] sm:$0xf] }
 0x215   : > { %v4620_v57 = vshll.u32 %v15511_v35, 16 }
 0x218   : > { %13031 = vmatmul.mubr.msk.bf16.gmra.mrb[8].mxu0 %vm1532_vm12, %v13987_v58  ;;  %v15450_v58 = vld [vmem:[#allocation2 + $0x4c] sm:$0xf] }
 0x219   : > { %13034 = vmatprep.mubr.msk.bf16.mxu0 %vm1532_vm12, %v13988_v22  ;;  %v13995_v22 = vld [vmem:[#allocation2 + $0xb4] sm:$0xff]   ;;  %v4562_v48 = vshll.u32 %v15450_v58, 16  ;;  %v4566_v25 = vshrl.u32 %v15450_v58, 16 }
 0x21b   : > { %v15473_v61 = vrot.slane %v4562_v48, 5  ;;  %v4568_v33 = vrot.slane %v4566_v25, 4 }
 0x220   : > { %13035 = vmatmul.mubr.msk.bf16.gmra.mrb[12].mxu0 %vm1532_vm12, %v13989_v19  ;;  %v4521_v19 = vor.u32 %v4520_v49, %v15441_v29  ;;  %v4493_v49 = vsel %vm14294_vm13, %v4488_v43, %v15438_v2  ;;  %v4592_v43 = vrot.slane %v4590_v13, 4  ;;  %v4658_v13 = vshll.u32 %v15522_v10, 16 }
 0x221   : > { %13038 = vmatprep.mubr.msk.bf16.mxu0 %vm1532_vm12, %v13990_v45  ;;  %v4524_v45 = vshll.u32 %v15444_v36, 16  ;;  %v11950_v8 = vcombine.low %v4493_v49, %v4503_v24 }
 0x222   : > { %v4522_v23 = vrot.slane %v4521_v19, 4  ;;  %v15497_v19 = vld [vmem:[#allocation2 + $0x5c] sm:$0x1] }
 0x228   : > { %13039 = vmatmul.mubr.msk.bf16.gmra.mrb[16].mxu0 %vm1532_vm12, %v13991_v0  ;;  %v4534_v0 = vrot.slane %v4532_v47, 5  ;;  %v4517_v47 = vsel %vm14294_vm13, %v4512_v16, %v15441_v29  ;;  %v4569_v29 = vor.u32 %v4568_v33, %v15473_v61  ;;  %v4593_v33 = vor.u32 %v4592_v43, %v15504_v40 }
 0x229   : > { %13042 = vmatprep.mubr.msk.bf16.mxu0 %vm1532_vm12, %v13992_v7  ;;  %v13996_v7 = vld [vmem:[#allocation2 + $0xc0] sm:$0xff]  }
 0x22a   : > { %v4535_v63 = vor.u32 %v4534_v0, %v4531_v5  ;;  %v4604_v5 = vshll.u32 %v4426_v51, 16  ;;  %v4610_v0 = vshll.u32 %v15487_v42, 16  ;;  %v4570_v21 = vrot.slane %v4569_v29, 4 }
 0x22b   : > { %v4594_v29 = vrot.slane %v4593_v33, 4 }
 0x22c   : > { %v15489_v20 = vrot.slane %v4535_v63, 4  ;;  %v4432_v63 = vld [vmem:[#allocation2 + $0x78] sm:$0xf] }
 0x22d   : > { %v4649_v24 = vshrl.u32 %v4432_v63, 16 }
 0x22e   : > { %v4541_v25 = vsel %vm14294_vm13, %v15489_v20, %v15454_v55  ;;  %v15520_v55 = vrot.slane %v4610_v0, 5  ;;  %v4575_v20 = vsel %vm14294_vm13, %v4570_v21, %v4574_v62  ;;  %v15546_v62 = vrot.slane %v4658_v13, 5  ;;  %v15569_v13 = vld [vmem:[#allocation2 + $0x8c] sm:$0x1] }
 0x230   : > { %13043 = vmatmul.mubr.msk.bf16.gmra.mrb[20].mxu0 %vm1532_vm12, %v13993_v27  ;;  %v4526_v27 = vrot.slane %v4524_v45, 5  ;;  %v4601_v45 = vshrl.u32 %v4426_v51, 16  ;;  %v4662_v51 = vshrl.u32 %v15522_v10, 16 }
 0x231   : > { %13046 = vmatprep.mubr.msk.bf16.mxu0 %vm1532_vm12, %v13994_v28  ;;  %v4548_v28 = vshll.u32 %v15456_v39, 16 }
 0x232   : > { %v4527_v12 = vsel %vm14294_vm13, %v4522_v23, %v4526_v27  ;;  %v4596_v23 = vshll.u32 %v15497_v19, 16  ;;  %v15518_v27 = vld [vmem:[#allocation2 + $0x70] sm:$0xf]  ;;  %v4603_v4 = vrot.slane %v4601_v45, 4  ;;  %v15539_v45 = vld [vmem:[#allocation2 + $0x88] sm:$0xf] }
 0x233   : > { %v15491_v2 = vrot.slane %v4548_v28, 5  ;;  %v11951_v48 = vcombine.low %v4517_v47, %v4527_v12  ;;  %v4606_v28 = vrot.slane %v4604_v5, 5  ;;  %v4638_v49 = vshrl.u32 %v15518_v27, 16 }
 0x234   : > { %v4652_v47 = vshll.u32 %v4432_v63, 16  ;;  %v4565_v12 = vsel %vm14294_vm13, %v4560_v17, %v15473_v61  ;;  %v15544_v17 = vld [vmem:[#allocation2 + $0x74] sm:$0x1]  ;;  %v15548_v63 = vld [vmem:[#allocation2 + $0x80] sm:$0x1] }
 0x235   : > { %v4551_v41 = vsel %vm14294_vm13, %v15494_v53, %v15491_v2  ;;  %v4598_v2 = vrot.slane %v4596_v23, 5  ;;  %v4607_v56 = vor.u32 %v4606_v28, %v4603_v4  ;;  %v4435_v53 = vld [vmem:[#allocation2 + $0x84] sm:$0xf]  ;;  %v4640_v0 = vrot.slane %v4638_v49, 4  ;;  %v4438_v49 = vld [vmem:[#allocation2 + $0x90] sm:$0xf] }
 0x236   : > { %v4654_v43 = vrot.slane %v4652_v47, 5  ;;  %v4676_v21 = vshll.u32 %v4435_v53, 16  ;;  %v11952_v4 = vcombine.low %v4541_v25, %v4551_v41  ;;  %v11953_v28 = vcombine.low %v4565_v12, %v4575_v20 }
 0x237   : > { %v4599_v33 = vsel %vm14294_vm13, %v4594_v29, %v4598_v2  ;;  %v4668_v41 = vshll.u32 %v15548_v63, 16  ;;  %v4697_v2 = vshrl.u32 %v4438_v49, 16 }
 0x238   : > { %13047 = vmatmul.mubr.msk.bf16.gmra.mrb[24].mxu0 %vm1532_vm12, %v13995_v22  ;;  %v4582_v22 = vrot.slane %v4580_v3, 5  ;;  %v4625_v3 = vshrl.u32 %v4429_v50, 16  ;;  %v4678_v12 = vrot.slane %v4676_v21, 5 }
 0x239   : > { %13050 = vmatprep.mubr.msk.bf16.mxu0 %vm1532_vm12, %v13996_v7  ;;  %v4614_v7 = vshrl.u32 %v15487_v42, 16 }
 0x23a   : > { %v4583_v16 = vor.u32 %v4582_v22, %v4579_v52  ;;  %v4622_v52 = vrot.slane %v4620_v57, 5  ;;  %v4627_v22 = vrot.slane %v4625_v3, 4 }
 0x23b   : > { %v4616_v18 = vrot.slane %v4614_v7, 4  ;;  %v4651_v7 = vrot.slane %v4649_v24, 4  ;;  %v15560_v24 = vld [vmem:[#allocation2 + $0x94] sm:$0xf] }
 0x23c   : > { %v15531_v1 = vrot.slane %v4583_v16, 4  ;;  %v4608_v16 = vrot.slane %v4607_v56, 4  ;;  %v4700_v56 = vshll.u32 %v4438_v49, 16  ;;  %v15590_v49 = vld [vmem:[#allocation2 + $0xac] sm:$0xf] }
 0x23d   : > { %v4617_v34 = vor.u32 %v4616_v18, %v15520_v55 }
 0x23e   : > { %v4589_v18 = vsel %vm14294_vm13, %v15531_v1, %v15504_v40  ;;  %v4613_v40 = vsel %vm14294_vm13, %v4608_v16, %v15520_v55 }
 0x23f   : > { %v4618_v23 = vrot.slane %v4617_v34, 4  ;;  %v4706_v34 = vshll.u32 %v15560_v24, 16 }
 0x240   : > { %13051 = vmatmul.mubr.msk.bf16.gmra.mrb[28].mxu0 %vm1532_vm12, %v13997_v38  ;;  %v4628_v38 = vshll.u32 %v4429_v50, 16  ;;  %v4664_v50 = vrot.slane %v4662_v51, 4 }
 0x241   : > { %13056 = vmatprep.mubr.msk.bf16.mxu0 %vm1532_vm12, %v11949_v32  ;;  %v4634_v32 = vshll.u32 %v15518_v27, 16  ;;  %v4623_v1 = vsel %vm14294_vm13, %v4618_v23, %v4622_v52  ;;  %v15579_v23 = vld [vmem:[#allocation2 + $0xa0] sm:$0xf] }
 0x242   : > { %v4630_v61 = vrot.slane %v4628_v38, 5  ;;  %v4644_v38 = vshll.u32 %v15544_v17, 16  ;;  %v4665_v25 = vor.u32 %v4664_v50, %v15546_v62  ;;  %v4441_v50 = vld [vmem:[#allocation2 + $0x9c] sm:$0xf]  ;;  %v11955_v21 = vcombine.low %v4613_v40, %v4623_v1 }
 0x243   : > { %v15542_v5 = vrot.slane %v4634_v32, 5  ;;  %v4655_v32 = vor.u32 %v4654_v43, %v4651_v7  ;;  %v4692_v43 = vshll.u32 %v15569_v13, 16  ;;  %v4730_v1 = vshll.u32 %v15579_v23, 16 }
 0x244   : > { %v4631_v57 = vor.u32 %v4630_v61, %v4627_v22  ;;  %v4646_v22 = vrot.slane %v4644_v38, 5  ;;  %v4666_v52 = vrot.slane %v4665_v25, 4 }
 0x245   : > { %v4641_v3 = vor.u32 %v4640_v0, %v15542_v5  ;;  %v4656_v61 = vrot.slane %v4655_v32, 4  ;;  %v4670_v0 = vrot.slane %v4668_v41, 5  ;;  %v4444_v32 = vld [vmem:[#allocation2 + $0xa8] sm:$0xf] }
 0x246   : > { %v4632_v29 = vrot.slane %v4631_v57, 4 }
 0x247   : > { %v4642_v55 = vrot.slane %v4641_v3, 4  ;;  %v4661_v25 = vsel %vm14294_vm13, %v4656_v61, %v15546_v62  ;;  %v4671_v41 = vsel %vm14294_vm13, %v4666_v52, %v4670_v0  ;;  %v4758_v62 = vshrl.u32 %v15590_v49, 16 }
 0x248   : > { %13057 = vmatmul.mubr.msk.bf16.vlgmr.msra.gmra.mrb[0].mxu0 %vm1532_vm12, %v11950_v8  ;;  %v4673_v8 = vshrl.u32 %v4435_v53, 16  ;;  %v4710_v53 = vshrl.u32 %v15560_v24, 16  ;;  %v4637_v3 = vsel %vm14294_vm13, %v4632_v29, %v15542_v5  ;;  %v11957_v52 = vcombine.low %v4661_v25, %v4671_v41  ;;  %v15619_v25 = vld [vmem:[#allocation2 + $0xb8] sm:$0xf] }
 0x249   : > { %13089 = vmatpush3.bf16.msra.mxu0 %v5409_v11  ;;  %13060 = vmatprep.mubr.msk.bf16.mxu0 %vm1532_vm12, %v11951_v48  ;;  %v4682_v11 = vshll.u32 %v15539_v45, 16  ;;  %v4686_v48 = vshrl.u32 %v15539_v45, 16  ;;  %v4647_v38 = vsel %vm14294_vm13, %v4642_v55, %v4646_v22  ;;  %18946 = vst [vmem:[#allocation10_spill] sm:$0xff] %v15619_v25 }
 0x24a   : > { %v4675_v47 = vrot.slane %v4673_v8, 4  ;;  %v11954_v8 = vcombine.low %v4589_v18, %v4599_v33  ;;  %v4712_v57 = vrot.slane %v4710_v53, 4  ;;  %v4721_v18 = vshrl.u32 %v4441_v50, 16 }
 0x24b   : > { %v15571_v51 = vrot.slane %v4682_v11, 5  ;;  %v4688_v20 = vrot.slane %v4686_v48, 4  ;;  %v15581_v11 = vld [vmem:[#allocation2 + $0x98] sm:$0x1]  ;;  %v4699_v48 = vrot.slane %v4697_v2, 4  ;;  %v4724_v33 = vshll.u32 %v4441_v50, 16 }
 0x24c   : > { %v4679_v7 = vor.u32 %v4678_v12, %v4675_v47  ;;  %v4694_v12 = vrot.slane %v4692_v43, 5  ;;  %v4716_v5 = vshll.u32 %v15581_v11, 16  ;;  %v4745_v2 = vshrl.u32 %v4444_v32, 16 }
 0x24d   : > { %v4689_v16 = vor.u32 %v4688_v20, %v15571_v51  ;;  %v4734_v20 = vshrl.u32 %v15579_v23, 16  ;;  %v4723_v55 = vrot.slane %v4721_v18, 4  ;;  %v4726_v22 = vrot.slane %v4724_v33, 5 }
 0x24e   : > { %v4680_v47 = vrot.slane %v4679_v7, 4  ;;  %v11956_v61 = vcombine.low %v4637_v3, %v4647_v38  ;;  %v15608_v7 = vld [vmem:[#allocation2 + $0xa4] sm:$0x1]  ;;  %v4718_v50 = vrot.slane %v4716_v5, 5  ;;  %v4760_v3 = vrot.slane %v4758_v62, 4 }
 0x24f   : > { %v4690_v40 = vrot.slane %v4689_v16, 4  ;;  %v15614_v16 = vld [vmem:[#allocation2 + $0xb0] sm:$0x1]  ;;  %v4447_v38 = vld [vmem:[#allocation2 + $0xb4] sm:$0xf]  ;;  %v4782_v62 = vshrl.u32 %v15619_v25, 16 }
 0x250   : > { %13061 = vmatmul.mubr.msk.bf16.gmra.mrb[4].mxu0 %vm1532_vm12, %v11952_v4  ;;  %v4702_v4 = vrot.slane %v4700_v56, 5  ;;  %v4748_v56 = vshll.u32 %v4444_v32, 16  ;;  %v4685_v0 = vsel %vm14294_vm13, %v4680_v47, %v15571_v51  ;;  %v4727_v51 = vor.u32 %v4726_v22, %v4723_v55 }
 0x251   : > { %13064 = vmatprep.mubr.msk.bf16.mxu0 %vm1532_vm12, %v11953_v28  ;;  %v15583_v28 = vrot.slane %v4706_v34, 5  ;;  %v4754_v34 = vshll.u32 %v15590_v49, 16  ;;  %v4695_v43 = vsel %vm14294_vm13, %v4690_v40, %v4694_v12  ;;  %v4740_v32 = vshll.u32 %v15608_v7, 16 }
 0x252   : > { %v4703_v53 = vor.u32 %v4702_v4, %v4699_v48  ;;  %v4747_v48 = vrot.slane %v4745_v2, 4  ;;  %v4750_v4 = vrot.slane %v4748_v56, 5  ;;  %v4764_v41 = vshll.u32 %v15614_v16, 16 }
 0x253   : > { %v4713_v29 = vor.u32 %v4712_v57, %v15583_v28  ;;  %v15616_v57 = vrot.slane %v4754_v34, 5  ;;  %v11958_v47 = vcombine.low %v4685_v0, %v4695_v43  ;;  %v4769_v40 = vshrl.u32 %v4447_v38, 16 }
 0x254   : > { %v4704_v18 = vrot.slane %v4703_v53, 4  ;;  %v4772_v5 = vshll.u32 %v4447_v38, 16  ;;  %v4751_v2 = vor.u32 %v4750_v4, %v4747_v48  ;;  %v4778_v34 = vshll.u32 %v15619_v25, 16  ;;  %v15639_v25 = vld [vmem:[#allocation2 + $0xd0] sm:$0xf] }
 0x255   : > { %v4714_v33 = vrot.slane %v4713_v29, 4  ;;  %v4761_v56 = vor.u32 %v4760_v3, %v15616_v57  ;;  %v4728_v55 = vrot.slane %v4727_v51, 4  ;;  %v4742_v22 = vrot.slane %v4740_v32, 5 }
 0x256   : > { %v4709_v53 = vsel %vm14294_vm13, %v4704_v18, %v15583_v28  ;;  %v4766_v4 = vrot.slane %v4764_v41, 5  ;;  %v4771_v3 = vrot.slane %v4769_v40, 4  ;;  %v4774_v38 = vrot.slane %v4772_v5, 5  ;;  %v15637_v18 = vld [vmem:[#allocation2 + $0xbc] sm:$0x1] }
 0x257   : > { %v4719_v29 = vsel %vm14294_vm13, %v4714_v33, %v4718_v50  ;;  %v4762_v26 = vrot.slane %v4761_v56, 4  ;;  %v4780_v14 = vrot.slane %v4778_v34, 5  ;;  %v4784_v31 = vrot.slane %v4782_v62, 4  ;;  %v4453_v50 = vld [vmem:[#allocation2 + $0xcc] sm:$0xf] }
 0x258   : > { %13065 = vmatmul.mubr.msk.bf16.gmra.mrb[8].mxu0 %vm1532_vm12, %v11954_v8  ;;  %v15612_v8 = vrot.slane %v4730_v1, 5  ;;  %v4450_v1 = vld [vmem:[#allocation2 + $0xc0] sm:$0xf]  ;;  %v11959_v28 = vcombine.low %v4709_v53, %v4719_v29  ;;  %v4775_v40 = vor.u32 %v4774_v38, %v4771_v3  ;;  %v15646_v5 = vld [vmem:[#allocation2 + $0xc8] sm:$0x1]  ;;  %v4788_v62 = vshll.u32 %v15637_v18, 16 }
 0x259   : > { %13068 = vmatprep.mubr.msk.bf16.mxu0 %vm1532_vm12, %v11955_v21  ;;  %v4736_v21 = vrot.slane %v4734_v20, 4  ;;  %v15623_v20 = vld [vmem:[#allocation2 + $0xc4] sm:$0xf]  ;;  %v4793_v0 = vshrl.u32 %v4450_v1, 16  ;;  %v4767_v56 = vsel %vm14294_vm13, %v4762_v26, %v4766_v4  ;;  %v4785_v34 = vor.u32 %v4784_v31, %v4780_v14 }
 0x25a   : > { %v4802_v43 = vshll.u32 %v15623_v20, 16  ;;  %v4733_v41 = vsel %vm14294_vm13, %v4728_v55, %v15612_v8  ;;  %v4820_v53 = vshll.u32 %v4453_v50, 16  ;;  %v4826_v29 = vshll.u32 %v15639_v25, 16 }
 0x25b   : > { %v4737_v12 = vor.u32 %v4736_v21, %v15612_v8  ;;  %v4806_v21 = vshrl.u32 %v15623_v20, 16  ;;  %v4795_v33 = vrot.slane %v4793_v0, 4  ;;  %v4817_v8 = vshrl.u32 %v4453_v50, 16  ;;  %v15659_v50 = vld [vmem:[#allocation2 + $0xd4] sm:$0x1] }
 0x25c   : > { %v4804_v32 = vrot.slane %v4802_v43, 5  ;;  %v4830_v55 = vshrl.u32 %v15639_v25, 16  ;;  %v4812_v0 = vshll.u32 %v15646_v5, 16  ;;  %v4776_v43 = vrot.slane %v4775_v40, 4 }
 0x25d   : > { %v4738_v48 = vrot.slane %v4737_v12, 4  ;;  %v4790_v26 = vrot.slane %v4788_v62, 5  ;;  %v4819_v31 = vrot.slane %v4817_v8, 4  ;;  %v4828_v4 = vrot.slane %v4826_v29, 5 }
 0x25e   : > { %v4832_v3 = vrot.slane %v4830_v55, 4 }
 0x25f   : > { %v4743_v12 = vsel %vm14294_vm13, %v4738_v48, %v4742_v22  ;;  %v4822_v48 = vrot.slane %v4820_v53, 5 }
 0x260   : > { %13069 = vmatmul.mubr.msk.bf16.gmra.mrb[12].mxu0 %vm1532_vm12, %v11956_v61  ;;  %v4796_v61 = vshll.u32 %v4450_v1, 16  ;;  %v4808_v1 = vrot.slane %v4806_v21, 4  ;;  %v4786_v21 = vrot.slane %v4785_v34, 4  ;;  %v5134_v34 = vld [vmem:[#allocation2 + $0x18] sm:$0xe] }
 0x261   : > { %13072 = vmatprep.mubr.msk.bf16.mxu0 %vm1532_vm12, %v11957_v52  ;;  %v4752_v52 = vrot.slane %v4751_v2, 4  ;;  %v11981_v55 = vrot.slane %v5134_v34, 9  ;;  %v5224_v34 = vrot.slane %v15456_v39, 5 }
 0x262   : > { %v4798_v51 = vrot.slane %v4796_v61, 5  ;;  %v11960_v61 = vcombine.low %v4733_v41, %v4743_v12  ;;  %v4833_v41 = vor.u32 %v4832_v3, %v4828_v4  ;;  %v4836_v12 = vshll.u32 %v15659_v50, 16 }
 0x263   : > { %v4757_v2 = vsel %vm14294_vm13, %v4752_v52, %v15616_v57 }
 0x264   : > { %v4799_v22 = vor.u32 %v4798_v51, %v4795_v33  ;;  %v11961_v57 = vcombine.low %v4757_v2, %v4767_v56  ;;  %v4781_v33 = vsel %vm14294_vm13, %v4776_v43, %v4780_v14  ;;  %v4791_v51 = vsel %vm14294_vm13, %v4786_v21, %v4790_v26  ;;  %v5135_v43 = vld [vmem:[#allocation2 + $0x24] sm:$0xe]  ;;  %v5136_v21 = vld [vmem:[#allocation2 + $0x30] sm:$0xe] }
 0x265   : > { %v5200_v56 = vrot.slane %v15414_v59, 5  ;;  %v11962_v62 = vcombine.low %v4781_v33, %v4791_v51  ;;  %v4834_v53 = vrot.slane %v4833_v41, 4  ;;  %v4838_v29 = vrot.slane %v4836_v12, 5  ;;  %v5138_v41 = vld [vmem:[#allocation2 + $0x48] sm:$0xe] }
 0x266   : > { %v4800_v38 = vrot.slane %v4799_v22, 4  ;;  %v5221_v33 = vrot.slane %v15434_v9, 5  ;;  %v5231_v9 = vrot.slane %v15471_v54, 5  ;;  %v5242_v54 = vrot.slane %v15487_v42, 5 }
 0x267   : > { %v5202_v22 = vrot.slane %v5200_v56, 4  ;;  %v4839_v59 = vsel %vm14294_vm13, %v4834_v53, %v4838_v29  ;;  %v5235_v53 = vrot.slane %v15469_v60, 5  ;;  %v5245_v60 = vrot.slane %v15511_v35, 5 }
 0x268   : > { %13073 = vmatmul.mubr.msk.bf16.gmra.mrb[16].mxu0 %vm1532_vm12, %v11958_v47  ;;  %v4809_v47 = vor.u32 %v4808_v1, %v4804_v32  ;;  %v4823_v1 = vor.u32 %v4822_v48, %v4819_v31  ;;  %v4805_v40 = vsel %vm14294_vm13, %v4800_v38, %v4804_v32  ;;  %v11982_v48 = vrot.slane %v5135_v43, 9 }
 0x269   : > { %13076 = vmatprep.mubr.msk.bf16.mxu0 %vm1532_vm12, %v11959_v28  ;;  %v4814_v28 = vrot.slane %v4812_v0, 5  ;;  %v5207_v0 = vrot.slane %v15419_v37, 5  ;;  %v11983_v38 = vrot.slane %v5136_v21, 9  ;;  %v5217_v37 = vrot.slane %v15444_v36, 5 }
 0x26a   : > { %v4810_v52 = vrot.slane %v4809_v47, 4  ;;  %v4824_v8 = vrot.slane %v4823_v1, 4  ;;  %v5203_v47 = vrot.slane %v15426_v30, 5  ;;  %v5214_v30 = vrot.slane %v15422_v44, 5  ;;  %v5137_v1 = vld [vmem:[#allocation2 + $0x3c] sm:$0xe] }
 0x26b   : > { %v5209_v3 = vrot.slane %v5207_v0, 4  ;;  %v5228_v36 = vrot.slane %v15450_v58, 5  ;;  %v5244_v43 = vrot.slane %v5242_v54, 4  ;;  %v5249_v21 = vrot.slane %v15518_v27, 5 }
 0x26c   : > { %v4815_v2 = vsel %vm14294_vm13, %v4810_v52, %v4814_v28  ;;  %v4829_v32 = vsel %vm14294_vm13, %v4824_v8, %v4828_v4  ;;  %v5210_v4 = vrot.slane %v15436_v6, 5  ;;  %v5216_v52 = vrot.slane %v5214_v30, 4 }
 0x26d   : > { %v11963_v14 = vcombine.low %v4805_v40, %v4815_v2  ;;  %v11964_v26 = vcombine.low %v4829_v32, %v4839_v59  ;;  %v5208_v28 = vsel %vm14852_vm1, %v11982_v48, %v5207_v0  ;;  %v5215_v51 = vsel %vm14852_vm1, %v11983_v38, %v5214_v30  ;;  %v5142_v48 = vld [vmem:[#allocation2 + $0x78] sm:$0xe] }
 0x26e   : > { %v5211_v44 = vsel %vm14852_vm1, %v5209_v3, %v5210_v4  ;;  %v5218_v6 = vsel %vm14852_vm1, %v5216_v52, %v5217_v37  ;;  %v11984_v2 = vrot.slane %v5137_v1, 9  ;;  %v5237_v0 = vrot.slane %v5235_v53, 4  ;;  %v5143_v1 = vld [vmem:[#allocation2 + $0x84] sm:$0xe] }
 0x26f   : > { %v11999_v12 = vcombine.low %v5208_v28, %v5211_v44  ;;  %v12000_v40 = vcombine.low %v5215_v51, %v5218_v6  ;;  %v5256_v35 = vrot.slane %v15522_v10, 5  ;;  %v5251_v52 = vrot.slane %v5249_v21, 4 }
 0x270   : > { %13077 = vmatmul.mubr.msk.bf16.gmra.mrb[20].mxu0 %vm1532_vm12, %v11960_v61  ;;  %v5201_v61 = vsel %vm14852_vm1, %v11981_v55, %v5200_v56  ;;  %v5223_v56 = vrot.slane %v5221_v33, 4  ;;  %v5222_v8 = vsel %vm14852_vm1, %v11984_v2, %v5221_v33  ;;  %v5139_v55 = vld [vmem:[#allocation2 + $0x54] sm:$0xe]  ;;  %v5252_v37 = vrot.slane %v15544_v17, 5 }
 0x271   : > { %13080 = vmatprep.mubr.msk.bf16.mxu0 %vm1532_vm12, %v11961_v57  ;;  %v5204_v57 = vsel %vm14852_vm1, %v5202_v22, %v5203_v47  ;;  %v5140_v22 = vld [vmem:[#allocation2 + $0x60] sm:$0xe]  ;;  %v11986_v59 = vrot.slane %v5139_v55, 9  ;;  %v11989_v28 = vrot.slane %v5142_v48, 9  ;;  %v5258_v44 = vrot.slane %v5256_v35, 4 }
 0x272   : > { %v11998_v31 = vcombine.low %v5201_v61, %v5204_v57  ;;  %v5225_v58 = vsel %vm14852_vm1, %v5223_v56, %v5224_v34  ;;  %v5238_v61 = vrot.slane %v15497_v19, 5  ;;  %v11987_v57 = vrot.slane %v5140_v22, 9 }
 0x273   : > { %v12001_v47 = vcombine.low %v5222_v8, %v5225_v58  ;;  %v5236_v30 = vsel %vm14852_vm1, %v11986_v59, %v5235_v53  ;;  %v5246_v19 = vsel %vm14852_vm1, %v5244_v43, %v5245_v60  ;;  %v5259_v27 = vrot.slane %v15548_v63, 5  ;;  %v5145_v58 = vld [vmem:[#allocation2 + $0x9c] sm:$0xe]  ;;  %v5146_v53 = vld [vmem:[#allocation2 + $0xa8] sm:$0xe] }
 0x274   : > { %v5239_v42 = vsel %vm14852_vm1, %v5237_v0, %v5238_v61  ;;  %v5253_v10 = vsel %vm14852_vm1, %v5251_v52, %v5252_v37  ;;  %v5263_v51 = vrot.slane %v15539_v45, 5  ;;  %v5257_v6 = vsel %vm14852_vm1, %v11989_v28, %v5256_v35  ;;  %v18947_v0 = vld [vmem:[#allocation10_spill] sm:$0xff]  ;;  %v5148_v60 = vld [vmem:[#allocation2 + $0xc0] sm:$0xe]  ;;  %v5149_v52 = vld [vmem:[#allocation2 + $0xcc] sm:$0xe] }
 0x275   : > { %v12003_v3 = vcombine.low %v5236_v30, %v5239_v42  ;;  %v5260_v17 = vsel %vm14852_vm1, %v5258_v44, %v5259_v27  ;;  %v5270_v63 = vrot.slane %v15560_v24, 5  ;;  %v5266_v56 = vrot.slane %v15569_v13, 5  ;;  %v5147_v43 = vld [vmem:[#allocation2 + $0xb4] sm:$0xe] }
 0x276   : > { %v5265_v2 = vrot.slane %v5263_v51, 4  ;;  %v5273_v45 = vrot.slane %v15581_v11, 5  ;;  %v5284_v11 = vrot.slane %v15590_v49, 5  ;;  %v11992_v55 = vrot.slane %v5145_v58, 9 }
 0x277   : > { %v5280_v22 = vrot.slane %v15608_v7, 5  ;;  %v5291_v61 = vrot.slane %v18947_v0, 5  ;;  %v5301_v48 = vrot.slane %v15646_v5, 5  ;;  %v11996_v28 = vrot.slane %v5149_v52, 9 }
 0x278   : > { %13081 = vmatmul.mubr.msk.bf16.gmra.mrb[24].mxu0 %vm1532_vm12, %v11962_v62  ;;  %v11985_v62 = vrot.slane %v5138_v41, 9  ;;  %v5267_v24 = vsel %vm14852_vm1, %v5265_v2, %v5266_v56  ;;  %v5308_v27 = vrot.slane %v15659_v50, 5 }
 0x279   : > { %13084 = vmatprep.mubr.msk.bf16.mxu0 %vm1532_vm12, %v11963_v14  ;;  %v5230_v14 = vrot.slane %v5228_v36, 4 }
 0x27a   : > { %v5229_v29 = vsel %vm14852_vm1, %v11985_v62, %v5228_v36  ;;  %v5144_v36 = vld [vmem:[#allocation2 + $0x90] sm:$0xe]  ;;  %v5272_v62 = vrot.slane %v5270_v63, 4 }
 0x27b   : > { %v5232_v39 = vsel %vm14852_vm1, %v5230_v14, %v5231_v9  ;;  %v11991_v34 = vrot.slane %v5144_v36, 9  ;;  %v5277_v9 = vrot.slane %v15579_v23, 5  ;;  %v5287_v23 = vrot.slane %v15614_v16, 5 }
 0x27c   : > { %v12002_v32 = vcombine.low %v5229_v29, %v5232_v39  ;;  %v5274_v13 = vsel %vm14852_vm1, %v5272_v62, %v5273_v45  ;;  %v5298_v16 = vrot.slane %v15623_v20, 5 }
 0x27d   : > { %v5271_v8 = vsel %vm14852_vm1, %v11991_v34, %v5270_v63  ;;  %v5278_v59 = vsel %vm14852_vm1, %v11992_v55, %v5277_v9 }
 0x27e   : > { %v12008_v39 = vcombine.low %v5271_v8, %v5274_v13  ;;  %v5300_v35 = vrot.slane %v5298_v16, 4 }
 0x280   : > { %13085 = vmatmul.mubr.msk.bf16.gmra.mrb[28].mxu0 %vm1532_vm12, %v11964_v26  ;;  %v5243_v26 = vsel %vm14852_vm1, %v11987_v57, %v5242_v54  ;;  %v5279_v54 = vrot.slane %v5277_v9, 4 }
 0x281   : > { %13090 = vmatprep.mubr.msk.bf16.mxu0 %vm1532_vm12, %v11998_v31  ;;  %v5141_v31 = vld [vmem:[#allocation2 + $0x6c] sm:$0xe]  ;;  %v12004_v4 = vcombine.low %v5243_v26, %v5246_v19  ;;  %v5293_v26 = vrot.slane %v5291_v61, 4  ;;  %v5294_v19 = vrot.slane %v15637_v18, 5  ;;  %v5302_v18 = vsel %vm14852_vm1, %v5300_v35, %v5301_v48 }
 0x282   : > { %v11988_v38 = vrot.slane %v5141_v31, 9  ;;  %v5281_v49 = vsel %vm14852_vm1, %v5279_v54, %v5280_v22  ;;  %v11995_v31 = vrot.slane %v5148_v60, 9 }
 0x283   : > { %v12009_v30 = vcombine.low %v5278_v59, %v5281_v49  ;;  %v5295_v20 = vsel %vm14852_vm1, %v5293_v26, %v5294_v19 }
 0x284   : > { %v5250_v33 = vsel %vm14852_vm1, %v11988_v38, %v5249_v21  ;;  %v11994_v21 = vrot.slane %v5147_v43, 9  ;;  %v5299_v38 = vsel %vm14852_vm1, %v11995_v31, %v5298_v16 }
 0x285   : > { %v12005_v41 = vcombine.low %v5250_v33, %v5253_v10  ;;  %v12012_v37 = vcombine.low %v5299_v38, %v5302_v18 }
 0x288   : > { %13091 = vmatmul.mubr.msk.bf16.vlgmr.msra.gmra.mrb[0].mxu0 %vm1532_vm12, %v11999_v12  ;;  %v12006_v12 = vcombine.low %v5257_v6, %v5260_v17 }
 0x289   : > { %13094 = vmatprep.mubr.msk.bf16.mxu0 %vm1532_vm12, %v12000_v40  ;;  %v11990_v40 = vrot.slane %v5143_v1, 9 }
 0x28b   : > { %v5264_v14 = vsel %vm14852_vm1, %v11990_v40, %v5263_v51 }
 0x28c   : > { %v12007_v29 = vcombine.low %v5264_v14, %v5267_v24 }
 0x290   : > { %13095 = vmatmul.mubr.msk.bf16.gmra.mrb[4].mxu0 %vm1532_vm12, %v12001_v47  ;;  %v11993_v47 = vrot.slane %v5146_v53, 9 }
 0x291   : > { %13098 = vmatprep.mubr.msk.bf16.mxu0 %vm1532_vm12, %v12002_v32  ;;  %v5286_v32 = vrot.slane %v5284_v11, 4 }
 0x292   : > { %v5285_v57 = vsel %vm14852_vm1, %v11993_v47, %v5284_v11 }
 0x293   : > { %v5288_v7 = vsel %vm14852_vm1, %v5286_v32, %v5287_v23 }
 0x294   : > { %v12010_v42 = vcombine.low %v5285_v57, %v5288_v7 }
 0x298   : > { %13099 = vmatmul.mubr.msk.bf16.gmra.mrb[8].mxu0 %vm1532_vm12, %v12003_v3  ;;  %v5292_v3 = vsel %vm14852_vm1, %v11994_v21, %v5291_v61 }
 0x299   : > { %13102 = vmatprep.mubr.msk.bf16.mxu0 %vm1532_vm12, %v12004_v4  ;;  %v5305_v4 = vrot.slane %v15639_v25, 5  ;;  %v12011_v5 = vcombine.low %v5292_v3, %v5295_v20 }
 0x29b   : > { %v5307_v44 = vrot.slane %v5305_v4, 4  ;;  %v5306_v25 = vsel %vm14852_vm1, %v11996_v28, %v5305_v4 }
 0x29d   : > { %v5309_v33 = vsel %vm14852_vm1, %v5307_v44, %v5308_v27 }
 0x29e   : > { %v12013_v10 = vcombine.low %v5306_v25, %v5309_v33 }
 0x2a0   : > { %13103 = vmatmul.mubr.msk.bf16.gmra.mrb[12].mxu0 %vm1532_vm12, %v12005_v41 }
 0x2a1   : > { %13106 = vmatprep.mubr.msk.bf16.mxu0 %vm1532_vm12, %v12006_v12 }
 0x2a8   : > { %13107 = vmatmul.mubr.msk.bf16.gmra.mrb[16].mxu0 %vm1532_vm12, %v12007_v29 }
 0x2a9   : > { %13110 = vmatprep.mubr.msk.bf16.mxu0 %vm1532_vm12, %v12008_v39 }
 0x2b0   : > { %13111 = vmatmul.mubr.msk.bf16.gmra.mrb[20].mxu0 %vm1532_vm12, %v12009_v30 }
 0x2b1   : > { %13114 = vmatprep.mubr.msk.bf16.mxu0 %vm1532_vm12, %v12010_v42 }
 0x2b8   : > { %13115 = vmatmul.mubr.msk.bf16.gmra.mrb[24].mxu0 %vm1532_vm12, %v12011_v5 }
 0x2b9   : > { %13118 = vmatprep.mubr.msk.bf16.mxu0 %vm1532_vm12, %v12012_v37 }
 0x2c0   : > { %13119 = vmatmul.mubr.msk.bf16.gmra.mrb[28].mxu0 %vm1532_vm12, %v12013_v10 }
 0x35b   : > { %v15791_v51 = vpop.f32.mrb[0].mxu0 }
 0x35c   : > { %v15793_v6 = vpop.f32.mrb[1].mxu0  ;;  %v5607_v41 = vsel %vm1532_vm12, %v15791_v51, 0.0 }
 0x35d   : > { %v15795_v17 = vpop.f32.mrb[2].mxu0  ;;  %v5604_v1 = vsel %vm1532_vm12, %v15793_v6, 0.0 }
 0x35e   : > { %v15797_v50 = vpop.f32.mrb[3].mxu0  ;;  %v5609_v40 = vsel %vm1532_vm12, %v15795_v17, 0.0 }
 0x35f   : > { %v5605_v63 = vsel %vm1532_vm12, %v15797_v50, 0.0 }
 0x360   : > { %v5606_v36 = vadd.f32 %v5605_v63, %v5604_v1 }
 0x362   : > { %v5608_v12 = vadd.f32 %v5607_v41, %v5606_v36 }
 0x363   : > { %v15807_v2 = vpop.f32.mrb[4].mxu0 }
 0x364   : > { %v15809_v56 = vpop.f32.mrb[5].mxu0  ;;  %v5610_v34 = vadd.f32 %v5609_v40, %v5608_v12  ;;  %v5615_v13 = vsel %vm1532_vm12, %v15807_v2, 0.0 }
 0x365   : > { %v5611_v62 = vsel %vm1532_vm12, %v15809_v56, 0.0  ;;  %v15813_v45 = vpop.f32.mrb[6].mxu0 }
 0x366   : > { %v5612_v14 = vadd.f32 %v5611_v62, %v5610_v34  ;;  %v15815_v24 = vpop.f32.mrb[7].mxu0  ;;  %v5617_v11 = vsel %vm1532_vm12, %v15813_v45, 0.0 }
 0x367   : > { %v5613_v9 = vsel %vm1532_vm12, %v15815_v24, 0.0 }
 0x368   : > { %v5614_v8 = vadd.f32 %v5613_v9, %v5612_v14 }
 0x36a   : > { %v5616_v58 = vadd.f32 %v5615_v13, %v5614_v8 }
 0x36b   : > { %v15823_v53 = vpop.f32.mrb[8].mxu0 }
 0x36c   : > { %v15825_v29 = vpop.f32.mrb[9].mxu0  ;;  %v5618_v39 = vadd.f32 %v5617_v11, %v5616_v58  ;;  %v5623_v59 = vsel %vm1532_vm12, %v15823_v53, 0.0 }
 0x36d   : > { %v5619_v55 = vsel %vm1532_vm12, %v15825_v29, 0.0  ;;  %v15829_v54 = vpop.f32.mrb[10].mxu0 }
 0x36e   : > { %v5620_v22 = vadd.f32 %v5619_v55, %v5618_v39  ;;  %v15831_v47 = vpop.f32.mrb[11].mxu0  ;;  %v5625_v0 = vsel %vm1532_vm12, %v15829_v54, 0.0 }
 0x36f   : > { %v5621_v32 = vsel %vm1532_vm12, %v15831_v47, 0.0 }
 0x370   : > { %v5622_v23 = vadd.f32 %v5621_v32, %v5620_v22 }
 0x372   : > { %v5624_v49 = vadd.f32 %v5623_v59, %v5622_v23 }
 0x373   : > { %v15839_v61 = vpop.f32.mrb[12].mxu0 }
 0x374   : > { %v15841_v57 = vpop.f32.mrb[13].mxu0  ;;  %v5626_v7 = vadd.f32 %v5625_v0, %v5624_v49  ;;  %v5631_v26 = vsel %vm1532_vm12, %v15839_v61, 0.0 }
 0x375   : > { %v5627_v43 = vsel %vm1532_vm12, %v15841_v57, 0.0  ;;  %v15845_v16 = vpop.f32.mrb[14].mxu0 }
 0x376   : > { %v5628_v60 = vadd.f32 %v5627_v43, %v5626_v7  ;;  %v15847_v30 = vpop.f32.mrb[15].mxu0  ;;  %v5633_v31 = vsel %vm1532_vm12, %v15845_v16, 0.0 }
 0x377   : > { %v5629_v42 = vsel %vm1532_vm12, %v15847_v30, 0.0 }
 0x378   : > { %v5630_v21 = vadd.f32 %v5629_v42, %v5628_v60 }
 0x37a   : > { %v5632_v19 = vadd.f32 %v5631_v26, %v5630_v21 }
 0x37b   : > { %v15855_v35 = vpop.f32.mrb[16].mxu0 }
 0x37c   : > { %v15857_v48 = vpop.f32.mrb[17].mxu0  ;;  %v5634_v3 = vadd.f32 %v5633_v31, %v5632_v19  ;;  %v5639_v37 = vsel %vm1532_vm12, %v15855_v35, 0.0 }
 0x37d   : > { %v5635_v20 = vsel %vm1532_vm12, %v15857_v48, 0.0  ;;  %v15861_v4 = vpop.f32.mrb[18].mxu0 }
 0x37e   : > { %v5636_v38 = vadd.f32 %v5635_v20, %v5634_v3  ;;  %v15863_v18 = vpop.f32.mrb[19].mxu0  ;;  %v5641_v44 = vsel %vm1532_vm12, %v15861_v4, 0.0 }
 0x37f   : > { %v5637_v52 = vsel %vm1532_vm12, %v15863_v18, 0.0 }
 0x380   : > { %v5638_v5 = vadd.f32 %v5637_v52, %v5636_v38 }
 0x382   : > { %v5640_v28 = vadd.f32 %v5639_v37, %v5638_v5 }
 0x383   : > { %v15871_v27 = vpop.f32.mrb[20].mxu0 }
 0x384   : > { %v15873_v25 = vpop.f32.mrb[21].mxu0  ;;  %v5642_v33 = vadd.f32 %v5641_v44, %v5640_v28  ;;  %v5647_v40 = vsel %vm1532_vm12, %v15871_v27, 0.0 }
 0x385   : > { %v5643_v10 = vsel %vm1532_vm12, %v15873_v25, 0.0  ;;  %v15877_v1 = vpop.f32.mrb[22].mxu0 }
 0x386   : > { %v5644_v63 = vadd.f32 %v5643_v10, %v5642_v33  ;;  %v5528_v36 = vpop.f32.mrb[23].mxu0  ;;  %v5649_v62 = vsel %vm1532_vm12, %v15877_v1, 0.0 }
 0x387   : > { %v5645_v41 = vsel %vm1532_vm12, %v5528_v36, 0.0 }
 0x388   : > { %v5646_v12 = vadd.f32 %v5645_v41, %v5644_v63 }
 0x38a   : > { %v5648_v34 = vadd.f32 %v5647_v40, %v5646_v12 }
 0x38b   : > { %v13116_v14 = vpop.f32.mrb[24].mxu0 }
 0x38c   : > { %v5541_v9 = vpop.f32.mrb[25].mxu0  ;;  %v5650_v8 = vadd.f32 %v5649_v62, %v5648_v34  ;;  %v5655_v32 = vsel %vm1532_vm12, %v13116_v14, 0.0 }
 0x38d   : > { %v5651_v13 = vsel %vm1532_vm12, %v5541_v9, 0.0  ;;  %v13117_v58 = vpop.f32.mrb[26].mxu0 }
 0x38e   : > { %v5652_v11 = vadd.f32 %v5651_v13, %v5650_v8  ;;  %v5544_v39 = vpop.f32.mrb[27].mxu0  ;;  %v5657_v59 = vsel %vm1532_vm12, %v13117_v58, 0.0 }
 0x38f   : > { %v5653_v55 = vsel %vm1532_vm12, %v5544_v39, 0.0 }
 0x390   : > { %v5654_v22 = vadd.f32 %v5653_v55, %v5652_v11 }
 0x392   : > { %v5656_v23 = vadd.f32 %v5655_v32, %v5654_v22 }
 0x393   : > { %v13120_v49 = vpop.f32.mrb[28].mxu0 }
 0x394   : > { %v5557_v0 = vpop.f32.mrb[29].mxu0  ;;  %v5658_v7 = vadd.f32 %v5657_v59, %v5656_v23  ;;  %v5663_v31 = vsel %vm1532_vm12, %v13120_v49, 0.0 }
 0x395   : > { %v5659_v43 = vsel %vm1532_vm12, %v5557_v0, 0.0  ;;  %v13121_v60 = vpop.f32.mrb[30].mxu0 }
 0x396   : > { %v5660_v42 = vadd.f32 %v5659_v43, %v5658_v7  ;;  %v5560_v21 = vpop.f32.mrb[31].mxu0  ;;  %v5665_v20 = vsel %vm1532_vm12, %v13121_v60, 0.0 }
 0x397   : > { %v5661_v26 = vsel %vm1532_vm12, %v5560_v21, 0.0 }
 0x398   : > { %v5662_v19 = vadd.f32 %v5661_v26, %v5660_v42 }
 0x39a   : > { %v5664_v3 = vadd.f32 %v5663_v31, %v5662_v19 }
 0x39c   : > { %v5666_v38 = vadd.f32 %v5665_v20, %v5664_v3 }
 0x39e   : > { %v5667_v52 = vrot.slane %v5666_v38, 4 }
 0x3a0   : > { %v5668_v5 = vadd.f32 %v5667_v52, %v5666_v38 }
 0x3a2   : > { %v5669_v37 = vrot.slane %v5668_v5, 2 }
 0x3a4   : > { %v5670_v28 = vadd.f32 %v5669_v37, %v5668_v5 }
 0x3a6   : > { %v5671_v44 = vrot.slane %v5670_v28, 1 }
 0x3a8   : > { %v5672_v33 = vadd.f32 %v5671_v44, %v5670_v28 }
 0x3aa   : > { %v5673_v10 = vmul.f32 0.00390625, %v5672_v33 }
 0x3ac   : > { %v15893_v63 = vsub.f32 %v15793_v6, %v5673_v10  ;;  %v15896_v41 = vsub.f32 %v15797_v50, %v5673_v10  ;;  %v15899_v12 = vsub.f32 %v15791_v51, %v5673_v10  ;;  %v15902_v40 = vsub.f32 %v15795_v17, %v5673_v10 }
 0x3ad   : > { %v15905_v34 = vsub.f32 %v15809_v56, %v5673_v10  ;;  %v15908_v62 = vsub.f32 %v15815_v24, %v5673_v10  ;;  %v15911_v8 = vsub.f32 %v15807_v2, %v5673_v10  ;;  %v15914_v6 = vsub.f32 %v15813_v45, %v5673_v10 }
 0x3ae   : > { %v15917_v50 = vsub.f32 %v15825_v29, %v5673_v10  ;;  %v15920_v51 = vsub.f32 %v15831_v47, %v5673_v10  ;;  %v15923_v17 = vsub.f32 %v15823_v53, %v5673_v10  ;;  %v15926_v56 = vsub.f32 %v15829_v54, %v5673_v10 }
 0x3af   : > { %v15929_v24 = vsub.f32 %v15841_v57, %v5673_v10  ;;  %v15932_v2 = vsub.f32 %v15847_v30, %v5673_v10  ;;  %v15935_v45 = vsub.f32 %v15839_v61, %v5673_v10  ;;  %v15938_v29 = vsub.f32 %v15845_v16, %v5673_v10 }
 0x3b0   : > { %v15941_v47 = vsub.f32 %v15857_v48, %v5673_v10  ;;  %v15944_v53 = vsub.f32 %v15863_v18, %v5673_v10  ;;  %v15947_v54 = vsub.f32 %v15855_v35, %v5673_v10  ;;  %v15950_v57 = vsub.f32 %v15861_v4, %v5673_v10 }
 0x3b1   : > { %v15953_v30 = vsub.f32 %v15873_v25, %v5673_v10  ;;  %v15955_v61 = vsub.f32 %v5528_v36, %v5673_v10  ;;  %v15958_v16 = vsub.f32 %v15871_v27, %v5673_v10  ;;  %v15961_v48 = vsub.f32 %v15877_v1, %v5673_v10 }
 0x3b2   : > { %v15963_v13 = vsub.f32 %v5541_v9, %v5673_v10  ;;  %v15965_v18 = vsub.f32 %v5544_v39, %v5673_v10  ;;  %v15967_v35 = vsub.f32 %v13116_v14, %v5673_v10  ;;  %v15969_v11 = vsub.f32 %v13117_v58, %v5673_v10 }
 0x3b3   : > { %v15971_v4 = vsub.f32 %v5557_v0, %v5673_v10  ;;  %v15973_v25 = vsub.f32 %v5560_v21, %v5673_v10  ;;  %v15975_v36 = vsub.f32 %v13120_v49, %v5673_v10  ;;  %v15977_v55 = vsub.f32 %v13121_v60, %v5673_v10 }
 0x3b4   : > { %v5706_v27 = vmul.f32 %v15893_v63, %v15893_v63  ;;  %v5707_v1 = vmul.f32 %v15896_v41, %v15896_v41  ;;  %v5708_v14 = vmul.f32 %v15899_v12, %v15899_v12  ;;  %v5709_v9 = vmul.f32 %v15902_v40, %v15902_v40 }
 0x3b5   : > { %v5710_v32 = vmul.f32 %v15905_v34, %v15905_v34  ;;  %v5711_v49 = vmul.f32 %v15908_v62, %v15908_v62  ;;  %v5712_v43 = vmul.f32 %v15911_v8, %v15911_v8  ;;  %v5713_v21 = vmul.f32 %v15914_v6, %v15914_v6 }
 0x3b6   : > { %v5738_v58 = vsel %vm1532_vm12, %v5706_v27, 0.0  ;;  %v5739_v39 = vsel %vm1532_vm12, %v5707_v1, 0.0  ;;  %v5741_v23 = vsel %vm1532_vm12, %v5708_v14, 0.0  ;;  %v5743_v0 = vsel %vm1532_vm12, %v5709_v9, 0.0 }
 0x3b7   : > { %v5740_v22 = vadd.f32 %v5739_v39, %v5738_v58  ;;  %v5745_v60 = vsel %vm1532_vm12, %v5710_v32, 0.0  ;;  %v5747_v26 = vsel %vm1532_vm12, %v5711_v49, 0.0  ;;  %v5714_v31 = vmul.f32 %v15917_v50, %v15917_v50 }
 0x3b8   : > { %v5749_v3 = vsel %vm1532_vm12, %v5712_v43, 0.0  ;;  %v5715_v38 = vmul.f32 %v15920_v51, %v15920_v51  ;;  %v5751_v52 = vsel %vm1532_vm12, %v5713_v21, 0.0  ;;  %v5716_v37 = vmul.f32 %v15923_v17, %v15923_v17 }
 0x3b9   : > { %v5742_v59 = vadd.f32 %v5741_v23, %v5740_v22  ;;  %v5753_v28 = vsel %vm1532_vm12, %v5714_v31, 0.0  ;;  %v5717_v33 = vmul.f32 %v15926_v56, %v15926_v56  ;;  %v5718_v1 = vmul.f32 %v15929_v24, %v15929_v24 }
 0x3ba   : > { %v5755_v10 = vsel %vm1532_vm12, %v5715_v38, 0.0  ;;  %v5757_v14 = vsel %vm1532_vm12, %v5716_v37, 0.0  ;;  %v5719_v58 = vmul.f32 %v15932_v2, %v15932_v2  ;;  %v5720_v32 = vmul.f32 %v15935_v45, %v15935_v45 }
 0x3bb   : > { %v5744_v7 = vadd.f32 %v5743_v0, %v5742_v59  ;;  %v5759_v39 = vsel %vm1532_vm12, %v5717_v33, 0.0  ;;  %v5761_v23 = vsel %vm1532_vm12, %v5718_v1, 0.0  ;;  %v5721_v49 = vmul.f32 %v15938_v29, %v15938_v29 }
 0x3bc   : > { %v5763_v0 = vsel %vm1532_vm12, %v5719_v58, 0.0  ;;  %v5722_v43 = vmul.f32 %v15941_v47, %v15941_v47  ;;  %v5723_v21 = vmul.f32 %v15944_v53, %v15944_v53  ;;  %v5724_v31 = vmul.f32 %v15947_v54, %v15947_v54 }
 0x3bd   : > { %v5746_v42 = vadd.f32 %v5745_v60, %v5744_v7  ;;  %v5765_v60 = vsel %vm1532_vm12, %v5720_v32, 0.0  ;;  %v5725_v38 = vmul.f32 %v15950_v57, %v15950_v57  ;;  %v5726_v37 = vmul.f32 %v15953_v30, %v15953_v30 }
 0x3be   : > { %v5727_v33 = vmul.f32 %v15955_v61, %v15955_v61  ;;  %v5728_v1 = vmul.f32 %v15958_v16, %v15958_v16  ;;  %v5729_v58 = vmul.f32 %v15961_v48, %v15961_v48  ;;  %v5730_v32 = vmul.f32 %v15963_v13, %v15963_v13 }
 0x3bf   : > { %v5748_v19 = vadd.f32 %v5747_v26, %v5746_v42  ;;  %v5767_v26 = vsel %vm1532_vm12, %v5721_v49, 0.0  ;;  %v5731_v49 = vmul.f32 %v15965_v18, %v15965_v18 }
 0x3c1   : > { %v5750_v20 = vadd.f32 %v5749_v3, %v5748_v19  ;;  %v5769_v3 = vsel %vm1532_vm12, %v5722_v43, 0.0  ;;  %v5732_v43 = vmul.f32 %v15967_v35, %v15967_v35 }
 0x3c3   : > { %v5752_v5 = vadd.f32 %v5751_v52, %v5750_v20  ;;  %v5771_v52 = vsel %vm1532_vm12, %v5723_v21, 0.0  ;;  %v5733_v21 = vmul.f32 %v15969_v11, %v15969_v11 }
 0x3c5   : > { %v5754_v44 = vadd.f32 %v5753_v28, %v5752_v5  ;;  %v5773_v28 = vsel %vm1532_vm12, %v5724_v31, 0.0  ;;  %v5734_v31 = vmul.f32 %v15971_v4, %v15971_v4 }
 0x3c7   : > { %v5756_v27 = vadd.f32 %v5755_v10, %v5754_v44  ;;  %v5775_v10 = vsel %vm1532_vm12, %v5725_v38, 0.0  ;;  %v5735_v38 = vmul.f32 %v15973_v25, %v15973_v25 }
 0x3c9   : > { %v5758_v9 = vadd.f32 %v5757_v14, %v5756_v27  ;;  %v5777_v14 = vsel %vm1532_vm12, %v5726_v37, 0.0  ;;  %v5736_v37 = vmul.f32 %v15975_v36, %v15975_v36 }
 0x3cb   : > { %v5760_v22 = vadd.f32 %v5759_v39, %v5758_v9  ;;  %v5779_v39 = vsel %vm1532_vm12, %v5727_v33, 0.0  ;;  %v5737_v33 = vmul.f32 %v15977_v55, %v15977_v55 }
 0x3cd   : > { %v5762_v59 = vadd.f32 %v5761_v23, %v5760_v22  ;;  %v5781_v23 = vsel %vm1532_vm12, %v5728_v1, 0.0  ;;  %v5797_v1 = vsel %vm1532_vm12, %v5736_v37, 0.0 }
 0x3cf   : > { %v5764_v7 = vadd.f32 %v5763_v0, %v5762_v59  ;;  %v5783_v0 = vsel %vm1532_vm12, %v5729_v58, 0.0 }
 0x3d1   : > { %v5766_v42 = vadd.f32 %v5765_v60, %v5764_v7  ;;  %v5785_v60 = vsel %vm1532_vm12, %v5730_v32, 0.0 }
 0x3d3   : > { %v5768_v19 = vadd.f32 %v5767_v26, %v5766_v42  ;;  %v5787_v26 = vsel %vm1532_vm12, %v5731_v49, 0.0 }
 0x3d5   : > { %v5770_v20 = vadd.f32 %v5769_v3, %v5768_v19  ;;  %v5789_v3 = vsel %vm1532_vm12, %v5732_v43, 0.0  ;;  %v6735_v43 = vld [vmem:[%s18803_s2] sm:$0x3] }
 0x3d7   : > { %v5772_v5 = vadd.f32 %v5771_v52, %v5770_v20  ;;  %v5791_v52 = vsel %vm1532_vm12, %v5733_v21, 0.0 }
 0x3d9   : > { %v5774_v44 = vadd.f32 %v5773_v28, %v5772_v5  ;;  %v5793_v28 = vsel %vm1532_vm12, %v5734_v31, 0.0 }
 0x3db   : > { %v5776_v27 = vadd.f32 %v5775_v10, %v5774_v44  ;;  %v5795_v10 = vsel %vm1532_vm12, %v5735_v38, 0.0 }
 0x3dd   : > { %v5778_v9 = vadd.f32 %v5777_v14, %v5776_v27 }
 0x3df   : > { %v5780_v22 = vadd.f32 %v5779_v39, %v5778_v9  ;;  %v5799_v9 = vsel %vm1532_vm12, %v5737_v33, 0.0  ;;  %v12098_v39 = vld [vmem:[%s18803_s2 + $0x2] sm:$0x3] }
 0x3e0   : > { %13949 = vmatprep.subr.msk.bf16.mxu1 %vm1581_vm0, %v12098_v39  ;;  %v7235_v32 = vsel %vm1581_vm0, %v12098_v39, 0 }
 0x3e1   : > { %v5782_v59 = vadd.f32 %v5781_v23, %v5780_v22  ;;  %13123 = vmatpush3.bf16.msra.mxu1 %v7235_v32 }
 0x3e2   : > { %13950 = vmatprep.subr.msk.bf16.mxu1 %vm1581_vm0, %v6735_v43 }
 0x3e3   : > { %v5784_v7 = vadd.f32 %v5783_v0, %v5782_v59 }
 0x3e5   : > { %v5786_v42 = vadd.f32 %v5785_v60, %v5784_v7 }
 0x3e7   : > { %v5788_v19 = vadd.f32 %v5787_v26, %v5786_v42 }
 0x3e9   : > { %v5790_v20 = vadd.f32 %v5789_v3, %v5788_v19 }
 0x3eb   : > { %v5792_v5 = vadd.f32 %v5791_v52, %v5790_v20 }
 0x3ed   : > { %v5794_v44 = vadd.f32 %v5793_v28, %v5792_v5 }
 0x3ef   : > { %v5796_v27 = vadd.f32 %v5795_v10, %v5794_v44 }
 0x3f1   : > { %v5798_v14 = vadd.f32 %v5797_v1, %v5796_v27 }
 0x3f3   : > { %v5800_v58 = vadd.f32 %v5799_v9, %v5798_v14  ;;  %v6412_v14 = vld [vmem:[#allocation2 + $0xd4] sm:$0x1] }
 0x3f5   : > { %v5801_v22 = vrot.slane %v5800_v58, 4 }
 0x3f7   : > { %v5802_v23 = vadd.f32 %v5801_v22, %v5800_v58 }
 0x3f9   : > { %v5803_v59 = vrot.slane %v5802_v23, 2 }
 0x3fb   : > { %v5804_v49 = vadd.f32 %v5803_v59, %v5802_v23 }
 0x3fd   : > { %v5805_v0 = vrot.slane %v5804_v49, 1 }
 0x3ff   : > { %v5806_v7 = vadd.f32 %v5805_v0, %v5804_v49 }
 0x401   : > { %v5807_v60 = vmul.f32 0.00390625, %v5806_v7 }
 0x403   : > { %v5808_v42 = vadd.f32 1e-05, %v5807_v60 }
 0x405   : > { %14046 = vrsqrt.f32 %v5808_v42 }
 0x40f   : > { %v14047_v21 = vpop.eup %14046 }
 0x410   : > { %v5838_v26 = vmul.f32 %v14047_v21, %v15971_v4  ;;  %v5839_v19 = vmul.f32 %v14047_v21, %v15973_v25  ;;  %v16087_v31 = vmul.f32 %v14047_v21, %v15893_v63  ;;  %v16090_v3 = vmul.f32 %v14047_v21, %v15896_v41 }
 0x411   : > { %v16093_v20 = vmul.f32 %v14047_v21, %v15899_v12  ;;  %v16096_v38 = vmul.f32 %v14047_v21, %v15902_v40  ;;  %v16099_v52 = vmul.f32 %v14047_v21, %v15905_v34  ;;  %v16102_v5 = vmul.f32 %v14047_v21, %v15908_v62 }
 0x412   : > { %v5870_v4 = vmax.f32 %v5838_v26, 0.0  ;;  %v5871_v25 = vmax.f32 %v5839_v19, 0.0  ;;  %v16105_v63 = vmul.f32 %v14047_v21, %v15911_v8  ;;  %v16108_v41 = vmul.f32 %v14047_v21, %v15914_v6 }
 0x413   : > { %v16111_v12 = vmul.f32 %v14047_v21, %v15917_v50  ;;  %v16114_v40 = vmul.f32 %v14047_v21, %v15920_v51  ;;  %v16117_v34 = vmul.f32 %v14047_v21, %v15923_v17  ;;  %v16120_v62 = vmul.f32 %v14047_v21, %v15926_v56 }
 0x414   : > { %v16122_v37 = vpack.c.bf16 %v5870_v4, %v5870_v4  ;;  %v12507_v28 = vpack.c.bf16 %v5871_v25, %v5871_v25  ;;  %v16125_v8 = vmul.f32 %v14047_v21, %v15929_v24  ;;  %v16128_v6 = vmul.f32 %v14047_v21, %v15932_v2 }
 0x415   : > { %v16131_v50 = vmul.f32 %v14047_v21, %v15935_v45  ;;  %v16134_v51 = vmul.f32 %v14047_v21, %v15938_v29  ;;  %v16137_v17 = vmul.f32 %v14047_v21, %v15941_v47  ;;  %v16140_v56 = vmul.f32 %v14047_v21, %v15944_v53 }
 0x416   : > { %v6209_v44 = vshrl.u32 %v16122_v37, 16  ;;  %v6217_v33 = vshrl.u32 %v12507_v28, 16  ;;  %v6220_v24 = vshll.u32 %v12507_v28, 16  ;;  %v16144_v10 = vmul.f32 %v14047_v21, %v15947_v54 }
 0x417   : > { %v16147_v2 = vmul.f32 %v14047_v21, %v15950_v57  ;;  %v16150_v45 = vmul.f32 %v14047_v21, %v15953_v30  ;;  %v16153_v29 = vmul.f32 %v14047_v21, %v15955_v61  ;;  %v16156_v47 = vmul.f32 %v14047_v21, %v15958_v16  ;;  %v6391_v57 = vld [vmem:[#allocation2 + $0xbc] sm:$0x1] }
 0x418   : > { %v16158_v53 = vrot.slane %v6209_v44, 7  ;;  %v6219_v27 = vrot.slane %v6217_v33, 7  ;;  %v16161_v1 = vmul.f32 %v14047_v21, %v15961_v48  ;;  %v16164_v54 = vmul.f32 %v14047_v21, %v15963_v13 }
 0x419   : > { %v16167_v30 = vmul.f32 %v14047_v21, %v15965_v18  ;;  %v16170_v61 = vmul.f32 %v14047_v21, %v15967_v35  ;;  %v16173_v16 = vmul.f32 %v14047_v21, %v15969_v11  ;;  %v16176_v9 = vmul.f32 %v14047_v21, %v15975_v36  ;;  %v6401_v11 = vld [vmem:[#allocation2] sm:$0xf] }
 0x41a   : > { %v6215_v48 = vrot.slane %v16158_v53, 4  ;;  %v6222_v58 = vor.u32 %v6220_v24, %v6219_v27  ;;  %v6224_v39 = vrot.slane %v6219_v27, 4  ;;  %v16180_v13 = vmul.f32 %v14047_v21, %v15977_v55 }
 0x41b   : > { %v6212_v22 = vshll.u32 %v16122_v37, 16  ;;  %v5842_v18 = vmax.f32 %v16087_v31, 0.0  ;;  %v5843_v35 = vmax.f32 %v16090_v3, 0.0  ;;  %v5844_v32 = vmax.f32 %v16093_v20, 0.0  ;;  %v6324_v37 = vld [vmem:[#allocation2 + $0x48] sm:$0xf] }
 0x41c   : > { %v6223_v23 = vsel %vm14178_vm6, %v6215_v48, %v6222_v58  ;;  %v6392_v59 = vsel %vm14192_vm8, %v6224_v39, %v6391_v57  ;;  %v6413_v49 = vsel %vm14192_vm8, %v6224_v39, %v6412_v14  ;;  %v5845_v55 = vmax.f32 %v16096_v38, 0.0 }
 0x41d   : > { %6390 = vst.msk [vmem:[#allocation2 + $0xb8] sm:$0xf] %vm624_vm3, %v6223_v23  ;;  %6393 = vst [vmem:[#allocation2 + $0xbc] sm:$0x1] %v6392_v59  ;;  %v5846_v0 = vmax.f32 %v16099_v52, 0.0  ;;  %v5847_v7 = vmax.f32 %v16102_v5, 0.0  ;;  %v12480_v33 = vpack.c.bf16 %v5844_v32, %v5844_v32 }
 0x41e   : > { %6411 = vst.msk [vmem:[#allocation2 + $0xd0] sm:$0xf] %vm624_vm3, %v6223_v23  ;;  %6414 = vst [vmem:[#allocation2 + $0xd4] sm:$0x1] %v6413_v49  ;;  %v5848_v43 = vmax.f32 %v16105_v63, 0.0  ;;  %v5849_v60 = vmax.f32 %v16108_v41, 0.0  ;;  %v12481_v24 = vpack.c.bf16 %v5845_v55, %v5845_v55 }
 0x41f   : > { %v5850_v42 = vmax.f32 %v16111_v12, 0.0  ;;  %v5851_v21 = vmax.f32 %v16114_v40, 0.0  ;;  %v5852_v26 = vmax.f32 %v16117_v34, 0.0  ;;  %v5853_v19 = vmax.f32 %v16120_v62, 0.0 }
 0x420   : > { %v5854_v31 = vmax.f32 %v16125_v8, 0.0  ;;  %v5855_v3 = vmax.f32 %v16128_v6, 0.0  ;;  %v5856_v20 = vmax.f32 %v16131_v50, 0.0  ;;  %v5857_v38 = vmax.f32 %v16134_v51, 0.0 }
 0x421   : > { %v5858_v52 = vmax.f32 %v16137_v17, 0.0  ;;  %v5859_v5 = vmax.f32 %v16140_v56, 0.0  ;;  %v5860_v4 = vmax.f32 %v16144_v10, 0.0  ;;  %v5861_v25 = vmax.f32 %v16147_v2, 0.0 }
 0x422   : > { %v5862_v63 = vmax.f32 %v16150_v45, 0.0  ;;  %v5863_v41 = vmax.f32 %v16153_v29, 0.0  ;;  %v5864_v12 = vmax.f32 %v16156_v47, 0.0  ;;  %v5865_v40 = vmax.f32 %v16161_v1, 0.0 }
 0x423   : > { %v5866_v34 = vmax.f32 %v16164_v54, 0.0  ;;  %v5867_v62 = vmax.f32 %v16167_v30, 0.0  ;;  %v5868_v28 = vmax.f32 %v16170_v61, 0.0  ;;  %v5869_v8 = vmax.f32 %v16173_v16, 0.0  ;;  %v6359_v16 = vld [vmem:[#allocation2 + $0x84] sm:$0xf] }
 0x424   : > { %v5872_v6 = vmax.f32 %v16176_v9, 0.0  ;;  %v5873_v50 = vmax.f32 %v16180_v13, 0.0  ;;  %v12478_v51 = vpack.c.bf16 %v5842_v18, %v5842_v18  ;;  %v12479_v17 = vpack.c.bf16 %v5843_v35, %v5843_v35  ;;  %v6448_v56 = vld [vmem:[#allocation2 + $0xb8] sm:$0x8]  ;;  %v6694_v47 = vld [vmem:[#allocation2 + $0xbc] sm:$0x1] }
 0x425   : > { %v6450_v44 = vld [vmem:[#allocation2 + $0xd0] sm:$0x8]  ;;  %v16221_v10 = vpack.c.bf16 %v5846_v0, %v5846_v0  ;;  %v16223_v2 = vpack.c.bf16 %v5847_v7, %v5847_v7  ;;  %v12095_v45 = vrot.slane %v6448_v56, 11  ;;  %v16225_v27 = vpack.c.bf16 %v5848_v43, %v5848_v43  ;;  %v6700_v54 = vld [vmem:[#allocation2 + $0xd4] sm:$0x1] }
 0x426   : > { %v12097_v29 = vrot.slane %v6450_v44, 11  ;;  %v16227_v1 = vpack.c.bf16 %v5849_v60, %v5849_v60  ;;  %v16229_v57 = vpack.c.bf16 %v5850_v42, %v5850_v42  ;;  %v16231_v14 = vpack.c.bf16 %v5851_v21, %v5851_v21 }
 0x427   : > { %v16233_v30 = vpack.c.bf16 %v5852_v26, %v5852_v26  ;;  %v16235_v61 = vpack.c.bf16 %v5853_v19, %v5853_v19  ;;  %v6695_v9 = vsel %vm14221_vm9, %v12095_v45, %v6694_v47  ;;  %v16241_v58 = vpack.c.bf16 %v5854_v31, %v5854_v31 }
 0x428   : > { %v6701_v48 = vsel %vm14221_vm9, %v12097_v29, %v6700_v54  ;;  %v16243_v39 = vpack.c.bf16 %v5855_v3, %v5855_v3  ;;  %6696 = vst [vmem:[#allocation2 + $0xbc] sm:$0x1] %v6695_v9  ;;  %v16245_v13 = vpack.c.bf16 %v5856_v20, %v5856_v20  ;;  %v16247_v18 = vpack.c.bf16 %v5857_v38, %v5857_v38 }
 0x429   : > { %6702 = vst [vmem:[#allocation2 + $0xd4] sm:$0x1] %v6701_v48  ;;  %v16249_v35 = vpack.c.bf16 %v5858_v52, %v5858_v52  ;;  %v16251_v32 = vpack.c.bf16 %v5859_v5, %v5859_v5  ;;  %v16253_v23 = vpack.c.bf16 %v5860_v4, %v5860_v4  ;;  %v16255_v59 = vpack.c.bf16 %v5861_v25, %v5861_v25 }
 0x42a   : > { %v16257_v49 = vpack.c.bf16 %v5862_v63, %v5862_v63  ;;  %v16259_v55 = vpack.c.bf16 %v5863_v41, %v5863_v41  ;;  %v16261_v0 = vpack.c.bf16 %v5864_v12, %v5864_v12  ;;  %v16263_v7 = vpack.c.bf16 %v5865_v40, %v5865_v40 }
 0x42b   : > { %v16265_v43 = vpack.c.bf16 %v5866_v34, %v5866_v34  ;;  %v16267_v60 = vpack.c.bf16 %v5867_v62, %v5867_v62  ;;  %v16269_v42 = vpack.c.bf16 %v5868_v28, %v5868_v28  ;;  %v16271_v21 = vpack.c.bf16 %v5869_v8, %v5869_v8 }
 0x42c   : > { %v16273_v26 = vpack.c.bf16 %v5872_v6, %v5872_v6  ;;  %v16275_v19 = vpack.c.bf16 %v5873_v50, %v5873_v50  ;;  %v5971_v31 = vshrl.u32 %v12478_v51, 16  ;;  %v5974_v3 = vshll.u32 %v12478_v51, 16 }
 0x42d   : > { %v5979_v20 = vshrl.u32 %v12479_v17, 16  ;;  %v5982_v38 = vshll.u32 %v12479_v17, 16  ;;  %v5988_v52 = vshrl.u32 %v12480_v33, 16  ;;  %v5991_v5 = vshll.u32 %v12480_v33, 16  ;;  %v6338_v17 = vld [vmem:[#allocation2 + $0x60] sm:$0xf] }
 0x42e   : > { %v5996_v4 = vshrl.u32 %v12481_v24, 16  ;;  %v5999_v25 = vshll.u32 %v12481_v24, 16  ;;  %v5973_v63 = vrot.slane %v5971_v31, 7  ;;  %v6005_v12 = vshrl.u32 %v16221_v10, 16 }
 0x42f   : > { %v16277_v41 = vrot.slane %v5979_v20, 7  ;;  %v6008_v40 = vshll.u32 %v16221_v10, 16  ;;  %v5990_v34 = vrot.slane %v5988_v52, 7  ;;  %v6013_v28 = vshrl.u32 %v16223_v2, 16 }
 0x430   : > { %v16281_v62 = vrot.slane %v5996_v4, 7  ;;  %v6016_v8 = vshll.u32 %v16223_v2, 16  ;;  %v16285_v6 = vor.u32 %v5974_v3, %v5973_v63  ;;  %v5977_v50 = vrot.slane %v5973_v63, 4 }
 0x431   : > { %v5984_v51 = vor.u32 %v5982_v38, %v16277_v41  ;;  %v16289_v56 = vor.u32 %v5991_v5, %v5990_v34  ;;  %v5994_v44 = vrot.slane %v5990_v34, 4  ;;  %v6007_v45 = vrot.slane %v6005_v12, 7 }
 0x432   : > { %v6001_v33 = vor.u32 %v5999_v25, %v16281_v62  ;;  %v16295_v29 = vrot.slane %v6013_v28, 7  ;;  %v6022_v2 = vshrl.u32 %v16225_v27, 16  ;;  %v6025_v54 = vshll.u32 %v16225_v27, 16 }
 0x433   : > { %v5985_v10 = vsel %vm14178_vm6, %v5977_v50, %v5984_v51  ;;  %v6030_v9 = vshrl.u32 %v16227_v1, 16  ;;  %v6033_v48 = vshll.u32 %v16227_v1, 16  ;;  %v16304_v31 = vor.u32 %v6008_v40, %v6007_v45 }
 0x434   : > { %v6002_v47 = vsel %vm14178_vm6, %v5994_v44, %v6001_v33  ;;  %6292 = vst.msk [vmem:[#allocation2 + $0x10] sm:$0xf] %vm624_vm3, %v5985_v10  ;;  %v6011_v3 = vrot.slane %v6007_v45, 4  ;;  %v6018_v20 = vor.u32 %v6016_v8, %v16295_v29  ;;  %v6024_v52 = vrot.slane %v6022_v2, 7  ;;  %v6356_v8 = vld [vmem:[#allocation2 + $0x80] sm:$0x1] }
 0x435   : > { %6299 = vst.msk [vmem:[#allocation2 + $0x1c] sm:$0xf] %vm624_vm3, %v6002_v47  ;;  %6404 = vst.msk [vmem:[#allocation2 + $0x4] sm:$0xf] %vm624_vm3, %v6002_v47  ;;  %v16310_v5 = vrot.slane %v6030_v9, 7  ;;  %v6039_v27 = vshrl.u32 %v16229_v57, 16 }
 0x436   : > { %v6042_v1 = vshll.u32 %v16229_v57, 16  ;;  %v6019_v4 = vsel %vm14178_vm6, %v6011_v3, %v6018_v20  ;;  %v6047_v25 = vshrl.u32 %v16231_v14, 16  ;;  %v6050_v63 = vshll.u32 %v16231_v14, 16  ;;  %v6335_v9 = vld [vmem:[#allocation2 + $0x5c] sm:$0x1] }
 0x437   : > { %v6056_v12 = vshrl.u32 %v16233_v30, 16  ;;  %v16319_v40 = vor.u32 %v6025_v54, %v6024_v52  ;;  %v6028_v34 = vrot.slane %v6024_v52, 4  ;;  %v6035_v28 = vor.u32 %v6033_v48, %v16310_v5  ;;  %6306 = vst.msk [vmem:[#allocation2 + $0x28] sm:$0xf] %vm624_vm3, %v6019_v4 }
 0x438   : > { %v6041_v50 = vrot.slane %v6039_v27, 7  ;;  %v16324_v57 = vrot.slane %v6047_v25, 7  ;;  %v6059_v44 = vshll.u32 %v16233_v30, 16  ;;  %v6064_v33 = vshrl.u32 %v16235_v61, 16 }
 0x439   : > { %v6058_v51 = vrot.slane %v6056_v12, 7  ;;  %v6036_v14 = vsel %vm14178_vm6, %v6028_v34, %v6035_v28  ;;  %v6067_v10 = vshll.u32 %v16235_v61, 16  ;;  %v6073_v45 = vshrl.u32 %v16241_v58, 16 }
 0x43a   : > { %v16332_v2 = vor.u32 %v6042_v1, %v6041_v50  ;;  %v6045_v47 = vrot.slane %v6041_v50, 4  ;;  %v6052_v54 = vor.u32 %v6050_v63, %v16324_v57  ;;  %6313 = vst.msk [vmem:[#allocation2 + $0x34] sm:$0xf] %vm624_vm3, %v6036_v14  ;;  %v16339_v3 = vrot.slane %v6064_v33, 7 }
 0x43b   : > { %v16337_v48 = vor.u32 %v6059_v44, %v6058_v51  ;;  %v6062_v30 = vrot.slane %v6058_v51, 4  ;;  %v6075_v20 = vrot.slane %v6073_v45, 7  ;;  %v6076_v52 = vshll.u32 %v16241_v58, 16 }
 0x43c   : > { %v6053_v61 = vsel %vm14178_vm6, %v6045_v47, %v6052_v54  ;;  %v6081_v27 = vshrl.u32 %v16243_v39, 16  ;;  %v6084_v1 = vshll.u32 %v16243_v39, 16  ;;  %v6069_v4 = vor.u32 %v6067_v10, %v16339_v3  ;;  %v6307_v10 = vld [vmem:[#allocation2 + $0x2c] sm:$0x1] }
 0x43d   : > { %v6079_v63 = vrot.slane %v6075_v20, 4  ;;  %v6090_v12 = vshrl.u32 %v16245_v13, 16  ;;  %6320 = vst.msk [vmem:[#allocation2 + $0x40] sm:$0xf] %vm624_vm3, %v6053_v61  ;;  %v16350_v34 = vor.u32 %v6076_v52, %v6075_v20  ;;  %v6093_v50 = vshll.u32 %v16245_v13, 16 }
 0x43e   : > { %v16352_v28 = vrot.slane %v6081_v27, 7  ;;  %v6098_v58 = vshrl.u32 %v16247_v18, 16  ;;  %v6070_v39 = vsel %vm14178_vm6, %v6062_v30, %v6069_v4  ;;  %v6101_v44 = vshll.u32 %v16247_v18, 16  ;;  %v6303_v52 = vld [vmem:[#allocation2 + $0x24] sm:$0xf] }
 0x43f   : > { %v6092_v51 = vrot.slane %v6090_v12, 7  ;;  %v6107_v14 = vshrl.u32 %v16249_v35, 16  ;;  %v6110_v47 = vshll.u32 %v16249_v35, 16  ;;  %6327 = vst.msk [vmem:[#allocation2 + $0x4c] sm:$0xf] %vm624_vm3, %v6070_v39  ;;  %v6115_v30 = vshrl.u32 %v16251_v32, 16 }
 0x440   : > { %v6086_v33 = vor.u32 %v6084_v1, %v16352_v28  ;;  %v16362_v45 = vrot.slane %v6098_v58, 7  ;;  %v6118_v27 = vshll.u32 %v16251_v32, 16  ;;  %v6124_v12 = vshrl.u32 %v16253_v23, 16 }
 0x441   : > { %v16366_v13 = vor.u32 %v6093_v50, %v6092_v51  ;;  %v6096_v54 = vrot.slane %v6092_v51, 4  ;;  %v6109_v20 = vrot.slane %v6107_v14, 7  ;;  %v16376_v4 = vrot.slane %v6115_v30, 7  ;;  %v6310_v51 = vld [vmem:[#allocation2 + $0x30] sm:$0xf] }
 0x442   : > { %v6087_v18 = vsel %vm14178_vm6, %v6079_v63, %v6086_v33  ;;  %v6103_v61 = vor.u32 %v6101_v44, %v16362_v45  ;;  %v6127_v63 = vshll.u32 %v16253_v23, 16  ;;  %v6132_v58 = vshrl.u32 %v16255_v59, 16 }
 0x443   : > { %v16374_v1 = vor.u32 %v6110_v47, %v6109_v20  ;;  %v6113_v35 = vrot.slane %v6109_v20, 4  ;;  %6334 = vst.msk [vmem:[#allocation2 + $0x58] sm:$0xf] %vm624_vm3, %v6087_v18  ;;  %v6135_v39 = vshll.u32 %v16255_v59, 16  ;;  %v6120_v32 = vor.u32 %v6118_v27, %v16376_v4 }
 0x444   : > { %v6104_v50 = vsel %vm14178_vm6, %v6096_v54, %v6103_v61  ;;  %v6126_v44 = vrot.slane %v6124_v12, 7  ;;  %v6141_v14 = vshrl.u32 %v16257_v49, 16  ;;  %v16389_v33 = vrot.slane %v6132_v58, 7 }
 0x445   : > { %6341 = vst.msk [vmem:[#allocation2 + $0x64] sm:$0xf] %vm624_vm3, %v6104_v50  ;;  %v6144_v47 = vshll.u32 %v16257_v49, 16  ;;  %v6149_v54 = vshrl.u32 %v16259_v55, 16  ;;  %v6152_v23 = vshll.u32 %v16259_v55, 16  ;;  %v6121_v59 = vsel %vm14178_vm6, %v6113_v35, %v6120_v32 }
 0x446   : > { %v16396_v20 = vor.u32 %v6127_v63, %v6126_v44  ;;  %v6130_v30 = vrot.slane %v6126_v44, 4  ;;  %v6143_v18 = vrot.slane %v6141_v14, 7  ;;  %v6137_v61 = vor.u32 %v6135_v39, %v16389_v33  ;;  %6348 = vst.msk [vmem:[#allocation2 + $0x70] sm:$0xf] %vm624_vm3, %v6121_v59 }
 0x447   : > { %v16400_v12 = vrot.slane %v6149_v54, 7  ;;  %v6158_v50 = vshrl.u32 %v16261_v0, 16  ;;  %v6161_v58 = vshll.u32 %v16261_v0, 16  ;;  %v6166_v35 = vshrl.u32 %v16263_v7, 16 }
 0x448   : > { %v16404_v49 = vor.u32 %v6144_v47, %v6143_v18  ;;  %v6147_v55 = vrot.slane %v6143_v18, 4  ;;  %v6138_v63 = vsel %vm14178_vm6, %v6130_v30, %v6137_v61  ;;  %v6169_v54 = vshll.u32 %v16263_v7, 16 }
 0x449   : > { %v6154_v39 = vor.u32 %v6152_v23, %v16400_v12  ;;  %v6160_v44 = vrot.slane %v6158_v50, 7  ;;  %v16412_v14 = vrot.slane %v6166_v35, 7  ;;  %v6175_v47 = vshrl.u32 %v16265_v43, 16  ;;  %6355 = vst.msk [vmem:[#allocation2 + $0x7c] sm:$0xf] %vm624_vm3, %v6138_v63 }
 0x44a   : > { %v6178_v59 = vshll.u32 %v16265_v43, 16  ;;  %v6183_v23 = vshrl.u32 %v16267_v60, 16  ;;  %v6186_v7 = vshll.u32 %v16267_v60, 16  ;;  %v6192_v63 = vshrl.u32 %v16269_v42, 16 }
 0x44b   : > { %v6155_v0 = vsel %vm14178_vm6, %v6147_v55, %v6154_v39  ;;  %v16420_v18 = vor.u32 %v6161_v58, %v6160_v44  ;;  %v6164_v30 = vrot.slane %v6160_v44, 4  ;;  %v6171_v61 = vor.u32 %v6169_v54, %v16412_v14  ;;  %v6296_v39 = vld [vmem:[#allocation2 + $0x18] sm:$0xf]  ;;  %v6293_v44 = vld [vmem:[#allocation2 + $0x14] sm:$0x1] }
 0x44c   : > { %v6177_v35 = vrot.slane %v6175_v47, 7  ;;  %6362 = vst.msk [vmem:[#allocation2 + $0x88] sm:$0xf] %vm624_vm3, %v6155_v0  ;;  %v16427_v43 = vrot.slane %v6183_v23, 7  ;;  %v6195_v55 = vshll.u32 %v16269_v42, 16  ;;  %v6200_v58 = vshrl.u32 %v16271_v21, 16 }
 0x44d   : > { %v6172_v54 = vsel %vm14178_vm6, %v6164_v30, %v6171_v61  ;;  %v6203_v60 = vshll.u32 %v16271_v21, 16  ;;  %v6194_v50 = vrot.slane %v6192_v63, 7  ;;  %v6300_v42 = vld [vmem:[#allocation2 + $0x20] sm:$0x1]  ;;  %v6226_v21 = vshrl.u32 %v16273_v26, 16 }
 0x44e   : > { %v16434_v32 = vor.u32 %v6178_v59, %v6177_v35  ;;  %v6181_v47 = vrot.slane %v6177_v35, 4  ;;  %v6188_v0 = vor.u32 %v6186_v7, %v16427_v43  ;;  %v16439_v27 = vrot.slane %v6200_v58, 7  ;;  %6369 = vst.msk [vmem:[#allocation2 + $0x94] sm:$0xf] %vm624_vm3, %v6172_v54  ;;  %v6314_v35 = vld [vmem:[#allocation2 + $0x38] sm:$0x1] }
 0x44f   : > { %v16445_v59 = vor.u32 %v6212_v22, %v16158_v53  ;;  %v6229_v30 = vshll.u32 %v16273_v26, 16  ;;  %v6234_v61 = vshrl.u32 %v16275_v19, 16  ;;  %v6317_v7 = vld [vmem:[#allocation2 + $0x3c] sm:$0xf]  ;;  %v6321_v63 = vld [vmem:[#allocation2 + $0x44] sm:$0x1]  ;;  %v16452_v54 = vor.u32 %v6195_v55, %v6194_v50 }
 0x450   : > { %18951 = vst [vmem:[#allocation11_spill] sm:$0xff] %v16439_v27  ;;  %v6189_v58 = vsel %vm14178_vm6, %v6181_v47, %v6188_v0  ;;  %v6198_v23 = vrot.slane %v6194_v50, 4  ;;  %v6205_v25 = vor.u32 %v6203_v60, %v16439_v27  ;;  %v6328_v53 = vld [vmem:[#allocation2 + $0x50] sm:$0x1]  ;;  %v6331_v22 = vld [vmem:[#allocation2 + $0x54] sm:$0xf] }
 0x451   : > { %18952 = vst [vmem:[#allocation12_spill] sm:$0xff] %v16445_v59  ;;  %v6228_v26 = vrot.slane %v6226_v21, 7  ;;  %v16456_v38 = vrot.slane %v6234_v61, 7  ;;  %v6237_v24 = vshll.u32 %v16275_v19, 16  ;;  %6376 = vst.msk [vmem:[#allocation2 + $0xa0] sm:$0xf] %vm624_vm3, %v6189_v58  ;;  %v6297_v19 = vsel %vm14186_vm7, %v16289_v56, %v6296_v39 }
 0x452   : > { %v6342_v47 = vld [vmem:[#allocation2 + $0x68] sm:$0x1]  ;;  %v6345_v55 = vld [vmem:[#allocation2 + $0x6c] sm:$0xf]  ;;  %v6349_v0 = vld [vmem:[#allocation2 + $0x74] sm:$0x1]  ;;  %v6206_v50 = vsel %vm14178_vm6, %v6198_v23, %v6205_v25 }
 0x453   : > { %v14073_v60 = vld [vmem:[#allocation2 + $0xc] sm:$0xf]  ;;  %v18954_v21 = vrot.slane %v16277_v41, 4  ;;  %v6352_v58 = vld [vmem:[#allocation2 + $0x78] sm:$0xf]  ;;  %v16472_v27 = vor.u32 %v6229_v30, %v6228_v26  ;;  %v6232_v25 = vrot.slane %v6228_v26, 4  ;;  %v6239_v23 = vor.u32 %v6237_v24, %v16456_v38 }
 0x454   : > { %v6290_v46 = vsel %vm14186_vm7, %v16285_v6, %v14073_v60  ;;  %v6363_v59 = vld [vmem:[#allocation2 + $0x8c] sm:$0x1]  ;;  %6298 = vst [vmem:[#allocation2 + $0x18] sm:$0xf] %v6297_v19  ;;  %6383 = vst.msk [vmem:[#allocation2 + $0xac] sm:$0xf] %vm624_vm3, %v6206_v50  ;;  %v6304_v30 = vsel %vm14186_vm7, %v16304_v31, %v6303_v52  ;;  %v6311_v26 = vsel %vm14186_vm7, %v16319_v40, %v6310_v51 }
 0x455   : > { %v6294_v61 = vsel %vm14192_vm8, %v18954_v21, %v6293_v44  ;;  %6291 = vst [vmem:[#allocation2 + $0xc] sm:$0xf] %v6290_v46  ;;  %v6366_v41 = vld [vmem:[#allocation2 + $0x90] sm:$0xf]  ;;  %v6370_v44 = vld [vmem:[#allocation2 + $0x98] sm:$0x1]  ;;  %v6318_v40 = vsel %vm14186_vm7, %v16332_v2, %v6317_v7 }
 0x456   : > { %6295 = vst [vmem:[#allocation2 + $0x14] sm:$0x1] %v6294_v61  ;;  %v6373_v60 = vld [vmem:[#allocation2 + $0x9c] sm:$0xf]  ;;  %v18955_v39 = vrot.slane %v16281_v62, 4  ;;  %v18956_v24 = vrot.slane %v16295_v29, 4 }
 0x457   : > { %v6380_v50 = vld [vmem:[#allocation2 + $0xa8] sm:$0xf]  ;;  %v6384_v61 = vld [vmem:[#allocation2 + $0xb0] sm:$0x1]  ;;  %v6377_v19 = vld [vmem:[#allocation2 + $0xa4] sm:$0x1] }
 0x458   : > { %v6301_v21 = vsel %vm14192_vm8, %v18955_v39, %v6300_v42  ;;  %v6308_v46 = vsel %vm14192_vm8, %v18956_v24, %v6307_v10  ;;  %v16491_v6 = vld [vmem:[#allocation2 + $0xc0] sm:$0xf]  ;;  %v6240_v42 = vsel %vm14178_vm6, %v6232_v25, %v6239_v23  ;;  %6305 = vst [vmem:[#allocation2 + $0x24] sm:$0xf] %v6304_v30  ;;  %6312 = vst [vmem:[#allocation2 + $0x30] sm:$0xf] %v6311_v26 }
 0x459   : > { %6302 = vst [vmem:[#allocation2 + $0x20] sm:$0x1] %v6301_v21  ;;  %6309 = vst [vmem:[#allocation2 + $0x2c] sm:$0x1] %v6308_v46  ;;  %v18957_v29 = vrot.slane %v16310_v5, 4  ;;  %v18958_v10 = vrot.slane %v16324_v57, 4  ;;  %v6325_v5 = vsel %vm14186_vm7, %v16337_v48, %v6324_v37  ;;  %v6332_v57 = vsel %vm14186_vm7, %v16350_v34, %v6331_v22 }
 0x45a   : > { %v6405_v51 = vld [vmem:[#allocation2 + $0x8] sm:$0x1]  ;;  %v6387_v25 = vld [vmem:[#allocation2 + $0xb4] sm:$0xf]  ;;  %6319 = vst [vmem:[#allocation2 + $0x3c] sm:$0xf] %v6318_v40  ;;  %v6339_v48 = vsel %vm14186_vm7, %v16366_v13, %v6338_v17  ;;  %v6353_v17 = vsel %vm14186_vm7, %v16396_v20, %v6352_v58 }
 0x45b   : > { %v6315_v31 = vsel %vm14192_vm8, %v18957_v29, %v6314_v35  ;;  %v6322_v52 = vsel %vm14192_vm8, %v18958_v10, %v6321_v63  ;;  %v18959_v35 = vrot.slane %v16339_v3, 4  ;;  %v18960_v7 = vrot.slane %v16352_v28, 4  ;;  %6397 = vst.msk [vmem:[#allocation2 + $0xc4] sm:$0xf] %vm624_vm3, %v6240_v42  ;;  %6326 = vst [vmem:[#allocation2 + $0x48] sm:$0xf] %v6325_v5 }
 0x45c   : > { %6316 = vst [vmem:[#allocation2 + $0x38] sm:$0x1] %v6315_v31  ;;  %6323 = vst [vmem:[#allocation2 + $0x44] sm:$0x1] %v6322_v52  ;;  %v18961_v3 = vrot.slane %v16362_v45, 4  ;;  %v6346_v28 = vsel %vm14186_vm7, %v16374_v1, %v6345_v55  ;;  %v18963_v45 = vrot.slane %v16389_v33, 4  ;;  %v6360_v1 = vsel %vm14186_vm7, %v16404_v49, %v6359_v16 }
 0x45d   : > { %v6329_v2 = vsel %vm14192_vm8, %v18959_v35, %v6328_v53  ;;  %v6336_v63 = vsel %vm14192_vm8, %v18960_v7, %v6335_v9  ;;  %6333 = vst [vmem:[#allocation2 + $0x54] sm:$0xf] %v6332_v57  ;;  %v18962_v9 = vrot.slane %v16376_v4, 4  ;;  %v6408_v53 = vld [vmem:[#allocation2 + $0xcc] sm:$0xf]  ;;  %v18964_v4 = vrot.slane %v16400_v12, 4 }
 0x45e   : > { %6330 = vst [vmem:[#allocation2 + $0x50] sm:$0x1] %v6329_v2  ;;  %6337 = vst [vmem:[#allocation2 + $0x5c] sm:$0x1] %v6336_v63  ;;  %v6343_v34 = vsel %vm14192_vm8, %v18961_v3, %v6342_v47  ;;  %v6398_v22 = vld [vmem:[#allocation2 + $0xc8] sm:$0x1]  ;;  %v6357_v13 = vsel %vm14192_vm8, %v18963_v45, %v6356_v8  ;;  %v6367_v33 = vsel %vm14186_vm7, %v16420_v18, %v6366_v41 }
 0x45f   : > { %v6350_v37 = vsel %vm14192_vm8, %v18962_v9, %v6349_v0  ;;  %6340 = vst [vmem:[#allocation2 + $0x60] sm:$0xf] %v6339_v48  ;;  %6344 = vst [vmem:[#allocation2 + $0x68] sm:$0x1] %v6343_v34  ;;  %v6364_v47 = vsel %vm14192_vm8, %v18964_v4, %v6363_v59  ;;  %v18965_v20 = vrot.slane %v16412_v14, 4  ;;  %v6374_v16 = vsel %vm14186_vm7, %v16434_v32, %v6373_v60  ;;  %v18967_v18 = vld [vmem:[#allocation11_spill] sm:$0xff] }
 0x460   : > { %6347 = vst [vmem:[#allocation2 + $0x6c] sm:$0xf] %v6346_v28  ;;  %6351 = vst [vmem:[#allocation2 + $0x74] sm:$0x1] %v6350_v37  ;;  %v18966_v12 = vrot.slane %v16427_v43, 4  ;;  %v6381_v14 = vsel %vm14186_vm7, %v16452_v54, %v6380_v50  ;;  %v18968_v59 = vrot.slane %v18967_v18, 4  ;;  %v6395_v43 = vsel %vm14186_vm7, %v16472_v27, %v16491_v6 }
 0x461   : > { %6354 = vst [vmem:[#allocation2 + $0x78] sm:$0xf] %v6353_v17  ;;  %6358 = vst [vmem:[#allocation2 + $0x80] sm:$0x1] %v6357_v13  ;;  %v6371_v8 = vsel %vm14192_vm8, %v18965_v20, %v6370_v44  ;;  %v18969_v0 = vld [vmem:[#allocation12_spill] sm:$0xff]  ;;  %v18970_v54 = vrot.slane %v16456_v38, 4  ;;  %v6402_v44 = vsel %vm14186_vm7, %v16289_v56, %v6401_v11  ;;  %v18971_v60 = vmov %v18955_v39 }
 0x462   : > { %6361 = vst [vmem:[#allocation2 + $0x84] sm:$0xf] %v6360_v1  ;;  %6365 = vst [vmem:[#allocation2 + $0x8c] sm:$0x1] %v6364_v47  ;;  %v6378_v49 = vsel %vm14192_vm8, %v18966_v12, %v6377_v19  ;;  %v6385_v55 = vsel %vm14192_vm8, %v18968_v59, %v6384_v61  ;;  %v6388_v32 = vsel %vm14186_vm7, %v18969_v0, %v6387_v25  ;;  %v6417_v58 = vld [vmem:[#allocation2 + $0x18] sm:$0x2] }
 0x463   : > { %6368 = vst [vmem:[#allocation2 + $0x90] sm:$0xf] %v6367_v33  ;;  %6372 = vst [vmem:[#allocation2 + $0x98] sm:$0x1] %v6371_v8  ;;  %v16577_v23 = vld [vmem:[#allocation2 + $0x4] sm:$0x8]  ;;  %v6399_v41 = vsel %vm14192_vm8, %v18970_v54, %v6398_v22  ;;  %v6406_v27 = vsel %vm14192_vm8, %v18971_v60, %v6405_v51  ;;  %v6409_v6 = vsel %vm14186_vm7, %v18969_v0, %v6408_v53 }
 0x464   : > { %6375 = vst [vmem:[#allocation2 + $0x9c] sm:$0xf] %v6374_v16  ;;  %6379 = vst [vmem:[#allocation2 + $0xa4] sm:$0x1] %v6378_v49  ;;  %v6434_v39 = vld [vmem:[#allocation2 + $0x10] sm:$0x8] }
 0x465   : > { %6382 = vst [vmem:[#allocation2 + $0xa8] sm:$0xf] %v6381_v14  ;;  %6386 = vst [vmem:[#allocation2 + $0xb0] sm:$0x1] %v6385_v55  ;;  %v6529_v21 = vld [vmem:[#allocation2 + $0x18] sm:$0x1] }
 0x466   : > { %6389 = vst [vmem:[#allocation2 + $0xb4] sm:$0xf] %v6388_v32  ;;  %6396 = vst [vmem:[#allocation2 + $0xc0] sm:$0xf] %v6395_v43  ;;  %v6418_v38 = vld [vmem:[#allocation2 + $0x24] sm:$0x2] }
 0x467   : > { %6400 = vst [vmem:[#allocation2 + $0xc8] sm:$0x1] %v6399_v41  ;;  %6403 = vst [vmem:[#allocation2] sm:$0xf] %v6402_v44  ;;  %v6419_v30 = vld [vmem:[#allocation2 + $0x30] sm:$0x2] }
 0x468   : > { %6407 = vst [vmem:[#allocation2 + $0x8] sm:$0x1] %v6406_v27  ;;  %6410 = vst [vmem:[#allocation2 + $0xcc] sm:$0xf] %v6409_v6  ;;  %v12064_v24 = vrot.slane %v6417_v58, 9  ;;  %v12065_v46 = vrot.slane %v6418_v38, 9 }
 0x469   : > { %v6420_v56 = vld [vmem:[#allocation2 + $0x3c] sm:$0x2]  ;;  %v12066_v62 = vrot.slane %v6419_v30, 9  ;;  %v12080_v26 = vrot.slane %v16577_v23, 11  ;;  %v6652_v50 = vld [vmem:[#allocation2 + $0x14] sm:$0x1] }
 0x46a   : > { %v6421_v61 = vld [vmem:[#allocation2 + $0x48] sm:$0x2]  ;;  %v6422_v19 = vld [vmem:[#allocation2 + $0x54] sm:$0x2]  ;;  %v12067_v15 = vrot.slane %v6420_v56, 9  ;;  %v6530_v42 = vsel %vm14192_vm8, %v12064_v24, %v6529_v21  ;;  %v12081_v29 = vrot.slane %v6434_v39, 11 }
 0x46b   : > { %v6423_v31 = vld [vmem:[#allocation2 + $0x60] sm:$0x2]  ;;  %v6424_v40 = vld [vmem:[#allocation2 + $0x6c] sm:$0x2]  ;;  %v12068_v10 = vrot.slane %v6421_v61, 9  ;;  %v12069_v52 = vrot.slane %v6422_v19, 9 }
 0x46c   : > { %6531 = vst [vmem:[#allocation2 + $0x18] sm:$0x1] %v6530_v42  ;;  %v6425_v11 = vld [vmem:[#allocation2 + $0x78] sm:$0x2]  ;;  %v6426_v51 = vld [vmem:[#allocation2 + $0x84] sm:$0x2]  ;;  %v6653_v2 = vsel %vm14221_vm9, %v12081_v29, %v6652_v50 }
 0x46d   : > { %v12070_v25 = vrot.slane %v6423_v31, 9  ;;  %v12071_v5 = vrot.slane %v6424_v40, 9  ;;  %v6427_v57 = vld [vmem:[#allocation2 + $0x90] sm:$0x2]  ;;  %v16598_v7 = vld [vmem:[#allocation2 + $0x9c] sm:$0x2] }
 0x46e   : > { %v12072_v63 = vrot.slane %v6425_v11, 9  ;;  %v12073_v48 = vrot.slane %v6426_v51, 9  ;;  %6654 = vst [vmem:[#allocation2 + $0x14] sm:$0x1] %v6653_v2  ;;  %v16600_v3 = vld [vmem:[#allocation2 + $0xa8] sm:$0x2] }
 0x46f   : > { %v16602_v34 = vld [vmem:[#allocation2 + $0xb4] sm:$0x2]  ;;  %v12074_v28 = vrot.slane %v6427_v57, 9  ;;  %v12075_v9 = vrot.slane %v16598_v7, 9  ;;  %v6415_v37 = vld [vmem:[#allocation2] sm:$0x2] }
 0x470   : > { %v16605_v53 = vld [vmem:[#allocation2 + $0xcc] sm:$0x2]  ;;  %v12076_v22 = vrot.slane %v16600_v3, 9  ;;  %v12077_v17 = vrot.slane %v16602_v34, 9  ;;  %v16609_v45 = vld [vmem:[#allocation2 + $0x1c] sm:$0x8] }
 0x471   : > { %v12062_v13 = vrot.slane %v6415_v37, 9  ;;  %v12079_v1 = vrot.slane %v16605_v53, 9  ;;  %v6523_v4 = vld [vmem:[#allocation2] sm:$0x1]  ;;  %v6532_v47 = vld [vmem:[#allocation2 + $0x24] sm:$0x1] }
 0x472   : > { %v16612_v33 = vld [vmem:[#allocation2 + $0x28] sm:$0x8]  ;;  %v16614_v20 = vld [vmem:[#allocation2 + $0x34] sm:$0x8]  ;;  %v16616_v8 = vld [vmem:[#allocation2 + $0x40] sm:$0x8]  ;;  %v6533_v16 = vsel %vm14192_vm8, %v12065_v46, %v6532_v47 }
 0x473   : > { %v6535_v12 = vld [vmem:[#allocation2 + $0x30] sm:$0x1]  ;;  %v6538_v49 = vld [vmem:[#allocation2 + $0x3c] sm:$0x1]  ;;  %v6541_v14 = vld [vmem:[#allocation2 + $0x48] sm:$0x1]  ;;  %v6524_v32 = vsel %vm14192_vm8, %v12062_v13, %v6523_v4 }
 0x474   : > { %v16620_v18 = vld [vmem:[#allocation2 + $0x4c] sm:$0x8]  ;;  %v16622_v59 = vld [vmem:[#allocation2 + $0x58] sm:$0x8]  ;;  %v16624_v55 = vld [vmem:[#allocation2 + $0x64] sm:$0x8]  ;;  %v6536_v43 = vsel %vm14192_vm8, %v12066_v62, %v6535_v12  ;;  %v6539_v58 = vsel %vm14192_vm8, %v12067_v15, %v6538_v49  ;;  %v6542_v54 = vsel %vm14192_vm8, %v12068_v10, %v6541_v14 }
 0x475   : > { %v16626_v0 = vld [vmem:[#allocation2 + $0x70] sm:$0x8]  ;;  %6534 = vst [vmem:[#allocation2 + $0x24] sm:$0x1] %v6533_v16  ;;  %v6544_v41 = vld [vmem:[#allocation2 + $0x54] sm:$0x1] }
 0x476   : > { %v6547_v44 = vld [vmem:[#allocation2 + $0x60] sm:$0x1]  ;;  %v6550_v60 = vld [vmem:[#allocation2 + $0x6c] sm:$0x1]  ;;  %v16636_v27 = vld [vmem:[#allocation2 + $0x7c] sm:$0x8]  ;;  %v6545_v38 = vsel %vm14192_vm8, %v12069_v52, %v6544_v41 }
 0x477   : > { %v16638_v6 = vld [vmem:[#allocation2 + $0x88] sm:$0x8]  ;;  %v16640_v39 = vld [vmem:[#allocation2 + $0x94] sm:$0x8]  ;;  %v16642_v21 = vld [vmem:[#allocation2 + $0xa0] sm:$0x8]  ;;  %v6548_v30 = vsel %vm14192_vm8, %v12070_v25, %v6547_v44  ;;  %v6551_v24 = vsel %vm14192_vm8, %v12071_v5, %v6550_v60 }
 0x478   : > { %6525 = vst [vmem:[#allocation2] sm:$0x1] %v6524_v32  ;;  %6537 = vst [vmem:[#allocation2 + $0x30] sm:$0x1] %v6536_v43  ;;  %v6553_v56 = vld [vmem:[#allocation2 + $0x78] sm:$0x1] }
 0x479   : > { %6540 = vst [vmem:[#allocation2 + $0x3c] sm:$0x1] %v6539_v58  ;;  %6543 = vst [vmem:[#allocation2 + $0x48] sm:$0x1] %v6542_v54  ;;  %v6556_v46 = vld [vmem:[#allocation2 + $0x84] sm:$0x1]  ;;  %v6554_v61 = vsel %vm14192_vm8, %v12072_v63, %v6553_v56 }
 0x47a   : > { %v6559_v62 = vld [vmem:[#allocation2 + $0x90] sm:$0x1]  ;;  %v16650_v50 = vld [vmem:[#allocation2 + $0xac] sm:$0x8]  ;;  %6546 = vst [vmem:[#allocation2 + $0x54] sm:$0x1] %v6545_v38  ;;  %v6557_v19 = vsel %vm14192_vm8, %v12073_v48, %v6556_v46 }
 0x47b   : > { %6549 = vst [vmem:[#allocation2 + $0x60] sm:$0x1] %v6548_v30  ;;  %6552 = vst [vmem:[#allocation2 + $0x6c] sm:$0x1] %v6551_v24  ;;  %v6560_v15 = vsel %vm14192_vm8, %v12074_v28, %v6559_v62  ;;  %v6562_v42 = vld [vmem:[#allocation2 + $0x9c] sm:$0x1] }
 0x47c   : > { %v6565_v29 = vld [vmem:[#allocation2 + $0xa8] sm:$0x1]  ;;  %v6568_v31 = vld [vmem:[#allocation2 + $0xb4] sm:$0x1]  ;;  %v16658_v40 = vld [vmem:[#allocation2 + $0xc4] sm:$0x8]  ;;  %v6563_v10 = vsel %vm14192_vm8, %v12075_v9, %v6562_v42 }
 0x47d   : > { %6555 = vst [vmem:[#allocation2 + $0x78] sm:$0x1] %v6554_v61  ;;  %6558 = vst [vmem:[#allocation2 + $0x84] sm:$0x1] %v6557_v19  ;;  %v6566_v52 = vsel %vm14192_vm8, %v12076_v22, %v6565_v29  ;;  %v6569_v11 = vsel %vm14192_vm8, %v12077_v17, %v6568_v31  ;;  %v6574_v51 = vld [vmem:[#allocation2 + $0xcc] sm:$0x1] }
 0x47e   : > { %6561 = vst [vmem:[#allocation2 + $0x90] sm:$0x1] %v6560_v15  ;;  %v12082_v25 = vrot.slane %v16609_v45, 11  ;;  %6564 = vst [vmem:[#allocation2 + $0x9c] sm:$0x1] %v6563_v10  ;;  %v6575_v5 = vsel %vm14192_vm8, %v12079_v1, %v6574_v51  ;;  %v12083_v2 = vrot.slane %v16612_v33, 11 }
 0x47f   : > { %6567 = vst [vmem:[#allocation2 + $0xa8] sm:$0x1] %v6566_v52  ;;  %6570 = vst [vmem:[#allocation2 + $0xb4] sm:$0x1] %v6569_v11  ;;  %v12084_v57 = vrot.slane %v16614_v20, 11  ;;  %v12085_v7 = vrot.slane %v16616_v8, 11 }
 0x480   : > { %v6649_v63 = vld [vmem:[#allocation2 + $0x8] sm:$0x1]  ;;  %v6655_v48 = vld [vmem:[#allocation2 + $0x20] sm:$0x1]  ;;  %6576 = vst [vmem:[#allocation2 + $0xcc] sm:$0x1] %v6575_v5 }
 0x481   : > { %v12086_v3 = vrot.slane %v16620_v18, 11  ;;  %v12087_v34 = vrot.slane %v16622_v59, 11  ;;  %v12088_v28 = vrot.slane %v16624_v55, 11  ;;  %v12089_v9 = vrot.slane %v16626_v0, 11  ;;  %v6658_v37 = vld [vmem:[#allocation2 + $0x2c] sm:$0x1] }
 0x482   : > { %v12090_v53 = vrot.slane %v16636_v27, 11  ;;  %v12091_v22 = vrot.slane %v16638_v6, 11  ;;  %v12092_v17 = vrot.slane %v16640_v39, 11  ;;  %v12093_v45 = vrot.slane %v16642_v21, 11  ;;  %v6661_v13 = vld [vmem:[#allocation2 + $0x38] sm:$0x1] }
 0x483   : > { %v16680_v1 = vld [vmem:[#allocation2 + $0x4] sm:$0xf]  ;;  %v12094_v4 = vrot.slane %v16650_v50, 11  ;;  %v12096_v47 = vrot.slane %v16658_v40, 11  ;;  %v6650_v33 = vsel %vm14221_vm9, %v12080_v26, %v6649_v63  ;;  %v6656_v20 = vsel %vm14221_vm9, %v12082_v25, %v6655_v48  ;;  %v6667_v16 = vld [vmem:[#allocation2 + $0x50] sm:$0x1] }
 0x484   : > { %v6664_v8 = vld [vmem:[#allocation2 + $0x44] sm:$0x1]  ;;  %v6416_v12 = vld [vmem:[#allocation2 + $0xc] sm:$0x2]  ;;  %6651 = vst [vmem:[#allocation2 + $0x8] sm:$0x1] %v6650_v33  ;;  %v6659_v49 = vsel %vm14221_vm9, %v12083_v2, %v6658_v37  ;;  %v6662_v14 = vsel %vm14221_vm9, %v12084_v57, %v6661_v13  ;;  %v6668_v26 = vsel %vm14221_vm9, %v12086_v3, %v6667_v16 }
 0x485   : > { %6657 = vst [vmem:[#allocation2 + $0x20] sm:$0x1] %v6656_v20  ;;  %v6665_v23 = vsel %vm14221_vm9, %v12085_v7, %v6664_v8  ;;  %v6670_v18 = vld [vmem:[#allocation2 + $0x5c] sm:$0x1]  ;;  %v6673_v59 = vld [vmem:[#allocation2 + $0x68] sm:$0x1] }
 0x486   : > { %v6676_v55 = vld [vmem:[#allocation2 + $0x74] sm:$0x1]  ;;  %v16698_v0 = vld [vmem:[#allocation2 + $0x10] sm:$0xf]  ;;  %6660 = vst [vmem:[#allocation2 + $0x2c] sm:$0x1] %v6659_v49  ;;  %v6671_v32 = vsel %vm14221_vm9, %v12087_v34, %v6670_v18  ;;  %v6674_v43 = vsel %vm14221_vm9, %v12088_v28, %v6673_v59 }
 0x487   : > { %6663 = vst [vmem:[#allocation2 + $0x38] sm:$0x1] %v6662_v14  ;;  %6666 = vst [vmem:[#allocation2 + $0x44] sm:$0x1] %v6665_v23  ;;  %v6677_v58 = vsel %vm14221_vm9, %v12089_v9, %v6676_v55  ;;  %v6679_v54 = vld [vmem:[#allocation2 + $0x80] sm:$0x1] }
 0x488   : > { %6669 = vst [vmem:[#allocation2 + $0x50] sm:$0x1] %v6668_v26  ;;  %v6682_v41 = vld [vmem:[#allocation2 + $0x8c] sm:$0x1]  ;;  %v6685_v44 = vld [vmem:[#allocation2 + $0x98] sm:$0x1]  ;;  %v6680_v60 = vsel %vm14221_vm9, %v12090_v53, %v6679_v54 }
 0x489   : > { %6672 = vst [vmem:[#allocation2 + $0x5c] sm:$0x1] %v6671_v32  ;;  %6675 = vst [vmem:[#allocation2 + $0x68] sm:$0x1] %v6674_v43  ;;  %v6683_v27 = vsel %vm14221_vm9, %v12091_v22, %v6682_v41  ;;  %v6686_v6 = vsel %vm14221_vm9, %v12092_v17, %v6685_v44  ;;  %v6688_v39 = vld [vmem:[#allocation2 + $0xa4] sm:$0x1] }
 0x48a   : > { %6678 = vst [vmem:[#allocation2 + $0x74] sm:$0x1] %v6677_v58  ;;  %v6691_v21 = vld [vmem:[#allocation2 + $0xb0] sm:$0x1]  ;;  %v6697_v38 = vld [vmem:[#allocation2 + $0xc8] sm:$0x1]  ;;  %v6689_v30 = vsel %vm14221_vm9, %v12093_v45, %v6688_v39 }
 0x48b   : > { %6681 = vst [vmem:[#allocation2 + $0x80] sm:$0x1] %v6680_v60  ;;  %6684 = vst [vmem:[#allocation2 + $0x8c] sm:$0x1] %v6683_v27  ;;  %v6692_v24 = vsel %vm14221_vm9, %v12094_v4, %v6691_v21  ;;  %v6698_v56 = vsel %vm14221_vm9, %v12096_v47, %v6697_v38  ;;  %v16718_v46 = vld [vmem:[#allocation2] sm:$0xf] }
 0x48c   : > { %6687 = vst [vmem:[#allocation2 + $0x98] sm:$0x1] %v6686_v6  ;;  %v6762_v62 = vshll.u32 %v16680_v1, 16  ;;  %v6737_v50 = vld [vmem:[#allocation2 + $0x14] sm:$0x1]  ;;  %v6753_v61 = vshrl.u32 %v16718_v46, 16 }
 0x48d   : > { %6690 = vst [vmem:[#allocation2 + $0xa4] sm:$0x1] %v6689_v30  ;;  %6693 = vst [vmem:[#allocation2 + $0xb0] sm:$0x1] %v6692_v24  ;;  %v6756_v19 = vshll.u32 %v16718_v46, 16  ;;  %v6766_v15 = vshrl.u32 %v16680_v1, 16 }
 0x48e   : > { %6699 = vst [vmem:[#allocation2 + $0xc8] sm:$0x1] %v6698_v56  ;;  %v12063_v42 = vrot.slane %v6416_v12, 9  ;;  %v6764_v29 = vrot.slane %v6762_v62, 5  ;;  %v6526_v31 = vld [vmem:[#allocation2 + $0xc] sm:$0x1] }
 0x48f   : > { %v6786_v35 = vshll.u32 %v16698_v0, 16  ;;  %v6790_v40 = vshrl.u32 %v16698_v0, 16  ;;  %v6796_v10 = vshll.u32 %v6737_v50, 16  ;;  %v6755_v52 = vrot.slane %v6753_v61, 4  ;;  %v16728_v5 = vld [vmem:[#allocation2 + $0x18] sm:$0xf] }
 0x490   : > { %v6758_v11 = vrot.slane %v6756_v19, 5  ;;  %v6768_v51 = vrot.slane %v6766_v15, 4  ;;  %v6527_v25 = vsel %vm14192_vm8, %v12063_v42, %v6526_v31  ;;  %v16730_v2 = vld [vmem:[#allocation2 + $0x8] sm:$0x1]  ;;  %v16734_v63 = vld [vmem:[#allocation2 + $0x1c] sm:$0xf] }
 0x491   : > { %18973 = vst [vmem:[#allocation13_spill] sm:$0xff] %v16730_v2  ;;  %6528 = vst [vmem:[#allocation2 + $0xc] sm:$0x1] %v6527_v25  ;;  %v16732_v57 = vrot.slane %v6786_v35, 5  ;;  %v6792_v7 = vrot.slane %v6790_v40, 4  ;;  %v6772_v34 = vshll.u32 %v16730_v2, 16 }
 0x492   : > { %v6759_v48 = vor.u32 %v6758_v11, %v6755_v52  ;;  %v6769_v3 = vor.u32 %v6768_v51, %v6764_v29  ;;  %v14074_v28 = vld [vmem:[%s18803_s2] sm:$0x3]  ;;  %v16744_v53 = vrot.slane %v6796_v10, 5  ;;  %v6801_v17 = vshrl.u32 %v16728_v5, 16  ;;  %v16751_v20 = vld [vmem:[#allocation2 + $0x28] sm:$0xf] }
 0x493   : > { %v16741_v9 = vsel %vm1581_vm0, %v14074_v28, 0  ;;  %v6793_v37 = vor.u32 %v6792_v7, %v16732_v57  ;;  %v16746_v22 = vld [vmem:[#allocation2 + $0x20] sm:$0x1]  ;;  %v6804_v45 = vshll.u32 %v16728_v5, 16  ;;  %v6774_v47 = vrot.slane %v6772_v34, 5 }
 0x494   : > { %18974 = vst [vmem:[#allocation14_spill] sm:$0xff] %v16746_v22  ;;  %v6760_v13 = vrot.slane %v6759_v48, 4  ;;  %v6770_v4 = vrot.slane %v6769_v3, 4  ;;  %v6810_v33 = vshll.u32 %v16734_v63, 16  ;;  %v6803_v16 = vrot.slane %v6801_v17, 4 }
 0x495   : > { %v16753_v8 = vrot.slane %v6793_v37, 4  ;;  %v6806_v12 = vrot.slane %v6804_v45, 5  ;;  %v6814_v49 = vshrl.u32 %v16734_v63, 16  ;;  %v16756_v14 = vld [vmem:[#allocation2 + $0x24] sm:$0xf]  ;;  %v6820_v55 = vshll.u32 %v16746_v22, 16 }
 0x496   : > { %v6765_v26 = vsel %vm14294_vm13, %v6760_v13, %v6764_v29  ;;  %v6775_v18 = vsel %vm14294_vm13, %v6770_v4, %v6774_v47  ;;  %v6812_v59 = vrot.slane %v6810_v33, 5  ;;  %v16767_v41 = vld [vmem:[#allocation2 + $0x30] sm:$0xf]  ;;  %v6825_v27 = vshrl.u32 %v16756_v14, 16  ;;  %v16777_v56 = vld [vmem:[#allocation2 + $0x2c] sm:$0x1] }
 0x497   : > { %v12099_v32 = vcombine.low %v6765_v26, %v6775_v18  ;;  %v6799_v43 = vsel %vm14294_vm13, %v16753_v8, %v16744_v53  ;;  %v6807_v58 = vor.u32 %v6806_v12, %v6803_v16  ;;  %v6816_v54 = vrot.slane %v6814_v49, 4  ;;  %18976 = vst [vmem:[#allocation8_spill] sm:$0xff] %v16777_v56  ;;  %v16780_v15 = vld [vmem:[#allocation2 + $0x34] sm:$0xf]  ;;  %v16788_v7 = vld [vmem:[#allocation2 + $0x38] sm:$0x1] }
 0x498   : > { %v16769_v44 = vld [vmem:[#allocation2 + $0xc] sm:$0xf]  ;;  %v6822_v60 = vrot.slane %v6820_v55, 5  ;;  %v6828_v6 = vshll.u32 %v16756_v14, 16  ;;  %v6834_v39 = vshll.u32 %v16751_v20, 16  ;;  %v6827_v62 = vrot.slane %v6825_v27, 4 }
 0x499   : > { %13124 = vmatprep.mubr.msk.bf16.mxu1 %vm1532_vm12, %v12099_v32  ;;  %v6777_v21 = vshrl.u32 %v16769_v44, 16  ;;  %v6780_v38 = vshll.u32 %v16769_v44, 16  ;;  %v6808_v30 = vrot.slane %v6807_v58, 4  ;;  %v6817_v24 = vor.u32 %v6816_v54, %v6812_v59  ;;  %v16792_v17 = vld [vmem:[#allocation2 + $0x3c] sm:$0xf] }
 0x49a   : > { %v6830_v50 = vrot.slane %v6828_v6, 5  ;;  %v6836_v61 = vrot.slane %v6834_v39, 5  ;;  %v6838_v19 = vshrl.u32 %v16751_v20, 16  ;;  %v6844_v52 = vshll.u32 %v16777_v56, 16  ;;  %v16801_v18 = vld [vmem:[#allocation2 + $0x40] sm:$0xf] }
 0x49b   : > { %v6779_v42 = vrot.slane %v6777_v21, 4  ;;  %v6782_v29 = vrot.slane %v6780_v38, 5  ;;  %v6813_v31 = vsel %vm14294_vm13, %v6808_v30, %v6812_v59  ;;  %v6818_v35 = vrot.slane %v6817_v24, 4  ;;  %v16803_v59 = vld [vmem:[#allocation2 + $0x44] sm:$0x1] }
 0x49c   : > { %v6831_v40 = vor.u32 %v6830_v50, %v6827_v62  ;;  %v6840_v10 = vrot.slane %v6838_v19, 4  ;;  %v6849_v11 = vshrl.u32 %v16767_v41, 16  ;;  %v6852_v48 = vshll.u32 %v16767_v41, 16  ;;  %v16809_v6 = vld [vmem:[#allocation2 + $0x48] sm:$0xf] }
 0x49d   : > { %v6783_v51 = vor.u32 %v6782_v29, %v6779_v42  ;;  %v6823_v25 = vsel %vm14294_vm13, %v6818_v35, %v6822_v60  ;;  %v6858_v3 = vshll.u32 %v16780_v15, 16  ;;  %v6846_v53 = vrot.slane %v6844_v52, 5  ;;  %v16814_v30 = vld [vmem:[%s18803_s2 + $0x4] sm:$0x3]  ;;  %v16826_v29 = vld [vmem:[#allocation2 + $0x50] sm:$0x1] }
 0x49e   : > { %v12101_v34 = vcombine.low %v6813_v31, %v6823_v25  ;;  %v6832_v28 = vrot.slane %v6831_v40, 4  ;;  %v6841_v37 = vor.u32 %v6840_v10, %v6836_v61  ;;  %v6851_v13 = vrot.slane %v6849_v11, 4 }
 0x49f   : > { %v6784_v45 = vrot.slane %v6783_v51, 4  ;;  %v6854_v4 = vrot.slane %v6852_v48, 5  ;;  %v6860_v47 = vrot.slane %v6858_v3, 5  ;;  %v6862_v16 = vshrl.u32 %v16780_v15, 16  ;;  %v16833_v3 = vld [vmem:[#allocation2 + $0x54] sm:$0xf] }
 0x4a0   : > { %v6837_v33 = vsel %vm14294_vm13, %v6832_v28, %v6836_v61  ;;  %v6842_v8 = vrot.slane %v6841_v37, 4  ;;  %v6868_v12 = vshll.u32 %v16788_v7, 16  ;;  %v6873_v55 = vshrl.u32 %v16792_v17, 16  ;;  %v16820_v61 = vld [vmem:[#allocation2 + $0x4c] sm:$0xf] }
 0x4a1   : > { %v6789_v49 = vsel %vm14294_vm13, %v6784_v45, %v16732_v57  ;;  %v6855_v26 = vor.u32 %v6854_v4, %v6851_v13  ;;  %v6876_v32 = vshll.u32 %v16792_v17, 16  ;;  %v6864_v60 = vrot.slane %v6862_v16, 4  ;;  %v16839_v45 = vld [vmem:[#allocation2 + $0x58] sm:$0xf] }
 0x4a2   : > { %v12100_v58 = vcombine.low %v6789_v49, %v6799_v43  ;;  %v6847_v54 = vsel %vm14294_vm13, %v6842_v8, %v6846_v53  ;;  %v6870_v27 = vrot.slane %v6868_v12, 5  ;;  %v6875_v57 = vrot.slane %v6873_v55, 4  ;;  %v16843_v8 = vld [vmem:[#allocation2 + $0x5c] sm:$0x1] }
 0x4a3   : > { %v12102_v39 = vcombine.low %v6837_v33, %v6847_v54  ;;  %v6856_v21 = vrot.slane %v6855_v26, 4  ;;  %v6878_v38 = vrot.slane %v6876_v32, 5  ;;  %v6865_v24 = vor.u32 %v6864_v60, %v6860_v47  ;;  %v16849_v60 = vld [vmem:[#allocation2 + $0x60] sm:$0xf] }
 0x4a4   : > { %13125 = vmatmul.mubr.msk.bf16.vlgmr.msra.gmra.mrb[0].mxu1 %vm1532_vm12, %v12100_v58  ;;  %v6882_v43 = vshll.u32 %v16801_v18, 16  ;;  %v6886_v62 = vshrl.u32 %v16801_v18, 16  ;;  %v6892_v50 = vshll.u32 %v16803_v59, 16  ;;  %v6897_v31 = vshrl.u32 %v16809_v6, 16 }
 0x4a5   : > { %13157 = vmatpush3.bf16.msra.mxu1 %v16741_v9  ;;  %13128 = vmatprep.mubr.msk.bf16.mxu1 %vm1532_vm12, %v12101_v34  ;;  %v6861_v19 = vsel %vm14294_vm13, %v6856_v21, %v6860_v47  ;;  %v6879_v42 = vor.u32 %v6878_v38, %v6875_v57  ;;  %v6900_v35 = vshll.u32 %v16809_v6, 16  ;;  %v6866_v40 = vrot.slane %v6865_v24, 4  ;;  %v16855_v24 = vld [vmem:[#allocation2 + $0x64] sm:$0xf] }
 0x4a6   : > { %v6884_v10 = vrot.slane %v6882_v43, 5  ;;  %v6888_v52 = vrot.slane %v6886_v62, 4  ;;  %v6894_v11 = vrot.slane %v6892_v50, 5  ;;  %13951 = vmatprep.subr.msk.bf16.mxu1 %vm1581_vm0, %v16814_v30  ;;  %v6899_v51 = vrot.slane %v6897_v31, 4 }
 0x4a7   : > { %v6880_v9 = vrot.slane %v6879_v42, 4  ;;  %v6902_v25 = vrot.slane %v6900_v35, 5  ;;  %v6906_v48 = vshll.u32 %v16820_v61, 16  ;;  %v6871_v34 = vsel %vm14294_vm13, %v6866_v40, %v6870_v27  ;;  %v16860_v42 = vld [vmem:[#allocation2 + $0x68] sm:$0x1] }
 0x4a8   : > { %v6889_v28 = vor.u32 %v6888_v52, %v6884_v10  ;;  %v6910_v37 = vshrl.u32 %v16820_v61, 16  ;;  %v6916_v53 = vshll.u32 %v16826_v29, 16  ;;  %v12103_v13 = vcombine.low %v6861_v19, %v6871_v34  ;;  %18977 = vst [vmem:[#allocation10_spill] sm:$0xff] %v16860_v42 }
 0x4a9   : > { %v6885_v4 = vsel %vm14294_vm13, %v6880_v9, %v6884_v10  ;;  %v6903_v47 = vor.u32 %v6902_v25, %v6899_v51  ;;  %v6908_v33 = vrot.slane %v6906_v48, 5  ;;  %v6921_v26 = vshrl.u32 %v16833_v3, 16  ;;  %v16866_v51 = vld [vmem:[#allocation2 + $0x6c] sm:$0xf] }
 0x4aa   : > { %v6890_v16 = vrot.slane %v6889_v28, 4  ;;  %v6912_v12 = vrot.slane %v6910_v37, 4  ;;  %v6918_v49 = vrot.slane %v6916_v53, 5  ;;  %v6924_v32 = vshll.u32 %v16833_v3, 16  ;;  %v16871_v37 = vld [vmem:[#allocation2 + $0x70] sm:$0xf] }
 0x4ab   : > { %v6904_v55 = vrot.slane %v6903_v47, 4  ;;  %v6930_v58 = vshll.u32 %v16839_v45, 16  ;;  %v6934_v54 = vshrl.u32 %v16839_v45, 16  ;;  %v6923_v57 = vrot.slane %v6921_v26, 4 }
 0x4ac   : > { %13129 = vmatmul.mubr.msk.bf16.gmra.mrb[4].mxu1 %vm1532_vm12, %v12102_v39  ;;  %v6895_v27 = vsel %vm14294_vm13, %v6890_v16, %v6894_v11  ;;  %v6913_v21 = vor.u32 %v6912_v12, %v6908_v33  ;;  %v6940_v38 = vshll.u32 %v16843_v8, 16  ;;  %v6926_v50 = vrot.slane %v6924_v32, 5  ;;  %v16875_v16 = vld [vmem:[#allocation2 + $0x78] sm:$0xf] }
 0x4ad   : > { %13132 = vmatprep.mubr.msk.bf16.mxu1 %vm1532_vm12, %v12103_v13  ;;  %v12104_v43 = vcombine.low %v6885_v4, %v6895_v27  ;;  %v6909_v62 = vsel %vm14294_vm13, %v6904_v55, %v6908_v33  ;;  %v6932_v19 = vrot.slane %v6930_v58, 5  ;;  %v6936_v31 = vrot.slane %v6934_v54, 4  ;;  %v16873_v33 = vld [vmem:[#allocation2 + $0x74] sm:$0x1] }
 0x4ae   : > { %v6914_v39 = vrot.slane %v6913_v21, 4  ;;  %v6942_v35 = vrot.slane %v6940_v38, 5  ;;  %v6945_v40 = vshrl.u32 %v16849_v60, 16  ;;  %v6927_v10 = vor.u32 %v6926_v50, %v6923_v57  ;;  %18978 = vst [vmem:[#allocation3_spill] sm:$0xff] %v16873_v33 }
 0x4af   : > { %v6948_v52 = vshll.u32 %v16849_v60, 16  ;;  %v6954_v11 = vshll.u32 %v16855_v24, 16  ;;  %v6958_v9 = vshrl.u32 %v16855_v24, 16  ;;  %v6937_v48 = vor.u32 %v6936_v31, %v6932_v19 }
 0x4b0   : > { %v6919_v25 = vsel %vm14294_vm13, %v6914_v39, %v6918_v49  ;;  %v6947_v34 = vrot.slane %v6945_v40, 4  ;;  %v6964_v28 = vshll.u32 %v16860_v42, 16  ;;  %v6928_v13 = vrot.slane %v6927_v10, 4  ;;  %v16878_v49 = vld [vmem:[#allocation2 + $0x7c] sm:$0xf] }
 0x4b1   : > { %v12105_v53 = vcombine.low %v6909_v62, %v6919_v25  ;;  %v6950_v4 = vrot.slane %v6948_v52, 5  ;;  %v6956_v47 = vrot.slane %v6954_v11, 5  ;;  %v6938_v12 = vrot.slane %v6937_v48, 4  ;;  %v16889_v10 = vld [vmem:[#allocation2 + $0x80] sm:$0x1] }
 0x4b2   : > { %v6960_v26 = vrot.slane %v6958_v9, 4  ;;  %v6966_v55 = vrot.slane %v6964_v28, 5  ;;  %v6969_v32 = vshrl.u32 %v16866_v51, 16  ;;  %v6933_v58 = vsel %vm14294_vm13, %v6928_v13, %v6932_v19  ;;  %18979 = vst [vmem:[#allocation4_spill] sm:$0xff] %v16889_v10  ;;  %v16891_v52 = vld [vmem:[#allocation2 + $0x84] sm:$0xf] }
 0x4b3   : > { %v6951_v54 = vor.u32 %v6950_v4, %v6947_v34  ;;  %v6972_v27 = vshll.u32 %v16866_v51, 16  ;;  %v6978_v21 = vshll.u32 %v16871_v37, 16  ;;  %v6943_v57 = vsel %vm14294_vm13, %v6938_v12, %v6942_v35  ;;  %v16895_v25 = vld [vmem:[#allocation2 + $0x88] sm:$0xf] }
 0x4b4   : > { %13133 = vmatmul.mubr.msk.bf16.gmra.mrb[8].mxu1 %vm1532_vm12, %v12104_v43  ;;  %v6961_v38 = vor.u32 %v6960_v26, %v6956_v47  ;;  %v6971_v62 = vrot.slane %v6969_v32, 4  ;;  %v6982_v50 = vshrl.u32 %v16871_v37, 16  ;;  %v12106_v39 = vcombine.low %v6933_v58, %v6943_v57 }
 0x4b5   : > { %13136 = vmatprep.mubr.msk.bf16.mxu1 %vm1532_vm12, %v12105_v53  ;;  %v6952_v31 = vrot.slane %v6951_v54, 4  ;;  %v6974_v40 = vrot.slane %v6972_v27, 5  ;;  %v6980_v19 = vrot.slane %v6978_v21, 5  ;;  %v6988_v43 = vshll.u32 %v16873_v33, 16  ;;  %v16903_v21 = vld [vmem:[#allocation2 + $0x8c] sm:$0x1] }
 0x4b6   : > { %v6962_v11 = vrot.slane %v6961_v38, 4  ;;  %v6984_v9 = vrot.slane %v6982_v50, 4  ;;  %v6993_v35 = vshrl.u32 %v16875_v16, 16  ;;  %v6996_v28 = vshll.u32 %v16875_v16, 16  ;;  %18980 = vst [vmem:[#allocation11_spill] sm:$0xff] %v16903_v21 }
 0x4b7   : > { %v6957_v48 = vsel %vm14294_vm13, %v6952_v31, %v6956_v47  ;;  %v6975_v34 = vor.u32 %v6974_v40, %v6971_v62  ;;  %v7002_v53 = vshll.u32 %v16878_v49, 16  ;;  %v6990_v12 = vrot.slane %v6988_v43, 5 }
 0x4b8   : > { %v6967_v13 = vsel %vm14294_vm13, %v6962_v11, %v6966_v55  ;;  %v6985_v4 = vor.u32 %v6984_v9, %v6980_v19  ;;  %v6995_v26 = vrot.slane %v6993_v35, 4  ;;  %v6998_v54 = vrot.slane %v6996_v28, 5  ;;  %v16912_v11 = vld [vmem:[#allocation2 + $0x90] sm:$0xf] }
 0x4b9   : > { %v12107_v32 = vcombine.low %v6957_v48, %v6967_v13  ;;  %v6976_v58 = vrot.slane %v6975_v34, 4  ;;  %v7004_v27 = vrot.slane %v7002_v53, 5  ;;  %v7006_v47 = vshrl.u32 %v16878_v49, 16  ;;  %v16917_v34 = vld [vmem:[#allocation2 + $0x94] sm:$0xf] }
 0x4ba   : > { %v6986_v57 = vrot.slane %v6985_v4, 4  ;;  %v7012_v38 = vshll.u32 %v16889_v10, 16  ;;  %v7017_v62 = vshrl.u32 %v16891_v52, 16  ;;  %v6999_v55 = vor.u32 %v6998_v54, %v6995_v26 }
 0x4bb   : > { %v6981_v50 = vsel %vm14294_vm13, %v6976_v58, %v6980_v19  ;;  %v7020_v31 = vshll.u32 %v16891_v52, 16  ;;  %v7026_v40 = vshll.u32 %v16895_v25, 16  ;;  %v7008_v43 = vrot.slane %v7006_v47, 4 }
 0x4bc   : > { %13137 = vmatmul.mubr.msk.bf16.gmra.mrb[12].mxu1 %vm1532_vm12, %v12106_v39  ;;  %v6991_v9 = vsel %vm14294_vm13, %v6986_v57, %v6990_v12  ;;  %v7014_v35 = vrot.slane %v7012_v38, 5  ;;  %v7019_v48 = vrot.slane %v7017_v62, 4  ;;  %v7000_v28 = vrot.slane %v6999_v55, 4  ;;  %v16925_v57 = vld [vmem:[#allocation2 + $0x98] sm:$0x1] }
 0x4bd   : > { %13140 = vmatprep.mubr.msk.bf16.mxu1 %vm1532_vm12, %v12107_v32  ;;  %v12108_v19 = vcombine.low %v6981_v50, %v6991_v9  ;;  %v7022_v53 = vrot.slane %v7020_v31, 5  ;;  %v7028_v13 = vrot.slane %v7026_v40, 5  ;;  %v7009_v4 = vor.u32 %v7008_v43, %v7004_v27  ;;  %18981 = vst [vmem:[#allocation12_spill] sm:$0xff] %v16925_v57  ;;  %v16929_v38 = vld [vmem:[#allocation2 + $0x9c] sm:$0xf] }
 0x4be   : > { %v7030_v26 = vshrl.u32 %v16895_v25, 16  ;;  %v7036_v58 = vshll.u32 %v16903_v21, 16  ;;  %v7041_v39 = vshrl.u32 %v16912_v11, 16  ;;  %v7005_v12 = vsel %vm14294_vm13, %v7000_v28, %v7004_v27  ;;  %v16959_v21 = vld [vmem:[#allocation2 + $0xb4] sm:$0xf] }
 0x4bf   : > { %v7023_v54 = vor.u32 %v7022_v53, %v7019_v48  ;;  %v7044_v47 = vshll.u32 %v16912_v11, 16  ;;  %v7050_v32 = vshll.u32 %v16917_v34, 16  ;;  %v7010_v62 = vrot.slane %v7009_v4, 4  ;;  %v16935_v53 = vld [vmem:[#allocation2 + $0xa0] sm:$0xf] }
 0x4c0   : > { %v7032_v50 = vrot.slane %v7030_v26, 4  ;;  %v7038_v55 = vrot.slane %v7036_v58, 5  ;;  %v7043_v31 = vrot.slane %v7041_v39, 4  ;;  %v7054_v56 = vshrl.u32 %v16917_v34, 16  ;;  %v16940_v39 = vld [vmem:[#allocation2 + $0xa8] sm:$0xf] }
 0x4c1   : > { %v7024_v40 = vrot.slane %v7023_v54, 4  ;;  %v7046_v9 = vrot.slane %v7044_v47, 5  ;;  %v7052_v43 = vrot.slane %v7050_v32, 5  ;;  %v7015_v27 = vsel %vm14294_vm13, %v7010_v62, %v7014_v35  ;;  %v16943_v35 = vld [vmem:[#allocation2 + $0xa4] sm:$0x1] }
 0x4c2   : > { %v7033_v48 = vor.u32 %v7032_v50, %v7028_v13  ;;  %v7060_v28 = vshll.u32 %v16925_v57, 16  ;;  %v7065_v22 = vshrl.u32 %v16929_v38, 16  ;;  %v12109_v2 = vcombine.low %v7005_v12, %v7015_v27  ;;  %18982 = vst [vmem:[#allocation6_spill] sm:$0xff] %v16943_v35 }
 0x4c3   : > { %v7029_v4 = vsel %vm14294_vm13, %v7024_v40, %v7028_v13  ;;  %v7047_v26 = vor.u32 %v7046_v9, %v7043_v31  ;;  %v7056_v58 = vrot.slane %v7054_v56, 4  ;;  %v7068_v62 = vshll.u32 %v16929_v38, 16 }
 0x4c4   : > { %13141 = vmatmul.mubr.msk.bf16.gmra.mrb[16].mxu1 %vm1532_vm12, %v12108_v19  ;;  %v7034_v54 = vrot.slane %v7033_v48, 4  ;;  %v7062_v47 = vrot.slane %v7060_v28, 5  ;;  %v7067_v32 = vrot.slane %v7065_v22, 4  ;;  %v7074_v27 = vshll.u32 %v16935_v53, 16  ;;  %v16951_v19 = vld [vmem:[#allocation2 + $0xac] sm:$0xf] }
 0x4c5   : > { %13144 = vmatprep.mubr.msk.bf16.mxu1 %vm1532_vm12, %v12109_v2  ;;  %v7048_v50 = vrot.slane %v7047_v26, 4  ;;  %v7057_v12 = vor.u32 %v7056_v58, %v7052_v43  ;;  %v7078_v13 = vshrl.u32 %v16935_v53, 16  ;;  %v7070_v31 = vrot.slane %v7068_v62, 5  ;;  %v16957_v28 = vld [vmem:[#allocation2 + $0xb0] sm:$0x1] }
 0x4c6   : > { %v7039_v56 = vsel %vm14294_vm13, %v7034_v54, %v7038_v55  ;;  %v7089_v40 = vshrl.u32 %v16940_v39, 16  ;;  %v7076_v48 = vrot.slane %v7074_v27, 5  ;;  %v7084_v2 = vshll.u32 %v16943_v35, 16  ;;  %18983 = vst [vmem:[#allocation7_spill] sm:$0xff] %v16957_v28 }
 0x4c7   : > { %v7053_v22 = vsel %vm14294_vm13, %v7048_v50, %v7052_v43  ;;  %v7058_v9 = vrot.slane %v7057_v12, 4  ;;  %v12110_v26 = vcombine.low %v7029_v4, %v7039_v56  ;;  %v7071_v58 = vor.u32 %v7070_v31, %v7067_v32  ;;  %v16967_v4 = vld [vmem:[#allocation2 + $0xb8] sm:$0xf] }
 0x4c8   : > { %v7080_v36 = vrot.slane %v7078_v13, 4  ;;  %v7091_v57 = vrot.slane %v7089_v40, 4  ;;  %v7092_v54 = vshll.u32 %v16940_v39, 16  ;;  %v7098_v62 = vshll.u32 %v16951_v19, 16 }
 0x4c9   : > { %v7063_v55 = vsel %vm14294_vm13, %v7058_v9, %v7062_v47  ;;  %v7102_v43 = vshrl.u32 %v16951_v19, 16  ;;  %v7072_v12 = vrot.slane %v7071_v58, 4  ;;  %v7108_v35 = vshll.u32 %v16957_v28, 16 }
 0x4ca   : > { %v12111_v50 = vcombine.low %v7053_v22, %v7063_v55  ;;  %v7081_v27 = vor.u32 %v7080_v36, %v7076_v48  ;;  %v7094_v32 = vrot.slane %v7092_v54, 5  ;;  %v7100_v13 = vrot.slane %v7098_v62, 5  ;;  %v16973_v36 = vld [vmem:[#allocation2 + $0xbc] sm:$0x1] }
 0x4cb   : > { %v7104_v56 = vrot.slane %v7102_v43, 4  ;;  %v7113_v31 = vshrl.u32 %v16959_v21, 16  ;;  %v7086_v47 = vrot.slane %v7084_v2, 5  ;;  %v7110_v40 = vrot.slane %v7108_v35, 5 }
 0x4cc   : > { %13145 = vmatmul.mubr.msk.bf16.gmra.mrb[20].mxu1 %vm1532_vm12, %v12110_v26  ;;  %v7116_v9 = vshll.u32 %v16959_v21, 16  ;;  %v7095_v22 = vor.u32 %v7094_v32, %v7091_v57  ;;  %v7122_v28 = vshll.u32 %v16967_v4, 16  ;;  %v7077_v54 = vsel %vm14294_vm13, %v7072_v12, %v7076_v48 }
 0x4cd   : > { %13148 = vmatprep.mubr.msk.bf16.mxu1 %vm1532_vm12, %v12111_v50  ;;  %v7105_v58 = vor.u32 %v7104_v56, %v7100_v13  ;;  %v7115_v55 = vrot.slane %v7113_v31, 4  ;;  %v7126_v43 = vshrl.u32 %v16967_v4, 16  ;;  %v7082_v26 = vrot.slane %v7081_v27, 4 }
 0x4ce   : > { %v7118_v62 = vrot.slane %v7116_v9, 5  ;;  %v7096_v2 = vrot.slane %v7095_v22, 4  ;;  %v7124_v10 = vrot.slane %v7122_v28, 5  ;;  %v7132_v57 = vshll.u32 %v16973_v36, 16  ;;  %v7705_v9 = vld [vmem:[#allocation2 + $0xb4] sm:$0xe] }
 0x4cf   : > { %v7106_v35 = vrot.slane %v7105_v58, 4  ;;  %v7128_v42 = vrot.slane %v7126_v43, 4  ;;  %v7087_v50 = vsel %vm14294_vm13, %v7082_v26, %v7086_v47  ;;  %v12135_v28 = vcombine.low %v16767_v41, %v16780_v15  ;;  %v7701_v58 = vld [vmem:[#allocation2 + $0x84] sm:$0xe] }
 0x4d0   : > { %v7119_v33 = vor.u32 %v7118_v62, %v7115_v55  ;;  %v7101_v32 = vsel %vm14294_vm13, %v7096_v2, %v7100_v13  ;;  %v12112_v12 = vcombine.low %v7077_v54, %v7087_v50  ;;  %v7134_v47 = vrot.slane %v7132_v57, 5  ;;  %v7694_v57 = vld [vmem:[#allocation2 + $0x30] sm:$0xe]  ;;  %v7696_v62 = vld [vmem:[#allocation2 + $0x48] sm:$0xe] }
 0x4d1   : > { %v7111_v48 = vsel %vm14294_vm13, %v7106_v35, %v7110_v40  ;;  %v7129_v27 = vor.u32 %v7128_v42, %v7124_v10  ;;  %v18985_v55 = vld [vmem:[#allocation10_spill] sm:$0xff]  ;;  %v7703_v42 = vld [vmem:[#allocation2 + $0x9c] sm:$0xe]  ;;  %v6431_v13 = vld [vmem:[#allocation2 + $0xc0] sm:$0x2] }
 0x4d2   : > { %v12113_v56 = vcombine.low %v7101_v32, %v7111_v48  ;;  %v7120_v31 = vrot.slane %v7119_v33, 4  ;;  %v12131_v32 = vcombine.low %v16718_v46, %v16680_v1  ;;  %v7695_v48 = vld [vmem:[#allocation2 + $0x3c] sm:$0xe]  ;;  %v12133_v1 = vcombine.low %v16728_v5, %v16734_v63 }
 0x4d3   : > { %v7130_v2 = vrot.slane %v7129_v27, 4  ;;  %v7771_v27 = vrot.slane %v16788_v7, 5  ;;  %v18988_v40 = vld [vmem:[#allocation11_spill] sm:$0xff] }
 0x4d4   : > { %13149 = vmatmul.mubr.msk.bf16.gmra.mrb[24].mxu1 %vm1532_vm12, %v12112_v12  ;;  %v7125_v26 = vsel %vm14294_vm13, %v7120_v31, %v7124_v10  ;;  %v12167_v12 = vrot.slane %v7694_v57, 9  ;;  %v12132_v10 = vcombine.low %v16769_v44, %v16698_v0  ;;  %v7949_v31 = vsel %vm1581_vm0, %v16814_v30, 0  ;;  %v7697_v44 = vld [vmem:[#allocation2 + $0x54] sm:$0xe] }
 0x4d5   : > { %13152 = vmatprep.mubr.msk.bf16.mxu1 %vm1532_vm12, %v12113_v56  ;;  %v7135_v35 = vsel %vm14294_vm13, %v7130_v2, %v7134_v47  ;;  %v7768_v56 = vrot.slane %v16780_v15, 5  ;;  %v12168_v47 = vrot.slane %v7695_v48, 9  ;;  %v12134_v2 = vcombine.low %v16756_v14, %v16751_v20  ;;  %v7698_v48 = vld [vmem:[#allocation2 + $0x60] sm:$0xe]  ;;  %v18990_v14 = vld [vmem:[#allocation6_spill] sm:$0xff] }
 0x4d6   : > { %v12114_v50 = vcombine.low %v7125_v26, %v7135_v35  ;;  %v7775_v26 = vrot.slane %v16801_v18, 5  ;;  %v7778_v35 = vrot.slane %v16803_v59, 5  ;;  %v12169_v57 = vrot.slane %v7696_v62, 9  ;;  %v17061_v59 = vld [vmem:[%s18803_s2 + $0x6] sm:$0x3] }
 0x4d7   : > { %v7770_v46 = vrot.slane %v7768_v56, 4  ;;  %v7782_v0 = vrot.slane %v16820_v61, 5  ;;  %v17035_v30 = vsel %vm14852_vm1, %v12167_v12, %v7768_v56  ;;  %v7785_v12 = vrot.slane %v16826_v29, 5 }
 0x4d8   : > { %v17043_v7 = vsel %vm14852_vm1, %v12168_v47, %v7775_v26  ;;  %v7792_v47 = vrot.slane %v16843_v8, 5  ;;  %v7702_v8 = vld [vmem:[#allocation2 + $0x90] sm:$0xe] }
 0x4d9   : > { %v17039_v5 = vsel %vm14852_vm1, %v7770_v46, %v7771_v27  ;;  %v17049_v62 = vsel %vm14852_vm1, %v12169_v57, %v7782_v0  ;;  %v7784_v43 = vrot.slane %v7782_v0, 4  ;;  %v12170_v27 = vrot.slane %v7697_v44, 9  ;;  %v7700_v44 = vld [vmem:[#allocation2 + $0x78] sm:$0xe] }
 0x4da   : > { %v7789_v46 = vrot.slane %v16839_v45, 5  ;;  %v7796_v0 = vrot.slane %v16855_v24, 5  ;;  %v7799_v57 = vrot.slane %v18985_v55, 5  ;;  %v18986_v55 = vld [vmem:[#allocation3_spill] sm:$0xff] }
 0x4db   : > { %v17067_v29 = vsel %vm14852_vm1, %v7784_v43, %v7785_v12  ;;  %v7803_v12 = vrot.slane %v16871_v37, 5 }
 0x4dc   : > { %13153 = vmatmul.mubr.msk.bf16.gmra.mrb[28].mxu1 %vm1532_vm12, %v12114_v50  ;;  %v7791_v54 = vrot.slane %v7789_v46, 4 }
 0x4dd   : > { %13158 = vmatprep.mubr.msk.bf16.mxu1 %vm1532_vm12, %v12131_v32  ;;  %v7777_v32 = vrot.slane %v7775_v26, 4  ;;  %v7699_v26 = vld [vmem:[#allocation2 + $0x6c] sm:$0xe]  ;;  %v7805_v33 = vrot.slane %v7803_v12, 4 }
 0x4df   : > { %v17054_v56 = vsel %vm14852_vm1, %v7777_v32, %v7778_v35  ;;  %v12171_v35 = vrot.slane %v7698_v48, 9  ;;  %v17075_v32 = vsel %vm14852_vm1, %v12170_v27, %v7789_v46  ;;  %v7798_v48 = vrot.slane %v7796_v0, 4 }
 0x4e0   : > { %v17088_v27 = vsel %vm14852_vm1, %v7791_v54, %v7792_v47  ;;  %v12173_v46 = vrot.slane %v7700_v44, 9 }
 0x4e1   : > { %v17081_v43 = vsel %vm14852_vm1, %v12171_v35, %v7796_v0 }
 0x4e4   : > { %13159 = vmatmul.mubr.msk.bf16.vlgmr.msra.gmra.mrb[0].mxu1 %vm1532_vm12, %v12132_v10  ;;  %v12172_v10 = vrot.slane %v7699_v26, 9  ;;  %v17096_v26 = vsel %vm14852_vm1, %v7798_v48, %v7799_v57  ;;  %v12174_v48 = vrot.slane %v7701_v58, 9  ;;  %v18989_v58 = vld [vmem:[#allocation12_spill] sm:$0xff] }
 0x4e5   : > { %13191 = vmatpush3.bf16.msra.mxu1 %v7949_v31  ;;  %13162 = vmatprep.mubr.msk.bf16.mxu1 %vm1532_vm12, %v12133_v1  ;;  %v7806_v31 = vrot.slane %v18986_v55, 5  ;;  %v7810_v1 = vrot.slane %v16878_v49, 5  ;;  %v18987_v55 = vld [vmem:[#allocation4_spill] sm:$0xff]  ;;  %v7827_v22 = vrot.slane %v18989_v58, 5 }
 0x4e6   : > { %13952 = vmatprep.subr.msk.bf16.mxu1 %vm1581_vm0, %v17061_v59  ;;  %v17100_v0 = vsel %vm14852_vm1, %v12172_v10, %v7803_v12  ;;  %v7813_v35 = vrot.slane %v18987_v55, 5  ;;  %v7817_v10 = vrot.slane %v16895_v25, 5  ;;  %v7820_v12 = vrot.slane %v18988_v40, 5  ;;  %v7704_v55 = vld [vmem:[#allocation2 + $0xa8] sm:$0xe] }
 0x4e7   : > { %v17106_v47 = vsel %vm14852_vm1, %v12173_v46, %v7810_v1  ;;  %v7812_v44 = vrot.slane %v7810_v1, 4  ;;  %v17111_v57 = vsel %vm14852_vm1, %v7805_v33, %v7806_v31  ;;  %v12175_v46 = vrot.slane %v7702_v8, 9 }
 0x4e8   : > { %v7824_v1 = vrot.slane %v16917_v34, 5  ;;  %v7819_v31 = vrot.slane %v7817_v10, 4  ;;  %v17131_v40 = vsel %vm14852_vm1, %v12174_v48, %v7817_v10  ;;  %v12177_v33 = vrot.slane %v7704_v55, 9 }
 0x4e9   : > { %v17119_v54 = vsel %vm14852_vm1, %v7812_v44, %v7813_v35  ;;  %v12176_v35 = vrot.slane %v7703_v42, 9  ;;  %v7831_v44 = vrot.slane %v16935_v53, 5  ;;  %v7838_v48 = vrot.slane %v16951_v19, 5 }
 0x4ea   : > { %v7826_v8 = vrot.slane %v7824_v1, 4  ;;  %v17140_v58 = vsel %vm14852_vm1, %v7819_v31, %v7820_v12  ;;  %v17148_v10 = vsel %vm14852_vm1, %v12175_v46, %v7824_v1  ;;  %v18991_v31 = vld [vmem:[#allocation7_spill] sm:$0xff]  ;;  %v12178_v46 = vrot.slane %v7705_v9, 9 }
 0x4eb   : > { %v7833_v15 = vrot.slane %v7831_v44, 4  ;;  %v17158_v12 = vsel %vm14852_vm1, %v12176_v35, %v7831_v44  ;;  %v7840_v55 = vrot.slane %v7838_v48, 4  ;;  %v7845_v1 = vrot.slane %v16967_v4, 5 }
 0x4ec   : > { %13163 = vmatmul.mubr.msk.bf16.gmra.mrb[4].mxu1 %vm1532_vm12, %v12134_v2  ;;  %v7834_v2 = vrot.slane %v18990_v14, 5  ;;  %v17152_v41 = vsel %vm14852_vm1, %v7826_v8, %v7827_v22  ;;  %v7841_v14 = vrot.slane %v18991_v31, 5  ;;  %v7848_v22 = vrot.slane %v16973_v36, 5 }
 0x4ed   : > { %13166 = vmatprep.mubr.msk.bf16.mxu1 %vm1532_vm12, %v12135_v28  ;;  %v17171_v28 = vsel %vm14852_vm1, %v12177_v33, %v7838_v48  ;;  %v12078_v44 = vrot.slane %v6431_v13, 9  ;;  %v7847_v9 = vrot.slane %v7845_v1, 4  ;;  %v18993_v8 = vcombine.low %v16792_v17, %v16801_v18 }
 0x4ee   : > { %v17163_v42 = vsel %vm14852_vm1, %v7833_v15, %v7834_v2  ;;  %v17175_v35 = vsel %vm14852_vm1, %v7840_v55, %v7841_v14  ;;  %v6571_v15 = vld [vmem:[#allocation2 + $0xc0] sm:$0x1]  ;;  %v17187_v33 = vsel %vm14852_vm1, %v12178_v46, %v7845_v1  ;;  %v18994_v48 = vcombine.low %v16809_v6, %v16820_v61  ;;  %v17430_v55 = vld [vmem:[#allocation2 + $0xac] sm:$0xf] }
 0x4ef   : > { %v6572_v36 = vsel %vm14192_vm8, %v12078_v44, %v6571_v15  ;;  %v17191_v13 = vsel %vm14852_vm1, %v7847_v9, %v7848_v22  ;;  %v18995_v17 = vcombine.low %v16833_v3, %v16839_v45  ;;  %v18996_v18 = vcombine.low %v16849_v60, %v16855_v24  ;;  %v14075_v45 = vld [vmem:[#allocation2 + $0x4] sm:$0xf]  ;;  %v7690_v24 = vld [vmem:[#allocation2] sm:$0xe]  ;;  %v7691_v22 = vld [vmem:[#allocation2 + $0xc] sm:$0xe] }
 0x4f0   : > { %6573 = vst [vmem:[#allocation2 + $0xc0] sm:$0x1] %v6572_v36  ;;  %v18997_v14 = vcombine.low %v16866_v51, %v16871_v37  ;;  %v18998_v6 = vcombine.low %v16875_v16, %v16878_v49  ;;  %v18999_v61 = vcombine.low %v16891_v52, %v16895_v25  ;;  %v19000_v3 = vcombine.low %v16912_v11, %v16917_v34  ;;  %v19001_v51 = vld [vmem:[#allocation13_spill] sm:$0xff]  ;;  %v14076_v34 = vld [vmem:[#allocation2 + $0x10] sm:$0xf] }
 0x4f1   : > { %v7740_v60 = vrot.slane %v14075_v45, 5  ;;  %v7743_v37 = vrot.slane %v19001_v51, 5  ;;  %v19002_v16 = vcombine.low %v16929_v38, %v16935_v53  ;;  %v19003_v49 = vcombine.low %v16940_v39, %v16951_v19  ;;  %v14077_v53 = vld [vmem:[#allocation2 + $0x14] sm:$0x1]  ;;  %v7692_v9 = vld [vmem:[#allocation2 + $0x18] sm:$0xe] }
 0x4f2   : > { %v12163_v52 = vrot.slane %v7690_v24, 9  ;;  %v7747_v46 = vrot.slane %v14076_v34, 5  ;;  %v7754_v38 = vrot.slane %v16734_v63, 5  ;;  %v19004_v39 = vcombine.low %v16959_v21, %v16967_v4  ;;  %v19005_v19 = vld [vmem:[#allocation14_spill] sm:$0xff]  ;;  %v17258_v51 = vld [vmem:[%s18803_s2 + $0x8] sm:$0x3] }
 0x4f3   : > { %v7742_v25 = vrot.slane %v7740_v60, 4  ;;  %v7757_v15 = vrot.slane %v19005_v19, 5  ;;  %v12164_v31 = vrot.slane %v7691_v22, 9  ;;  %v7761_v21 = vrot.slane %v16751_v20, 5  ;;  %v17281_v34 = vld [vmem:[#allocation2 + $0x28] sm:$0xf] }
 0x4f4   : > { %13167 = vmatmul.mubr.msk.bf16.gmra.mrb[8].mxu1 %vm1532_vm12, %v18993_v8  ;;  %v7741_v1 = vsel %vm14852_vm1, %v12163_v52, %v7740_v60  ;;  %v7750_v8 = vrot.slane %v14077_v53, 5  ;;  %v7749_v36 = vrot.slane %v7747_v46, 4  ;;  %v19006_v60 = vld [vmem:[#allocation8_spill] sm:$0xff]  ;;  %v19007_v52 = vcombine.low %v17035_v30, %v17039_v5  ;;  %v17285_v22 = vld [vmem:[#allocation2 + $0x34] sm:$0xf] }
 0x4f5   : > { %13170 = vmatprep.mubr.msk.bf16.mxu1 %vm1532_vm12, %v18994_v48  ;;  %v7744_v11 = vsel %vm14852_vm1, %v7742_v25, %v7743_v37  ;;  %v12165_v48 = vrot.slane %v7692_v9, 9  ;;  %v7764_v24 = vrot.slane %v19006_v60, 5  ;;  %v7763_v37 = vrot.slane %v7761_v21, 4  ;;  %v17287_v30 = vld [vmem:[#allocation2 + $0x38] sm:$0x1] }
 0x4f6   : > { %v12180_v44 = vcombine.low %v7741_v1, %v7744_v11  ;;  %v7751_v63 = vsel %vm14852_vm1, %v7749_v36, %v7750_v8  ;;  %v19008_v25 = vcombine.low %v17043_v7, %v17054_v56  ;;  %v19009_v11 = vcombine.low %v17049_v62, %v17067_v29  ;;  %v17283_v1 = vld [vmem:[#allocation2 + $0x2c] sm:$0x1]  ;;  %v17289_v5 = vld [vmem:[#allocation2 + $0x40] sm:$0xf]  ;;  %v9231_v56 = vld [vmem:[#allocation2 + $0x30] sm:$0xe] }
 0x4f7   : > { %v9308_v7 = vrot.slane %v17281_v34, 5  ;;  %v17292_v53 = vld [vmem:[#allocation2 + $0x44] sm:$0x1]  ;;  %v17294_v62 = vld [vmem:[#allocation2 + $0x4c] sm:$0xf]  ;;  %v19010_v19 = vcombine.low %v17075_v32, %v17088_v27  ;;  %v9318_v36 = vrot.slane %v17287_v30, 5 }
 0x4f8   : > { %v9232_v29 = vld [vmem:[#allocation2 + $0x3c] sm:$0xe]  ;;  %v17296_v8 = vld [vmem:[#allocation2 + $0x50] sm:$0x1] }
 0x4f9   : > { %v9310_v9 = vrot.slane %v9308_v7, 4  ;;  %v12282_v27 = vrot.slane %v9232_v29, 9 }
 0x4fc   : > { %13171 = vmatmul.mubr.msk.bf16.gmra.mrb[12].mxu1 %vm1532_vm12, %v18995_v17  ;;  %v7756_v17 = vrot.slane %v7754_v38, 4 }
 0x4fd   : > { %13174 = vmatprep.mubr.msk.bf16.mxu1 %vm1532_vm12, %v18996_v18 }
 0x4fe   : > { %v7758_v18 = vsel %vm14852_vm1, %v7756_v17, %v7757_v15  ;;  %v12281_v15 = vrot.slane %v9231_v56, 9  ;;  %v19011_v17 = vcombine.low %v17081_v43, %v17096_v26  ;;  %v17418_v43 = vld [vmem:[#allocation2 + $0xa4] sm:$0x1] }
 0x504   : > { %13175 = vmatmul.mubr.msk.bf16.gmra.mrb[16].mxu1 %vm1532_vm12, %v18997_v14  ;;  %v7748_v14 = vsel %vm14852_vm1, %v12164_v31, %v7747_v46  ;;  %v9230_v46 = vld [vmem:[#allocation2 + $0x24] sm:$0xe]  ;;  %v9315_v31 = vrot.slane %v17285_v22, 5 }
 0x505   : > { %13178 = vmatprep.mubr.msk.bf16.mxu1 %vm1532_vm12, %v18998_v6  ;;  %v12181_v4 = vcombine.low %v7748_v14, %v7751_v63  ;;  %v8307_v6 = vsel %vm1581_vm0, %v17061_v59, 0  ;;  %v7765_v59 = vsel %vm14852_vm1, %v7763_v37, %v7764_v24  ;;  %v17311_v63 = vld [vmem:[#allocation2 + $0x5c] sm:$0x1]  ;;  %v9322_v14 = vrot.slane %v17289_v5, 5 }
 0x506   : > { %v17330_v26 = vsel %vm14852_vm1, %v12281_v15, %v9315_v31  ;;  %v9329_v37 = vrot.slane %v17294_v62, 5 }
 0x507   : > { %19014 = vst [vmem:[#allocation3_spill] sm:$0xff] %v17330_v26  ;;  %v17337_v60 = vsel %vm14852_vm1, %v12282_v27, %v9322_v14  ;;  %v9324_v24 = vrot.slane %v9322_v14, 4 }
 0x508   : > { %19015 = vst [vmem:[#allocation4_spill] sm:$0xff] %v17337_v60  ;;  %v9331_v29 = vrot.slane %v9329_v37, 4 }
 0x50c   : > { %13179 = vmatmul.mubr.msk.bf16.gmra.mrb[20].mxu1 %vm1532_vm12, %v18999_v61  ;;  %v7755_v61 = vsel %vm14852_vm1, %v12165_v48, %v7754_v38  ;;  %v12280_v38 = vrot.slane %v9230_v46, 9  ;;  %v9233_v48 = vld [vmem:[#allocation2 + $0x48] sm:$0xe]  ;;  %v17348_v46 = vld [vmem:[#allocation2 + $0x7c] sm:$0xf] }
 0x50d   : > { %13182 = vmatprep.mubr.msk.bf16.mxu1 %vm1532_vm12, %v19000_v3  ;;  %v7693_v3 = vld [vmem:[#allocation2 + $0x24] sm:$0xe]  ;;  %v12182_v45 = vcombine.low %v7755_v61, %v7758_v18  ;;  %v9317_v61 = vrot.slane %v9315_v31, 4 }
 0x50e   : > { %v12166_v20 = vrot.slane %v7693_v3, 9  ;;  %v17315_v18 = vsel %vm14852_vm1, %v12280_v38, %v9308_v7  ;;  %v9325_v3 = vrot.slane %v17292_v53, 5  ;;  %v9239_v38 = vld [vmem:[#allocation2 + $0x90] sm:$0xe] }
 0x50f   : > { %19012 = vst [vmem:[#allocation9_spill] sm:$0xff] %v17315_v18 }
 0x510   : > { %v17354_v7 = vsel %vm14852_vm1, %v9324_v24, %v9325_v3  ;;  %v19021_v3 = vcombine.low %v17100_v0, %v17111_v57  ;;  %v17381_v24 = vld [vmem:[#allocation2 + $0x8c] sm:$0x1]  ;;  %v17394_v0 = vld [vmem:[#allocation2 + $0x94] sm:$0xf]  ;;  %v17396_v57 = vld [vmem:[#allocation2 + $0x98] sm:$0x1] }
 0x511   : > { %19017 = vst [vmem:[#allocation12_spill] sm:$0xff] %v17354_v7 }
 0x514   : > { %13183 = vmatmul.mubr.msk.bf16.gmra.mrb[24].mxu1 %vm1532_vm12, %v19002_v16  ;;  %v7762_v16 = vsel %vm14852_vm1, %v12166_v20, %v7761_v21  ;;  %v9234_v21 = vld [vmem:[#allocation2 + $0x54] sm:$0xe]  ;;  %v12283_v20 = vrot.slane %v9233_v48, 9  ;;  %v9339_v48 = vrot.slane %v17311_v63, 5 }
 0x515   : > { %13186 = vmatprep.mubr.msk.bf16.mxu1 %vm1532_vm12, %v19003_v49  ;;  %v12183_v49 = vcombine.low %v7762_v16, %v7765_v59  ;;  %v17340_v59 = vld [vmem:[#allocation2 + $0x74] sm:$0x1]  ;;  %v17344_v16 = vsel %vm14852_vm1, %v9317_v61, %v9318_v36  ;;  %v9237_v61 = vld [vmem:[#allocation2 + $0x78] sm:$0xe] }
 0x516   : > { %19016 = vst [vmem:[#allocation11_spill] sm:$0xff] %v17344_v16  ;;  %v17358_v56 = vsel %vm14852_vm1, %v12283_v20, %v9329_v37  ;;  %v9357_v20 = vrot.slane %v17348_v46, 5 }
 0x517   : > { %19018 = vst [vmem:[#allocation6_spill] sm:$0xff] %v17358_v56  ;;  %v8511_v56 = vld [vmem:[#allocation2 + $0x30] sm:$0xf] }
 0x518   : > { %v8623_v26 = vshrl.u32 %v8511_v56, 16 }
 0x51c   : > { %13187 = vmatmul.mubr.msk.bf16.gmra.mrb[28].mxu1 %vm1532_vm12, %v19004_v39  ;;  %v9311_v39 = vrot.slane %v17283_v1, 5 }
 0x51d   : > { %13192 = vmatprep.mubr.msk.bf16.mxu1 %vm1532_vm12, %v12180_v44  ;;  %v17298_v44 = vld [vmem:[#allocation2 + $0x58] sm:$0xf] }
 0x51e   : > { %v17319_v32 = vsel %vm14852_vm1, %v9310_v9, %v9311_v39  ;;  %v9236_v9 = vld [vmem:[#allocation2 + $0x6c] sm:$0xe]  ;;  %v17360_v39 = vld [vmem:[#allocation2 + $0x80] sm:$0x1] }
 0x51f   : > { %19013 = vst [vmem:[#allocation10_spill] sm:$0xff] %v17319_v32  ;;  %v8626_v32 = vshll.u32 %v8511_v56, 16 }
 0x524   : > { %13193 = vmatmul.mubr.msk.bf16.vlgmr.msra.gmra.mrb[0].mxu1 %vm1532_vm12, %v12181_v4  ;;  %v17322_v4 = vld [vmem:[#allocation2 + $0x64] sm:$0xf] }
 0x525   : > { %13225 = vmatpush3.bf16.msra.mxu1 %v8307_v6  ;;  %13196 = vmatprep.mubr.msk.bf16.mxu1 %vm1532_vm12, %v12182_v45  ;;  %v17324_v6 = vld [vmem:[#allocation2 + $0x68] sm:$0x1]  ;;  %v17333_v45 = vld [vmem:[#allocation2 + $0x70] sm:$0xf]  ;;  %v9343_v14 = vrot.slane %v17322_v4, 5 }
 0x526   : > { %13953 = vmatprep.subr.msk.bf16.mxu1 %vm1581_vm0, %v17258_v51  ;;  %v8752_v18 = vshll.u32 %v17333_v45, 16 }
 0x52c   : > { %13197 = vmatmul.mubr.msk.bf16.gmra.mrb[4].mxu1 %vm1532_vm12, %v12183_v49  ;;  %v9332_v49 = vrot.slane %v17296_v8, 5 }
 0x52d   : > { %13200 = vmatprep.mubr.msk.bf16.mxu1 %vm1532_vm12, %v19007_v52  ;;  %v12284_v52 = vrot.slane %v9234_v21, 9  ;;  %v9346_v21 = vrot.slane %v17324_v6, 5 }
 0x534   : > { %13201 = vmatmul.mubr.msk.bf16.gmra.mrb[8].mxu1 %vm1532_vm12, %v19008_v25  ;;  %v9336_v25 = vrot.slane %v17298_v44, 5 }
 0x535   : > { %13204 = vmatprep.mubr.msk.bf16.mxu1 %vm1532_vm12, %v19009_v11  ;;  %v9235_v11 = vld [vmem:[#allocation2 + $0x60] sm:$0xe] }
 0x536   : > { %v17368_v31 = vsel %vm14852_vm1, %v12284_v52, %v9336_v25  ;;  %v9338_v36 = vrot.slane %v9336_v25, 4  ;;  %v12285_v27 = vrot.slane %v9235_v11, 9  ;;  %v9350_v52 = vrot.slane %v17333_v45, 5  ;;  %v9238_v25 = vld [vmem:[#allocation2 + $0x84] sm:$0xe] }
 0x537   : > { %19019 = vst [vmem:[#allocation7_spill] sm:$0xff] %v17368_v31  ;;  %v19023_v11 = vcombine.low %v17106_v47, %v17119_v54  ;;  %v12288_v15 = vrot.slane %v9238_v25, 9  ;;  %v17432_v25 = vld [vmem:[#allocation2 + $0xb0] sm:$0x1]  ;;  %v17447_v31 = vld [vmem:[#allocation2 + $0xb8] sm:$0xf] }
 0x538   : > { %v17387_v37 = vsel %vm14852_vm1, %v9338_v36, %v9339_v48  ;;  %v17402_v36 = vsel %vm14852_vm1, %v12285_v27, %v9343_v14  ;;  %v9353_v48 = vrot.slane %v17340_v59, 5  ;;  %v9352_v47 = vrot.slane %v9350_v52, 4 }
 0x539   : > { %19022 = vst [vmem:[#allocation13_spill] sm:$0xff] %v17387_v37  ;;  %19024 = vst [vmem:[#allocation14_spill] sm:$0xff] %v17402_v36  ;;  %v9360_v27 = vrot.slane %v17360_v39, 5  ;;  %v9374_v36 = vrot.slane %v17396_v57, 5  ;;  %v9241_v37 = vld [vmem:[#allocation2 + $0xa8] sm:$0xe] }
 0x53c   : > { %13205 = vmatmul.mubr.msk.bf16.gmra.mrb[12].mxu1 %vm1532_vm12, %v19010_v19  ;;  %v17362_v19 = vld [vmem:[#allocation2 + $0x88] sm:$0xf] }
 0x53d   : > { %13208 = vmatprep.mubr.msk.bf16.mxu1 %vm1532_vm12, %v19011_v17  ;;  %v17373_v17 = vsel %vm14852_vm1, %v9331_v29, %v9332_v49  ;;  %v12286_v49 = vrot.slane %v9236_v9, 9  ;;  %v9345_v9 = vrot.slane %v9343_v14, 4  ;;  %v9364_v14 = vrot.slane %v17362_v19, 5 }
 0x53e   : > { %19020 = vst [vmem:[#allocation5_spill] sm:$0xff] %v17373_v17 }
 0x53f   : > { %v17409_v54 = vsel %vm14852_vm1, %v12286_v49, %v9350_v52  ;;  %v17414_v29 = vsel %vm14852_vm1, %v9345_v9, %v9346_v21  ;;  %v9359_v21 = vrot.slane %v9357_v20, 4  ;;  %v9240_v9 = vld [vmem:[#allocation2 + $0x9c] sm:$0xe]  ;;  %v17438_v49 = vsel %vm14852_vm1, %v12288_v15, %v9364_v14 }
 0x540   : > { %19025 = vst [vmem:[#allocation8_spill] sm:$0xff] %v17409_v54  ;;  %19026 = vst [vmem:[#allocation15_spill] sm:$0xff] %v17414_v29  ;;  %v9366_v29 = vrot.slane %v9364_v14, 4  ;;  %v12290_v14 = vrot.slane %v9240_v9, 9  ;;  %v17462_v54 = vld [vmem:[#allocation2 + $0xc4] sm:$0xf]  ;;  %v19033_v9 = vcombine.low %v17148_v10, %v17152_v41 }
 0x541   : > { %19029 = vst [vmem:[#allocation18_spill] sm:$0xff] %v17438_v49  ;;  %v9392_v10 = vrot.slane %v17447_v31, 5  ;;  %v9243_v41 = vld [vmem:[#allocation2 + $0xc0] sm:$0xe] }
 0x544   : > { %13209 = vmatmul.mubr.msk.bf16.gmra.mrb[16].mxu1 %vm1532_vm12, %v19021_v3  ;;  %v17405_v3 = vld [vmem:[#allocation2 + $0xa0] sm:$0xf] }
 0x545   : > { %13212 = vmatprep.mubr.msk.bf16.mxu1 %vm1532_vm12, %v19023_v11  ;;  %v12287_v11 = vrot.slane %v9237_v61, 9  ;;  %v17424_v61 = vsel %vm14852_vm1, %v9352_v47, %v9353_v48  ;;  %v9367_v48 = vrot.slane %v17381_v24, 5  ;;  %v17443_v47 = vsel %vm14852_vm1, %v9359_v21, %v9360_v27  ;;  %v9242_v27 = vld [vmem:[#allocation2 + $0xb4] sm:$0xe]  ;;  %v17460_v21 = vld [vmem:[#allocation2 + $0xbc] sm:$0x1] }
 0x546   : > { %19027 = vst [vmem:[#allocation16_spill] sm:$0xff] %v17424_v61  ;;  %19030 = vst [vmem:[#allocation19_spill] sm:$0xff] %v17443_v47  ;;  %v9378_v61 = vrot.slane %v17405_v3, 5  ;;  %v12292_v49 = vrot.slane %v9242_v27, 9  ;;  %v9394_v27 = vrot.slane %v9392_v10, 4  ;;  %v9395_v17 = vrot.slane %v17460_v21, 5 }
 0x547   : > { %v17428_v52 = vsel %vm14852_vm1, %v12287_v11, %v9357_v20  ;;  %v12289_v20 = vrot.slane %v9239_v38, 9  ;;  %v9371_v11 = vrot.slane %v17394_v0, 5  ;;  %v17453_v15 = vsel %vm14852_vm1, %v9366_v29, %v9367_v48  ;;  %v17471_v48 = vld [vmem:[#allocation2 + $0xc8] sm:$0x1] }
 0x548   : > { %19028 = vst [vmem:[#allocation17_spill] sm:$0xff] %v17428_v52  ;;  %19031 = vst [vmem:[#allocation20_spill] sm:$0xff] %v17453_v15  ;;  %v19032_v38 = vcombine.low %v17131_v40, %v17140_v58  ;;  %v9381_v29 = vrot.slane %v17418_v43, 5  ;;  %v9380_v58 = vrot.slane %v9378_v61, 4  ;;  %v9385_v52 = vrot.slane %v17430_v55, 5 }
 0x549   : > { %v9373_v47 = vrot.slane %v9371_v11, 4  ;;  %v17475_v40 = vsel %vm14852_vm1, %v12289_v20, %v9371_v11  ;;  %v9388_v15 = vrot.slane %v17432_v25, 5  ;;  %v17488_v20 = vsel %vm14852_vm1, %v12290_v14, %v9378_v61 }
 0x54a   : > { %19034 = vst [vmem:[#allocation21_spill] sm:$0xff] %v17475_v40  ;;  %19036 = vst [vmem:[#allocation23_spill] sm:$0xff] %v17488_v20  ;;  %v9387_v11 = vrot.slane %v9385_v52, 4  ;;  %v12293_v61 = vrot.slane %v9243_v41, 9  ;;  %v9399_v14 = vrot.slane %v17462_v54, 5  ;;  %v19042_v41 = vcombine.low %v17158_v12, %v17163_v42 }
 0x54b   : > { %v17480_v2 = vsel %vm14852_vm1, %v9373_v47, %v9374_v36  ;;  %v17511_v36 = vsel %vm14852_vm1, %v12292_v49, %v9392_v10  ;;  %v19046_v42 = vcombine.low %v17187_v33, %v17191_v13  ;;  %v9033_v12 = vsel %vm1581_vm0, %v17258_v51, 0  ;;  %v14017_v33 = vld [vmem:[#allocation2 + $0x30] sm:$0xff]   ;;  %v8502_v13 = vld [vmem:[#allocation2 + $0xc] sm:$0xf] }
 0x54c   : > { %13213 = vmatmul.mubr.msk.bf16.gmra.mrb[20].mxu1 %vm1532_vm12, %v19032_v38  ;;  %v12291_v38 = vrot.slane %v9241_v37, 9  ;;  %19035 = vst [vmem:[#allocation22_spill] sm:$0xff] %v17480_v2  ;;  %v17492_v37 = vsel %vm14852_vm1, %v9380_v58, %v9381_v29  ;;  %v9402_v29 = vrot.slane %v17471_v48, 5  ;;  %19040 = vst [vmem:[#allocation27_spill] sm:$0xff] %v17511_v36  ;;  %v17529_v49 = vsel %vm14852_vm1, %v12293_v61, %v9399_v14  ;;  %v17547_v61 = vld [vmem:[%s18803_s2 + $0xa] sm:$0x3] }
 0x54d   : > { %13216 = vmatprep.mubr.msk.bf16.mxu1 %vm1532_vm12, %v19033_v9  ;;  %19037 = vst [vmem:[#allocation24_spill] sm:$0xff] %v17492_v37  ;;  %v17503_v9 = vsel %vm14852_vm1, %v9387_v11, %v9388_v15  ;;  %v19043_v11 = vcombine.low %v17171_v28, %v17175_v35  ;;  %19044 = vst [vmem:[#allocation29_spill] sm:$0xff] %v17529_v49  ;;  %v14015_v28 = vld [vmem:[#allocation2 + $0x18] sm:$0xff]   ;;  %v14016_v35 = vld [vmem:[#allocation2 + $0x24] sm:$0xff]  }
 0x54e   : > { %v17498_v47 = vsel %vm14852_vm1, %v12291_v38, %v9385_v52  ;;  %19039 = vst [vmem:[#allocation26_spill] sm:$0xff] %v17503_v9  ;;  %v17515_v52 = vsel %vm14852_vm1, %v9394_v27, %v9395_v17  ;;  %v9401_v38 = vrot.slane %v9399_v14, 4  ;;  %v14014_v27 = vld [vmem:[#allocation2 + $0xc] sm:$0xff]   ;;  %v14018_v14 = vld [vmem:[#allocation2 + $0x3c] sm:$0xff]  }
 0x54f   : > { %19038 = vst [vmem:[#allocation25_spill] sm:$0xff] %v17498_v47  ;;  %19041 = vst [vmem:[#allocation28_spill] sm:$0xff] %v17515_v52  ;;  %v17555_v51 = vld [vmem:[#allocation2 + $0x10] sm:$0xf]  ;;  %v14019_v58 = vld [vmem:[#allocation2 + $0x48] sm:$0xff]  }
 0x550   : > { %v17533_v17 = vsel %vm14852_vm1, %v9401_v38, %v9402_v29  ;;  %v8505_v29 = vld [vmem:[#allocation2 + $0x18] sm:$0xf]  ;;  %v8551_v38 = vshrl.u32 %v8502_v13, 16  ;;  %v8564_v15 = vshrl.u32 %v17555_v51, 16  ;;  %v17567_v47 = vld [vmem:[#allocation2 + $0x20] sm:$0x1] }
 0x551   : > { %19045 = vst [vmem:[#allocation30_spill] sm:$0xff] %v17533_v17  ;;  %v14020_v52 = vld [vmem:[#allocation2 + $0x54] sm:$0xff]   ;;  %19049 = vst [vmem:[#allocation33_spill] sm:$0xff] %v17567_v47 }
 0x554   : > { %13217 = vmatmul.mubr.msk.bf16.gmra.mrb[24].mxu1 %vm1532_vm12, %v19042_v41  ;;  %v8554_v41 = vshll.u32 %v8502_v13, 16 }
 0x555   : > { %13220 = vmatprep.mubr.msk.bf16.mxu1 %vm1532_vm12, %v19043_v11  ;;  %v8575_v11 = vshrl.u32 %v8505_v29, 16 }
 0x556   : > { %v8556_v10 = vrot.slane %v8554_v41, 5  ;;  %v8566_v41 = vrot.slane %v8564_v15, 4 }
 0x557   : > { %v8577_v17 = vrot.slane %v8575_v11, 4  ;;  %v8608_v11 = vshll.u32 %v17281_v34, 16 }
 0x55c   : > { %13221 = vmatmul.mubr.msk.bf16.gmra.mrb[28].mxu1 %vm1532_vm12, %v19046_v42  ;;  %v17557_v42 = vld [vmem:[#allocation2 + $0x1c] sm:$0xf] }
 0x55d   : > { %13226 = vmatprep.mubr.msk.bf16.mxu1 %vm1532_vm12, %v14014_v27  ;;  %v8578_v27 = vshll.u32 %v8505_v29, 16  ;;  %19047 = vst [vmem:[#allocation31_spill] sm:$0xff] %v17557_v42  ;;  %v8588_v49 = vshrl.u32 %v17557_v42, 16  ;;  %v17564_v29 = vld [vmem:[#allocation2 + $0x14] sm:$0x1] }
 0x55e   : > { %19048 = vst [vmem:[#allocation32_spill] sm:$0xff] %v17564_v29 }
 0x55f   : > { %v8590_v2 = vrot.slane %v8588_v49, 4  ;;  %v8618_v49 = vshll.u32 %v17283_v1, 16 }
 0x561   : > { %v8620_v1 = vrot.slane %v8618_v49, 5 }
 0x564   : > { %13227 = vmatmul.mubr.msk.bf16.vlgmr.msra.gmra.mrb[0].mxu1 %vm1532_vm12, %v14015_v28  ;;  %v8560_v28 = vshll.u32 %v17555_v51, 16 }
 0x565   : > { %13259 = vmatpush3.bf16.msra.mxu1 %v9033_v12  ;;  %13230 = vmatprep.mubr.msk.bf16.mxu1 %vm1532_vm12, %v14016_v35  ;;  %v8508_v12 = vld [vmem:[#allocation2 + $0x24] sm:$0xf]  ;;  %v8553_v35 = vrot.slane %v8551_v38, 4 }
 0x566   : > { %13954 = vmatprep.subr.msk.bf16.mxu1 %vm1581_vm0, %v17547_v61  ;;  %v8599_v13 = vshrl.u32 %v8508_v12, 16  ;;  %v8602_v36 = vshll.u32 %v8508_v12, 16  ;;  %v8562_v9 = vrot.slane %v8560_v28, 5  ;;  %v8594_v28 = vshll.u32 %v17567_v47, 16  ;;  %v17749_v47 = vld [vmem:[#allocation2 + $0x7c] sm:$0xf] }
 0x567   : > { %v8557_v38 = vor.u32 %v8556_v10, %v8553_v35  ;;  %v8610_v10 = vrot.slane %v8608_v11, 5  ;;  %v14021_v35 = vld [vmem:[#allocation2 + $0x60] sm:$0xff]   ;;  %19061 = vst [vmem:[#allocation45_spill] sm:$0xff] %v17749_v47 }
 0x568   : > { %v8601_v40 = vrot.slane %v8599_v13, 4  ;;  %v8604_v12 = vrot.slane %v8602_v36, 5 }
 0x569   : > { %v8558_v7 = vrot.slane %v8557_v38, 4 }
 0x56c   : > { %13231 = vmatmul.mubr.msk.bf16.gmra.mrb[4].mxu1 %vm1532_vm12, %v14017_v33  ;;  %v8580_v33 = vrot.slane %v8578_v27, 5  ;;  %v8612_v27 = vshrl.u32 %v17281_v34, 16  ;;  %v14022_v34 = vld [vmem:[#allocation2 + $0x6c] sm:$0xff]  }
 0x56d   : > { %13234 = vmatprep.mubr.msk.bf16.mxu1 %vm1532_vm12, %v14018_v14  ;;  %v8584_v14 = vshll.u32 %v17557_v42, 16 }
 0x56e   : > { %v8581_v37 = vor.u32 %v8580_v33, %v8577_v17  ;;  %v8614_v15 = vrot.slane %v8612_v27, 4  ;;  %v8605_v17 = vor.u32 %v8604_v12, %v8601_v40  ;;  %v8596_v33 = vrot.slane %v8594_v28, 5 }
 0x56f   : > { %v8586_v20 = vrot.slane %v8584_v14, 5  ;;  %v8563_v14 = vsel %vm14294_vm13, %v8558_v7, %v8562_v9  ;;  %v8628_v40 = vrot.slane %v8626_v32, 5  ;;  %v8632_v27 = vshll.u32 %v17285_v22, 16 }
 0x570   : > { %v8582_v60 = vrot.slane %v8581_v37, 4  ;;  %v8615_v38 = vor.u32 %v8614_v15, %v8610_v10  ;;  %v8625_v37 = vrot.slane %v8623_v26, 4  ;;  %v8606_v11 = vrot.slane %v8605_v17, 4  ;;  %v8517_v26 = vld [vmem:[#allocation2 + $0x48] sm:$0xf] }
 0x571   : > { %v8591_v16 = vor.u32 %v8590_v2, %v8586_v20  ;;  %v8636_v12 = vshrl.u32 %v17285_v22, 16  ;;  %v8656_v22 = vshll.u32 %v17289_v5, 16  ;;  %v14024_v17 = vld [vmem:[#allocation2 + $0x84] sm:$0xff]  }
 0x572   : > { %v8587_v2 = vsel %vm14294_vm13, %v8582_v60, %v8586_v20  ;;  %v8616_v32 = vrot.slane %v8615_v38, 4  ;;  %v8629_v20 = vor.u32 %v8628_v40, %v8625_v37  ;;  %v8611_v49 = vsel %vm14294_vm13, %v8606_v11, %v8610_v10  ;;  %v8523_v37 = vld [vmem:[#allocation2 + $0x60] sm:$0xf] }
 0x573   : > { %v8592_v56 = vrot.slane %v8591_v16, 4  ;;  %v14023_v16 = vld [vmem:[#allocation2 + $0x78] sm:$0xff]   ;;  %v8671_v38 = vshrl.u32 %v8517_v26, 16 }
 0x574   : > { %13235 = vmatmul.mubr.msk.bf16.gmra.mrb[8].mxu1 %vm1532_vm12, %v14019_v58  ;;  %v8570_v58 = vshll.u32 %v17564_v29, 16  ;;  %v8630_v40 = vrot.slane %v8629_v20, 4  ;;  %v10790_v29 = vld [vmem:[#allocation2 + $0x78] sm:$0xe] }
 0x575   : > { %13238 = vmatprep.mubr.msk.bf16.mxu1 %vm1532_vm12, %v14020_v52  ;;  %v8567_v52 = vor.u32 %v8566_v41, %v8562_v9  ;;  %v8514_v41 = vld [vmem:[#allocation2 + $0x3c] sm:$0xf]  ;;  %v8597_v7 = vsel %vm14294_vm13, %v8592_v56, %v8596_v33  ;;  %v8642_v9 = vshll.u32 %v17287_v30, 16  ;;  %v8621_v30 = vsel %vm14294_vm13, %v8616_v32, %v8620_v1 }
 0x576   : > { %v8572_v36 = vrot.slane %v8570_v58, 5  ;;  %v8647_v28 = vshrl.u32 %v8514_v41, 16  ;;  %v17589_v60 = vcombine.low %v8587_v2, %v8597_v7  ;;  %v8650_v15 = vshll.u32 %v8514_v41, 16 }
 0x577   : > { %v8568_v13 = vrot.slane %v8567_v52, 4  ;;  %v8638_v33 = vrot.slane %v8636_v12, 4  ;;  %v8674_v41 = vshll.u32 %v8517_v26, 16  ;;  %v8684_v2 = vshrl.u32 %v17294_v62, 16 }
 0x578   : > { %v8652_v11 = vrot.slane %v8650_v15, 5  ;;  %v17605_v1 = vrot.slane %v8656_v22, 5  ;;  %v17607_v12 = vcombine.low %v8611_v49, %v8621_v30  ;;  %v8704_v7 = vshll.u32 %v17298_v44, 16  ;;  %v14025_v22 = vld [vmem:[#allocation2 + $0x90] sm:$0xff]  }
 0x579   : > { %v8573_v58 = vsel %vm14294_vm13, %v8568_v13, %v8572_v36  ;;  %v17597_v36 = vrot.slane %v8632_v27, 5  ;;  %v8649_v13 = vrot.slane %v8647_v28, 4  ;;  %v8673_v28 = vrot.slane %v8671_v38, 4 }
 0x57a   : > { %v17587_v52 = vcombine.low %v8563_v14, %v8573_v58  ;;  %v17600_v14 = vrot.slane %v8642_v9, 5  ;;  %v8708_v9 = vshrl.u32 %v17298_v44, 16  ;;  %v8676_v32 = vrot.slane %v8674_v41, 5 }
 0x57b   : > { %v8639_v58 = vor.u32 %v8638_v33, %v17597_v36  ;;  %v8719_v26 = vshrl.u32 %v8523_v37, 16  ;;  %v8653_v49 = vor.u32 %v8652_v11, %v8649_v13  ;;  %v8666_v44 = vshll.u32 %v17292_v53, 16 }
 0x57c   : > { %13239 = vmatmul.mubr.msk.bf16.gmra.mrb[12].mxu1 %vm1532_vm12, %v14021_v35  ;;  %v8660_v35 = vshrl.u32 %v17289_v5, 16  ;;  %v8680_v5 = vshll.u32 %v17294_v62, 16  ;;  %v8722_v62 = vshll.u32 %v8523_v37, 16  ;;  %v17619_v33 = vrot.slane %v8704_v7, 5 }
 0x57d   : > { %13242 = vmatprep.mubr.msk.bf16.mxu1 %vm1532_vm12, %v14022_v34  ;;  %v8520_v34 = vld [vmem:[#allocation2 + $0x54] sm:$0xf]  ;;  %v8710_v38 = vrot.slane %v8708_v9, 4  ;;  %v8728_v41 = vshll.u32 %v17322_v4, 16  ;;  %v8721_v37 = vrot.slane %v8719_v26, 4  ;;  %v8640_v13 = vrot.slane %v8639_v58, 4 }
 0x57e   : > { %v8695_v10 = vshrl.u32 %v8520_v34, 16  ;;  %v8698_v56 = vshll.u32 %v8520_v34, 16  ;;  %v8662_v27 = vrot.slane %v8660_v35, 4  ;;  %v8686_v34 = vrot.slane %v8684_v2, 4  ;;  %v8526_v2 = vld [vmem:[#allocation2 + $0x6c] sm:$0xf] }
 0x57f   : > { %v8635_v35 = vsel %vm14294_vm13, %v8630_v40, %v17597_v36  ;;  %v8724_v36 = vrot.slane %v8722_v62, 5  ;;  %v8714_v11 = vshll.u32 %v17311_v63, 16  ;;  %v8668_v7 = vrot.slane %v8666_v44, 5 }
 0x580   : > { %v8697_v20 = vrot.slane %v8695_v10, 4  ;;  %v8700_v15 = vrot.slane %v8698_v56, 5  ;;  %v8663_v30 = vor.u32 %v8662_v27, %v17605_v1  ;;  %v8677_v10 = vor.u32 %v8676_v32, %v8673_v28 }
 0x581   : > { %v8690_v56 = vshll.u32 %v17296_v8, 16  ;;  %v8654_v27 = vrot.slane %v8653_v49, 4  ;;  %v8743_v9 = vshrl.u32 %v8526_v2, 16  ;;  %v8645_v28 = vsel %vm14294_vm13, %v8640_v13, %v17600_v14  ;;  %v14027_v49 = vld [vmem:[#allocation2 + $0xa8] sm:$0xff]  }
 0x582   : > { %v8701_v40 = vor.u32 %v8700_v15, %v8697_v20  ;;  %v8711_v8 = vor.u32 %v8710_v38, %v17619_v33  ;;  %v17632_v32 = vrot.slane %v8728_v41, 5  ;;  %v8664_v62 = vrot.slane %v8663_v30, 4  ;;  %v14028_v38 = vld [vmem:[#allocation2 + $0xb4] sm:$0xff]  }
 0x583   : > { %v8678_v58 = vrot.slane %v8677_v10, 4  ;;  %v8716_v63 = vrot.slane %v8714_v11, 5  ;;  %v8745_v44 = vrot.slane %v8743_v9, 4  ;;  %v8756_v14 = vshrl.u32 %v17333_v45, 16  ;;  %v10784_v9 = vld [vmem:[#allocation2 + $0x30] sm:$0xe] }
 0x584   : > { %13243 = vmatmul.mubr.msk.bf16.gmra.mrb[16].mxu1 %vm1532_vm12, %v14023_v16  ;;  %v17612_v16 = vrot.slane %v8680_v5, 5  ;;  %v8732_v5 = vshrl.u32 %v17322_v4, 16  ;;  %v8746_v4 = vshll.u32 %v8526_v2, 16  ;;  %v8702_v15 = vrot.slane %v8701_v40, 4  ;;  %v17662_v40 = vld [vmem:[#allocation2 + $0x34] sm:$0xf] }
 0x585   : > { %13246 = vmatprep.mubr.msk.bf16.mxu1 %vm1532_vm12, %v14024_v17  ;;  %v14026_v17 = vld [vmem:[#allocation2 + $0x9c] sm:$0xff]   ;;  %v17637_v41 = vcombine.low %v8635_v35, %v8645_v28  ;;  %v8659_v30 = vsel %vm14294_vm13, %v8654_v27, %v17605_v1  ;;  %19050 = vst [vmem:[#allocation34_spill] sm:$0xff] %v17662_v40  ;;  %v17664_v11 = vrot.slane %v8752_v18, 5  ;;  %v17666_v27 = vrot.slane %v8756_v14, 4 }
 0x586   : > { %v8687_v53 = vor.u32 %v8686_v34, %v17612_v16  ;;  %v8734_v26 = vrot.slane %v8732_v5, 4  ;;  %v8725_v34 = vor.u32 %v8724_v36, %v8721_v37  ;;  %v8748_v2 = vrot.slane %v8746_v4, 5 }
 0x587   : > { %v8712_v5 = vrot.slane %v8711_v8, 4  ;;  %v8683_v45 = vsel %vm14294_vm13, %v8678_v58, %v17612_v16  ;;  %v8707_v1 = vsel %vm14294_vm13, %v8702_v15, %v17619_v33  ;;  %v8776_v33 = vshll.u32 %v17348_v46, 16 }
 0x588   : > { %v8688_v20 = vrot.slane %v8687_v53, 4  ;;  %v8735_v10 = vor.u32 %v8734_v26, %v17632_v32  ;;  %v17651_v37 = vrot.slane %v8725_v34, 4  ;;  %v8762_v53 = vshll.u32 %v17340_v59, 16  ;;  %v17672_v26 = vld [vmem:[#allocation2 + $0x38] sm:$0x1] }
 0x589   : > { %v8717_v36 = vsel %vm14294_vm13, %v8712_v5, %v8716_v63  ;;  %v8749_v16 = vor.u32 %v8748_v2, %v8745_v44  ;;  %v8780_v8 = vshrl.u32 %v17348_v46, 16  ;;  %19051 = vst [vmem:[#allocation35_spill] sm:$0xff] %v17672_v26  ;;  %v17686_v34 = vld [vmem:[#allocation2 + $0x40] sm:$0xf]  ;;  %v17696_v63 = vld [vmem:[#allocation2 + $0x4c] sm:$0xf] }
 0x58a   : > { %v17668_v4 = vrot.slane %v8735_v10, 4  ;;  %v17678_v58 = vcombine.low %v8707_v1, %v8717_v36  ;;  %19052 = vst [vmem:[#allocation36_spill] sm:$0xff] %v17686_v34  ;;  %v17694_v15 = vrot.slane %v8762_v53, 5  ;;  %19054 = vst [vmem:[#allocation38_spill] sm:$0xff] %v17696_v63  ;;  %v10785_v44 = vld [vmem:[#allocation2 + $0x3c] sm:$0xe] }
 0x58b   : > { %v14029_v2 = vld [vmem:[#allocation2 + $0xc0] sm:$0xff]   ;;  %v17699_v14 = vrot.slane %v8749_v16, 4  ;;  %v17705_v5 = vld [vmem:[#allocation2 + $0x50] sm:$0x1]  ;;  %v17707_v10 = vld [vmem:[#allocation2 + $0x58] sm:$0xf] }
 0x58c   : > { %13247 = vmatmul.mubr.msk.bf16.gmra.mrb[20].mxu1 %vm1532_vm12, %v14025_v22  ;;  %v8692_v22 = vrot.slane %v8690_v56, 5  ;;  %v8529_v56 = vld [vmem:[#allocation2 + $0x78] sm:$0xf]  ;;  %19055 = vst [vmem:[#allocation39_spill] sm:$0xff] %v17705_v5  ;;  %19056 = vst [vmem:[#allocation40_spill] sm:$0xff] %v17707_v10  ;;  %v17714_v1 = vrot.slane %v8780_v8, 4 }
 0x58d   : > { %13250 = vmatprep.mubr.msk.bf16.mxu1 %vm1532_vm12, %v14026_v17  ;;  %v8738_v17 = vshll.u32 %v17324_v6, 16  ;;  %v8669_v6 = vsel %vm14294_vm13, %v8664_v62, %v8668_v7  ;;  %v8767_v7 = vshrl.u32 %v8529_v56, 16  ;;  %v8770_v28 = vshll.u32 %v8529_v56, 16  ;;  %v17716_v36 = vld [vmem:[#allocation2 + $0x5c] sm:$0x1] }
 0x58e   : > { %v8693_v35 = vsel %vm14294_vm13, %v8688_v20, %v8692_v22  ;;  %v17674_v62 = vcombine.low %v8659_v30, %v8669_v6  ;;  %v17684_v22 = vld [vmem:[#allocation2 + $0x84] sm:$0xf]  ;;  %v10865_v56 = vrot.slane %v17672_v26, 5  ;;  %v10786_v6 = vld [vmem:[#allocation2 + $0x48] sm:$0xe]  ;;  %19057 = vst [vmem:[#allocation41_spill] sm:$0xff] %v17716_v36 }
 0x58f   : > { %v17659_v13 = vrot.slane %v8738_v17, 5  ;;  %v17676_v59 = vcombine.low %v8683_v45, %v8693_v35  ;;  %v17688_v20 = vld [vmem:[#allocation2 + $0x44] sm:$0x1]  ;;  %v12395_v17 = vrot.slane %v10784_v9, 9  ;;  %v17703_v30 = vrot.slane %v8767_v7, 4 }
 0x590   : > { %19053 = vst [vmem:[#allocation37_spill] sm:$0xff] %v17688_v20  ;;  %v17710_v45 = vrot.slane %v8770_v28, 5  ;;  %v17712_v35 = vrot.slane %v8776_v33, 5  ;;  %v17721_v9 = vld [vmem:[#allocation2 + $0x64] sm:$0xf]  ;;  %v12396_v18 = vrot.slane %v10785_v44, 9 }
 0x591   : > { %v10869_v46 = vrot.slane %v17686_v34, 5  ;;  %v10787_v28 = vld [vmem:[#allocation2 + $0x54] sm:$0xe]  ;;  %v17726_v33 = vld [vmem:[#allocation2 + $0x68] sm:$0x1]  ;;  %v12397_v7 = vrot.slane %v10786_v6, 9 }
 0x592   : > { %v10788_v44 = vld [vmem:[#allocation2 + $0x60] sm:$0xe]  ;;  %v9503_v16 = vsel %vm1581_vm0, %v17547_v61, 0  ;;  %v17739_v26 = vld [vmem:[#allocation2 + $0x70] sm:$0xf] }
 0x593   : > { %v10871_v34 = vrot.slane %v10869_v46, 4  ;;  %v10789_v6 = vld [vmem:[#allocation2 + $0x6c] sm:$0xe]  ;;  %v17753_v61 = vsel %vm14852_vm1, %v12396_v18, %v10869_v46  ;;  %v10890_v18 = vrot.slane %v17721_v9, 5  ;;  %v17770_v46 = vld [vmem:[#allocation2 + $0x8c] sm:$0x1] }
 0x594   : > { %13251 = vmatmul.mubr.msk.bf16.gmra.mrb[24].mxu1 %vm1532_vm12, %v14027_v49  ;;  %v10862_v49 = vrot.slane %v17662_v40, 5  ;;  %v12398_v40 = vrot.slane %v10787_v28, 9  ;;  %19062 = vst [vmem:[#allocation46_spill] sm:$0xff] %v17753_v61  ;;  %v17759_v28 = vld [vmem:[#allocation2 + $0x80] sm:$0x1]  ;;  %19067 = vst [vmem:[#allocation51_spill] sm:$0xff] %v17770_v46 }
 0x595   : > { %13254 = vmatprep.mubr.msk.bf16.mxu1 %vm1532_vm12, %v14028_v38  ;;  %v10872_v38 = vrot.slane %v17688_v20, 5  ;;  %v17747_v20 = vld [vmem:[#allocation2 + $0x74] sm:$0x1]  ;;  %19064 = vst [vmem:[#allocation48_spill] sm:$0xff] %v17759_v28  ;;  %v10897_v42 = vrot.slane %v17739_v26, 5 }
 0x596   : > { %v10864_v53 = vrot.slane %v10862_v49, 4  ;;  %v17730_v8 = vsel %vm14852_vm1, %v12395_v17, %v10862_v49  ;;  %v10876_v17 = vrot.slane %v17696_v63, 5  ;;  %v10879_v49 = vrot.slane %v17705_v5, 5  ;;  %19060 = vst [vmem:[#allocation44_spill] sm:$0xff] %v17747_v20  ;;  %v17797_v61 = vld [vmem:[#allocation2 + $0x98] sm:$0x1] }
 0x597   : > { %19058 = vst [vmem:[#allocation42_spill] sm:$0xff] %v17730_v8  ;;  %v12399_v8 = vrot.slane %v10788_v44, 9  ;;  %v12400_v44 = vrot.slane %v10789_v6, 9  ;;  %v10791_v6 = vld [vmem:[#allocation2 + $0x84] sm:$0xe] }
 0x598   : > { %v17767_v5 = vsel %vm14852_vm1, %v12397_v7, %v10876_v17  ;;  %v17781_v7 = vld [vmem:[%s18803_s2 + $0xc] sm:$0x3] }
 0x599   : > { %19066 = vst [vmem:[#allocation50_spill] sm:$0xff] %v17767_v5 }
 0x59c   : > { %13255 = vmatmul.mubr.msk.bf16.gmra.mrb[28].mxu1 %vm1532_vm12, %v14029_v2  ;;  %v17734_v2 = vsel %vm14852_vm1, %v10864_v53, %v10865_v56  ;;  %v10883_v56 = vrot.slane %v17707_v10, 5  ;;  %v10886_v53 = vrot.slane %v17716_v36, 5  ;;  %v17761_v10 = vld [vmem:[#allocation2 + $0x88] sm:$0xf] }
 0x59d   : > { %13260 = vmatprep.mubr.msk.bf16.mxu1 %vm1532_vm12, %v17587_v52  ;;  %19059 = vst [vmem:[#allocation43_spill] sm:$0xff] %v17734_v2  ;;  %v17757_v52 = vsel %vm14852_vm1, %v10871_v34, %v10872_v38  ;;  %v10878_v2 = vrot.slane %v10876_v17, 4  ;;  %19065 = vst [vmem:[#allocation49_spill] sm:$0xff] %v17761_v10  ;;  %v10893_v38 = vrot.slane %v17726_v33, 5  ;;  %v10900_v17 = vrot.slane %v17747_v20, 5 }
 0x59e   : > { %19063 = vst [vmem:[#allocation47_spill] sm:$0xff] %v17757_v52  ;;  %v10885_v63 = vrot.slane %v10883_v56, 4  ;;  %v17787_v36 = vsel %vm14852_vm1, %v12398_v40, %v10883_v56  ;;  %v17795_v52 = vld [vmem:[#allocation2 + $0x94] sm:$0xf]  ;;  %v17803_v40 = vsel %vm14852_vm1, %v12399_v8, %v10890_v18  ;;  %v10899_v56 = vrot.slane %v10897_v42, 4 }
 0x59f   : > { %v17774_v34 = vsel %vm14852_vm1, %v10878_v2, %v10879_v49  ;;  %19069 = vst [vmem:[#allocation53_spill] sm:$0xff] %v17787_v36  ;;  %v10892_v49 = vrot.slane %v10890_v18, 4  ;;  %19071 = vst [vmem:[#allocation55_spill] sm:$0xff] %v17803_v40  ;;  %v10904_v8 = vrot.slane %v17749_v47, 5  ;;  %v10792_v18 = vld [vmem:[#allocation2 + $0x90] sm:$0xe] }
 0x5a0   : > { %19068 = vst [vmem:[#allocation52_spill] sm:$0xff] %v17774_v34  ;;  %v17791_v2 = vsel %vm14852_vm1, %v10885_v63, %v10886_v53  ;;  %v17807_v63 = vsel %vm14852_vm1, %v12400_v44, %v10897_v42  ;;  %v10911_v44 = vrot.slane %v17761_v10, 5  ;;  %v10793_v36 = vld [vmem:[#allocation2 + $0x9c] sm:$0xe]  ;;  %v10914_v42 = vrot.slane %v17770_v46, 5 }
 0x5a1   : > { %19070 = vst [vmem:[#allocation54_spill] sm:$0xff] %v17791_v2  ;;  %19072 = vst [vmem:[#allocation56_spill] sm:$0xff] %v17807_v63  ;;  %v17815_v53 = vsel %vm14852_vm1, %v10892_v49, %v10893_v38  ;;  %v12401_v2 = vrot.slane %v10790_v29, 9  ;;  %v17825_v38 = vld [vmem:[#allocation2 + $0xa4] sm:$0x1]  ;;  %v17831_v29 = vsel %vm14852_vm1, %v10899_v56, %v10900_v17  ;;  %v10906_v5 = vrot.slane %v10904_v8, 4 }
 0x5a2   : > { %19074 = vst [vmem:[#allocation58_spill] sm:$0xff] %v17815_v53  ;;  %19075 = vst [vmem:[#allocation59_spill] sm:$0xff] %v17825_v38  ;;  %v17827_v49 = vld [vmem:[#allocation2 + $0xac] sm:$0xf]  ;;  %v17838_v53 = vld [vmem:[#allocation2 + $0xb0] sm:$0x1] }
 0x5a3   : > { %19076 = vst [vmem:[#allocation60_spill] sm:$0xff] %v17831_v29  ;;  %v17835_v34 = vsel %vm14852_vm1, %v12401_v2, %v10904_v8  ;;  %v10913_v10 = vrot.slane %v10911_v44, 4  ;;  %v10794_v17 = vld [vmem:[#allocation2 + $0xa8] sm:$0xe]  ;;  %v17846_v56 = vld [vmem:[#allocation2 + $0xb8] sm:$0xf] }
 0x5a4   : > { %13261 = vmatmul.mubr.msk.bf16.vlgmr.msra.gmra.mrb[0].mxu1 %vm1532_vm12, %v17589_v60  ;;  %v17811_v60 = vld [vmem:[#allocation2 + $0xa0] sm:$0xf]  ;;  %19077 = vst [vmem:[#allocation61_spill] sm:$0xff] %v17835_v34  ;;  %19079 = vst [vmem:[#allocation63_spill] sm:$0xff] %v17846_v56  ;;  %v10918_v8 = vrot.slane %v17795_v52, 5  ;;  %v10921_v46 = vrot.slane %v17797_v61, 5 }
 0x5a5   : > { %13293 = vmatpush3.bf16.msra.mxu1 %v9503_v16  ;;  %13264 = vmatprep.mubr.msk.bf16.mxu1 %vm1532_vm12, %v17607_v12  ;;  %19073 = vst [vmem:[#allocation57_spill] sm:$0xff] %v17811_v60  ;;  %v10907_v12 = vrot.slane %v17759_v28, 5  ;;  %v12402_v16 = vrot.slane %v10791_v6, 9  ;;  %v12403_v28 = vrot.slane %v10792_v18, 9  ;;  %v12404_v20 = vrot.slane %v10793_v36, 9 }
 0x5a6   : > { %13955 = vmatprep.subr.msk.bf16.mxu1 %vm1581_vm0, %v17781_v7  ;;  %v10097_v47 = vld [vmem:[#allocation2 + $0xbc] sm:$0x1]  ;;  %v10925_v18 = vrot.slane %v17811_v60, 5  ;;  %v10795_v29 = vld [vmem:[#allocation2 + $0xb4] sm:$0xe]  ;;  %v10920_v6 = vrot.slane %v10918_v8, 4 }
 0x5a7   : > { %v17844_v40 = vsel %vm14852_vm1, %v12402_v16, %v10911_v44  ;;  %v17850_v2 = vsel %vm14852_vm1, %v10906_v5, %v10907_v12  ;;  %v17858_v16 = vsel %vm14852_vm1, %v10913_v10, %v10914_v42  ;;  %v10928_v44 = vrot.slane %v17825_v38, 5  ;;  %v17862_v5 = vld [vmem:[#allocation2 + $0xc4] sm:$0xf]  ;;  %v10100_v12 = vld [vmem:[#allocation2 + $0xc8] sm:$0x1] }
 0x5a8   : > { %19078 = vst [vmem:[#allocation62_spill] sm:$0xff] %v17844_v40  ;;  %19080 = vst [vmem:[#allocation64_spill] sm:$0xff] %v17850_v2  ;;  %v17868_v36 = vsel %vm14852_vm1, %v12403_v28, %v10918_v8  ;;  %v12405_v2 = vrot.slane %v10794_v17, 9  ;;  %v17874_v10 = vsel %vm14852_vm1, %v12404_v20, %v10925_v18  ;;  %v10927_v42 = vrot.slane %v10925_v18, 4  ;;  %v10796_v60 = vld [vmem:[#allocation2 + $0xc0] sm:$0xe] }
 0x5a9   : > { %19081 = vst [vmem:[#allocation65_spill] sm:$0xff] %v17858_v16  ;;  %v10932_v34 = vrot.slane %v17827_v49, 5  ;;  %v10935_v38 = vrot.slane %v17838_v53, 5  ;;  %v17882_v28 = vsel %vm14852_vm1, %v10920_v6, %v10921_v46  ;;  %v12406_v17 = vrot.slane %v10795_v29, 9  ;;  %v10797_v63 = vld [vmem:[#allocation2 + $0xcc] sm:$0xe] }
 0x5aa   : > { %19082 = vst [vmem:[#allocation66_spill] sm:$0xff] %v17882_v28  ;;  %v10942_v8 = vrot.slane %v10097_v47, 5  ;;  %v17885_v20 = vld [vmem:[#allocation2 + $0xd0] sm:$0xf]  ;;  %v10103_v18 = vld [vmem:[#allocation2 + $0xd4] sm:$0x1]  ;;  %v17891_v40 = vsel %vm14852_vm1, %v10927_v42, %v10928_v44 }
 0x5ab   : > { %19083 = vst [vmem:[#allocation67_spill] sm:$0xff] %v17891_v40  ;;  %v10934_v46 = vrot.slane %v10932_v34, 4  ;;  %v10946_v44 = vrot.slane %v17862_v5, 5  ;;  %v10949_v42 = vrot.slane %v10100_v12, 5  ;;  %v12408_v28 = vrot.slane %v10797_v63, 9  ;;  %v19161_v50 = vld [vmem:[#allocation53_spill] sm:$0xff] }
 0x5ac   : > { %13265 = vmatmul.mubr.msk.bf16.gmra.mrb[4].mxu1 %vm1532_vm12, %v17637_v41  ;;  %v10939_v41 = vrot.slane %v17846_v56, 5  ;;  %v12407_v56 = vrot.slane %v10796_v60, 9  ;;  %v8800_v60 = vshll.u32 %v17362_v19, 16  ;;  %v8773_v63 = vor.u32 %v17710_v45, %v17703_v30  ;;  %v8538_v40 = vld [vmem:[#allocation2 + $0x9c] sm:$0xf] }
 0x5ad   : > { %13268 = vmatprep.mubr.msk.bf16.mxu1 %vm1532_vm12, %v17674_v62  ;;  %v17895_v62 = vsel %vm14852_vm1, %v12405_v2, %v10932_v34  ;;  %v17905_v16 = vsel %vm14852_vm1, %v10934_v46, %v10935_v38  ;;  %v8535_v2 = vld [vmem:[#allocation2 + $0x90] sm:$0xf]  ;;  %v8804_v38 = vshrl.u32 %v17362_v19, 16  ;;  %v10948_v12 = vrot.slane %v10946_v44, 4 }
 0x5ae   : > { %19084 = vst [vmem:[#allocation68_spill] sm:$0xff] %v17895_v62  ;;  %v17901_v47 = vsel %vm14852_vm1, %v12406_v17, %v10939_v41  ;;  %v10941_v6 = vrot.slane %v10939_v41, 4  ;;  %19085 = vst [vmem:[#allocation69_spill] sm:$0xff] %v17905_v16  ;;  %v10953_v17 = vrot.slane %v17885_v20, 5  ;;  %v10956_v41 = vrot.slane %v10103_v18, 5 }
 0x5af   : > { %v8786_v34 = vshll.u32 %v17360_v39, 16  ;;  %v19086_v16 = vshrl.u32 %v17684_v22, 16  ;;  %v19087_v18 = vshll.u32 %v17684_v22, 16  ;;  %v8815_v19 = vshrl.u32 %v8535_v2, 16 }
 0x5b0   : > { %v17912_v29 = vsel %vm14852_vm1, %v10941_v6, %v10942_v8  ;;  %v10955_v6 = vrot.slane %v10953_v17, 4  ;;  %v17930_v46 = vsel %vm14852_vm1, %v12407_v56, %v10946_v44  ;;  %v17934_v30 = vsel %vm14852_vm1, %v10948_v12, %v10949_v42 }
 0x5b1   : > { %v8793_v8 = vrot.slane %v19086_v16, 4  ;;  %v8796_v62 = vrot.slane %v19087_v18, 5  ;;  %v8818_v39 = vshll.u32 %v8535_v2, 16  ;;  %v17942_v22 = vsel %vm14852_vm1, %v12408_v28, %v10953_v17 }
 0x5b2   : > { %v17946_v45 = vsel %vm14852_vm1, %v10955_v6, %v10956_v41  ;;  %v19088_v56 = vor.u32 %v17666_v27, %v17664_v11  ;;  %v8802_v44 = vrot.slane %v8800_v60, 5  ;;  %v8806_v42 = vrot.slane %v8804_v38, 4 }
 0x5b3   : > { %v8755_v2 = vsel %vm14294_vm13, %v17699_v14, %v17664_v11  ;;  %v8783_v28 = vor.u32 %v17714_v1, %v17712_v35  ;;  %v8839_v17 = vshrl.u32 %v8538_v40, 16  ;;  %v8842_v41 = vshll.u32 %v8538_v40, 16 }
 0x5b4   : > { %13269 = vmatmul.mubr.msk.bf16.gmra.mrb[8].mxu1 %vm1532_vm12, %v17676_v59  ;;  %v12424_v59 = vcombine.low %v17930_v46, %v17934_v30  ;;  %v8760_v16 = vrot.slane %v19088_v56, 4  ;;  %v8774_v12 = vrot.slane %v8773_v63, 4  ;;  %v8797_v60 = vor.u32 %v8796_v62, %v8793_v8 }
 0x5b5   : > { %13272 = vmatprep.mubr.msk.bf16.mxu1 %vm1532_vm12, %v17678_v58  ;;  %v8810_v38 = vshll.u32 %v17381_v24, 16  ;;  %v8817_v6 = vrot.slane %v8815_v19, 4  ;;  %v8820_v18 = vrot.slane %v8818_v39, 5  ;;  %v8824_v56 = vshll.u32 %v17394_v0, 16  ;;  %v8541_v19 = vld [vmem:[#allocation2 + $0xa8] sm:$0xf] }
 0x5b6   : > { %v8765_v27 = vsel %vm14294_vm13, %v8760_v16, %v17694_v15  ;;  %v8828_v58 = vshrl.u32 %v17394_v0, 16  ;;  %v19089_v11 = vsel %vm14294_vm13, %v17668_v4, %v17659_v13  ;;  %v19090_v15 = vsel %vm14294_vm13, %v17651_v37, %v17632_v32 }
 0x5b7   : > { %v12253_v14 = vcombine.low %v19090_v15, %v19089_v11  ;;  %v12254_v1 = vcombine.low %v8755_v2, %v8765_v27  ;;  %v8788_v40 = vrot.slane %v8786_v34, 5  ;;  %v8807_v24 = vor.u32 %v8806_v42, %v8802_v44  ;;  %v8544_v42 = vld [vmem:[#allocation2 + $0xb4] sm:$0xf] }
 0x5b8   : > { %v8841_v62 = vrot.slane %v8839_v17, 4  ;;  %v8844_v63 = vrot.slane %v8842_v41, 5  ;;  %v8848_v8 = vshll.u32 %v17405_v3, 16  ;;  %v8852_v0 = vshrl.u32 %v17405_v3, 16 }
 0x5b9   : > { %v8779_v13 = vsel %vm14294_vm13, %v8774_v12, %v17712_v35  ;;  %v8784_v4 = vrot.slane %v8783_v28, 4  ;;  %v8798_v39 = vrot.slane %v8797_v60, 4  ;;  %v8812_v32 = vrot.slane %v8810_v38, 5 }
 0x5ba   : > { %v8821_v37 = vor.u32 %v8820_v18, %v8817_v6  ;;  %v8826_v34 = vrot.slane %v8824_v56, 5  ;;  %v8830_v16 = vrot.slane %v8828_v58, 4  ;;  %v8808_v3 = vrot.slane %v8807_v24, 4 }
 0x5bb   : > { %v8789_v2 = vsel %vm14294_vm13, %v8784_v4, %v8788_v40  ;;  %v8863_v17 = vshrl.u32 %v8541_v19, 16  ;;  %v8866_v41 = vshll.u32 %v8541_v19, 16  ;;  %v8834_v27 = vshll.u32 %v17396_v57, 16  ;;  %v8547_v4 = vld [vmem:[#allocation2 + $0xc0] sm:$0xf] }
 0x5bc   : > { %13273 = vmatmul.mubr.msk.bf16.gmra.mrb[12].mxu1 %vm1532_vm12, %v12253_v14  ;;  %v8845_v11 = vor.u32 %v8844_v63, %v8841_v62  ;;  %v8850_v15 = vrot.slane %v8848_v8, 5  ;;  %v8854_v35 = vrot.slane %v8852_v0, 4  ;;  %v12255_v28 = vcombine.low %v8779_v13, %v8789_v2 }
 0x5bd   : > { %13276 = vmatprep.mubr.msk.bf16.mxu1 %vm1532_vm12, %v12254_v1  ;;  %v8803_v12 = vsel %vm14294_vm13, %v8798_v39, %v8802_v44  ;;  %v8887_v60 = vshrl.u32 %v8544_v42, 16  ;;  %v8890_v38 = vshll.u32 %v8544_v42, 16  ;;  %v8813_v58 = vsel %vm14294_vm13, %v8808_v3, %v8812_v32 }
 0x5be   : > { %v8822_v6 = vrot.slane %v8821_v37, 4  ;;  %v8831_v18 = vor.u32 %v8830_v16, %v8826_v34  ;;  %v8858_v56 = vshll.u32 %v17418_v43, 16  ;;  %v8865_v14 = vrot.slane %v8863_v17, 4 }
 0x5bf   : > { %v8868_v1 = vrot.slane %v8866_v41, 5  ;;  %v8872_v57 = vshll.u32 %v17430_v55, 16  ;;  %v8876_v40 = vshrl.u32 %v17430_v55, 16  ;;  %v12256_v24 = vcombine.low %v8803_v12, %v8813_v58 }
 0x5c0   : > { %v8836_v62 = vrot.slane %v8834_v27, 5  ;;  %v8846_v63 = vrot.slane %v8845_v11, 4  ;;  %v8855_v8 = vor.u32 %v8854_v35, %v8850_v15  ;;  %v8889_v44 = vrot.slane %v8887_v60, 4 }
 0x5c1   : > { %v8892_v0 = vrot.slane %v8890_v38, 5  ;;  %v8896_v19 = vshll.u32 %v17447_v31, 16  ;;  %v8900_v13 = vshrl.u32 %v17447_v31, 16  ;;  %v8827_v43 = vsel %vm14294_vm13, %v8822_v6, %v8826_v34 }
 0x5c2   : > { %v8860_v39 = vrot.slane %v8858_v56, 5  ;;  %v8832_v55 = vrot.slane %v8831_v18, 4  ;;  %v8869_v32 = vor.u32 %v8868_v1, %v8865_v14  ;;  %v8874_v37 = vrot.slane %v8872_v57, 5 }
 0x5c3   : > { %v8878_v16 = vrot.slane %v8876_v40, 4  ;;  %v8851_v42 = vsel %vm14294_vm13, %v8846_v63, %v8850_v15  ;;  %v8856_v2 = vrot.slane %v8855_v8, 4  ;;  %v8911_v3 = vshrl.u32 %v8547_v4, 16 }
 0x5c4   : > { %13277 = vmatmul.mubr.msk.bf16.gmra.mrb[16].mxu1 %vm1532_vm12, %v12255_v28  ;;  %v8914_v17 = vshll.u32 %v8547_v4, 16  ;;  %v8837_v31 = vsel %vm14294_vm13, %v8832_v55, %v8836_v62  ;;  %v8893_v41 = vor.u32 %v8892_v0, %v8889_v44  ;;  %v8898_v27 = vrot.slane %v8896_v19, 5 }
 0x5c5   : > { %13280 = vmatprep.mubr.msk.bf16.mxu1 %vm1532_vm12, %v12256_v24  ;;  %v8902_v11 = vrot.slane %v8900_v13, 4  ;;  %v12257_v35 = vcombine.low %v8827_v43, %v8837_v31  ;;  %v8861_v34 = vsel %vm14294_vm13, %v8856_v2, %v8860_v39  ;;  %v8882_v28 = vshll.u32 %v17432_v25, 16 }
 0x5c6   : > { %v12258_v12 = vcombine.low %v8851_v42, %v8861_v34  ;;  %v8870_v60 = vrot.slane %v8869_v32, 4  ;;  %v8879_v38 = vor.u32 %v8878_v16, %v8874_v37  ;;  %v8906_v15 = vshll.u32 %v17460_v21, 16  ;;  %v9228_v32 = vld [vmem:[#allocation2 + $0xc] sm:$0xe]  ;;  %v9229_v34 = vld [vmem:[#allocation2 + $0x18] sm:$0xe] }
 0x5c7   : > { %v8913_v58 = vrot.slane %v8911_v3, 4  ;;  %v8916_v6 = vrot.slane %v8914_v17, 5  ;;  %v8920_v18 = vshll.u32 %v17462_v54, 16  ;;  %v8924_v56 = vshrl.u32 %v17462_v54, 16 }
 0x5c8   : > { %v8894_v14 = vrot.slane %v8893_v41, 4  ;;  %v8903_v1 = vor.u32 %v8902_v11, %v8898_v27  ;;  %v8884_v57 = vrot.slane %v8882_v28, 5  ;;  %v8875_v25 = vsel %vm14294_vm13, %v8870_v60, %v8874_v37  ;;  %v19091_v37 = vld [vmem:[#allocation32_spill] sm:$0xff]  ;;  %v19092_v41 = vld [vmem:[#allocation31_spill] sm:$0xff] }
 0x5c9   : > { %v8908_v40 = vrot.slane %v8906_v15, 5  ;;  %v8880_v24 = vrot.slane %v8879_v38, 4  ;;  %v8917_v62 = vor.u32 %v8916_v6, %v8913_v58  ;;  %v8922_v21 = vrot.slane %v8920_v18, 5 }
 0x5ca   : > { %v8926_v63 = vrot.slane %v8924_v56, 4  ;;  %v8899_v8 = vsel %vm14294_vm13, %v8894_v14, %v8898_v27  ;;  %v8904_v44 = vrot.slane %v8903_v1, 4  ;;  %v8930_v0 = vshll.u32 %v17471_v48, 16  ;;  %v12360_v14 = vld [vmem:[%s18803_s2 + $0xe] sm:$0x3] }
 0x5cb   : > { %v8885_v54 = vsel %vm14294_vm13, %v8880_v24, %v8884_v57  ;;  %v9294_v4 = vrot.slane %v17555_v51, 5  ;;  %v8918_v39 = vrot.slane %v8917_v62, 4  ;;  %v9297_v16 = vrot.slane %v19091_v37, 5  ;;  %v19094_v1 = vld [vmem:[#allocation9_spill] sm:$0xff]  ;;  %v19095_v57 = vld [vmem:[#allocation10_spill] sm:$0xff]  ;;  %v19098_v24 = vld [vmem:[#allocation11_spill] sm:$0xff] }
 0x5cc   : > { %13281 = vmatmul.mubr.msk.bf16.gmra.mrb[20].mxu1 %vm1532_vm12, %v12257_v35  ;;  %v12259_v19 = vcombine.low %v8875_v25, %v8885_v54  ;;  %v8909_v13 = vsel %vm14294_vm13, %v8904_v44, %v8908_v40  ;;  %v8927_v55 = vor.u32 %v8926_v63, %v8922_v21  ;;  %v8932_v42 = vrot.slane %v8930_v0, 5  ;;  %v19097_v40 = vld [vmem:[#allocation3_spill] sm:$0xff]  ;;  %v19104_v44 = vld [vmem:[#allocation5_spill] sm:$0xff] }
 0x5cd   : > { %13284 = vmatprep.mubr.msk.bf16.mxu1 %vm1532_vm12, %v12258_v12  ;;  %v12260_v43 = vcombine.low %v8899_v8, %v8909_v13  ;;  %v12278_v2 = vrot.slane %v9228_v32, 9  ;;  %v9296_v3 = vrot.slane %v9294_v4, 4  ;;  %v8923_v48 = vsel %vm14294_vm13, %v8918_v39, %v8922_v21  ;;  %v19093_v12 = vld [vmem:[#allocation33_spill] sm:$0xff]  ;;  %v19101_v21 = vld [vmem:[#allocation12_spill] sm:$0xff]  ;;  %v19103_v8 = vld [vmem:[#allocation6_spill] sm:$0xff] }
 0x5ce   : > { %v8928_v17 = vrot.slane %v8927_v55, 4  ;;  %v9301_v27 = vrot.slane %v19092_v41, 5  ;;  %v9304_v60 = vrot.slane %v19093_v12, 5  ;;  %v12279_v38 = vrot.slane %v9229_v34, 9  ;;  %v19106_v0 = vld [vmem:[#allocation7_spill] sm:$0xff]  ;;  %v19112_v55 = vld [vmem:[#allocation8_spill] sm:$0xff] }
 0x5cf   : > { %v9298_v51 = vsel %vm14852_vm1, %v9296_v3, %v9297_v16  ;;  %v9295_v35 = vsel %vm14852_vm1, %v12278_v2, %v9294_v4  ;;  %v9861_v56 = vsel %vm1581_vm0, %v17781_v7, 0  ;;  %v19096_v25 = vcombine.low %v19094_v1, %v19095_v57  ;;  %v19100_v7 = vld [vmem:[#allocation4_spill] sm:$0xff]  ;;  %v19109_v4 = vld [vmem:[#allocation14_spill] sm:$0xff]  ;;  %v19115_v16 = vld [vmem:[#allocation17_spill] sm:$0xff] }
 0x5d0   : > { %v8933_v31 = vsel %vm14294_vm13, %v8928_v17, %v8932_v42  ;;  %v12295_v28 = vcombine.low %v9295_v35, %v9298_v51  ;;  %v9303_v15 = vrot.slane %v9301_v27, 4  ;;  %v9302_v6 = vsel %vm14852_vm1, %v12279_v38, %v9301_v27  ;;  %v19113_v32 = vld [vmem:[#allocation16_spill] sm:$0xff]  ;;  %v19116_v42 = vld [vmem:[#allocation19_spill] sm:$0xff]  ;;  %v19118_v3 = vld [vmem:[#allocation18_spill] sm:$0xff] }
 0x5d1   : > { %v12261_v11 = vcombine.low %v8923_v48, %v8933_v31  ;;  %v19099_v62 = vcombine.low %v19097_v40, %v19098_v24  ;;  %v19102_v63 = vcombine.low %v19100_v7, %v19101_v21  ;;  %v19105_v54 = vcombine.low %v19103_v8, %v19104_v44  ;;  %v19119_v48 = vld [vmem:[#allocation20_spill] sm:$0xff]  ;;  %v19121_v51 = vld [vmem:[#allocation21_spill] sm:$0xff]  ;;  %v19122_v31 = vld [vmem:[#allocation22_spill] sm:$0xff] }
 0x5d2   : > { %v9305_v58 = vsel %vm14852_vm1, %v9303_v15, %v9304_v60  ;;  %v19114_v37 = vcombine.low %v19112_v55, %v19113_v32  ;;  %v19117_v2 = vcombine.low %v19115_v16, %v19116_v42  ;;  %v19120_v17 = vcombine.low %v19118_v3, %v19119_v48  ;;  %v19124_v27 = vld [vmem:[#allocation23_spill] sm:$0xff]  ;;  %v19127_v34 = vld [vmem:[#allocation25_spill] sm:$0xff]  ;;  %v19131_v38 = vld [vmem:[#allocation28_spill] sm:$0xff] }
 0x5d3   : > { %v12296_v18 = vcombine.low %v9302_v6, %v9305_v58  ;;  %v19123_v41 = vcombine.low %v19121_v51, %v19122_v31  ;;  %v19130_v60 = vld [vmem:[#allocation27_spill] sm:$0xff]  ;;  %v19133_v6 = vld [vmem:[#allocation29_spill] sm:$0xff]  ;;  %v10587_v57 = vsel %vm1581_vm0, %v12360_v14, 0  ;;  %v18107_v40 = vld [vmem:[%s18803_s2 + $0x10] sm:$0x3] }
 0x5d4   : > { %13285 = vmatmul.mubr.msk.bf16.gmra.mrb[24].mxu1 %vm1532_vm12, %v12259_v19  ;;  %v19107_v19 = vld [vmem:[#allocation13_spill] sm:$0xff]  ;;  %v19132_v15 = vcombine.low %v19130_v60, %v19131_v38  ;;  %v14030_v58 = vld [vmem:[#allocation2 + $0x18] sm:$0xff]   ;;  %v14036_v7 = vld [vmem:[#allocation2 + $0x60] sm:$0xff]  }
 0x5d5   : > { %13288 = vmatprep.mubr.msk.bf16.mxu1 %vm1532_vm12, %v12260_v43  ;;  %v19108_v13 = vcombine.low %v19106_v0, %v19107_v19  ;;  %v19110_v43 = vld [vmem:[#allocation15_spill] sm:$0xff]  ;;  %v14031_v1 = vld [vmem:[#allocation2 + $0x24] sm:$0xff]   ;;  %v14037_v21 = vld [vmem:[#allocation2 + $0x6c] sm:$0xff]  }
 0x5d6   : > { %v19111_v39 = vcombine.low %v19109_v4, %v19110_v43  ;;  %v14033_v24 = vld [vmem:[#allocation2 + $0x3c] sm:$0xff]   ;;  %v14039_v8 = vld [vmem:[#allocation2 + $0x84] sm:$0xff]   ;;  %v10056_v44 = vld [vmem:[#allocation2 + $0x18] sm:$0xf] }
 0x5d7   : > { %v18119_v0 = vld [vmem:[#allocation2 + $0x1c] sm:$0xf]  ;;  %v10105_v19 = vshrl.u32 %v10056_v44, 16  ;;  %v18125_v55 = vld [vmem:[#allocation2 + $0x28] sm:$0xf] }
 0x5d8   : > { %v10114_v4 = vshll.u32 %v18119_v0, 16  ;;  %v10118_v43 = vshrl.u32 %v18119_v0, 16  ;;  %v10062_v32 = vld [vmem:[#allocation2 + $0x30] sm:$0xf]  ;;  %v14042_v31 = vld [vmem:[#allocation2 + $0xa8] sm:$0xff]  }
 0x5d9   : > { %v10107_v16 = vrot.slane %v10105_v19, 4 }
 0x5da   : > { %v18129_v3 = vrot.slane %v10114_v4, 5  ;;  %v10120_v48 = vrot.slane %v10118_v43, 4 }
 0x5dc   : > { %13289 = vmatmul.mubr.msk.bf16.gmra.mrb[28].mxu1 %vm1532_vm12, %v12261_v11  ;;  %v19125_v11 = vld [vmem:[#allocation24_spill] sm:$0xff]  ;;  %v10121_v60 = vor.u32 %v10120_v48, %v18129_v3 }
 0x5dd   : > { %13294 = vmatprep.mubr.msk.bf16.mxu1 %vm1532_vm12, %v12295_v28  ;;  %v19126_v35 = vcombine.low %v19124_v27, %v19125_v11  ;;  %v19128_v28 = vld [vmem:[#allocation26_spill] sm:$0xff]  ;;  %v10142_v27 = vshrl.u32 %v18125_v55, 16  ;;  %v10153_v11 = vshrl.u32 %v10062_v32, 16 }
 0x5de   : > { %v19129_v12 = vcombine.low %v19127_v34, %v19128_v28  ;;  %v10065_v28 = vld [vmem:[#allocation2 + $0x3c] sm:$0xf]  ;;  %v10122_v19 = vrot.slane %v10121_v60, 4 }
 0x5e4   : > { %13295 = vmatmul.mubr.msk.bf16.vlgmr.msra.gmra.mrb[0].mxu1 %vm1532_vm12, %v12296_v18  ;;  %v19134_v18 = vld [vmem:[#allocation30_spill] sm:$0xff] }
 0x5e5   : > { %13327 = vmatpush3.bf16.msra.mxu1 %v9861_v56  ;;  %13298 = vmatprep.mubr.msk.bf16.mxu1 %vm1532_vm12, %v19096_v25  ;;  %v19135_v56 = vcombine.low %v19133_v6, %v19134_v18  ;;  %v14032_v25 = vld [vmem:[#allocation2 + $0x30] sm:$0xff]   ;;  %v10144_v18 = vrot.slane %v10142_v27, 4 }
 0x5e6   : > { %13956 = vmatprep.subr.msk.bf16.mxu1 %vm1581_vm0, %v12360_v14  ;;  %v14035_v14 = vld [vmem:[#allocation2 + $0x54] sm:$0xff]  }
 0x5ec   : > { %13299 = vmatmul.mubr.msk.bf16.gmra.mrb[4].mxu1 %vm1532_vm12, %v19099_v62  ;;  %v14034_v62 = vld [vmem:[#allocation2 + $0x48] sm:$0xff]  }
 0x5ed   : > { %13302 = vmatprep.mubr.msk.bf16.mxu1 %vm1532_vm12, %v19102_v63  ;;  %v14038_v63 = vld [vmem:[#allocation2 + $0x78] sm:$0xff]  }
 0x5f4   : > { %13303 = vmatmul.mubr.msk.bf16.gmra.mrb[8].mxu1 %vm1532_vm12, %v19105_v54  ;;  %v14040_v54 = vld [vmem:[#allocation2 + $0x90] sm:$0xff]  }
 0x5f5   : > { %13306 = vmatprep.mubr.msk.bf16.mxu1 %vm1532_vm12, %v19108_v13  ;;  %v10108_v13 = vshll.u32 %v10056_v44, 16  ;;  %v10068_v44 = vld [vmem:[#allocation2 + $0x48] sm:$0xf] }
 0x5f7   : > { %v10110_v42 = vrot.slane %v10108_v13, 5 }
 0x5fc   : > { %13307 = vmatmul.mubr.msk.bf16.gmra.mrb[12].mxu1 %vm1532_vm12, %v19111_v39  ;;  %v10059_v39 = vld [vmem:[#allocation2 + $0x24] sm:$0xf] }
 0x5fd   : > { %13310 = vmatprep.mubr.msk.bf16.mxu1 %vm1532_vm12, %v19114_v37  ;;  %v14041_v37 = vld [vmem:[#allocation2 + $0x9c] sm:$0xff]   ;;  %v10132_v51 = vshll.u32 %v10059_v39, 16 }
 0x604   : > { %13311 = vmatmul.mubr.msk.bf16.gmra.mrb[16].mxu1 %vm1532_vm12, %v19117_v2  ;;  %v18127_v2 = vld [vmem:[#allocation2 + $0x20] sm:$0x1] }
 0x605   : > { %13314 = vmatprep.mubr.msk.bf16.mxu1 %vm1532_vm12, %v19120_v17  ;;  %v10129_v17 = vshrl.u32 %v10059_v39, 16  ;;  %v10124_v34 = vshll.u32 %v18127_v2, 16 }
 0x607   : > { %v10131_v38 = vrot.slane %v10129_v17, 4  ;;  %v10126_v13 = vrot.slane %v10124_v34, 5 }
 0x60c   : > { %13315 = vmatmul.mubr.msk.bf16.gmra.mrb[20].mxu1 %vm1532_vm12, %v19123_v41  ;;  %v10138_v41 = vshll.u32 %v18125_v55, 16 }
 0x60d   : > { %13318 = vmatprep.mubr.msk.bf16.mxu1 %vm1532_vm12, %v19126_v35  ;;  %v10156_v35 = vshll.u32 %v10062_v32, 16 }
 0x60e   : > { %v18139_v6 = vrot.slane %v10138_v41, 5 }
 0x610   : > { %v10145_v4 = vor.u32 %v10144_v18, %v18139_v6  ;;  %v19139_v18 = vld [vmem:[#allocation38_spill] sm:$0xff] }
 0x612   : > { %v10146_v34 = vrot.slane %v10145_v4, 4 }
 0x614   : > { %13319 = vmatmul.mubr.msk.bf16.gmra.mrb[24].mxu1 %vm1532_vm12, %v19129_v12  ;;  %v10111_v12 = vor.u32 %v10110_v42, %v10107_v16  ;;  %v19137_v16 = vld [vmem:[#allocation36_spill] sm:$0xff] }
 0x615   : > { %13322 = vmatprep.mubr.msk.bf16.mxu1 %vm1532_vm12, %v19132_v15  ;;  %v10134_v15 = vrot.slane %v10132_v51, 5  ;;  %v10186_v42 = vshll.u32 %v19137_v16, 16  ;;  %v10190_v17 = vshrl.u32 %v19137_v16, 16  ;;  %v10201_v51 = vshrl.u32 %v10068_v44, 16 }
 0x61c   : > { %13323 = vmatmul.mubr.msk.bf16.gmra.mrb[28].mxu1 %vm1532_vm12, %v19135_v56  ;;  %v10155_v56 = vrot.slane %v10153_v11, 4 }
 0x61d   : > { %13328 = vmatprep.mubr.msk.bf16.mxu1 %vm1532_vm12, %v14030_v58  ;;  %v18137_v58 = vld [vmem:[#allocation2 + $0x2c] sm:$0x1] }
 0x624   : > { %13329 = vmatmul.mubr.msk.bf16.vlgmr.msra.gmra.mrb[0].mxu1 %vm1532_vm12, %v14031_v1  ;;  %v10158_v1 = vrot.slane %v10156_v35, 5  ;;  %v10127_v35 = vsel %vm14294_vm13, %v10122_v19, %v10126_v13  ;;  %v10074_v13 = vld [vmem:[#allocation2 + $0x60] sm:$0xf] }
 0x625   : > { %13361 = vmatpush3.bf16.msra.mxu1 %v10587_v57  ;;  %13332 = vmatprep.mubr.msk.bf16.mxu1 %vm1532_vm12, %v14032_v25  ;;  %v19136_v57 = vld [vmem:[#allocation34_spill] sm:$0xff] }
 0x626   : > { %13957 = vmatprep.subr.msk.bf16.mxu1 %vm1581_vm0, %v18107_v40  ;;  %v10162_v25 = vshll.u32 %v19136_v57, 16  ;;  %v10159_v43 = vor.u32 %v10158_v1, %v10155_v56  ;;  %v10210_v56 = vshll.u32 %v19139_v18, 16  ;;  %v10214_v1 = vshrl.u32 %v19139_v18, 16 }
 0x628   : > { %v10164_v39 = vrot.slane %v10162_v25, 5  ;;  %v10192_v25 = vrot.slane %v10190_v17, 4  ;;  %v10212_v4 = vrot.slane %v10210_v56, 5 }
 0x62c   : > { %13333 = vmatmul.mubr.msk.bf16.gmra.mrb[4].mxu1 %vm1532_vm12, %v14033_v24  ;;  %v10166_v24 = vshrl.u32 %v19136_v57, 16 }
 0x62d   : > { %13336 = vmatprep.mubr.msk.bf16.mxu1 %vm1532_vm12, %v14034_v62  ;;  %v10177_v62 = vshrl.u32 %v10065_v28, 16 }
 0x62e   : > { %v10168_v32 = vrot.slane %v10166_v24, 4  ;;  %v10203_v24 = vrot.slane %v10201_v51, 4 }
 0x634   : > { %13337 = vmatmul.mubr.msk.bf16.gmra.mrb[8].mxu1 %vm1532_vm12, %v14035_v14  ;;  %v10180_v14 = vshll.u32 %v10065_v28, 16  ;;  %v10160_v28 = vrot.slane %v10159_v43, 4  ;;  %v10216_v43 = vrot.slane %v10214_v1, 4 }
 0x635   : > { %13340 = vmatprep.mubr.msk.bf16.mxu1 %vm1532_vm12, %v14036_v7  ;;  %v14043_v7 = vld [vmem:[#allocation2 + $0xb4] sm:$0xff]  }
 0x636   : > { %v10182_v48 = vrot.slane %v10180_v14, 5  ;;  %v14045_v14 = vld [vmem:[#allocation2 + $0xcc] sm:$0xff]  }
 0x63c   : > { %13341 = vmatmul.mubr.msk.bf16.gmra.mrb[12].mxu1 %vm1532_vm12, %v14037_v21  ;;  %v10112_v21 = vrot.slane %v10111_v12, 4  ;;  %v19138_v12 = vld [vmem:[#allocation35_spill] sm:$0xff] }
 0x63d   : > { %13344 = vmatprep.mubr.msk.bf16.mxu1 %vm1532_vm12, %v14038_v63  ;;  %v10135_v63 = vor.u32 %v10134_v15, %v10131_v38  ;;  %v10172_v60 = vshll.u32 %v19138_v12, 16  ;;  %v10169_v38 = vor.u32 %v10168_v32, %v10164_v39  ;;  %v10188_v15 = vrot.slane %v10186_v42, 5 }
 0x63e   : > { %v10117_v41 = vsel %vm14294_vm13, %v10112_v21, %v18129_v3  ;;  %v10071_v3 = vld [vmem:[#allocation2 + $0x54] sm:$0xf]  ;;  %v19140_v21 = vld [vmem:[#allocation37_spill] sm:$0xff] }
 0x63f   : > { %v10136_v27 = vrot.slane %v10135_v63, 4  ;;  %v10196_v63 = vshll.u32 %v19140_v21, 16  ;;  %v10174_v19 = vrot.slane %v10172_v60, 5  ;;  %v10225_v32 = vshrl.u32 %v10071_v3, 16 }
 0x640   : > { %v10170_v16 = vrot.slane %v10169_v38, 4  ;;  %v10217_v60 = vor.u32 %v10216_v43, %v10212_v4 }
 0x641   : > { %v10198_v51 = vrot.slane %v10196_v63, 5  ;;  %v10227_v18 = vrot.slane %v10225_v32, 4  ;;  %v10080_v32 = vld [vmem:[#allocation2 + $0x78] sm:$0xf] }
 0x644   : > { %13345 = vmatmul.mubr.msk.bf16.gmra.mrb[16].mxu1 %vm1532_vm12, %v14039_v8  ;;  %v10148_v8 = vshll.u32 %v18137_v58, 16 }
 0x645   : > { %13348 = vmatprep.mubr.msk.bf16.mxu1 %vm1532_vm12, %v14040_v54  ;;  %v14044_v54 = vld [vmem:[#allocation2 + $0xc0] sm:$0xff]  }
 0x646   : > { %v10150_v11 = vrot.slane %v10148_v8, 5  ;;  %v10141_v8 = vsel %vm14294_vm13, %v10136_v27, %v18139_v6  ;;  %v19141_v27 = vld [vmem:[#allocation39_spill] sm:$0xff] }
 0x64c   : > { %13349 = vmatmul.mubr.msk.bf16.gmra.mrb[20].mxu1 %vm1532_vm12, %v14041_v37  ;;  %v10179_v37 = vrot.slane %v10177_v62, 4 }
 0x64d   : > { %13352 = vmatprep.mubr.msk.bf16.mxu1 %vm1532_vm12, %v14042_v31  ;;  %v10204_v31 = vshll.u32 %v10068_v44, 16  ;;  %v10151_v44 = vsel %vm14294_vm13, %v10146_v34, %v10150_v11  ;;  %v10220_v11 = vshll.u32 %v19141_v27, 16 }
 0x64e   : > { %v10183_v57 = vor.u32 %v10182_v48, %v10179_v37  ;;  %v10228_v37 = vshll.u32 %v10071_v3, 16  ;;  %v10193_v48 = vor.u32 %v10192_v25, %v10188_v15  ;;  %v12362_v17 = vcombine.low %v10141_v8, %v10151_v44 }
 0x64f   : > { %v10206_v62 = vrot.slane %v10204_v31, 5  ;;  %v10249_v31 = vshrl.u32 %v10074_v13, 16  ;;  %v10258_v25 = vshll.u32 %v17721_v9, 16  ;;  %v10222_v63 = vrot.slane %v10220_v11, 5 }
 0x650   : > { %v10184_v42 = vrot.slane %v10183_v57, 4  ;;  %v10230_v38 = vrot.slane %v10228_v37, 5  ;;  %v10194_v1 = vrot.slane %v10193_v48, 4 }
 0x651   : > { %v10207_v6 = vor.u32 %v10206_v62, %v10203_v24  ;;  %v11057_v24 = vsel %vm1581_vm0, %v18107_v40, 0  ;;  %v10251_v62 = vrot.slane %v10249_v31, 4  ;;  %v10260_v40 = vrot.slane %v10258_v25, 5 }
 0x652   : > { %v10189_v56 = vsel %vm14294_vm13, %v10184_v42, %v10188_v15  ;;  %v10199_v21 = vsel %vm14294_vm13, %v10194_v1, %v10198_v51 }
 0x653   : > { %v10208_v57 = vrot.slane %v10207_v6, 4  ;;  %v12364_v15 = vcombine.low %v10189_v56, %v10199_v21  ;;  %v10282_v6 = vshll.u32 %v17739_v26, 16 }
 0x654   : > { %13353 = vmatmul.mubr.msk.bf16.gmra.mrb[24].mxu1 %vm1532_vm12, %v14043_v7  ;;  %v12361_v7 = vcombine.low %v10117_v41, %v10127_v35  ;;  %v10252_v41 = vshll.u32 %v10074_v13, 16  ;;  %v19142_v35 = vld [vmem:[#allocation40_spill] sm:$0xff]  ;;  %v19143_v13 = vld [vmem:[#allocation41_spill] sm:$0xff] }
 0x655   : > { %13356 = vmatprep.mubr.msk.bf16.mxu1 %vm1532_vm12, %v14044_v54  ;;  %v10165_v54 = vsel %vm14294_vm13, %v10160_v28, %v10164_v39  ;;  %v10175_v39 = vsel %vm14294_vm13, %v10170_v16, %v10174_v19  ;;  %v10234_v34 = vshll.u32 %v19142_v35, 16  ;;  %v10238_v28 = vshrl.u32 %v19142_v35, 16 }
 0x656   : > { %v12363_v12 = vcombine.low %v10165_v54, %v10175_v39  ;;  %v10254_v3 = vrot.slane %v10252_v41, 5  ;;  %v10218_v54 = vrot.slane %v10217_v60, 4  ;;  %v10231_v19 = vor.u32 %v10230_v38, %v10227_v18  ;;  %v19144_v60 = vld [vmem:[#allocation45_spill] sm:$0xff] }
 0x657   : > { %v10236_v8 = vrot.slane %v10234_v34, 5  ;;  %v10240_v44 = vrot.slane %v10238_v28, 4  ;;  %v10244_v43 = vshll.u32 %v19143_v13, 16  ;;  %v10297_v41 = vshrl.u32 %v10080_v32, 16  ;;  %v10083_v34 = vld [vmem:[#allocation2 + $0x84] sm:$0xf] }
 0x658   : > { %v10255_v42 = vor.u32 %v10254_v3, %v10251_v62  ;;  %v10223_v51 = vsel %vm14294_vm13, %v10218_v54, %v10222_v63  ;;  %v10300_v39 = vshll.u32 %v10080_v32, 16  ;;  %v10232_v11 = vrot.slane %v10231_v19, 4  ;;  %v10086_v19 = vld [vmem:[#allocation2 + $0x90] sm:$0xf]  ;;  %v19145_v32 = vld [vmem:[#allocation44_spill] sm:$0xff] }
 0x659   : > { %v10241_v31 = vor.u32 %v10240_v44, %v10236_v8  ;;  %v10246_v35 = vrot.slane %v10244_v43, 5  ;;  %v10306_v18 = vshll.u32 %v19144_v60, 16  ;;  %v10310_v38 = vshrl.u32 %v19144_v60, 16 }
 0x65a   : > { %v10256_v56 = vrot.slane %v10255_v42, 4  ;;  %v18192_v1 = vrot.slane %v10282_v6, 5  ;;  %v10302_v62 = vrot.slane %v10300_v39, 5  ;;  %v10321_v3 = vshrl.u32 %v10083_v34, 16 }
 0x65b   : > { %v10242_v25 = vrot.slane %v10241_v31, 4  ;;  %v10308_v44 = vrot.slane %v10306_v18, 5  ;;  %v10312_v54 = vrot.slane %v10310_v38, 4  ;;  %v10345_v31 = vshrl.u32 %v10086_v19, 16 }
 0x65c   : > { %13357 = vmatmul.mubr.msk.bf16.gmra.mrb[28].mxu1 %vm1532_vm12, %v14045_v14  ;;  %v10262_v14 = vshrl.u32 %v17721_v9, 16  ;;  %v10213_v9 = vsel %vm14294_vm13, %v10208_v57, %v10212_v4  ;;  %v10268_v4 = vshll.u32 %v17726_v33, 16  ;;  %v10237_v33 = vsel %vm14294_vm13, %v10232_v11, %v10236_v8 }
 0x65d   : > { %13362 = vmatprep.mubr.msk.bf16.mxu1 %vm1532_vm12, %v12361_v7  ;;  %v10077_v7 = vld [vmem:[#allocation2 + $0x6c] sm:$0xf]  ;;  %v12365_v27 = vcombine.low %v10213_v9, %v10223_v51  ;;  %v10247_v21 = vsel %vm14294_vm13, %v10242_v25, %v10246_v35  ;;  %v10261_v13 = vsel %vm14294_vm13, %v10256_v56, %v10260_v40  ;;  %v10292_v9 = vshll.u32 %v19145_v32, 16 }
 0x65e   : > { %v10273_v37 = vshrl.u32 %v10077_v7, 16  ;;  %v10276_v16 = vshll.u32 %v10077_v7, 16  ;;  %v10264_v48 = vrot.slane %v10262_v14, 4  ;;  %v10270_v14 = vrot.slane %v10268_v4, 5 }
 0x65f   : > { %v10324_v7 = vshll.u32 %v10083_v34, 16  ;;  %v10323_v42 = vrot.slane %v10321_v3, 4  ;;  %v12366_v39 = vcombine.low %v10237_v33, %v10247_v21  ;;  %v10313_v11 = vor.u32 %v10312_v54, %v10308_v44  ;;  %v19148_v21 = vld [vmem:[#allocation51_spill] sm:$0xff] }
 0x660   : > { %v10275_v28 = vrot.slane %v10273_v37, 4  ;;  %v19146_v37 = vld [vmem:[#allocation48_spill] sm:$0xff]  ;;  %v10294_v4 = vrot.slane %v10292_v9, 5  ;;  %v10354_v34 = vshll.u32 %v17795_v52, 16  ;;  %v10347_v25 = vrot.slane %v10345_v31, 4 }
 0x661   : > { %v10314_v33 = vrot.slane %v10313_v11, 4  ;;  %v10406_v11 = vshrl.u32 %v17827_v49, 16 }
 0x662   : > { %v10356_v54 = vrot.slane %v10354_v34, 5 }
 0x664   : > { %13363 = vmatmul.mubr.msk.bf16.vlgmr.msra.gmra.mrb[0].mxu1 %vm1532_vm12, %v12362_v17  ;;  %v10286_v17 = vshrl.u32 %v17739_v26, 16  ;;  %v10265_v26 = vor.u32 %v10264_v48, %v10260_v40  ;;  %v19147_v48 = vld [vmem:[#allocation49_spill] sm:$0xff] }
 0x665   : > { %13395 = vmatpush3.bf16.msra.mxu1 %v11057_v24  ;;  %13366 = vmatprep.mubr.msk.bf16.mxu1 %vm1532_vm12, %v12363_v12  ;;  %v10278_v12 = vrot.slane %v10276_v16, 5  ;;  %v10299_v24 = vrot.slane %v10297_v41, 4  ;;  %v10316_v16 = vshll.u32 %v19146_v37, 16  ;;  %v10330_v6 = vshll.u32 %v19147_v48, 16 }
 0x666   : > { %v10288_v57 = vrot.slane %v10286_v17, 4  ;;  %v10266_v43 = vrot.slane %v10265_v26, 4  ;;  %v10326_v17 = vrot.slane %v10324_v7, 5  ;;  %v10334_v51 = vshrl.u32 %v19147_v48, 16  ;;  %v19149_v48 = vld [vmem:[#allocation57_spill] sm:$0xff] }
 0x667   : > { %v10279_v63 = vor.u32 %v10278_v12, %v10275_v28  ;;  %v10303_v8 = vor.u32 %v10302_v62, %v10299_v24  ;;  %v10348_v41 = vshll.u32 %v10086_v19, 16  ;;  %v10358_v28 = vshrl.u32 %v17795_v52, 16  ;;  %v10089_v12 = vld [vmem:[#allocation2 + $0x9c] sm:$0xf]  ;;  %v10092_v62 = vld [vmem:[#allocation2 + $0xa8] sm:$0xf] }
 0x668   : > { %v10271_v40 = vsel %vm14294_vm13, %v10266_v43, %v10270_v14  ;;  %v10318_v38 = vrot.slane %v10316_v16, 5  ;;  %v10332_v56 = vrot.slane %v10330_v6, 5  ;;  %v10327_v26 = vor.u32 %v10326_v17, %v10323_v42 }
 0x669   : > { %v12367_v35 = vcombine.low %v10261_v13, %v10271_v40  ;;  %v10304_v18 = vrot.slane %v10303_v8, 4  ;;  %v10350_v24 = vrot.slane %v10348_v41, 5  ;;  %v10369_v52 = vshrl.u32 %v10089_v12, 16 }
 0x66a   : > { %v10372_v14 = vshll.u32 %v10089_v12, 16  ;;  %v10360_v19 = vrot.slane %v10358_v28, 4  ;;  %v10319_v43 = vsel %vm14294_vm13, %v10314_v33, %v10318_v38  ;;  %v10396_v32 = vshll.u32 %v10092_v62, 16  ;;  %v10098_v38 = vld [vmem:[#allocation2 + $0xc0] sm:$0xf] }
 0x66b   : > { %v10309_v13 = vsel %vm14294_vm13, %v10304_v18, %v10308_v44  ;;  %v10328_v9 = vrot.slane %v10327_v26, 4  ;;  %v10351_v8 = vor.u32 %v10350_v24, %v10347_v25  ;;  %v10364_v37 = vshll.u32 %v17797_v61, 16 }
 0x66c   : > { %13367 = vmatmul.mubr.msk.bf16.gmra.mrb[4].mxu1 %vm1532_vm12, %v12364_v15  ;;  %v10289_v15 = vor.u32 %v10288_v57, %v18192_v1  ;;  %v10336_v57 = vrot.slane %v10334_v51, 4  ;;  %v10371_v16 = vrot.slane %v10369_v52, 4  ;;  %v10374_v42 = vrot.slane %v10372_v14, 5 }
 0x66d   : > { %13370 = vmatprep.mubr.msk.bf16.mxu1 %vm1532_vm12, %v12365_v27  ;;  %v10280_v27 = vrot.slane %v10279_v63, 4  ;;  %v10340_v63 = vshll.u32 %v19148_v21, 16  ;;  %v10378_v6 = vshll.u32 %v19149_v48, 16  ;;  %v10382_v17 = vshrl.u32 %v19149_v48, 16 }
 0x66e   : > { %v10290_v60 = vrot.slane %v10289_v15, 4  ;;  %v10393_v15 = vshrl.u32 %v10092_v62, 16  ;;  %v12369_v31 = vcombine.low %v10309_v13, %v10319_v43  ;;  %v10361_v44 = vor.u32 %v10360_v19, %v10356_v54 }
 0x66f   : > { %v10285_v3 = vsel %vm14294_vm13, %v10280_v27, %v18192_v1  ;;  %v10337_v1 = vor.u32 %v10336_v57, %v10332_v56  ;;  %v10342_v41 = vrot.slane %v10340_v63, 5  ;;  %v10398_v40 = vrot.slane %v10396_v32, 5  ;;  %v19150_v57 = vld [vmem:[#allocation59_spill] sm:$0xff] }
 0x670   : > { %v10295_v7 = vsel %vm14294_vm13, %v10290_v60, %v10294_v4  ;;  %v10402_v27 = vshll.u32 %v17827_v49, 16  ;;  %v10333_v61 = vsel %vm14294_vm13, %v10328_v9, %v10332_v56  ;;  %v10352_v34 = vrot.slane %v10351_v8, 4  ;;  %v19151_v9 = vld [vmem:[#allocation63_spill] sm:$0xff] }
 0x671   : > { %v12368_v51 = vcombine.low %v10285_v3, %v10295_v7  ;;  %v10338_v4 = vrot.slane %v10337_v1, 4  ;;  %v10366_v28 = vrot.slane %v10364_v37, 5  ;;  %v10375_v12 = vor.u32 %v10374_v42, %v10371_v16 }
 0x672   : > { %v10380_v60 = vrot.slane %v10378_v6, 5  ;;  %v10384_v18 = vrot.slane %v10382_v17, 4  ;;  %v10388_v49 = vshll.u32 %v19150_v57, 16  ;;  %v10362_v62 = vrot.slane %v10361_v44, 4 }
 0x673   : > { %v10343_v26 = vsel %vm14294_vm13, %v10338_v4, %v10342_v41  ;;  %v10404_v33 = vrot.slane %v10402_v27, 5  ;;  %v10408_v56 = vrot.slane %v10406_v11, 4  ;;  %v10357_v14 = vsel %vm14294_vm13, %v10352_v34, %v10356_v54 }
 0x674   : > { %13371 = vmatmul.mubr.msk.bf16.gmra.mrb[8].mxu1 %vm1532_vm12, %v12366_v39  ;;  %v10395_v39 = vrot.slane %v10393_v15, 4  ;;  %v12370_v52 = vcombine.low %v10333_v61, %v10343_v26  ;;  %v10441_v7 = vshrl.u32 %v10098_v38, 16  ;;  %v10444_v21 = vshll.u32 %v10098_v38, 16  ;;  %v14078_v38 = vld [vmem:[#allocation2 + $0xbc] sm:$0x1] }
 0x675   : > { %13374 = vmatprep.mubr.msk.bf16.mxu1 %vm1532_vm12, %v12367_v35  ;;  %v10095_v35 = vld [vmem:[#allocation2 + $0xb4] sm:$0xf]  ;;  %v10367_v63 = vsel %vm14294_vm13, %v10362_v62, %v10366_v28  ;;  %v10376_v19 = vrot.slane %v10375_v12, 4  ;;  %v10385_v13 = vor.u32 %v10384_v18, %v10380_v60  ;;  %v10412_v43 = vshll.u32 %v17838_v53, 16 }
 0x676   : > { %v10417_v25 = vshrl.u32 %v10095_v35, 16  ;;  %v10420_v24 = vshll.u32 %v10095_v35, 16  ;;  %v10399_v3 = vor.u32 %v10398_v40, %v10395_v39  ;;  %v10426_v1 = vshll.u32 %v19151_v9, 16 }
 0x677   : > { %v10430_v8 = vshrl.u32 %v19151_v9, 16  ;;  %v12371_v37 = vcombine.low %v10357_v14, %v10367_v63  ;;  %v10390_v16 = vrot.slane %v10388_v49, 5  ;;  %v10409_v48 = vor.u32 %v10408_v56, %v10404_v33 }
 0x678   : > { %v10419_v15 = vrot.slane %v10417_v25, 4  ;;  %v10422_v32 = vrot.slane %v10420_v24, 5  ;;  %v10400_v42 = vrot.slane %v10399_v3, 4  ;;  %v10443_v54 = vrot.slane %v10441_v7, 4  ;;  %v14079_v24 = vld [vmem:[#allocation2 + $0xc8] sm:$0x1] }
 0x679   : > { %v10446_v6 = vrot.slane %v10444_v21, 5  ;;  %v10450_v17 = vshll.u32 %v17862_v5, 16  ;;  %v10381_v53 = vsel %vm14294_vm13, %v10376_v19, %v10380_v60  ;;  %v10414_v41 = vrot.slane %v10412_v43, 5 }
 0x67a   : > { %v10386_v44 = vrot.slane %v10385_v13, 4  ;;  %v10423_v39 = vor.u32 %v10422_v32, %v10419_v15  ;;  %v10428_v40 = vrot.slane %v10426_v1, 5  ;;  %v10432_v27 = vrot.slane %v10430_v8, 4  ;;  %v14080_v8 = vld [vmem:[#allocation2 + $0xd4] sm:$0x1] }
 0x67b   : > { %v10405_v11 = vsel %vm14294_vm13, %v10400_v42, %v10404_v33  ;;  %v10410_v35 = vrot.slane %v10409_v48, 4  ;;  %v10447_v34 = vor.u32 %v10446_v6, %v10443_v54  ;;  %v10452_v28 = vrot.slane %v10450_v17, 5 }
 0x67c   : > { %13375 = vmatmul.mubr.msk.bf16.gmra.mrb[12].mxu1 %vm1532_vm12, %v12368_v51  ;;  %v10454_v51 = vshrl.u32 %v17862_v5, 16  ;;  %v10391_v5 = vsel %vm14294_vm13, %v10386_v44, %v10390_v16  ;;  %v10436_v26 = vshll.u32 %v14078_v38, 16  ;;  %v10424_v49 = vrot.slane %v10423_v39, 4 }
 0x67d   : > { %13378 = vmatprep.mubr.msk.bf16.mxu1 %vm1532_vm12, %v12369_v31  ;;  %v10101_v31 = vld [vmem:[#allocation2 + $0xcc] sm:$0xf]  ;;  %v12372_v18 = vcombine.low %v10381_v53, %v10391_v5  ;;  %v10415_v60 = vsel %vm14294_vm13, %v10410_v35, %v10414_v41  ;;  %v10433_v25 = vor.u32 %v10432_v27, %v10428_v40  ;;  %v10460_v62 = vshll.u32 %v14079_v24, 16 }
 0x67e   : > { %v10465_v61 = vshrl.u32 %v10101_v31, 16  ;;  %v10468_v4 = vshll.u32 %v10101_v31, 16  ;;  %v10456_v12 = vrot.slane %v10454_v51, 4  ;;  %v12373_v57 = vcombine.low %v10405_v11, %v10415_v60  ;;  %v10782_v51 = vld [vmem:[#allocation2 + $0x18] sm:$0xe] }
 0x67f   : > { %v10474_v56 = vshll.u32 %v17885_v20, 16  ;;  %v10448_v14 = vrot.slane %v10447_v34, 4  ;;  %v10438_v21 = vrot.slane %v10436_v26, 5  ;;  %v10429_v63 = vsel %vm14294_vm13, %v10424_v49, %v10428_v40  ;;  %v19153_v60 = vld [vmem:[#allocation43_spill] sm:$0xff]  ;;  %v19158_v49 = vld [vmem:[#allocation50_spill] sm:$0xff] }
 0x680   : > { %v10467_v3 = vrot.slane %v10465_v61, 4  ;;  %v10470_v33 = vrot.slane %v10468_v4, 5  ;;  %v10457_v7 = vor.u32 %v10456_v12, %v10452_v28  ;;  %v10462_v19 = vrot.slane %v10460_v62, 5  ;;  %v10783_v61 = vld [vmem:[#allocation2 + $0x24] sm:$0xe]  ;;  %v19156_v26 = vld [vmem:[#allocation47_spill] sm:$0xff] }
 0x681   : > { %v10434_v13 = vrot.slane %v10433_v25, 4  ;;  %v10476_v15 = vrot.slane %v10474_v56, 5  ;;  %v10453_v9 = vsel %vm14294_vm13, %v10448_v14, %v10452_v28  ;;  %v10848_v48 = vrot.slane %v18119_v0, 5  ;;  %v19159_v25 = vld [vmem:[#allocation52_spill] sm:$0xff]  ;;  %v19162_v62 = vld [vmem:[#allocation54_spill] sm:$0xff] }
 0x682   : > { %v10471_v43 = vor.u32 %v10470_v33, %v10467_v3  ;;  %v10458_v1 = vrot.slane %v10457_v7, 4  ;;  %v10851_v31 = vrot.slane %v18127_v2, 5  ;;  %v12393_v41 = vrot.slane %v10782_v51, 9  ;;  %v19164_v33 = vld [vmem:[#allocation55_spill] sm:$0xff]  ;;  %v19165_v56 = vld [vmem:[#allocation58_spill] sm:$0xff]  ;;  %v19167_v14 = vld [vmem:[#allocation56_spill] sm:$0xff] }
 0x683   : > { %v10850_v44 = vrot.slane %v10848_v48, 4  ;;  %v10855_v11 = vrot.slane %v18125_v55, 5  ;;  %v10858_v5 = vrot.slane %v18137_v58, 5  ;;  %v12394_v34 = vrot.slane %v10783_v61, 9  ;;  %v19155_v58 = vld [vmem:[#allocation46_spill] sm:$0xff]  ;;  %v19168_v7 = vld [vmem:[#allocation60_spill] sm:$0xff] }
 0x684   : > { %13379 = vmatmul.mubr.msk.bf16.gmra.mrb[16].mxu1 %vm1532_vm12, %v12370_v52  ;;  %v10478_v52 = vshrl.u32 %v17885_v20, 16  ;;  %v10439_v20 = vsel %vm14294_vm13, %v10434_v13, %v10438_v21  ;;  %v10463_v42 = vsel %vm14294_vm13, %v10458_v1, %v10462_v19  ;;  %v10472_v6 = vrot.slane %v10471_v43, 4  ;;  %v19171_v19 = vld [vmem:[#allocation64_spill] sm:$0xff]  ;;  %v19173_v43 = vld [vmem:[#allocation62_spill] sm:$0xff] }
 0x685   : > { %13382 = vmatprep.mubr.msk.bf16.mxu1 %vm1532_vm12, %v12371_v37  ;;  %v10484_v37 = vshll.u32 %v14080_v8, 16  ;;  %v12374_v16 = vcombine.low %v10429_v63, %v10439_v20  ;;  %v12375_v54 = vcombine.low %v10453_v9, %v10463_v42  ;;  %v10852_v0 = vsel %vm14852_vm1, %v10850_v44, %v10851_v31  ;;  %v19170_v63 = vld [vmem:[#allocation61_spill] sm:$0xff]  ;;  %v19176_v9 = vld [vmem:[#allocation66_spill] sm:$0xff]  ;;  %v19178_v20 = vld [vmem:[#allocation67_spill] sm:$0xff] }
 0x686   : > { %v10480_v32 = vrot.slane %v10478_v52, 4  ;;  %v10477_v39 = vsel %vm14294_vm13, %v10472_v6, %v10476_v15  ;;  %v10849_v2 = vsel %vm14852_vm1, %v12393_v41, %v10848_v48  ;;  %v10857_v28 = vrot.slane %v10855_v11, 4 }
 0x687   : > { %v10486_v53 = vrot.slane %v10484_v37, 5  ;;  %v12410_v4 = vcombine.low %v10849_v2, %v10852_v0  ;;  %v10856_v55 = vsel %vm14852_vm1, %v12394_v34, %v10855_v11  ;;  %v19160_v24 = vcombine.low %v19158_v49, %v19159_v25  ;;  %v19180_v37 = vld [vmem:[#allocation68_spill] sm:$0xff] }
 0x688   : > { %v10481_v17 = vor.u32 %v10480_v32, %v10476_v15  ;;  %v10859_v23 = vsel %vm14852_vm1, %v10857_v28, %v10858_v5  ;;  %v19163_v3 = vcombine.low %v19161_v50, %v19162_v62  ;;  %v19166_v52 = vcombine.low %v19164_v33, %v19165_v56  ;;  %v19174_v15 = vld [vmem:[#allocation65_spill] sm:$0xff] }
 0x689   : > { %v12411_v12 = vcombine.low %v10856_v55, %v10859_v23  ;;  %v19169_v21 = vcombine.low %v19167_v14, %v19168_v7  ;;  %v19172_v13 = vcombine.low %v19170_v63, %v19171_v19  ;;  %v19175_v32 = vcombine.low %v19173_v43, %v19174_v15 }
 0x68a   : > { %v10482_v40 = vrot.slane %v10481_v17, 4  ;;  %v19177_v1 = vcombine.low %v17868_v36, %v19176_v9  ;;  %v19179_v8 = vcombine.low %v17874_v10, %v19178_v20  ;;  %v19183_v48 = vcombine.low %v17901_v47, %v17912_v29 }
 0x68b   : > { %v19184_v36 = vcombine.low %v17942_v22, %v17946_v45 }
 0x68c   : > { %13383 = vmatmul.mubr.msk.bf16.gmra.mrb[20].mxu1 %vm1532_vm12, %v12372_v18  ;;  %v10487_v27 = vsel %vm14294_vm13, %v10482_v40, %v10486_v53  ;;  %v19152_v18 = vld [vmem:[#allocation42_spill] sm:$0xff] }
 0x68d   : > { %13386 = vmatprep.mubr.msk.bf16.mxu1 %vm1532_vm12, %v12373_v57  ;;  %v12376_v35 = vcombine.low %v10477_v39, %v10487_v27  ;;  %v19154_v38 = vcombine.low %v19152_v18, %v19153_v60  ;;  %v19157_v57 = vcombine.low %v19155_v58, %v19156_v26 }
 0x694   : > { %13387 = vmatmul.mubr.msk.bf16.gmra.mrb[24].mxu1 %vm1532_vm12, %v12374_v16  ;;  %v19181_v16 = vld [vmem:[#allocation69_spill] sm:$0xff] }
 0x695   : > { %13390 = vmatprep.mubr.msk.bf16.mxu1 %vm1532_vm12, %v12375_v54  ;;  %v19182_v42 = vcombine.low %v19180_v37, %v19181_v16 }
 0x69c   : > { %13391 = vmatmul.mubr.msk.bf16.gmra.mrb[28].mxu1 %vm1532_vm12, %v12376_v35 }
 0x69d   : > { %13396 = vmatprep.mubr.msk.bf16.mxu1 %vm1532_vm12, %v12410_v4 }
 0x6a4   : > { %13397 = vmatmul.mubr.msk.bf16.vlgmr.msra.gmra.mrb[0].mxu1 %vm1532_vm12, %v12411_v12 }
 0x6a5   : > { %13400 = vmatprep.mubr.msk.bf16.mxu1 %vm1532_vm12, %v19154_v38 }
 0x6ac   : > { %13401 = vmatmul.mubr.msk.bf16.gmra.mrb[4].mxu1 %vm1532_vm12, %v19157_v57 }
 0x6ad   : > { %13404 = vmatprep.mubr.msk.bf16.mxu1 %vm1532_vm12, %v19160_v24 }
 0x6b4   : > { %13405 = vmatmul.mubr.msk.bf16.gmra.mrb[8].mxu1 %vm1532_vm12, %v19163_v3 }
 0x6b5   : > { %13408 = vmatprep.mubr.msk.bf16.mxu1 %vm1532_vm12, %v19166_v52 }
 0x6bc   : > { %13409 = vmatmul.mubr.msk.bf16.gmra.mrb[12].mxu1 %vm1532_vm12, %v19169_v21 }
 0x6bd   : > { %13412 = vmatprep.mubr.msk.bf16.mxu1 %vm1532_vm12, %v19172_v13 }
 0x6c4   : > { %13413 = vmatmul.mubr.msk.bf16.gmra.mrb[16].mxu1 %vm1532_vm12, %v19175_v32 }
 0x6c5   : > { %13416 = vmatprep.mubr.msk.bf16.mxu1 %vm1532_vm12, %v19177_v1 }
 0x6cc   : > { %13417 = vmatmul.mubr.msk.bf16.gmra.mrb[20].mxu1 %vm1532_vm12, %v19179_v8 }
 0x6cd   : > { %13420 = vmatprep.mubr.msk.bf16.mxu1 %vm1532_vm12, %v19182_v42 }
 0x6d4   : > { %13421 = vmatmul.mubr.msk.bf16.gmra.mrb[24].mxu1 %vm1532_vm12, %v19183_v48 }
 0x6d5   : > { %13424 = vmatprep.mubr.msk.bf16.mxu1 %vm1532_vm12, %v12424_v59 }
 0x6dc   : > { %13425 = vmatmul.mubr.msk.bf16.gmra.mrb[28].mxu1 %vm1532_vm12, %v19184_v36 }
 0x777   : > { %v18343_v10 = vpop.f32.mrb[0].mxu1 }
 0x778   : > { %v18345_v54 = vpop.f32.mrb[1].mxu1  ;;  %v11255_v30 = vsel %vm1532_vm12, %v18343_v10, 0.0 }
 0x779   : > { %v18347_v6 = vpop.f32.mrb[2].mxu1  ;;  %v11252_v29 = vsel %vm1532_vm12, %v18345_v54, 0.0 }
 0x77a   : > { %v18349_v17 = vpop.f32.mrb[3].mxu1  ;;  %v11257_v22 = vsel %vm1532_vm12, %v18347_v6, 0.0 }
 0x77b   : > { %v11253_v47 = vsel %vm1532_vm12, %v18349_v17, 0.0 }
 0x77c   : > { %v11254_v46 = vadd.f32 %v11253_v47, %v11252_v29 }
 0x77e   : > { %v11256_v59 = vadd.f32 %v11255_v30, %v11254_v46 }
 0x77f   : > { %v18359_v45 = vpop.f32.mrb[4].mxu1 }
 0x780   : > { %v18361_v51 = vpop.f32.mrb[5].mxu1  ;;  %v11258_v31 = vadd.f32 %v11257_v22, %v11256_v59  ;;  %v11263_v27 = vsel %vm1532_vm12, %v18359_v45, 0.0 }
 0x781   : > { %v11259_v53 = vsel %vm1532_vm12, %v18361_v51, 0.0  ;;  %v18365_v41 = vpop.f32.mrb[6].mxu1 }
 0x782   : > { %v11260_v44 = vadd.f32 %v11259_v53, %v11258_v31  ;;  %v18367_v39 = vpop.f32.mrb[7].mxu1  ;;  %v11265_v35 = vsel %vm1532_vm12, %v18365_v41, 0.0 }
 0x783   : > { %v11261_v40 = vsel %vm1532_vm12, %v18367_v39, 0.0 }
 0x784   : > { %v11262_v0 = vadd.f32 %v11261_v40, %v11260_v44 }
 0x786   : > { %v11264_v11 = vadd.f32 %v11263_v27, %v11262_v0 }
 0x787   : > { %v18375_v2 = vpop.f32.mrb[8].mxu1 }
 0x788   : > { %v18377_v61 = vpop.f32.mrb[9].mxu1  ;;  %v11266_v4 = vadd.f32 %v11265_v35, %v11264_v11  ;;  %v11271_v18 = vsel %vm1532_vm12, %v18375_v2, 0.0 }
 0x789   : > { %v11267_v5 = vsel %vm1532_vm12, %v18377_v61, 0.0  ;;  %v18381_v34 = vpop.f32.mrb[10].mxu1 }
 0x78a   : > { %v11268_v28 = vadd.f32 %v11267_v5, %v11266_v4  ;;  %v18383_v23 = vpop.f32.mrb[11].mxu1  ;;  %v11273_v38 = vsel %vm1532_vm12, %v18381_v34, 0.0 }
 0x78b   : > { %v11269_v55 = vsel %vm1532_vm12, %v18383_v23, 0.0 }
 0x78c   : > { %v11270_v12 = vadd.f32 %v11269_v55, %v11268_v28 }
 0x78e   : > { %v11272_v60 = vadd.f32 %v11271_v18, %v11270_v12 }
 0x78f   : > { %v18391_v58 = vpop.f32.mrb[12].mxu1 }
 0x790   : > { %v18393_v26 = vpop.f32.mrb[13].mxu1  ;;  %v11274_v57 = vadd.f32 %v11273_v38, %v11272_v60  ;;  %v11279_v33 = vsel %vm1532_vm12, %v18391_v58, 0.0 }
 0x791   : > { %v11275_v49 = vsel %vm1532_vm12, %v18393_v26, 0.0  ;;  %v18397_v25 = vpop.f32.mrb[14].mxu1 }
 0x792   : > { %v11276_v24 = vadd.f32 %v11275_v49, %v11274_v57  ;;  %v18399_v50 = vpop.f32.mrb[15].mxu1  ;;  %v11281_v52 = vsel %vm1532_vm12, %v18397_v25, 0.0 }
 0x793   : > { %v11277_v62 = vsel %vm1532_vm12, %v18399_v50, 0.0 }
 0x794   : > { %v11278_v3 = vadd.f32 %v11277_v62, %v11276_v24 }
 0x796   : > { %v11280_v56 = vadd.f32 %v11279_v33, %v11278_v3 }
 0x797   : > { %v18407_v14 = vpop.f32.mrb[16].mxu1 }
 0x798   : > { %v18409_v7 = vpop.f32.mrb[17].mxu1  ;;  %v11282_v21 = vadd.f32 %v11281_v52, %v11280_v56  ;;  %v11287_v9 = vsel %vm1532_vm12, %v18407_v14, 0.0 }
 0x799   : > { %v11283_v63 = vsel %vm1532_vm12, %v18409_v7, 0.0  ;;  %v18413_v19 = vpop.f32.mrb[18].mxu1 }
 0x79a   : > { %v11284_v13 = vadd.f32 %v11283_v63, %v11282_v21  ;;  %v18415_v43 = vpop.f32.mrb[19].mxu1  ;;  %v11289_v20 = vsel %vm1532_vm12, %v18413_v19, 0.0 }
 0x79b   : > { %v11285_v15 = vsel %vm1532_vm12, %v18415_v43, 0.0 }
 0x79c   : > { %v11286_v32 = vadd.f32 %v11285_v15, %v11284_v13 }
 0x79e   : > { %v11288_v1 = vadd.f32 %v11287_v9, %v11286_v32 }
 0x79f   : > { %v18423_v8 = vpop.f32.mrb[20].mxu1 }
 0x7a0   : > { %v18425_v37 = vpop.f32.mrb[21].mxu1  ;;  %v11290_v16 = vadd.f32 %v11289_v20, %v11288_v1  ;;  %v11295_v30 = vsel %vm1532_vm12, %v18423_v8, 0.0 }
 0x7a1   : > { %v11291_v42 = vsel %vm1532_vm12, %v18425_v37, 0.0  ;;  %v18429_v48 = vpop.f32.mrb[22].mxu1 }
 0x7a2   : > { %v11292_v36 = vadd.f32 %v11291_v42, %v11290_v16  ;;  %v11176_v29 = vpop.f32.mrb[23].mxu1  ;;  %v11297_v22 = vsel %vm1532_vm12, %v18429_v48, 0.0 }
 0x7a3   : > { %v11293_v47 = vsel %vm1532_vm12, %v11176_v29, 0.0 }
 0x7a4   : > { %v11294_v46 = vadd.f32 %v11293_v47, %v11292_v36 }
 0x7a6   : > { %v11296_v59 = vadd.f32 %v11295_v30, %v11294_v46 }
 0x7a7   : > { %v13422_v31 = vpop.f32.mrb[24].mxu1 }
 0x7a8   : > { %v11189_v53 = vpop.f32.mrb[25].mxu1  ;;  %v11298_v44 = vadd.f32 %v11297_v22, %v11296_v59  ;;  %v11303_v5 = vsel %vm1532_vm12, %v13422_v31, 0.0 }
 0x7a9   : > { %v11299_v40 = vsel %vm1532_vm12, %v11189_v53, 0.0  ;;  %v13423_v0 = vpop.f32.mrb[26].mxu1 }
 0x7aa   : > { %v11300_v27 = vadd.f32 %v11299_v40, %v11298_v44  ;;  %v11192_v11 = vpop.f32.mrb[27].mxu1  ;;  %v11305_v55 = vsel %vm1532_vm12, %v13423_v0, 0.0 }
 0x7ab   : > { %v11301_v35 = vsel %vm1532_vm12, %v11192_v11, 0.0 }
 0x7ac   : > { %v11302_v4 = vadd.f32 %v11301_v35, %v11300_v27 }
 0x7ae   : > { %v11304_v28 = vadd.f32 %v11303_v5, %v11302_v4 }
 0x7af   : > { %v13426_v12 = vpop.f32.mrb[28].mxu1 }
 0x7b0   : > { %v11205_v18 = vpop.f32.mrb[29].mxu1  ;;  %v11306_v60 = vadd.f32 %v11305_v55, %v11304_v28  ;;  %v11311_v33 = vsel %vm1532_vm12, %v13426_v12, 0.0 }
 0x7b1   : > { %v11307_v38 = vsel %vm1532_vm12, %v11205_v18, 0.0  ;;  %v13427_v57 = vpop.f32.mrb[30].mxu1 }
 0x7b2   : > { %v11308_v49 = vadd.f32 %v11307_v38, %v11306_v60  ;;  %v11208_v24 = vpop.f32.mrb[31].mxu1  ;;  %v11313_v52 = vsel %vm1532_vm12, %v13427_v57, 0.0 }
 0x7b3   : > { %v11309_v62 = vsel %vm1532_vm12, %v11208_v24, 0.0 }
 0x7b4   : > { %v11310_v3 = vadd.f32 %v11309_v62, %v11308_v49 }
 0x7b6   : > { %v11312_v56 = vadd.f32 %v11311_v33, %v11310_v3 }
 0x7b8   : > { %v11314_v21 = vadd.f32 %v11313_v52, %v11312_v56 }
 0x7ba   : > { %v11315_v63 = vrot.slane %v11314_v21, 4 }
 0x7bc   : > { %v11316_v13 = vadd.f32 %v11315_v63, %v11314_v21 }
 0x7be   : > { %v11317_v15 = vrot.slane %v11316_v13, 2 }
 0x7c0   : > { %v11318_v32 = vadd.f32 %v11317_v15, %v11316_v13 }
 0x7c2   : > { %v11319_v9 = vrot.slane %v11318_v32, 1 }
 0x7c4   : > { %v11320_v1 = vadd.f32 %v11319_v9, %v11318_v32 }
 0x7c6   : > { %v11321_v20 = vmul.f32 0.00390625, %v11320_v1 }
 0x7c8   : > { %v18445_v16 = vsub.f32 %v18345_v54, %v11321_v20  ;;  %v18448_v42 = vsub.f32 %v18349_v17, %v11321_v20  ;;  %v18451_v36 = vsub.f32 %v18343_v10, %v11321_v20  ;;  %v18454_v47 = vsub.f32 %v18347_v6, %v11321_v20 }
 0x7c9   : > { %v18457_v46 = vsub.f32 %v18361_v51, %v11321_v20  ;;  %v18460_v30 = vsub.f32 %v18367_v39, %v11321_v20  ;;  %v18463_v59 = vsub.f32 %v18359_v45, %v11321_v20  ;;  %v18466_v54 = vsub.f32 %v18365_v41, %v11321_v20 }
 0x7ca   : > { %v18469_v17 = vsub.f32 %v18377_v61, %v11321_v20  ;;  %v18472_v10 = vsub.f32 %v18383_v23, %v11321_v20  ;;  %v18475_v6 = vsub.f32 %v18375_v2, %v11321_v20  ;;  %v18478_v51 = vsub.f32 %v18381_v34, %v11321_v20 }
 0x7cb   : > { %v18481_v39 = vsub.f32 %v18393_v26, %v11321_v20  ;;  %v18484_v45 = vsub.f32 %v18399_v50, %v11321_v20  ;;  %v18487_v41 = vsub.f32 %v18391_v58, %v11321_v20  ;;  %v18490_v61 = vsub.f32 %v18397_v25, %v11321_v20 }
 0x7cc   : > { %v18493_v23 = vsub.f32 %v18409_v7, %v11321_v20  ;;  %v18496_v2 = vsub.f32 %v18415_v43, %v11321_v20  ;;  %v18499_v34 = vsub.f32 %v18407_v14, %v11321_v20  ;;  %v18502_v26 = vsub.f32 %v18413_v19, %v11321_v20 }
 0x7cd   : > { %v18505_v50 = vsub.f32 %v18425_v37, %v11321_v20  ;;  %v18507_v58 = vsub.f32 %v11176_v29, %v11321_v20  ;;  %v18510_v25 = vsub.f32 %v18423_v8, %v11321_v20  ;;  %v18513_v7 = vsub.f32 %v18429_v48, %v11321_v20 }
 0x7ce   : > { %v18515_v22 = vsub.f32 %v11189_v53, %v11321_v20  ;;  %v18517_v43 = vsub.f32 %v11192_v11, %v11321_v20  ;;  %v18519_v14 = vsub.f32 %v13422_v31, %v11321_v20  ;;  %v18521_v44 = vsub.f32 %v13423_v0, %v11321_v20 }
 0x7cf   : > { %v18523_v19 = vsub.f32 %v11205_v18, %v11321_v20  ;;  %v18525_v37 = vsub.f32 %v11208_v24, %v11321_v20  ;;  %v18527_v29 = vsub.f32 %v13426_v12, %v11321_v20  ;;  %v18529_v40 = vsub.f32 %v13427_v57, %v11321_v20 }
 0x7d0   : > { %v11354_v8 = vmul.f32 %v18445_v16, %v18445_v16  ;;  %v11355_v48 = vmul.f32 %v18448_v42, %v18448_v42  ;;  %v11356_v31 = vmul.f32 %v18451_v36, %v18451_v36  ;;  %v11357_v53 = vmul.f32 %v18454_v47, %v18454_v47 }
 0x7d1   : > { %v11358_v35 = vmul.f32 %v18457_v46, %v18457_v46  ;;  %v11359_v28 = vmul.f32 %v18460_v30, %v18460_v30  ;;  %v11360_v18 = vmul.f32 %v18463_v59, %v18463_v59  ;;  %v11361_v57 = vmul.f32 %v18466_v54, %v18466_v54 }
 0x7d2   : > { %v11386_v0 = vsel %vm1532_vm12, %v11354_v8, 0.0  ;;  %v11387_v27 = vsel %vm1532_vm12, %v11355_v48, 0.0  ;;  %v11389_v4 = vsel %vm1532_vm12, %v11356_v31, 0.0  ;;  %v11391_v55 = vsel %vm1532_vm12, %v11357_v53, 0.0 }
 0x7d3   : > { %v11388_v11 = vadd.f32 %v11387_v27, %v11386_v0  ;;  %v11393_v60 = vsel %vm1532_vm12, %v11358_v35, 0.0  ;;  %v11395_v49 = vsel %vm1532_vm12, %v11359_v28, 0.0  ;;  %v11362_v62 = vmul.f32 %v18469_v17, %v18469_v17 }
 0x7d4   : > { %v11397_v3 = vsel %vm1532_vm12, %v11360_v18, 0.0  ;;  %v11363_v56 = vmul.f32 %v18472_v10, %v18472_v10  ;;  %v11399_v52 = vsel %vm1532_vm12, %v11361_v57, 0.0  ;;  %v11364_v63 = vmul.f32 %v18475_v6, %v18475_v6 }
 0x7d5   : > { %v11390_v5 = vadd.f32 %v11389_v4, %v11388_v11  ;;  %v11401_v13 = vsel %vm1532_vm12, %v11362_v62, 0.0  ;;  %v11365_v32 = vmul.f32 %v18478_v51, %v18478_v51  ;;  %v11366_v20 = vmul.f32 %v18481_v39, %v18481_v39 }
 0x7d6   : > { %v11403_v9 = vsel %vm1532_vm12, %v11363_v56, 0.0  ;;  %v11405_v8 = vsel %vm1532_vm12, %v11364_v63, 0.0  ;;  %v11367_v31 = vmul.f32 %v18484_v45, %v18484_v45  ;;  %v11368_v27 = vmul.f32 %v18487_v41, %v18487_v41 }
 0x7d7   : > { %v11392_v12 = vadd.f32 %v11391_v55, %v11390_v5  ;;  %v11407_v53 = vsel %vm1532_vm12, %v11365_v32, 0.0  ;;  %v11409_v11 = vsel %vm1532_vm12, %v11366_v20, 0.0  ;;  %v11369_v4 = vmul.f32 %v18490_v61, %v18490_v61 }
 0x7d8   : > { %v11411_v5 = vsel %vm1532_vm12, %v11367_v31, 0.0  ;;  %v11370_v55 = vmul.f32 %v18493_v23, %v18493_v23 }
 0x7d9   : > { %v11394_v38 = vadd.f32 %v11393_v60, %v11392_v12  ;;  %v11413_v12 = vsel %vm1532_vm12, %v11368_v27, 0.0  ;;  %v11371_v60 = vmul.f32 %v18496_v2, %v18496_v2 }
 0x7db   : > { %v11396_v24 = vadd.f32 %v11395_v49, %v11394_v38  ;;  %v11415_v38 = vsel %vm1532_vm12, %v11369_v4, 0.0  ;;  %v11372_v49 = vmul.f32 %v18499_v34, %v18499_v34 }
 0x7dd   : > { %v11398_v33 = vadd.f32 %v11397_v3, %v11396_v24  ;;  %v11417_v24 = vsel %vm1532_vm12, %v11370_v55, 0.0  ;;  %v11373_v3 = vmul.f32 %v18502_v26, %v18502_v26 }
 0x7df   : > { %v11400_v21 = vadd.f32 %v11399_v52, %v11398_v33  ;;  %v11419_v33 = vsel %vm1532_vm12, %v11371_v60, 0.0  ;;  %v11374_v52 = vmul.f32 %v18505_v50, %v18505_v50 }
 0x7e1   : > { %v11402_v15 = vadd.f32 %v11401_v13, %v11400_v21  ;;  %v11421_v21 = vsel %vm1532_vm12, %v11372_v49, 0.0  ;;  %v11375_v13 = vmul.f32 %v18507_v58, %v18507_v58 }
 0x7e3   : > { %v11404_v1 = vadd.f32 %v11403_v9, %v11402_v15  ;;  %v11423_v15 = vsel %vm1532_vm12, %v11373_v3, 0.0  ;;  %v11376_v9 = vmul.f32 %v18510_v25, %v18510_v25 }
 0x7e5   : > { %v11406_v48 = vadd.f32 %v11405_v8, %v11404_v1  ;;  %v11425_v1 = vsel %vm1532_vm12, %v11374_v52, 0.0  ;;  %v11377_v8 = vmul.f32 %v18513_v7, %v18513_v7 }
 0x7e7   : > { %v11408_v0 = vadd.f32 %v11407_v53, %v11406_v48  ;;  %v11427_v48 = vsel %vm1532_vm12, %v11375_v13, 0.0  ;;  %v11378_v53 = vmul.f32 %v18515_v22, %v18515_v22 }
 0x7e9   : > { %v11410_v35 = vadd.f32 %v11409_v11, %v11408_v0  ;;  %v11429_v0 = vsel %vm1532_vm12, %v11376_v9, 0.0  ;;  %v11379_v11 = vmul.f32 %v18517_v43, %v18517_v43 }
 0x7eb   : > { %v11412_v28 = vadd.f32 %v11411_v5, %v11410_v35  ;;  %v11431_v35 = vsel %vm1532_vm12, %v11377_v8, 0.0  ;;  %v11380_v5 = vmul.f32 %v18519_v14, %v18519_v14 }
 0x7ed   : > { %v11414_v18 = vadd.f32 %v11413_v12, %v11412_v28  ;;  %v11433_v28 = vsel %vm1532_vm12, %v11378_v53, 0.0  ;;  %v11381_v12 = vmul.f32 %v18521_v44, %v18521_v44 }
 0x7ef   : > { %v11416_v57 = vadd.f32 %v11415_v38, %v11414_v18  ;;  %v11435_v18 = vsel %vm1532_vm12, %v11379_v11, 0.0  ;;  %v11382_v38 = vmul.f32 %v18523_v19, %v18523_v19 }
 0x7f1   : > { %v11418_v62 = vadd.f32 %v11417_v24, %v11416_v57  ;;  %v11437_v57 = vsel %vm1532_vm12, %v11380_v5, 0.0  ;;  %v11383_v24 = vmul.f32 %v18525_v37, %v18525_v37 }
 0x7f3   : > { %v11420_v56 = vadd.f32 %v11419_v33, %v11418_v62  ;;  %v11439_v62 = vsel %vm1532_vm12, %v11381_v12, 0.0  ;;  %v11384_v33 = vmul.f32 %v18527_v29, %v18527_v29 }
 0x7f5   : > { %v11422_v63 = vadd.f32 %v11421_v21, %v11420_v56  ;;  %v11441_v56 = vsel %vm1532_vm12, %v11382_v38, 0.0  ;;  %v11385_v21 = vmul.f32 %v18529_v40, %v18529_v40 }
 0x7f7   : > { %v11424_v32 = vadd.f32 %v11423_v15, %v11422_v63  ;;  %v11443_v63 = vsel %vm1532_vm12, %v11383_v24, 0.0  ;;  %v11445_v15 = vsel %vm1532_vm12, %v11384_v33, 0.0  ;;  %v11447_v9 = vsel %vm1532_vm12, %v11385_v21, 0.0  ;;  %v14085_v24 = vld [vmem:[%s14167_s21 + $0x20] sm:$0xff] }
 0x7f8   : > { %v14089_v21 = vld [vmem:[%s14167_s21 + $0x40] sm:$0xff] }
 0x7f9   : > { %v11426_v20 = vadd.f32 %v11425_v1, %v11424_v32 }
 0x7fb   : > { %v11428_v31 = vadd.f32 %v11427_v48, %v11426_v20 }
 0x7fd   : > { %v11430_v27 = vadd.f32 %v11429_v0, %v11428_v31 }
 0x7ff   : > { %v11432_v4 = vadd.f32 %v11431_v35, %v11430_v27 }
 0x801   : > { %v11434_v55 = vadd.f32 %v11433_v28, %v11432_v4 }
 0x803   : > { %v11436_v60 = vadd.f32 %v11435_v18, %v11434_v55 }
 0x805   : > { %v11438_v49 = vadd.f32 %v11437_v57, %v11436_v60 }
 0x807   : > { %v11440_v3 = vadd.f32 %v11439_v62, %v11438_v49  ;;  %v14086_v62 = vld [vmem:[%s14167_s21 + $0x28] sm:$0xff] }
 0x809   : > { %v11442_v52 = vadd.f32 %v11441_v56, %v11440_v3  ;;  %v14087_v3 = vld [vmem:[%s14167_s21 + $0x30] sm:$0xff]  ;;  %v14088_v56 = vld [vmem:[%s14167_s21 + $0x38] sm:$0xff] }
 0x80b   : > { %v11444_v13 = vadd.f32 %v11443_v63, %v11442_v52 }
 0x80d   : > { %v11446_v32 = vadd.f32 %v11445_v15, %v11444_v13  ;;  %v14090_v13 = vld [vmem:[%s14167_s21 + $0x48] sm:$0xff] }
 0x80f   : > { %v11448_v1 = vadd.f32 %v11447_v9, %v11446_v32  ;;  %v14091_v32 = vld [vmem:[%s14167_s21 + $0x50] sm:$0xff] }
 0x811   : > { %v11449_v20 = vrot.slane %v11448_v1, 4 }
 0x813   : > { %v11450_v8 = vadd.f32 %v11449_v20, %v11448_v1  ;;  %v14092_v1 = vld [vmem:[%s14167_s21 + $0x58] sm:$0xff] }
 0x815   : > { %v11451_v48 = vrot.slane %v11450_v8, 2 }
 0x817   : > { %v11452_v31 = vadd.f32 %v11451_v48, %v11450_v8  ;;  %v14093_v8 = vld [vmem:[%s14167_s21 + $0x60] sm:$0xff] }
 0x819   : > { %v11453_v53 = vrot.slane %v11452_v31, 1 }
 0x81b   : > { %v11454_v0 = vadd.f32 %v11453_v53, %v11452_v31  ;;  %v14094_v31 = vld [vmem:[%s14167_s21 + $0x68] sm:$0xff] }
 0x81d   : > { %v11455_v27 = vmul.f32 0.00390625, %v11454_v0  ;;  %v14095_v0 = vld [vmem:[%s14167_s21 + $0x70] sm:$0xff] }
 0x81f   : > { %v11456_v11 = vadd.f32 1e-05, %v11455_v27 }
 0x821   : > { %14048 = vrsqrt.f32 %v11456_v11  ;;  %v14096_v11 = vld [vmem:[%s14167_s21 + $0x78] sm:$0xff] }
 0x82b   : > { %v14049_v35 = vpop.eup %14048 }
 0x82c   : > { %v11458_v4 = vmul.f32 %v14049_v35, %v18445_v16  ;;  %v11459_v5 = vmul.f32 %v14049_v35, %v18448_v42  ;;  %v11460_v28 = vmul.f32 %v14049_v35, %v18451_v36  ;;  %v11461_v55 = vmul.f32 %v14049_v35, %v18454_v47 }
 0x82d   : > { %v11462_v12 = vmul.f32 %v14049_v35, %v18457_v46  ;;  %v11463_v18 = vmul.f32 %v14049_v35, %v18460_v30  ;;  %v11464_v60 = vmul.f32 %v14049_v35, %v18463_v59  ;;  %v11465_v38 = vmul.f32 %v14049_v35, %v18466_v54 }
 0x82e   : > { %v11466_v57 = vmul.f32 %v14049_v35, %v18469_v17  ;;  %v11467_v49 = vmul.f32 %v14049_v35, %v18472_v10  ;;  %v11468_v16 = vmul.f32 %v14049_v35, %v18475_v6  ;;  %v11469_v42 = vmul.f32 %v14049_v35, %v18478_v51 }
 0x82f   : > { %v11470_v36 = vmul.f32 %v14049_v35, %v18481_v39  ;;  %v11471_v47 = vmul.f32 %v14049_v35, %v18484_v45  ;;  %v11472_v46 = vmul.f32 %v14049_v35, %v18487_v41  ;;  %v11473_v30 = vmul.f32 %v14049_v35, %v18490_v61 }
 0x830   : > { %v11474_v59 = vmul.f32 %v14049_v35, %v18493_v23  ;;  %v11475_v54 = vmul.f32 %v14049_v35, %v18496_v2  ;;  %v11476_v17 = vmul.f32 %v14049_v35, %v18499_v34  ;;  %v11477_v10 = vmul.f32 %v14049_v35, %v18502_v26 }
 0x831   : > { %v18648_v6 = vmul.f32 %v14049_v35, %v18505_v50  ;;  %v18651_v51 = vmul.f32 %v14049_v35, %v18507_v58  ;;  %v18654_v39 = vmul.f32 %v14049_v35, %v18510_v25  ;;  %v18657_v45 = vmul.f32 %v14049_v35, %v18513_v7  ;;  %v14081_v25 = vld [vmem:[%s14167_s21] sm:$0xff] }
 0x832   : > { %v18660_v41 = vmul.f32 %v14049_v35, %v18515_v22  ;;  %v18663_v61 = vmul.f32 %v14049_v35, %v18517_v43  ;;  %v18666_v23 = vmul.f32 %v14049_v35, %v18519_v14  ;;  %v18669_v2 = vmul.f32 %v14049_v35, %v18521_v44  ;;  %v14082_v22 = vld [vmem:[%s14167_s21 + $0x8] sm:$0xff]  ;;  %v14083_v14 = vld [vmem:[%s14167_s21 + $0x10] sm:$0xff] }
 0x833   : > { %v18679_v34 = vmul.f32 %v14049_v35, %v18523_v19  ;;  %v18682_v26 = vmul.f32 %v14049_v35, %v18525_v37  ;;  %v18685_v50 = vmul.f32 %v14049_v35, %v18527_v29  ;;  %v18688_v58 = vmul.f32 %v14049_v35, %v18529_v40  ;;  %v14084_v19 = vld [vmem:[%s14167_s21 + $0x18] sm:$0xff] }
 0x834   : > { %v11490_v7 = vadd.f32 %v14081_v25, %v11458_v4  ;;  %v11491_v43 = vadd.f32 %v14082_v22, %v11459_v5  ;;  %v11492_v44 = vadd.f32 %v14083_v14, %v11460_v28  ;;  %v11493_v37 = vadd.f32 %v14084_v19, %v11461_v55  ;;  %v14097_v4 = vld [vmem:[%s14167_s21 + $0x80] sm:$0xff]  ;;  %v14098_v28 = vld [vmem:[%s14167_s21 + $0x88] sm:$0xff]  ;;  %v14111_v25 = vld [vmem:[%s14167_s21 + $0xf0] sm:$0xff] }
 0x835   : > { %v11494_v29 = vadd.f32 %v14085_v24, %v11462_v12  ;;  %v11495_v40 = vadd.f32 %v14086_v62, %v11463_v18  ;;  %v11496_v33 = vadd.f32 %v14087_v3, %v11464_v60  ;;  %v11497_v52 = vadd.f32 %v14088_v56, %v11465_v38  ;;  %v14099_v12 = vld [vmem:[%s14167_s21 + $0x90] sm:$0xff]  ;;  %v14100_v60 = vld [vmem:[%s14167_s21 + $0x98] sm:$0xff] }
 0x836   : > { %v11498_v63 = vadd.f32 %v14089_v21, %v11466_v57  ;;  %v11499_v15 = vadd.f32 %v14090_v13, %v11467_v49  ;;  %v11500_v9 = vadd.f32 %v14091_v32, %v11468_v16  ;;  %v11501_v20 = vadd.f32 %v14092_v1, %v11469_v42  ;;  %11522 = vst.msk [vmem:[%s18676_s10] sm:$0xff] %vm1532_vm12, %v11490_v7  ;;  %v14101_v57 = vld [vmem:[%s14167_s21 + $0xa0] sm:$0xff]  ;;  %v14102_v16 = vld [vmem:[%s14167_s21 + $0xa8] sm:$0xff]  ;;  %v14112_v22 = vld [vmem:[%s14167_s21 + $0xf8] sm:$0xff] }
 0x837   : > { %11523 = vst.msk [vmem:[%s18676_s10 + $0x8] sm:$0xff] %vm1532_vm12, %v11491_v43  ;;  %11524 = vst.msk [vmem:[%s18676_s10 + $0x10] sm:$0xff] %vm1532_vm12, %v11492_v44  ;;  %v11502_v48 = vadd.f32 %v14093_v8, %v11470_v36  ;;  %v11503_v53 = vadd.f32 %v14094_v31, %v11471_v47  ;;  %v11504_v27 = vadd.f32 %v14095_v0, %v11472_v46  ;;  %v14103_v36 = vld [vmem:[%s14167_s21 + $0xb0] sm:$0xff]  ;;  %v14104_v46 = vld [vmem:[%s14167_s21 + $0xb8] sm:$0xff] }
 0x838   : > { %11525 = vst.msk [vmem:[%s18676_s10 + $0x18] sm:$0xff] %vm1532_vm12, %v11493_v37  ;;  %v11505_v35 = vadd.f32 %v14096_v11, %v11473_v30  ;;  %11526 = vst.msk [vmem:[%s18676_s10 + $0x20] sm:$0xff] %vm1532_vm12, %v11494_v29  ;;  %v11506_v5 = vadd.f32 %v14097_v4, %v11474_v59  ;;  %v11507_v55 = vadd.f32 %v14098_v28, %v11475_v54  ;;  %v14105_v59 = vld [vmem:[%s14167_s21 + $0xc0] sm:$0xff] }
 0x839   : > { %11527 = vst.msk [vmem:[%s18676_s10 + $0x28] sm:$0xff] %vm1532_vm12, %v11495_v40  ;;  %11528 = vst.msk [vmem:[%s18676_s10 + $0x30] sm:$0xff] %vm1532_vm12, %v11496_v33  ;;  %v11508_v18 = vadd.f32 %v14099_v12, %v11476_v17  ;;  %v11509_v38 = vadd.f32 %v14100_v60, %v11477_v10  ;;  %v11510_v49 = vadd.f32 %v14101_v57, %v18648_v6  ;;  %v14106_v17 = vld [vmem:[%s14167_s21 + $0xc8] sm:$0xff]  ;;  %v14107_v6 = vld [vmem:[%s14167_s21 + $0xd0] sm:$0xff] }
 0x83a   : > { %11529 = vst.msk [vmem:[%s18676_s10 + $0x38] sm:$0xff] %vm1532_vm12, %v11497_v52  ;;  %11530 = vst.msk [vmem:[%s18676_s10 + $0x40] sm:$0xff] %vm1532_vm12, %v11498_v63  ;;  %v11511_v42 = vadd.f32 %v14102_v16, %v18651_v51  ;;  %v11512_v47 = vadd.f32 %v14103_v36, %v18654_v39  ;;  %v11513_v30 = vadd.f32 %v14104_v46, %v18657_v45  ;;  %v14108_v39 = vld [vmem:[%s14167_s21 + $0xd8] sm:$0xff] }
 0x83b   : > { %11531 = vst.msk [vmem:[%s18676_s10 + $0x48] sm:$0xff] %vm1532_vm12, %v11499_v15  ;;  %11532 = vst.msk [vmem:[%s18676_s10 + $0x50] sm:$0xff] %vm1532_vm12, %v11500_v9  ;;  %v11514_v54 = vadd.f32 %v14105_v59, %v18660_v41  ;;  %v11515_v10 = vadd.f32 %v14106_v17, %v18663_v61  ;;  %v11516_v51 = vadd.f32 %v14107_v6, %v18666_v23  ;;  %v14109_v41 = vld [vmem:[%s14167_s21 + $0xe0] sm:$0xff]  ;;  %v14110_v23 = vld [vmem:[%s14167_s21 + $0xe8] sm:$0xff] }
 0x83c   : > { %11533 = vst.msk [vmem:[%s18676_s10 + $0x58] sm:$0xff] %vm1532_vm12, %v11501_v20  ;;  %11534 = vst.msk [vmem:[%s18676_s10 + $0x60] sm:$0xff] %vm1532_vm12, %v11502_v48  ;;  %v11517_v45 = vadd.f32 %v14108_v39, %v18669_v2  ;;  %v11518_v61 = vadd.f32 %v14109_v41, %v18679_v34  ;;  %v11519_v2 = vadd.f32 %v14110_v23, %v18682_v26 }
 0x83d   : > { %11535 = vst.msk [vmem:[%s18676_s10 + $0x68] sm:$0xff] %vm1532_vm12, %v11503_v53  ;;  %11536 = vst.msk [vmem:[%s18676_s10 + $0x70] sm:$0xff] %vm1532_vm12, %v11504_v27  ;;  %v11520_v7 = vadd.f32 %v14111_v25, %v18685_v50  ;;  %v11521_v43 = vadd.f32 %v14112_v22, %v18688_v58 }
 0x83e   : > { %11537 = vst.msk [vmem:[%s18676_s10 + $0x78] sm:$0xff] %vm1532_vm12, %v11505_v35  ;;  %11538 = vst.msk [vmem:[%s18676_s10 + $0x80] sm:$0xff] %vm1532_vm12, %v11506_v5 }
 0x83f   : > { %11539 = vst.msk [vmem:[%s18676_s10 + $0x88] sm:$0xff] %vm1532_vm12, %v11507_v55  ;;  %11540 = vst.msk [vmem:[%s18676_s10 + $0x90] sm:$0xff] %vm1532_vm12, %v11508_v18 }
 0x840   : > { %11541 = vst.msk [vmem:[%s18676_s10 + $0x98] sm:$0xff] %vm1532_vm12, %v11509_v38  ;;  %11542 = vst.msk [vmem:[%s18676_s10 + $0xa0] sm:$0xff] %vm1532_vm12, %v11510_v49 }
 0x841   : > { %11543 = vst.msk [vmem:[%s18676_s10 + $0xa8] sm:$0xff] %vm1532_vm12, %v11511_v42  ;;  %11544 = vst.msk [vmem:[%s18676_s10 + $0xb0] sm:$0xff] %vm1532_vm12, %v11512_v47 }
 0x842   : > { %11545 = vst.msk [vmem:[%s18676_s10 + $0xb8] sm:$0xff] %vm1532_vm12, %v11513_v30  ;;  %11546 = vst.msk [vmem:[%s18676_s10 + $0xc0] sm:$0xff] %vm1532_vm12, %v11514_v54 }
 0x843   : > { %11547 = vst.msk [vmem:[%s18676_s10 + $0xc8] sm:$0xff] %vm1532_vm12, %v11515_v10  ;;  %11548 = vst.msk [vmem:[%s18676_s10 + $0xd0] sm:$0xff] %vm1532_vm12, %v11516_v51 }
 0x844   : > { %11549 = vst.msk [vmem:[%s18676_s10 + $0xd8] sm:$0xff] %vm1532_vm12, %v11517_v45  ;;  %11550 = vst.msk [vmem:[%s18676_s10 + $0xe0] sm:$0xff] %vm1532_vm12, %v11518_v61 }
 0x845   : > { %11551 = vst.msk [vmem:[%s18676_s10 + $0xe8] sm:$0xff] %vm1532_vm12, %v11519_v2  ;;  %11552 = vst.msk [vmem:[%s18676_s10 + $0xf0] sm:$0xff] %vm1532_vm12, %v11520_v7 }
 0x846   : > { %11553 = vst.msk [vmem:[%s18676_s10 + $0xf8] sm:$0xff] %vm1532_vm12, %v11521_v43 }
 0x847 PF: > { %s13_s12 = sadd.s32 1, %s14119_s12  }
 0x848   : > { %p10_p4 = scmp.ge.s32.totalorder %s13_s12, 4  }
 0x84a   :  { %12 = sbr.rel (!%p10_p4) target bundleno = 1 (0x1), region = 81 }

</bundles_post_ra>
